<compile_context>
chip_gen: v7x
topology: tpu7x:2x2x1
jax: 0.10.0
libtpu: 0.0.40
codegen_flags: <defaults>
</compile_context>

<pallas_src>
import math

import jax
import jax.numpy as jnp
from jax.experimental import pallas as pl
from jax.experimental.pallas import tpu as pltpu

_LANE = 128
_SUBLANE = 8
_C = 4  # spiral channels


def _channels(params_ref, x):
    """Hoisted scalar reads + the 4 per-channel (tm, 128) f32 results."""
    f = [params_ref[0, c] for c in range(_C)]
    p = [params_ref[1, c] for c in range(_C)]
    a = [params_ref[2, c] for c in range(_C)]
    return [jnp.sin(f[c] * x + p[c]) * (a[c] * x) for c in range(_C)]


def _spiral_stack_kernel(params_ref, x_ref, o_ref):
    # o_ref: (tm, 512) lane-dense, column j = 4*lane + channel (element-major).
    x = x_ref[...].astype(jnp.float32)                         # (tm, 128)
    r = _channels(params_ref, x)
    y = jnp.stack(r, axis=-1).reshape(x.shape[0], _C * _LANE)  # (tm, 512)
    o_ref[...] = y.astype(o_ref.dtype)


def _spiral_strided_kernel(params_ref, x_ref, o_ref):
    # Same output layout, written as 4 lane-strided stores (stride 4).
    x = x_ref[...].astype(jnp.float32)
    r = _channels(params_ref, x)
    for c in range(_C):
        o_ref[:, pl.ds(c, _LANE, stride=_C)] = r[c].astype(o_ref.dtype)


def _spiral_cmajor_kernel(params_ref, x_ref, o_ref):
    # Channel-major (4, tm, 128); needs a wrapper-side transpose (fallback only).
    x = x_ref[...].astype(jnp.float32)
    r = _channels(params_ref, x)
    for c in range(_C):
        o_ref[c] = r[c].astype(o_ref.dtype)


def _compiler_params():
    return pltpu.CompilerParams(
        dimension_semantics=("parallel",),    # v7x: shard row tiles over 2 TCs
        vmem_limit_bytes=32 * 1024 * 1024,    # explicit: v5e default scope is 16 MiB
    )


def _call_lane_dense(body, params, x2d, rows, tm, out_dtype):
    return pl.pallas_call(
        body,
        out_shape=jax.ShapeDtypeStruct((rows, _C * _LANE), out_dtype),
        grid_spec=pltpu.PrefetchScalarGridSpec(
            num_scalar_prefetch=1,
            grid=(pl.cdiv(rows, tm),),
            in_specs=[pl.BlockSpec((tm, _LANE), lambda i, p: (i, 0))],
            out_specs=pl.BlockSpec((tm, _C * _LANE), lambda i, p: (i, 0)),
        ),
        compiler_params=_compiler_params(),
    )(params, x2d)


def _call_channel_major(params, x2d, rows, tm, out_dtype):
    return pl.pallas_call(
        _spiral_cmajor_kernel,
        out_shape=jax.ShapeDtypeStruct((_C, rows, _LANE), out_dtype),
        grid_spec=pltpu.PrefetchScalarGridSpec(
            num_scalar_prefetch=1,
            grid=(pl.cdiv(rows, tm),),
            in_specs=[pl.BlockSpec((tm, _LANE), lambda i, p: (i, 0))],
            out_specs=pl.BlockSpec((_C, tm, _LANE), lambda i, p: (0, i, 0)),
        ),
        compiler_params=_compiler_params(),
    )(params, x2d)


def learnable_spiral4d(x, frequencies, phase_shifts, amplitude_scales, *,
                       tile_rows=2048, out_dtype=None):
    """Forward pass of LearnableSpiral4D; returns x.shape + (4,) (or (..., 4)
    when x's trailing dim is already 1, matching the PyTorch broadcast).

    tile_rows: rows (of 128 lanes) per grid step; 2048 suits v7x, 4096 is a
    good choice on v5e/v6e (128 MiB VMEM).
    out_dtype: defaults to x.dtype; pass jnp.float32 to force f32 writeback.
    """
    orig_shape = x.shape
    if len(orig_shape) > 0 and orig_shape[-1] == 1:
        base_shape = orig_shape[:-1]          # PyTorch keeps x as (..., 1)
    else:
        base_shape = orig_shape               # PyTorch unsqueezes to (..., D, 1)
    n = math.prod(orig_shape) if orig_shape else 1
    if out_dtype is None:
        out_dtype = x.dtype                   # don't force-promote writeback

    # 12 learnable scalars ride in SMEM via scalar prefetch as one (3, 4) table.
    params = jnp.stack([
        jnp.asarray(frequencies, jnp.float32).reshape(_C),
        jnp.asarray(phase_shifts, jnp.float32).reshape(_C),
        jnp.asarray(amplitude_scales, jnp.float32).reshape(_C),
    ])

    if n == 0:
        return jnp.zeros(base_shape + (_C,), dtype=out_dtype)

    # Lane-dense (rows, 128) slab. Pad only the ragged tail (< 128 elements);
    # when n % 128 == 0 (common case) the reshape is a free bitcast. Rows need
    # not be a sublane multiple — Pallas masks the ragged last tile.
    rows = pl.cdiv(n, _LANE)
    n_pad = rows * _LANE
    x_flat = jnp.ravel(x)
    if n_pad != n:
        x_flat = jnp.pad(x_flat, (0, n_pad - n))
    x2d = jnp.reshape(x_flat, (rows, _LANE))

    # Tile rows: sublane-aligned, capped at ceil(rows/2) so there are >= 2 grid
    # steps whenever possible (lets v7x megacore shard the "parallel" axis).
    tm = max(_SUBLANE, (int(tile_rows) // _SUBLANE) * _SUBLANE)
    half_rows = pl.cdiv(pl.cdiv(rows, 2), _SUBLANE) * _SUBLANE
    tm = min(tm, half_rows)
    if tm >= rows:
        tm = rows                             # single full-extent tile

    # Preferred path: in-kernel channel interleave -> (rows, 512) output whose
    # flat order is already element-major, so the reshape to (..., 4) is free.
    out_flat = None
    for body in (_spiral_stack_kernel, _spiral_strided_kernel):
        try:
            out2d = _call_lane_dense(body, params, x2d, rows, tm, out_dtype)
            out_flat = jnp.reshape(out2d, (-1,))
            break
        except Exception:   # interleave form not lowerable on this jax/libtpu
            out_flat = None
    if out_flat is None:
        # TODO(synk): drop this fallback once the in-kernel interleave lowers
        # everywhere; it re-adds one HBM pass over the output (the wrapper
        # transpose the perf review flagged).
        out_cm = _call_channel_major(params, x2d, rows, tm, out_dtype)
        out_flat = jnp.reshape(
            jnp.transpose(jnp.reshape(out_cm, (_C, n_pad)), (1, 0)), (-1,))

    if n_pad != n:
        out_flat = out_flat[: n * _C]
    return jnp.reshape(out_flat, base_shape + (_C,))


def init_params(key, init_freq=1.0, init_amp=1.0):
    # Deterministic synthetic init mirroring the PyTorch __init__.
    freqs = jnp.ones((_C,), jnp.float32) * init_freq + \
        jax.random.normal(key, (_C,), jnp.float32) * 0.1
    phases = jnp.linspace(0.0, 2.0 * jnp.pi, 5)[:-1].astype(jnp.float32)
    amps = jnp.ones((_C,), jnp.float32) * init_amp
    return freqs, phases, amps


if __name__ == "__main__":
    key = jax.random.PRNGKey(0)
    k_param, k_x = jax.random.split(key)

    frequencies, phase_shifts, amplitude_scales = init_params(k_param)

    # Small NCHW-like input: (batch=2, channels=4, H=16, W=16)
    x = jax.random.normal(k_x, (2, 4, 16, 16), jnp.float32)

    out = learnable_spiral4d(x, frequencies, phase_shifts, amplitude_scales)
    out = jax.block_until_ready(out)

    # Pure-JAX reference of the PyTorch forward.
    x_u = x[..., None]                                         # (2,4,16,16,1)
    ref = jnp.sin(frequencies * x_u + phase_shifts) * (amplitude_scales * x_u)
    assert out.shape == (2, 4, 16, 16, 4), out.shape
    assert jnp.allclose(out, ref, atol=1e-5, rtol=1e-5), \
        float(jnp.max(jnp.abs(out - ref)))

    print("KERNEL_OK")
</pallas_src>

<mosaic_0001>
module attributes {stable_mosaic.version = 11 : i64} {
  func.func @_spiral_stack_kernel(%arg0: i32, %arg1: memref<3x4xf32, #tpu.memory_space<smem>>, %arg2: memref<8x128xf32, #tpu.memory_space<vmem>>, %arg3: memref<8x512xf32, #tpu.memory_space<vmem>>) attributes {dimension_semantics = [#tpu.dimension_semantics<parallel>], iteration_bounds = array<i64: 2>, scalar_prefetch = 1 : i64, scratch_operands = 0 : i64, tpu.core_type = #tpu.core_type<tc>, window_params = [{transform_indices = @transform_0, window_bounds = array<i64: 8, 128>}, {transform_indices = @transform_1, window_bounds = array<i64: 8, 512>}]} {
    %c0 = arith.constant 0 : index
    %c0_0 = arith.constant 0 : index
    %0 = vector.load %arg2[%c0, %c0_0] : memref<8x128xf32, #tpu.memory_space<vmem>>, vector<8x128xf32>
    %c0_1 = arith.constant 0 : index
    %c0_2 = arith.constant 0 : index
    %1 = memref.load %arg1[%c0_1, %c0_2] : memref<3x4xf32, #tpu.memory_space<smem>>
    %c0_3 = arith.constant 0 : index
    %c1 = arith.constant 1 : index
    %2 = memref.load %arg1[%c0_3, %c1] : memref<3x4xf32, #tpu.memory_space<smem>>
    %c0_4 = arith.constant 0 : index
    %c2 = arith.constant 2 : index
    %3 = memref.load %arg1[%c0_4, %c2] : memref<3x4xf32, #tpu.memory_space<smem>>
    %c0_5 = arith.constant 0 : index
    %c3 = arith.constant 3 : index
    %4 = memref.load %arg1[%c0_5, %c3] : memref<3x4xf32, #tpu.memory_space<smem>>
    %c1_6 = arith.constant 1 : index
    %c0_7 = arith.constant 0 : index
    %5 = memref.load %arg1[%c1_6, %c0_7] : memref<3x4xf32, #tpu.memory_space<smem>>
    %c1_8 = arith.constant 1 : index
    %c1_9 = arith.constant 1 : index
    %6 = memref.load %arg1[%c1_8, %c1_9] : memref<3x4xf32, #tpu.memory_space<smem>>
    %c1_10 = arith.constant 1 : index
    %c2_11 = arith.constant 2 : index
    %7 = memref.load %arg1[%c1_10, %c2_11] : memref<3x4xf32, #tpu.memory_space<smem>>
    %c1_12 = arith.constant 1 : index
    %c3_13 = arith.constant 3 : index
    %8 = memref.load %arg1[%c1_12, %c3_13] : memref<3x4xf32, #tpu.memory_space<smem>>
    %c2_14 = arith.constant 2 : index
    %c0_15 = arith.constant 0 : index
    %9 = memref.load %arg1[%c2_14, %c0_15] : memref<3x4xf32, #tpu.memory_space<smem>>
    %c2_16 = arith.constant 2 : index
    %c1_17 = arith.constant 1 : index
    %10 = memref.load %arg1[%c2_16, %c1_17] : memref<3x4xf32, #tpu.memory_space<smem>>
    %c2_18 = arith.constant 2 : index
    %c2_19 = arith.constant 2 : index
    %11 = memref.load %arg1[%c2_18, %c2_19] : memref<3x4xf32, #tpu.memory_space<smem>>
    %c2_20 = arith.constant 2 : index
    %c3_21 = arith.constant 3 : index
    %12 = memref.load %arg1[%c2_20, %c3_21] : memref<3x4xf32, #tpu.memory_space<smem>>
    %13 = vector.broadcast %1 : f32 to vector<8x128xf32>
    %14 = arith.mulf %13, %0 : vector<8x128xf32>
    %15 = vector.broadcast %5 : f32 to vector<8x128xf32>
    %16 = arith.addf %14, %15 : vector<8x128xf32>
    %17 = math.sin %16 : vector<8x128xf32>
    %18 = vector.broadcast %9 : f32 to vector<8x128xf32>
    %19 = arith.mulf %18, %0 : vector<8x128xf32>
    %20 = arith.mulf %17, %19 : vector<8x128xf32>
    %21 = vector.broadcast %2 : f32 to vector<8x128xf32>
    %22 = arith.mulf %21, %0 : vector<8x128xf32>
    %23 = vector.broadcast %6 : f32 to vector<8x128xf32>
    %24 = arith.addf %22, %23 : vector<8x128xf32>
    %25 = math.sin %24 : vector<8x128xf32>
    %26 = vector.broadcast %10 : f32 to vector<8x128xf32>
    %27 = arith.mulf %26, %0 : vector<8x128xf32>
    %28 = arith.mulf %25, %27 : vector<8x128xf32>
    %29 = vector.broadcast %3 : f32 to vector<8x128xf32>
    %30 = arith.mulf %29, %0 : vector<8x128xf32>
    %31 = vector.broadcast %7 : f32 to vector<8x128xf32>
    %32 = arith.addf %30, %31 : vector<8x128xf32>
    %33 = math.sin %32 : vector<8x128xf32>
    %34 = vector.broadcast %11 : f32 to vector<8x128xf32>
    %35 = arith.mulf %34, %0 : vector<8x128xf32>
    %36 = arith.mulf %33, %35 : vector<8x128xf32>
    %37 = vector.broadcast %4 : f32 to vector<8x128xf32>
    %38 = arith.mulf %37, %0 : vector<8x128xf32>
    %39 = vector.broadcast %8 : f32 to vector<8x128xf32>
    %40 = arith.addf %38, %39 : vector<8x128xf32>
    %41 = math.sin %40 : vector<8x128xf32>
    %42 = vector.broadcast %12 : f32 to vector<8x128xf32>
    %43 = arith.mulf %42, %0 : vector<8x128xf32>
    %44 = arith.mulf %41, %43 : vector<8x128xf32>
    %45 = vector.shape_cast %20 : vector<8x128xf32> to vector<8x128x1xf32>
    %46 = vector.shape_cast %28 : vector<8x128xf32> to vector<8x128x1xf32>
    %47 = vector.shape_cast %36 : vector<8x128xf32> to vector<8x128x1xf32>
    %48 = vector.shape_cast %44 : vector<8x128xf32> to vector<8x128x1xf32>
    %49 = tpu.concatenate %45, %46, %47, %48 in 2 : vector<8x128x1xf32>, vector<8x128x1xf32>, vector<8x128x1xf32>, vector<8x128x1xf32> -> vector<8x128x4xf32>
    %50 = vector.shape_cast %49 : vector<8x128x4xf32> to vector<8x512xf32>
    %c0_22 = arith.constant 0 : index
    %c0_23 = arith.constant 0 : index
    %51 = vector.load %arg3[%c0_22, %c0_23] : memref<8x512xf32, #tpu.memory_space<vmem>>, vector<8x512xf32>
    tpu.vector_store %arg3[%c0_22, %c0_23], %50 {strides = array<i32>} : memref<8x512xf32, #tpu.memory_space<vmem>>, vector<8x512xf32>,
    return
  }
  func.func @transform_0(%arg0: i32, %arg1: memref<3x4xf32, #tpu.memory_space<smem>>) -> (i32, i32) {
    %c0_i32 = arith.constant 0 : i32
    %c0_i32_0 = arith.constant 0 : i32
    return %arg0, %c0_i32 : i32, i32
  }
  func.func @transform_1(%arg0: i32, %arg1: memref<3x4xf32, #tpu.memory_space<smem>>) -> (i32, i32) {
    %c0_i32 = arith.constant 0 : i32
    %c0_i32_0 = arith.constant 0 : i32
    return %arg0, %c0_i32 : i32, i32
  }
}

module attributes {stable_mosaic.version = 11 : i64} {
  func.func @_spiral_strided_kernel(%arg0: i32, %arg1: memref<3x4xf32, #tpu.memory_space<smem>>, %arg2: memref<8x128xf32, #tpu.memory_space<vmem>>, %arg3: memref<8x512xf32, #tpu.memory_space<vmem>>) attributes {dimension_semantics = [#tpu.dimension_semantics<parallel>], iteration_bounds = array<i64: 2>, scalar_prefetch = 1 : i64, scratch_operands = 0 : i64, tpu.core_type = #tpu.core_type<tc>, window_params = [{transform_indices = @transform_0, window_bounds = array<i64: 8, 128>}, {transform_indices = @transform_1, window_bounds = array<i64: 8, 512>}]} {
    %c0 = arith.constant 0 : index
    %c0_0 = arith.constant 0 : index
    %0 = vector.load %arg2[%c0, %c0_0] : memref<8x128xf32, #tpu.memory_space<vmem>>, vector<8x128xf32>
    %c0_1 = arith.constant 0 : index
    %c0_2 = arith.constant 0 : index
    %1 = memref.load %arg1[%c0_1, %c0_2] : memref<3x4xf32, #tpu.memory_space<smem>>
    %c0_3 = arith.constant 0 : index
    %c1 = arith.constant 1 : index
    %2 = memref.load %arg1[%c0_3, %c1] : memref<3x4xf32, #tpu.memory_space<smem>>
    %c0_4 = arith.constant 0 : index
    %c2 = arith.constant 2 : index
    %3 = memref.load %arg1[%c0_4, %c2] : memref<3x4xf32, #tpu.memory_space<smem>>
    %c0_5 = arith.constant 0 : index
    %c3 = arith.constant 3 : index
    %4 = memref.load %arg1[%c0_5, %c3] : memref<3x4xf32, #tpu.memory_space<smem>>
    %c1_6 = arith.constant 1 : index
    %c0_7 = arith.constant 0 : index
    %5 = memref.load %arg1[%c1_6, %c0_7] : memref<3x4xf32, #tpu.memory_space<smem>>
    %c1_8 = arith.constant 1 : index
    %c1_9 = arith.constant 1 : index
    %6 = memref.load %arg1[%c1_8, %c1_9] : memref<3x4xf32, #tpu.memory_space<smem>>
    %c1_10 = arith.constant 1 : index
    %c2_11 = arith.constant 2 : index
    %7 = memref.load %arg1[%c1_10, %c2_11] : memref<3x4xf32, #tpu.memory_space<smem>>
    %c1_12 = arith.constant 1 : index
    %c3_13 = arith.constant 3 : index
    %8 = memref.load %arg1[%c1_12, %c3_13] : memref<3x4xf32, #tpu.memory_space<smem>>
    %c2_14 = arith.constant 2 : index
    %c0_15 = arith.constant 0 : index
    %9 = memref.load %arg1[%c2_14, %c0_15] : memref<3x4xf32, #tpu.memory_space<smem>>
    %c2_16 = arith.constant 2 : index
    %c1_17 = arith.constant 1 : index
    %10 = memref.load %arg1[%c2_16, %c1_17] : memref<3x4xf32, #tpu.memory_space<smem>>
    %c2_18 = arith.constant 2 : index
    %c2_19 = arith.constant 2 : index
    %11 = memref.load %arg1[%c2_18, %c2_19] : memref<3x4xf32, #tpu.memory_space<smem>>
    %c2_20 = arith.constant 2 : index
    %c3_21 = arith.constant 3 : index
    %12 = memref.load %arg1[%c2_20, %c3_21] : memref<3x4xf32, #tpu.memory_space<smem>>
    %13 = vector.broadcast %1 : f32 to vector<8x128xf32>
    %14 = arith.mulf %13, %0 : vector<8x128xf32>
    %15 = vector.broadcast %5 : f32 to vector<8x128xf32>
    %16 = arith.addf %14, %15 : vector<8x128xf32>
    %17 = math.sin %16 : vector<8x128xf32>
    %18 = vector.broadcast %9 : f32 to vector<8x128xf32>
    %19 = arith.mulf %18, %0 : vector<8x128xf32>
    %20 = arith.mulf %17, %19 : vector<8x128xf32>
    %21 = vector.broadcast %2 : f32 to vector<8x128xf32>
    %22 = arith.mulf %21, %0 : vector<8x128xf32>
    %23 = vector.broadcast %6 : f32 to vector<8x128xf32>
    %24 = arith.addf %22, %23 : vector<8x128xf32>
    %25 = math.sin %24 : vector<8x128xf32>
    %26 = vector.broadcast %10 : f32 to vector<8x128xf32>
    %27 = arith.mulf %26, %0 : vector<8x128xf32>
    %28 = arith.mulf %25, %27 : vector<8x128xf32>
    %29 = vector.broadcast %3 : f32 to vector<8x128xf32>
    %30 = arith.mulf %29, %0 : vector<8x128xf32>
    %31 = vector.broadcast %7 : f32 to vector<8x128xf32>
    %32 = arith.addf %30, %31 : vector<8x128xf32>
    %33 = math.sin %32 : vector<8x128xf32>
    %34 = vector.broadcast %11 : f32 to vector<8x128xf32>
    %35 = arith.mulf %34, %0 : vector<8x128xf32>
    %36 = arith.mulf %33, %35 : vector<8x128xf32>
    %37 = vector.broadcast %4 : f32 to vector<8x128xf32>
    %38 = arith.mulf %37, %0 : vector<8x128xf32>
    %39 = vector.broadcast %8 : f32 to vector<8x128xf32>
    %40 = arith.addf %38, %39 : vector<8x128xf32>
    %41 = math.sin %40 : vector<8x128xf32>
    %42 = vector.broadcast %12 : f32 to vector<8x128xf32>
    %43 = arith.mulf %42, %0 : vector<8x128xf32>
    %44 = arith.mulf %41, %43 : vector<8x128xf32>
    %c0_22 = arith.constant 0 : index
    %c0_23 = arith.constant 0 : index
    %45 = tpu.strided_load %arg3[%c0_22, %c0_23] {strides = array<i32: 1, 4>} : memref<8x512xf32, #tpu.memory_space<vmem>>, vector<8x128xf32>
    tpu.strided_store %arg3[%c0_22, %c0_23], %20 {strides = array<i32: 1, 4>} : memref<8x512xf32, #tpu.memory_space<vmem>>, vector<8x128xf32>
    %c0_24 = arith.constant 0 : index
    %c1_25 = arith.constant 1 : index
    %46 = tpu.strided_load %arg3[%c0_24, %c1_25] {strides = array<i32: 1, 4>} : memref<8x512xf32, #tpu.memory_space<vmem>>, vector<8x128xf32>
    tpu.strided_store %arg3[%c0_24, %c1_25], %28 {strides = array<i32: 1, 4>} : memref<8x512xf32, #tpu.memory_space<vmem>>, vector<8x128xf32>
    %c0_26 = arith.constant 0 : index
    %c2_27 = arith.constant 2 : index
    %47 = tpu.strided_load %arg3[%c0_26, %c2_27] {strides = array<i32: 1, 4>} : memref<8x512xf32, #tpu.memory_space<vmem>>, vector<8x128xf32>
    tpu.strided_store %arg3[%c0_26, %c2_27], %36 {strides = array<i32: 1, 4>} : memref<8x512xf32, #tpu.memory_space<vmem>>, vector<8x128xf32>
    %c0_28 = arith.constant 0 : index
    %c3_29 = arith.constant 3 : index
    %48 = tpu.strided_load %arg3[%c0_28, %c3_29] {strides = array<i32: 1, 4>} : memref<8x512xf32, #tpu.memory_space<vmem>>, vector<8x128xf32>
    tpu.strided_store %arg3[%c0_28, %c3_29], %44 {strides = array<i32: 1, 4>} : memref<8x512xf32, #tpu.memory_space<vmem>>, vector<8x128xf32>
    return
  }
  func.func @transform_0(%arg0: i32, %arg1: memref<3x4xf32, #tpu.memory_space<smem>>) -> (i32, i32) {
    %c0_i32 = arith.constant 0 : i32
    %c0_i32_0 = arith.constant 0 : i32
    return %arg0, %c0_i32 : i32, i32
  }
  func.func @transform_1(%arg0: i32, %arg1: memref<3x4xf32, #tpu.memory_space<smem>>) -> (i32, i32) {
    %c0_i32 = arith.constant 0 : i32
    %c0_i32_0 = arith.constant 0 : i32
    return %arg0, %c0_i32 : i32, i32
  }
}

module attributes {stable_mosaic.version = 11 : i64} {
  func.func @_spiral_cmajor_kernel(%arg0: i32, %arg1: memref<3x4xf32, #tpu.memory_space<smem>>, %arg2: memref<8x128xf32, #tpu.memory_space<vmem>>, %arg3: memref<4x8x128xf32, #tpu.memory_space<vmem>>) attributes {dimension_semantics = [#tpu.dimension_semantics<parallel>], iteration_bounds = array<i64: 2>, scalar_prefetch = 1 : i64, scratch_operands = 0 : i64, tpu.core_type = #tpu.core_type<tc>, window_params = [{transform_indices = @transform_0, window_bounds = array<i64: 8, 128>}, {transform_indices = @transform_1, window_bounds = array<i64: 4, 8, 128>}]} {
    %c0 = arith.constant 0 : index
    %c0_0 = arith.constant 0 : index
    %0 = vector.load %arg2[%c0, %c0_0] : memref<8x128xf32, #tpu.memory_space<vmem>>, vector<8x128xf32>
    %c0_1 = arith.constant 0 : index
    %c0_2 = arith.constant 0 : index
    %1 = memref.load %arg1[%c0_1, %c0_2] : memref<3x4xf32, #tpu.memory_space<smem>>
    %c0_3 = arith.constant 0 : index
    %c1 = arith.constant 1 : index
    %2 = memref.load %arg1[%c0_3, %c1] : memref<3x4xf32, #tpu.memory_space<smem>>
    %c0_4 = arith.constant 0 : index
    %c2 = arith.constant 2 : index
    %3 = memref.load %arg1[%c0_4, %c2] : memref<3x4xf32, #tpu.memory_space<smem>>
    %c0_5 = arith.constant 0 : index
    %c3 = arith.constant 3 : index
    %4 = memref.load %arg1[%c0_5, %c3] : memref<3x4xf32, #tpu.memory_space<smem>>
    %c1_6 = arith.constant 1 : index
    %c0_7 = arith.constant 0 : index
    %5 = memref.load %arg1[%c1_6, %c0_7] : memref<3x4xf32, #tpu.memory_space<smem>>
    %c1_8 = arith.constant 1 : index
    %c1_9 = arith.constant 1 : index
    %6 = memref.load %arg1[%c1_8, %c1_9] : memref<3x4xf32, #tpu.memory_space<smem>>
    %c1_10 = arith.constant 1 : index
    %c2_11 = arith.constant 2 : index
    %7 = memref.load %arg1[%c1_10, %c2_11] : memref<3x4xf32, #tpu.memory_space<smem>>
    %c1_12 = arith.constant 1 : index
    %c3_13 = arith.constant 3 : index
    %8 = memref.load %arg1[%c1_12, %c3_13] : memref<3x4xf32, #tpu.memory_space<smem>>
    %c2_14 = arith.constant 2 : index
    %c0_15 = arith.constant 0 : index
    %9 = memref.load %arg1[%c2_14, %c0_15] : memref<3x4xf32, #tpu.memory_space<smem>>
    %c2_16 = arith.constant 2 : index
    %c1_17 = arith.constant 1 : index
    %10 = memref.load %arg1[%c2_16, %c1_17] : memref<3x4xf32, #tpu.memory_space<smem>>
    %c2_18 = arith.constant 2 : index
    %c2_19 = arith.constant 2 : index
    %11 = memref.load %arg1[%c2_18, %c2_19] : memref<3x4xf32, #tpu.memory_space<smem>>
    %c2_20 = arith.constant 2 : index
    %c3_21 = arith.constant 3 : index
    %12 = memref.load %arg1[%c2_20, %c3_21] : memref<3x4xf32, #tpu.memory_space<smem>>
    %13 = vector.broadcast %1 : f32 to vector<8x128xf32>
    %14 = arith.mulf %13, %0 : vector<8x128xf32>
    %15 = vector.broadcast %5 : f32 to vector<8x128xf32>
    %16 = arith.addf %14, %15 : vector<8x128xf32>
    %17 = math.sin %16 : vector<8x128xf32>
    %18 = vector.broadcast %9 : f32 to vector<8x128xf32>
    %19 = arith.mulf %18, %0 : vector<8x128xf32>
    %20 = arith.mulf %17, %19 : vector<8x128xf32>
    %21 = vector.broadcast %2 : f32 to vector<8x128xf32>
    %22 = arith.mulf %21, %0 : vector<8x128xf32>
    %23 = vector.broadcast %6 : f32 to vector<8x128xf32>
    %24 = arith.addf %22, %23 : vector<8x128xf32>
    %25 = math.sin %24 : vector<8x128xf32>
    %26 = vector.broadcast %10 : f32 to vector<8x128xf32>
    %27 = arith.mulf %26, %0 : vector<8x128xf32>
    %28 = arith.mulf %25, %27 : vector<8x128xf32>
    %29 = vector.broadcast %3 : f32 to vector<8x128xf32>
    %30 = arith.mulf %29, %0 : vector<8x128xf32>
    %31 = vector.broadcast %7 : f32 to vector<8x128xf32>
    %32 = arith.addf %30, %31 : vector<8x128xf32>
    %33 = math.sin %32 : vector<8x128xf32>
    %34 = vector.broadcast %11 : f32 to vector<8x128xf32>
    %35 = arith.mulf %34, %0 : vector<8x128xf32>
    %36 = arith.mulf %33, %35 : vector<8x128xf32>
    %37 = vector.broadcast %4 : f32 to vector<8x128xf32>
    %38 = arith.mulf %37, %0 : vector<8x128xf32>
    %39 = vector.broadcast %8 : f32 to vector<8x128xf32>
    %40 = arith.addf %38, %39 : vector<8x128xf32>
    %41 = math.sin %40 : vector<8x128xf32>
    %42 = vector.broadcast %12 : f32 to vector<8x128xf32>
    %43 = arith.mulf %42, %0 : vector<8x128xf32>
    %44 = arith.mulf %41, %43 : vector<8x128xf32>
    %c0_22 = arith.constant 0 : index
    %c0_23 = arith.constant 0 : index
    %c0_24 = arith.constant 0 : index
    %45 = vector.load %arg3[%c0_22, %c0_23, %c0_24] : memref<4x8x128xf32, #tpu.memory_space<vmem>>, vector<1x8x128xf32>
    %46 = vector.shape_cast %45 : vector<1x8x128xf32> to vector<8x128xf32>
    %47 = vector.shape_cast %20 : vector<8x128xf32> to vector<1x8x128xf32>
    tpu.vector_store %arg3[%c0_22, %c0_23, %c0_24], %47 {strides = array<i32>} : memref<4x8x128xf32, #tpu.memory_space<vmem>>, vector<1x8x128xf32>,
    %c1_25 = arith.constant 1 : index
    %c0_26 = arith.constant 0 : index
    %c0_27 = arith.constant 0 : index
    %48 = vector.load %arg3[%c1_25, %c0_26, %c0_27] : memref<4x8x128xf32, #tpu.memory_space<vmem>>, vector<1x8x128xf32>
    %49 = vector.shape_cast %48 : vector<1x8x128xf32> to vector<8x128xf32>
    %50 = vector.shape_cast %28 : vector<8x128xf32> to vector<1x8x128xf32>
    tpu.vector_store %arg3[%c1_25, %c0_26, %c0_27], %50 {strides = array<i32>} : memref<4x8x128xf32, #tpu.memory_space<vmem>>, vector<1x8x128xf32>,
    %c2_28 = arith.constant 2 : index
    %c0_29 = arith.constant 0 : index
    %c0_30 = arith.constant 0 : index
    %51 = vector.load %arg3[%c2_28, %c0_29, %c0_30] : memref<4x8x128xf32, #tpu.memory_space<vmem>>, vector<1x8x128xf32>
    %52 = vector.shape_cast %51 : vector<1x8x128xf32> to vector<8x128xf32>
    %53 = vector.shape_cast %36 : vector<8x128xf32> to vector<1x8x128xf32>
    tpu.vector_store %arg3[%c2_28, %c0_29, %c0_30], %53 {strides = array<i32>} : memref<4x8x128xf32, #tpu.memory_space<vmem>>, vector<1x8x128xf32>,
    %c3_31 = arith.constant 3 : index
    %c0_32 = arith.constant 0 : index
    %c0_33 = arith.constant 0 : index
    %54 = vector.load %arg3[%c3_31, %c0_32, %c0_33] : memref<4x8x128xf32, #tpu.memory_space<vmem>>, vector<1x8x128xf32>
    %55 = vector.shape_cast %54 : vector<1x8x128xf32> to vector<8x128xf32>
    %56 = vector.shape_cast %44 : vector<8x128xf32> to vector<1x8x128xf32>
    tpu.vector_store %arg3[%c3_31, %c0_32, %c0_33], %56 {strides = array<i32>} : memref<4x8x128xf32, #tpu.memory_space<vmem>>, vector<1x8x128xf32>,
    return
  }
  func.func @transform_0(%arg0: i32, %arg1: memref<3x4xf32, #tpu.memory_space<smem>>) -> (i32, i32) {
    %c0_i32 = arith.constant 0 : i32
    %c0_i32_0 = arith.constant 0 : i32
    return %arg0, %c0_i32 : i32, i32
  }
  func.func @transform_1(%arg0: i32, %arg1: memref<3x4xf32, #tpu.memory_space<smem>>) -> (i32, i32, i32) {
    %c0_i32 = arith.constant 0 : i32
    %c0_i32_0 = arith.constant 0 : i32
    %c0_i32_1 = arith.constant 0 : i32
    return %c0_i32, %arg0, %c0_i32_0 : i32, i32, i32
  }
}

</mosaic_0001>

<bundles_post_ra>
// kernel: tpu_custom_call.1
= control target key start
LH: loop header
LB: loop body
LE: loop exit
PB: predicated region body
PF: predicated region fallthrough
CT: control target
= control target key end

     0   :  { %s11146_s0 = inlined_call_operand.hbm [shape: f32[3,4], index: 0, kind: input, shape index: {}]   ;;  %s11147_s1 = inlined_call_operand.hbm [shape: f32[16,128], index: 1, kind: input, shape index: {}]   ;;  %s11148_s2 = inlined_call_operand.hbm [shape: f32[16,512], index: 2, kind: output, shape index: {}]  }
   0x1   :  { %11255 = sst [smem:[#allocation461_spill]] %s11147_s1  ;;  %s6200_s11 = scalar_lea.hbm %s11146_s0, 64 }
   0x2   :  { %p6201_p0 = scmp.ne.s32.totalorder %s11146_s0, %s6200_s11  ;;  %p6204_p1 = scmp.lt.u32.totalorder %s6200_s11, %s11146_s0 }
   0x4   :  { %p6206_p2 = pnand %p6204_p1, %p6201_p0 }
   0x6   :  { %6209 = shalt.err (!%p6206_p2)  }
   0x7   :  { %s6310_s16 = smov [#allocation3]  }
   0x8   :  { %8 = dma.hbm_to_smem %s11146_s0, 64, %s6310_s16, [#allocation2] }
   0x9   :  { %6284 = dma.done.wait [#allocation2], 64 }
   0xa   :  { %6285 = vsyncadd [#allocation2], 4294967232 }
   0xb   :  { %10 = sfence }
   0xc   :  { %11 = vsyncpa [#allocation5], 0 }
   0xd   :  { %13 = vsyncpa [#allocation5 + $0x1], 0 }
   0xe   :  { %14 = vsyncpa [#allocation6], 0 }
   0xf   :  { %16 = vsyncpa [#allocation6 + $0x1], 0  ;;  %s6379_s19 = smov 0   ;;  %s6381_s20 = smov 0  }
  0x10   :  { %s6383_s21 = smov 0   ;;  %s6385_s22 = smov 0  }
  0x11 LB: > { %11256 = sst [smem:[#allocation11_spill]] %s6300_s20  ;;  %s6400_s0 = sadd.s32 4294967295, %s6308_s22   ;;  %s6308_s22 = sphi %s6385_s22, %s12468_s22   ;;  %s6304_s21 = sphi %s6383_s21, %s12471_s21   ;;  %s6300_s20 = sphi %s6381_s20, %s12470_s20   ;;  %s6296_s19 = sphi %s6379_s19, %s12469_s19  }
  0x12   : > { %11257 = sst [smem:[#allocation12_spill]] %s6304_s21  ;;  %s6041_s23 = sadd.s32 4294967294, %s6308_s22  }
  0x13   : > { %11258 = sst [smem:[#allocation13_spill]] %s6308_s22  ;;  %s6404_s24 = sadd.s32 1, %s6308_s22  }
  0x14   : > { %11259 = sst [smem:[#allocation14_spill]] %s6404_s24  ;;  %s29_s25 = sadd.s32 1, %s6304_s21 }
  0x15   : > { %s26_s26 = ssub.s32 %s6308_s22, %s6404_s24  ;;  %p36_p3 = scmp.ne.s32.totalorder %s6304_s21, %s6300_s20 }
  0x16   : > { %p27_p4 = scmp.eq.s32.totalorder %s26_s26, 0  ;;  %p37_p5 = scmp.eq.s32.totalorder %s6308_s22, 0 }
  0x17   : > { %p42_p6 = scmp.ne.s32.totalorder %s6300_s20, %s6296_s19  ;;  %p43_p7 = scmp.eq.s32.totalorder %s6400_s0, 0 }
  0x18   : > { %s6416_s27 = scalar_select %p27_p4, %s6304_s21, %s29_s25  }
  0x19   : > { %p6418_p8 = por %p37_p5, %p36_p3  ;;  %p6422_p9 = por %p43_p7, %p42_p6 }
  0x1a   : > { %11260 = sst [smem:[#allocation15_spill]] %s6416_s27  ;;  %p66_p10 = scmp.eq.s32.totalorder %s6400_s0, 1 }
  0x1b   : > { %p72_p11 = scmp.eq.s32.totalorder %s6041_s23, 1  ;;  %p6110_p13 = scmp.lt.s32.totalorder %s6308_s22, 2 }
  0x1c   : > { %p6429_p0 = por %p66_p10, %p36_p3  ;;  %s92_s4 = sand.u32 1, %s6304_s21  }
  0x1d   : > { %p6433_p1 = por %p72_p11, %p42_p6  ;;  %s6045_s5 = sshll.u32 %s6308_s22, 7 }
  0x1e   : > { %s11263_s30 = scalar_select %p6429_p0, 1, 0 }
  0x1f   : > { %s11264_s3 = scalar_select %p6433_p1, 1, 0 }
  0x20   : > { %s6044_s6 = sshll.u32 %s92_s4, 3  ;;  %s11265_s1 = sld [smem:[#allocation461_spill]] }
  0x21   : > { %s96_s10 = scalar_lea.vmem [#allocation4], %s6044_s6  ;;  %p6446_p2 = pnand %p6110_p13, %p6418_p8 }
  0x22   : > { %s103_s11 = sshll.u32 %s96_s10, 4  ;;  %s93_s13 = scalar_lea.sflag [#allocation5], %s92_s4  ;;  %s6450_s11 = int_to_ptr.vmem [resolvable:$true] %s103_s11 }
  0x23   : > { %p6212_p6 = pneg %p6446_p2 }
  0x26   : > { %s6442_s9 = scalar_lea.hbm %s11265_s1, %s6045_s5  ;;  %s6215_s17 = scalar_lea.hbm %s11265_s1, 256 }
  0x27   : > { %s6210_s14 = scalar_lea.hbm %s6442_s9, 128  ;;  %p6216_p8 = scmp.lt.u32.totalorder %s6442_s9, %s11265_s1 }
  0x28   : > { %p6211_p5 = scmp.ne.s32.totalorder %s6442_s9, %s6210_s14  ;;  %p6217_p11 = scmp.lt.u32.totalorder %s6215_s17, %s6210_s14 }
  0x29   : > { %p6219_p12 = scmp.lt.u32.totalorder %s6210_s14, %s6442_s9 }
  0x2a   : > { %p6213_p7 = pnand %p6212_p6, %p6211_p5  ;;  %p6218_p13 = por %p6217_p11, %p6216_p8 }
  0x2c   : > { %p6214_p10 = pneg %p6213_p7  ;;  %p6220_p3 = por %p6219_p12, %p6218_p13 }
  0x2e   : > { %p6221_p4 = pnand %p6220_p3, %p6214_p10 }
  0x30   : > { %6224 = shalt.err (!%p6221_p4)
}
  0x31   : > { %s6225_s25 = scalar_lea.vmem %s6450_s11, 128  ;;  %s6311_s26 = smov [#allocation4]  }
  0x32   : > { %p6226_p5 = scmp.ne.s32.totalorder %s6450_s11, %s6225_s25  ;;  %s6230_s28 = sshll.u32 %s6311_s26, 4  ;;  %s6231_s28 = int_to_ptr.vmem [resolvable:$false] %s6230_s28 }
  0x33   : > { %s6232_s4 = scalar_lea.vmem %s6231_s28, 256  ;;  %p6233_p0 = scmp.lt.s32.totalorder %s6450_s11, %s6231_s28 }
  0x34   : > { %p6228_p7 = pnand %p6226_p5, %p6212_p6  ;;  %p6234_p8 = scmp.lt.s32.totalorder %s6232_s4, %s6225_s25 }
  0x36   : > { %p6229_p1 = pneg %p6228_p7  ;;  %p6235_p11 = por %p6234_p8, %p6233_p0 }
  0x38   : > { %p6236_p12 = pnand %p6235_p11, %p6229_p1 }
  0x3a   : > { %6239 = shalt.err (!%p6236_p12)
}
  0x3b   : > { %6105 = dma.hbm_to_vmem [thread:$0]  (!%p6446_p2), %s6442_s9, 128, %s6450_s11, %s93_s13  }
  0x3c   : > { %p11267_p3 = scmp.lt.s32.totalorder %s6308_s22, 3  ;;  %p11268_p4 = scmp.ge.s32.totalorder %s6308_s22, 1 }
  0x3e   : > { %p109_p6 = pnand %p11268_p4, %p11267_p3 }
  0x40   : > { %112 = sbr.rel (%p109_p6) target bundleno = 1709 (0x6ad), region = 24 }
  0x47   : > { %s6484_s5 = sand.u32 1, %s6300_s20  }
  0x48   : > { %s6047_s6 = sshll.u32 %s6484_s5, 3  ;;  %s115_s7 = scalar_lea.sflag [#allocation5], %s6484_s5 }
  0x49   : > { %s118_s8 = scalar_lea.vmem [#allocation4], %s6047_s6 }
  0x4a   : > { %6287 = dma.done.wait (%p6422_p9), %s115_s7, 128  }
  0x4b   : > { %6289 = vsyncadd (%p6422_p9), %s115_s7, 4294967168  ;;  %s138_s10 = sld [smem:[#allocation3]]  ;;  %s6049_s9 = sld [smem:[#allocation3 + $0x1]]  ;;  %v6492_v0 = vld [vmem:[%s118_s8] sm:$0xff]  ;;  %v594_v29 = vlaneseq  ;;  %v6312_v40 = vmov 683565275  }
  0x4c   : > { %s6050_s11 = sld [smem:[#allocation3 + $0x2]]  ;;  %s6052_s12 = sld [smem:[#allocation3 + $0x80]]  ;;  %v6313_v42 = vmov 2475754826   ;;  %v6314_v44 = vmov 2131351028  }
  0x4d   : > { %s6053_s13 = sld [smem:[#allocation3 + $0x81]]  ;;  %s6054_s14 = sld [smem:[#allocation3 + $0x82]]  ;;  %v6315_v46 = vmov 2102212464   ;;  %v6316_v48 = vmov 920167782  }
  0x4e   : > { %v6317_v56 = vmov 1326507024   ;;  %s6560_s29 = sld [smem:[#allocation3 + $0x3]]  ;;  %s6654_s16 = sld [smem:[#allocation3 + $0x100]] }
  0x4f   : > { %s6568_s15 = sld [smem:[#allocation3 + $0x83]]  ;;  %s6674_s17 = sld [smem:[#allocation3 + $0x101]] }
  0x50   : > { %s6058_s18 = sld [smem:[#allocation3 + $0x102]]  ;;  %s6059_s23 = sld [smem:[#allocation3 + $0x103]] }
  0x51   : > { %v150_v1 = vstv %s138_s10  ;;  %v261_v2 = vstv %s6049_s9  ;;  %s11226_s25 = smov 8   ;;  %s11230_s26 = smov 4  }
  0x52   : > { %v151_v3 = vmul.f32 %v150_v1, %v6492_v0  ;;  %v262_v4 = vmul.f32 %v261_v2, %v6492_v0  ;;  %v372_v5 = vstv %s6050_s11  ;;  %v152_v6 = vstv %s6052_s12  ;;  %s11223_s28 = smov 16   ;;  %s11228_s4 = smov 12  }
  0x53   : > { %v263_v7 = vstv %s6053_s13  ;;  %v373_v8 = vmul.f32 %v372_v5, %v6492_v0  ;;  %v374_v11 = vstv %s6054_s14  ;;  %s11222_s6 = smov 24   ;;  %s11224_s7 = smov 20  }
  0x54   : > { %v6497_v9 = vadd.f32 %v152_v6, %v151_v3  ;;  %v6499_v10 = vadd.f32 %v263_v7, %v262_v4  ;;  %s11216_s8 = smov 32   ;;  %s11214_s10 = smov 28  }
  0x55   : > { %v6505_v16 = vadd.f32 %v374_v11, %v373_v8  ;;  %s11212_s9 = smov 40   ;;  %s11210_s11 = smov 36  }
  0x56   : > { %v154_v12 = vand.u32 2147483647, %v6497_v9  ;;  %v157_v13 = vand.u32 2139095040, %v6497_v9  ;;  %v265_v14 = vand.u32 2147483647, %v6499_v10  ;;  %v268_v15 = vand.u32 2139095040, %v6499_v10 }
  0x57   : > { %v379_v23 = vand.u32 2139095040, %v6505_v16  ;;  %vm156_vm13 = vcmp.lt.s32.totalorder %v6497_v9, 0  ;;  %s11208_s12 = smov 48   ;;  %s11206_s13 = smov 44  }
  0x58   : > { %v158_v17 = vshrl.u32 %v157_v13, 23  ;;  %v161_v18 = vand.u32 8388607, %v154_v12  ;;  %v269_v19 = vshrl.u32 %v268_v15, 23  ;;  %v272_v20 = vand.u32 8388607, %v265_v14 }
  0x59   : > { %v380_v28 = vshrl.u32 %v379_v23, 23  ;;  %s11204_s14 = smov 56   ;;  %s12320_s1 = smov 52  }
  0x5a   : > { %v6060_v21 = vadd.s32 4294967169, %v158_v17  ;;  %v6064_v22 = vadd.s32 4294967169, %v269_v19  ;;  %v162_v25 = vor.u32 8388608, %v161_v18  ;;  %v273_v26 = vor.u32 8388608, %v272_v20  ;;  %s12327_s27 = smov 64   ;;  %s12330_s21 = smov 60  }
  0x5b   : > { %v6068_v31 = vadd.s32 4294967169, %v380_v28  ;;  %s12334_s20 = smov 4   ;;  %s12337_s24 = smov 68  }
  0x5c   : > { %v164_v24 = vadd.s32 1, %v6060_v21  ;;  %v275_v27 = vadd.s32 1, %v6064_v22  ;;  %v6512_v35 = vshll.u32 %v162_v25, 8  ;;  %v6516_v38 = vshll.u32 %v273_v26, 8  ;;  %s12341_s22 = smov 8   ;;  %p12464_p0 = scmp.ne.s32.totalorder %s11263_s30, 0 }
  0x5d   : > { %v6523_v50 = vadd.s32 1, %v6068_v31 }
  0x5e   : > { %vm165_vm0 = vcmp.gt.s32.totalorder %v164_v24, 0  ;;  %vm276_vm1 = vcmp.gt.s32.totalorder %v275_v27, 0 }
  0x5f   : > { %v166_v30 = vsel %vm165_vm0, %v164_v24, 0  ;;  %v277_v34 = vsel %vm276_vm1, %v275_v27, 0  ;;  %vm387_vm11 = vcmp.gt.s32.totalorder %v6523_v50, 0 }
  0x60   : > { %v167_v32 = vshrl.u32 %v166_v30, 5  ;;  %v168_v33 = vand.u32 31, %v166_v30  ;;  %v6514_v36 = vshrl.u32 %v277_v34, 5  ;;  %v279_v37 = vand.u32 31, %v277_v34 }
  0x62   : > { %v169_v39 = vsub.s32 32, %v168_v33  ;;  %v171_v41 = vshll.u32 %v6312_v40, %v168_v33  ;;  %v174_v43 = vshll.u32 %v6313_v42, %v168_v33  ;;  %v177_v45 = vshll.u32 %v6314_v44, %v168_v33 }
  0x63   : > { %v180_v47 = vshll.u32 %v6315_v46, %v168_v33  ;;  %v183_v49 = vshll.u32 %v6316_v48, %v168_v33  ;;  %vm186_vm2 = vcmp.lt.s32.totalorder %v167_v32, 1  ;;  %vm187_vm3 = vcmp.lt.s32.totalorder %v167_v32, 2 }
  0x64   : > { %v170_v51 = vshrl.u32 %v6312_v40, %v169_v39  ;;  %v172_v52 = vshrl.u32 %v6313_v42, %v169_v39  ;;  %v175_v53 = vshrl.u32 %v6314_v44, %v169_v39  ;;  %v178_v54 = vshrl.u32 %v6315_v46, %v169_v39 }
  0x65   : > { %v181_v55 = vshrl.u32 %v6316_v48, %v169_v39  ;;  %v184_v57 = vshrl.u32 %v6317_v56, %v169_v39  ;;  %vm189_vm4 = vcmp.lt.s32.totalorder %v167_v32, 4  ;;  %v280_v61 = vsub.s32 32, %v279_v37 }
  0x66   : > { %v173_v58 = vor.u32 %v172_v52, %v171_v41  ;;  %v176_v59 = vor.u32 %v175_v53, %v174_v43  ;;  %v179_v60 = vor.u32 %v178_v54, %v177_v45  ;;  %vm188_vm5 = vcmp.lt.s32.totalorder %v167_v32, 3 }
  0x67   : > { %v182_v62 = vor.u32 %v181_v55, %v180_v47  ;;  %v185_v63 = vor.u32 %v184_v57, %v183_v49  ;;  %v282_v1 = vshll.u32 %v6312_v40, %v279_v37  ;;  %v285_v11 = vshll.u32 %v6313_v42, %v279_v37 }
  0x68   : > { %v190_v2 = vsel %vm186_vm2, %v170_v51, %v173_v58  ;;  %v191_v3 = vsel %vm189_vm4, %v179_v60, 2102212464  ;;  %v194_v4 = vsel %vm186_vm2, %v173_v58, %v176_v59  ;;  %v198_v5 = vsel %vm186_vm2, %v176_v59, %v179_v60 }
  0x69   : > { %v192_v6 = vsel %vm188_vm5, %v176_v59, %v191_v3  ;;  %v195_v7 = vsel %vm189_vm4, %v182_v62, 920167782  ;;  %v199_v8 = vsel %vm189_vm4, %v185_v63, 1326507024  ;;  %v281_v17 = vshrl.u32 %v6312_v40, %v280_v61 }
  0x6a   : > { %v196_v13 = vsel %vm188_vm5, %v179_v60, %v195_v7  ;;  %v200_v15 = vsel %vm188_vm5, %v182_v62, %v199_v8  ;;  %v283_v18 = vshrl.u32 %v6313_v42, %v280_v61  ;;  %v193_v19 = vsel %vm187_vm3, %v190_v2, %v192_v6 }
  0x6b   : > { %v197_v20 = vsel %vm187_vm3, %v194_v4, %v196_v13  ;;  %v201_v21 = vsel %vm187_vm3, %v198_v5, %v200_v15  ;;  %v286_v22 = vshrl.u32 %v6314_v44, %v280_v61  ;;  %v288_v30 = vshll.u32 %v6314_v44, %v279_v37 }
  0x6c   : > { %v6543_v23 = vmul.u32.u64.low %v6512_v35, %v201_v21  ;;  %v6544_v24 = vmul.u32.u64.high %v6512_v35, %v201_v21, %v6543_v23  ;;  %v6547_v25 = vmul.u32.u64.low %v6512_v35, %v197_v20  ;;  %v6548_v26 = vmul.u32.u64.high %v6512_v35, %v197_v20, %v6547_v25 }
  0x6d   : > { %v284_v27 = vor.u32 %v283_v18, %v282_v1  ;;  %v287_v28 = vor.u32 %v286_v22, %v285_v11  ;;  %v289_v31 = vshrl.u32 %v6315_v46, %v280_v61  ;;  %v291_v32 = vshll.u32 %v6315_v46, %v279_v37 }
  0x6e   : > { %v292_v33 = vshrl.u32 %v6316_v48, %v280_v61  ;;  %v294_v34 = vshll.u32 %v6316_v48, %v279_v37  ;;  %v295_v39 = vshrl.u32 %v6317_v56, %v280_v61  ;;  %v209_v41 = vmul.u32 %v6512_v35, %v193_v19 }
  0x6f   : > { %v290_v43 = vor.u32 %v289_v31, %v288_v30  ;;  %vm297_vm6 = vcmp.lt.s32.totalorder %v6514_v36, 1  ;;  %vm298_vm7 = vcmp.lt.s32.totalorder %v6514_v36, 2  ;;  %vm211_vm8 = vc.u32 %v6544_v24, %v6547_v25 }
  0x70   : > { %v212_v45 = vadd.s32 1, %v6548_v26  ;;  %v293_v47 = vor.u32 %v292_v33, %v291_v32  ;;  %vm299_vm9 = vcmp.lt.s32.totalorder %v6514_v36, 3  ;;  %v296_v37 = vor.u32 %v295_v39, %v294_v34 }
  0x71   : > { %vm300_vm10 = vcmp.lt.s32.totalorder %v6514_v36, 4  ;;  %v301_v49 = vsel %vm297_vm6, %v281_v17, %v284_v27  ;;  %v305_v35 = vsel %vm297_vm6, %v284_v27, %v287_v28  ;;  %v309_v54 = vsel %vm297_vm6, %v287_v28, %v290_v43 }
  0x72   : > { %v213_v51 = vsel %vm211_vm8, %v212_v45, %v6548_v26  ;;  %v302_v52 = vsel %vm300_vm10, %v290_v43, 2102212464  ;;  %v306_v53 = vsel %vm300_vm10, %v293_v47, 920167782  ;;  %v310_v59 = vsel %vm300_vm10, %v296_v37, 1326507024 }
  0x73   : > { %v214_v55 = vadd.s32 %v213_v51, %v209_v41  ;;  %v303_v57 = vsel %vm299_vm9, %v287_v28, %v302_v52  ;;  %v307_v58 = vsel %vm299_vm9, %v290_v43, %v306_v53  ;;  %v311_v62 = vsel %vm299_vm9, %v293_v47, %v310_v59 }
  0x74   : > { %v304_v60 = vsel %vm298_vm7, %v301_v49, %v303_v57  ;;  %v308_v61 = vsel %vm298_vm7, %v305_v35, %v307_v58  ;;  %v312_v1 = vsel %vm298_vm7, %v309_v54, %v311_v62  ;;  %v388_v6 = vsel %vm387_vm11, %v6523_v50, 0 }
  0x75   : > { %v215_v63 = vadd.s32 536870912, %v214_v55  ;;  %v6584_v2 = vmul.u32.u64.low %v6516_v38, %v308_v61  ;;  %v6585_v3 = vmul.u32.u64.high %v6516_v38, %v308_v61, %v6584_v2  ;;  %v390_v8 = vand.u32 31, %v388_v6 }
  0x76   : > { %v6588_v4 = vmul.u32.u64.low %v6516_v38, %v312_v1  ;;  %v6589_v5 = vmul.u32.u64.high %v6516_v38, %v312_v1, %v6588_v4  ;;  %v320_v11 = vmul.u32 %v6516_v38, %v304_v60  ;;  %v376_v13 = vand.u32 2147483647, %v6505_v16 }
  0x77   : > { %v6592_v7 = vshrl.u32 %v215_v63, 30  ;;  %v483_v36 = vstv %s6560_s29  ;;  %v323_v17 = vadd.s32 1, %v6585_v3  ;;  %v391_v18 = vsub.s32 32, %v390_v8  ;;  %s11202_s29 = smov 52  }
  0x78   : > { %v6600_v19 = vshrl.u32 %v594_v29, 7  ;;  %v6603_v20 = vadd.s32 %v6584_v2, %v6589_v5  ;;  %vm322_vm12 = vc.u32 %v6589_v5, %v6584_v2  ;;  %v393_v50 = vshll.u32 %v6312_v40, %v390_v8 }
  0x79   : > { %v217_v15 = vshll.u32 %v6592_v7, 30  ;;  %v396_v38 = vshll.u32 %v6313_v42, %v390_v8  ;;  %v324_v22 = vsel %vm322_vm12, %v323_v17, %v6585_v3  ;;  %v484_v23 = vmul.f32 %v483_v36, %v6492_v0 }
  0x7a   : > { %v485_v26 = vstv %s6568_s15  ;;  %v325_v27 = vadd.s32 %v324_v22, %v320_v11  ;;  %v383_v29 = vand.u32 8388607, %v376_v13  ;;  %v394_v28 = vshrl.u32 %v6313_v42, %v391_v18  ;;  %s11200_s15 = smov 64  }
  0x7b   : > { %v6608_v21 = vsub.s32 %v214_v55, %v217_v15  ;;  %v397_v30 = vshrl.u32 %v6314_v44, %v391_v18  ;;  %v6618_v32 = vshrl.u32 %v388_v6, 5  ;;  %v399_v33 = vshll.u32 %v6314_v44, %v390_v8 }
  0x7c   : > { %v400_v34 = vshrl.u32 %v6315_v46, %v391_v18  ;;  %v326_v39 = vadd.s32 536870912, %v325_v27  ;;  %v395_v41 = vor.u32 %v394_v28, %v393_v50  ;;  %v402_v45 = vshll.u32 %v6315_v46, %v390_v8 }
  0x7d   : > { %v220_v31 = vsub.s32 0, %v6608_v21  ;;  %v398_v43 = vor.u32 %v397_v30, %v396_v38  ;;  %v403_v49 = vshrl.u32 %v6316_v48, %v391_v18  ;;  %v6626_v35 = vsub.s32 0, %v6600_v19 }
  0x7e   : > { %v401_v37 = vor.u32 %v400_v34, %v399_v33  ;;  %v6628_v51 = vshrl.u32 %v326_v39, 30  ;;  %v392_v52 = vshrl.u32 %v6312_v40, %v391_v18  ;;  %v405_v53 = vshll.u32 %v6316_v48, %v390_v8 }
  0x7f   : > { %v6061_v47 = vmin.u32 %v220_v31, %v6608_v21  ;;  %v406_v54 = vshrl.u32 %v6317_v56, %v391_v18  ;;  %v384_v57 = vor.u32 8388608, %v383_v29  ;;  %v6634_v58 = vadd.f32 %v485_v26, %v484_v23 }
  0x80   : > { %v328_v59 = vshll.u32 %v6628_v51, 30  ;;  %v404_v60 = vor.u32 %v403_v49, %v402_v45  ;;  %vm408_vm14 = vcmp.lt.s32.totalorder %v6618_v32, 1  ;;  %v210_v62 = vadd.s32 %v6547_v25, %v6544_v24 }
  0x81   : > { %v222_v55 = vclz %v6061_v47  ;;  %v407_v61 = vor.u32 %v406_v54, %v405_v53  ;;  %v240_v1 = vsub.s32 4, %v6592_v7  ;;  %vm411_vm15 = vcmp.lt.s32.totalorder %v6618_v32, 4 }
  0x82   : > { %v6642_v2 = vsub.s32 %v325_v27, %v328_v59  ;;  %vm410_vm0 = vcmp.lt.s32.totalorder %v6618_v32, 3  ;;  %v412_v3 = vsel %vm408_vm14, %v392_v52, %v395_v41  ;;  %v413_v4 = vsel %vm411_vm15, %v401_v37, 2102212464 }
  0x83   : > { %v6062_v63 = vadd.s32 4294967294, %v222_v55  ;;  %vm409_vm2 = vcmp.lt.s32.totalorder %v6618_v32, 2  ;;  %v414_v24 = vsel %vm410_vm0, %v398_v43, %v413_v4  ;;  %v416_v25 = vsel %vm408_vm14, %v395_v41, %v398_v43 }
  0x84   : > { %v331_v6 = vsub.s32 0, %v6642_v2  ;;  %v415_v8 = vsel %vm409_vm2, %v412_v3, %v414_v24  ;;  %v424_v11 = vshll.u32 %v384_v57, 8  ;;  %v417_v18 = vsel %vm411_vm15, %v404_v60, 920167782 }
  0x85   : > { %vm6063_vm1 = vcmp.lt.s32.totalorder %v6062_v63, 0  ;;  %v241_v50 = vsel %vm156_vm13, %v240_v1, %v6592_v7  ;;  %v418_v22 = vsel %vm410_vm0, %v401_v37, %v417_v18  ;;  %v420_v23 = vsel %vm408_vm14, %v398_v43, %v401_v37 }
  0x86   : > { %v225_v5 = vsel %vm6063_vm1, 0, %v6062_v63  ;;  %v6065_v38 = vmin.u32 %v331_v6, %v6642_v2  ;;  %v421_v29 = vsel %vm411_vm15, %v407_v61, 1326507024  ;;  %vm6678_vm3 = vcmp.le.f32.partialorder %v154_v12, 0.7853982 }
  0x87   : > { %v226_v36 = vsub.s32 32, %v225_v5  ;;  %v227_v15 = vshll.u32 %v6608_v21, %v225_v5  ;;  %v230_v17 = vsub.s32 4294967266, %v225_v5  ;;  %v419_v21 = vsel %vm409_vm2, %v416_v25, %v418_v22 }
  0x88   : > { %v333_v28 = vclz %v6065_v38  ;;  %v490_v30 = vand.u32 2139095040, %v6634_v58  ;;  %v6684_v31 = vsub.s32 1, %v6600_v19  ;;  %v243_v39 = vsel %vm6678_vm3, 0, %v241_v50 }
  0x89   : > { %v228_v26 = vshrl.u32 %v210_v62, %v226_v36  ;;  %v231_v27 = vadd.s32 127, %v230_v17  ;;  %v422_v41 = vsel %vm410_vm0, %v404_v60, %v421_v29  ;;  %v247_v54 = vadd.s32 3, %v243_v39 }
  0x8a   : > { %v6066_v43 = vadd.s32 4294967294, %v333_v28  ;;  %v423_v12 = vsel %vm409_vm2, %v420_v23, %v422_v41  ;;  %v6692_v45 = vmul.u32.u64.low %v424_v11, %v419_v21  ;;  %v6693_v47 = vmul.u32.u64.high %v424_v11, %v419_v21, %v6692_v45 }
  0x8b   : > { %v229_v33 = vor.u32 %v228_v26, %v227_v15  ;;  %v232_v34 = vshll.u32 %v231_v27, 23  ;;  %v6695_v52 = vmul.u32.u64.low %v424_v11, %v423_v12  ;;  %v6696_v53 = vmul.u32.u64.high %v424_v11, %v423_v12, %v6695_v52 }
  0x8c   : > { %v258_v55 = vstv %s6654_s16  ;;  %vm6067_vm4 = vcmp.lt.s32.totalorder %v6066_v43, 0  ;;  %v491_v57 = vshrl.u32 %v490_v30, 23  ;;  %v351_v60 = vsub.s32 4, %v6628_v51  ;;  %s11198_s16 = smov 60  }
  0x8d   : > { %v233_v37 = vor.u32 4788187, %v232_v34  ;;  %v236_v49 = vcvt.s32.f32 %v229_v33  ;;  %v336_v61 = vsel %vm6067_vm4, 0, %v6066_v43  ;;  %v431_v62 = vmul.u32 %v424_v11, %v415_v8 }
  0x8e   : > { %v337_v32 = vsub.s32 32, %v336_v61  ;;  %v338_v63 = vshll.u32 %v6642_v2, %v336_v61  ;;  %v341_v1 = vsub.s32 4294967266, %v336_v61  ;;  %v434_v3 = vadd.s32 1, %v6693_v47 }
  0x8f   : > { %v234_v59 = vand.u32 2147483647, %v233_v37  ;;  %v6703_v24 = vadd.s32 %v6692_v45, %v6696_v53  ;;  %vm433_vm5 = vc.u32 %v6696_v53, %v6692_v45  ;;  %v6072_v25 = vadd.s32 4294967169, %v491_v57 }
  0x90   : > { %v339_v5 = vshrl.u32 %v6603_v20, %v337_v32  ;;  %v342_v6 = vadd.s32 127, %v341_v1  ;;  %v369_v36 = vstv %s6674_s17  ;;  %v435_v15 = vsel %vm433_vm5, %v434_v3, %v6693_v47  ;;  %s11154_s17 = smov 72  }
  0x91   : > { %v237_v4 = vmul.f32 %v236_v49, %v234_v59  ;;  %vm267_vm6 = vcmp.lt.s32.totalorder %v6499_v10, 0  ;;  %v436_v2 = vadd.s32 %v435_v15, %v431_v62  ;;  %v497_v11 = vadd.s32 1, %v6072_v25 }
  0x92   : > { %v6710_v17 = vand.u32 3, %v247_v54  ;;  %v340_v18 = vor.u32 %v339_v5, %v338_v63  ;;  %v343_v50 = vshll.u32 %v342_v6, 23  ;;  %v487_v38 = vand.u32 2147483647, %v6634_v58 }
  0x93   : > { %v238_v8 = vxor.u32 2147483648, %v237_v4  ;;  %v352_v20 = vsel %vm267_vm6, %v351_v60, %v6628_v51  ;;  %v437_v23 = vadd.s32 536870912, %v436_v2  ;;  %vm498_vm7 = vcmp.gt.s32.totalorder %v497_v11, 0 }
  0x94   : > { %v344_v27 = vor.u32 4788187, %v343_v50  ;;  %v347_v21 = vcvt.s32.f32 %v340_v18  ;;  %v499_v29 = vsel %vm498_vm7, %v497_v11, 0  ;;  %vm6723_vm8 = vcmp.le.f32.partialorder %v265_v14, 0.7853982 }
  0x95   : > { %v239_v22 = vsel %vm156_vm13, %v238_v8, %v237_v4  ;;  %v6727_v30 = vshrl.u32 %v437_v23, 30  ;;  %v501_v33 = vand.u32 31, %v499_v29  ;;  %v354_v34 = vsel %vm6723_vm8, 0, %v352_v20 }
  0x96   : > { %v242_v26 = vsel %vm6678_vm3, %v6497_v9, %v239_v22  ;;  %v345_v51 = vand.u32 2147483647, %v344_v27  ;;  %v494_v7 = vand.u32 8388607, %v487_v38  ;;  %v6734_v39 = vmul.f32 %v258_v55, %v6492_v0 }
  0x97   : > { %6184 = vcosq.f32 %v242_v26  ;;  %v439_v41 = vshll.u32 %v6727_v30, 30  ;;  %v502_v14 = vsub.s32 32, %v501_v33  ;;  %v504_v43 = vshll.u32 %v6312_v40, %v501_v33 }
  0x98   : > { %6186 = vsinq.f32 %v242_v26  ;;  %vm250_vm9 = vcmp.eq.s32.totalorder %v6710_v17, 0  ;;  %v348_v12 = vmul.f32 %v347_v21, %v345_v51  ;;  %v507_v45 = vshll.u32 %v6313_v42, %v501_v33 }
  0x99   : > { %v510_v47 = vshll.u32 %v6314_v44, %v501_v33  ;;  %vm249_vm10 = vcmp.lt.s32.totalorder %v6710_v17, 2  ;;  %v358_v37 = vadd.s32 3, %v354_v34  ;;  %v6742_v49 = vsub.s32 %v436_v2, %v439_v41 }
  0x9a   : > { %v505_v52 = vshrl.u32 %v6313_v42, %v502_v14  ;;  %v513_v53 = vshll.u32 %v6315_v46, %v501_v33  ;;  %vm246_vm11 = vweird.f32 %v6497_v9  ;;  %v349_v54 = vxor.u32 2147483648, %v348_v12 }
  0x9b   : > { %v495_v55 = vor.u32 8388608, %v494_v7  ;;  %v508_v57 = vshrl.u32 %v6314_v44, %v502_v14  ;;  %v511_v59 = vshrl.u32 %v6315_v46, %v502_v14  ;;  %v442_v61 = vsub.s32 0, %v6742_v49 }
  0x9c   : > { %v500_v60 = vshrl.u32 %v499_v29, 5  ;;  %v506_v62 = vor.u32 %v505_v52, %v504_v43  ;;  %v514_v32 = vshrl.u32 %v6316_v48, %v502_v14  ;;  %v350_v63 = vsel %vm267_vm6, %v349_v54, %v348_v12 }
  0x9d   : > { %v509_v42 = vor.u32 %v508_v57, %v507_v45  ;;  %v512_v1 = vor.u32 %v511_v59, %v510_v47  ;;  %v516_v3 = vshll.u32 %v6316_v48, %v501_v33  ;;  %v353_v4 = vsel %vm6723_vm8, %v6499_v10, %v350_v63 }
  0x9e   : > { %v6069_v44 = vmin.u32 %v442_v61, %v6742_v49  ;;  %v503_v46 = vshrl.u32 %v6312_v40, %v502_v14  ;;  %v515_v25 = vor.u32 %v514_v32, %v513_v53  ;;  %vm253_vm12 = vcmp.eq.s32.totalorder %v6710_v17, 2 }
  0x9f   : > { %6188 = vcosq.f32 %v353_v4  ;;  %v6760_v5 = vand.u32 3, %v358_v37  ;;  %v517_v6 = vshrl.u32 %v6317_v56, %v502_v14  ;;  %vm519_vm13 = vcmp.lt.s32.totalorder %v500_v60, 1 }
  0xa0   : > { %6190 = vsinq.f32 %v353_v4  ;;  %v444_v8 = vclz %v6069_v44  ;;  %v6763_v48 = vshll.u32 %v495_v55, 8  ;;  %vm520_vm14 = vcmp.lt.s32.totalorder %v500_v60, 2 }
  0xa1   : > { %v6185_v15 = vpop.eup %6184  ;;  %v518_v18 = vor.u32 %v517_v6, %v516_v3  ;;  %vm521_vm15 = vcmp.lt.s32.totalorder %v500_v60, 3  ;;  %vm522_vm0 = vcmp.lt.s32.totalorder %v500_v60, 4  ;;  %v523_v22 = vsel %vm519_vm13, %v503_v46, %v506_v62 }
  0xa2   : > { %v6187_v2 = vpop.eup %6186  ;;  %v254_v11 = vxor.u32 2147483648, %v6185_v15  ;;  %v6070_v50 = vadd.s32 4294967294, %v444_v8  ;;  %v524_v56 = vsel %vm522_vm0, %v512_v1, 2102212464  ;;  %v527_v23 = vsel %vm519_vm13, %v506_v62, %v509_v42 }
  0xa3   : > { %v251_v40 = vxor.u32 2147483648, %v6187_v2  ;;  %v528_v26 = vsel %vm522_vm0, %v515_v25, 920167782  ;;  %vm357_vm1 = vweird.f32 %v6499_v10  ;;  %v525_v21 = vsel %vm521_vm15, %v509_v42, %v524_v56 }
  0xa4   : > { %v255_v20 = vsel %vm253_vm12, %v254_v11, %v6187_v2  ;;  %vm6071_vm2 = vcmp.lt.s32.totalorder %v6070_v50, 0  ;;  %v529_v29 = vsel %vm521_vm15, %v512_v1, %v528_v26  ;;  %v526_v51 = vsel %vm520_vm14, %v523_v22, %v525_v21 }
  0xa5   : > { %v252_v27 = vsel %vm250_vm9, %v6185_v15, %v251_v40  ;;  %v447_v33 = vsel %vm6071_vm2, 0, %v6070_v50  ;;  %v530_v34 = vsel %vm520_vm14, %v527_v23, %v529_v29  ;;  %v370_v45 = vmul.f32 %v369_v36, %v6492_v0 }
  0xa6   : > { %v256_v28 = vsel %vm249_vm10, %v252_v27, %v255_v20  ;;  %v448_v41 = vsub.s32 32, %v447_v33  ;;  %v449_v14 = vshll.u32 %v6742_v49, %v447_v33  ;;  %v452_v43 = vsub.s32 4294967266, %v447_v33 }
  0xa7   : > { %v257_v7 = vsel %vm246_vm11, nan, %v256_v28  ;;  %v531_v17 = vsel %vm519_vm13, %v509_v42, %v512_v1  ;;  %v532_v47 = vsel %vm522_vm0, %v518_v18, 1326507024  ;;  %vm364_vm3 = vcmp.eq.s32.totalorder %v6760_v5, 2 }
  0xa8   : > { %v6784_v12 = vmul.f32 %v6734_v39, %v257_v7  ;;  %vm378_vm4 = vcmp.lt.s32.totalorder %v6505_v16, 0  ;;  %v450_v9 = vshrl.u32 %v6703_v24, %v448_v41  ;;  %v453_v37 = vadd.s32 127, %v452_v43 }
  0xa9   : > { %v533_v49 = vsel %vm521_vm15, %v515_v25, %v532_v47  ;;  %v6189_v52 = vpop.eup %6188  ;;  %v6797_v53 = vmul.u32.u64.low %v6763_v48, %v530_v34  ;;  %v6798_v54 = vmul.u32.u64.high %v6763_v48, %v530_v34, %v6797_v53  ;;  %vm361_vm5 = vcmp.eq.s32.totalorder %v6760_v5, 0 }
  0xaa   : > { %v534_v39 = vsel %vm520_vm14, %v531_v17, %v533_v49  ;;  %v6802_v36 = vrot.slane %v6784_v12, %v6626_v35  ;;  %v6191_v55 = vpop.eup %6190  ;;  %v365_v57 = vxor.u32 2147483648, %v6189_v52  ;;  %v451_v59 = vor.u32 %v450_v9, %v449_v14 }
  0xab   : > { %v454_v24 = vshll.u32 %v453_v37, 23  ;;  %vm360_vm6 = vcmp.lt.s32.totalorder %v6760_v5, 2  ;;  %v362_v61 = vxor.u32 2147483648, %v6191_v55  ;;  %vm6816_vm7 = vcmp.le.f32.partialorder %v376_v13, 0.7853982 }
  0xac   : > { %v6807_v60 = vmul.u32.u64.low %v6763_v48, %v534_v39  ;;  %v6808_v62 = vmul.u32.u64.high %v6763_v48, %v534_v39, %v6807_v60  ;;  %607 = vbcast.lane.b32.xlu1 %v6802_v36, 272  ;;  %599 = vbcast.lane.b32.xlu0 %v6802_v36, 256  ;;  %v366_v32 = vsel %vm364_vm3, %v365_v57, %v6191_v55  ;;  %v458_v1 = vcvt.s32.f32 %v451_v59 }
  0xad   : > { %v455_v42 = vor.u32 4788187, %v454_v24  ;;  %v363_v3 = vsel %vm361_vm5, %v6189_v52, %v362_v61  ;;  %v462_v4 = vsub.s32 4, %v6727_v30  ;;  %v542_v44 = vmul.u32 %v6763_v48, %v526_v51 }
  0xae   : > { %v545_v46 = vadd.s32 1, %v6798_v54  ;;  %v367_v25 = vsel %vm360_vm6, %v363_v3, %v366_v32  ;;  %v6824_v5 = vsub.s32 2, %v6600_v19  ;;  %v6827_v15 = vsub.s32 3, %v6600_v19 }
  0xaf   : > { %v456_v6 = vand.u32 2147483647, %v455_v42  ;;  %v368_v13 = vsel %vm357_vm1, nan, %v367_v25  ;;  %v6832_v8 = vadd.s32 %v6797_v53, %v6808_v62  ;;  %vm544_vm8 = vc.u32 %v6808_v62, %v6797_v53 }
  0xb0   : > { %v6836_v48 = vsub.s32 4, %v6600_v19  ;;  %611 = vbcast.lane.b32.xlu1 %v6802_v36, 280  ;;  %603 = vbcast.lane.b32.xlu0 %v6802_v36, 264  ;;  %v371_v2 = vmul.f32 %v370_v45, %v368_v13  ;;  %v546_v18 = vsel %vm544_vm8, %v545_v46, %v6798_v54  ;;  %v6842_v40 = vsub.s32 5, %v6600_v19 }
  0xb1   : > { %v459_v11 = vmul.f32 %v458_v1, %v456_v6  ;;  %v463_v10 = vsel %vm378_vm4, %v462_v4, %v6727_v30  ;;  %v547_v50 = vadd.s32 %v546_v18, %v542_v44  ;;  %v6848_v22 = vsub.s32 6, %v6600_v19 }
  0xb2   : > { %v6851_v20 = vsub.s32 7, %v6600_v19  ;;  %v6854_v23 = vrot.slane %v371_v2, %v6626_v35  ;;  %v6857_v26 = vrot.slane %v371_v2, %v6684_v31  ;;  %v6860_v27 = vrot.slane %v371_v2, %v6824_v5 }
  0xb3   : > { %v460_v56 = vxor.u32 2147483648, %v459_v11  ;;  %v548_v21 = vadd.s32 536870912, %v547_v50  ;;  %v6863_v30 = vrot.slane %v371_v2, %v6827_v15  ;;  %v6866_v29 = vrot.slane %v371_v2, %v6836_v48 }
  0xb4   : > { %v6869_v28 = vrot.slane %v371_v2, %v6842_v40  ;;  %619 = vbcast.lane.b32.xlu1 %v6802_v36, 296  ;;  %615 = vbcast.lane.b32.xlu0 %v6802_v36, 288  ;;  %v6876_v51 = vrot.slane %v371_v2, %v6848_v22  ;;  %v6879_v34 = vrot.slane %v371_v2, %v6851_v20  ;;  %v465_v41 = vsel %vm6816_vm7, 0, %v463_v10 }
  0xb5   : > { %v461_v33 = vsel %vm378_vm4, %v460_v56, %v459_v11  ;;  %v6886_v14 = vshrl.u32 %v548_v21, 30  ;;  %v469_v45 = vadd.s32 3, %v465_v41  ;;  %v480_v39 = vstv %s6058_s18  ;;  %s11196_s18 = smov 68  }
  0xb6   : > { %v464_v7 = vsel %vm6816_vm7, %v6505_v16, %v461_v33  ;;  %vm468_vm12 = vweird.f32 %v6505_v16  ;;  %v481_v24 = vmul.f32 %v480_v39, %v6492_v0  ;;  %v664_v16 = vrot.slane %v6784_v12, %v6684_v31 }
  0xb7   : > { %6192 = vcosq.f32 %v464_v7  ;;  %v550_v43 = vshll.u32 %v6886_v14, 30  ;;  %v470_v9 = vand.u32 3, %v469_v45  ;;  %v573_v33 = vsub.s32 4, %v6886_v14 }
  0xb8   : > { %6194 = vsinq.f32 %v464_v7  ;;  %627 = vbcast.lane.b32.xlu1 %v6802_v36, 312  ;;  %623 = vbcast.lane.b32.xlu0 %v6802_v36, 304  ;;  %vm489_vm14 = vcmp.lt.s32.totalorder %v6634_v58, 0  ;;  %vm488_vm15 = vcmp.le.f32.partialorder %v487_v38, 0.7853982  ;;  %v591_v38 = vstv %s6059_s23  ;;  %s11156_s23 = smov 80  }
  0xb9   : > { %v551_v17 = vsub.s32 %v547_v50, %v550_v43  ;;  %vm475_vm9 = vcmp.eq.s32.totalorder %v470_v9, 2  ;;  %vm472_vm10 = vcmp.eq.s32.totalorder %v470_v9, 0  ;;  %vm471_vm11 = vcmp.lt.s32.totalorder %v470_v9, 2 }
  0xba   : > { %v574_v43 = vsel %vm489_vm14, %v573_v33, %v6886_v14  ;;  %vm579_vm3 = vweird.f32 %v6634_v58  ;;  %vm2738_vm4 = vcmask 7168   ;;  %vm2867_vm5 = vcmask 15360  }
  0xbb   : > { %v553_v47 = vsub.s32 0, %v551_v17  ;;  %vm2996_vm6 = vcmask 23552   ;;  %vm5797_vm7 = vcmask 31744   ;;  %vm5799_vm8 = vcmask 64512  }
  0xbc   : > { %635 = vbcast.lane.b32.xlu1 %v6802_v36, 328  ;;  %631 = vbcast.lane.b32.xlu0 %v6802_v36, 320 }
  0xbd   : > { %v6073_v37 = vmin.u32 %v553_v47, %v551_v17  ;;  %v576_v47 = vsel %vm488_vm15, 0, %v574_v43 }
  0xbe   : > { %v580_v9 = vadd.s32 3, %v576_v47 }
  0xbf   : > { %v555_v49 = vclz %v6073_v37 }
  0xc0   : > { %643 = vbcast.lane.b32.xlu1 %v6802_v36, 344  ;;  %639 = vbcast.lane.b32.xlu0 %v6802_v36, 336  ;;  %v581_v37 = vand.u32 3, %v580_v9 }
  0xc1   : > { %v6193_v52 = vpop.eup %6192  ;;  %v6074_v55 = vadd.s32 4294967294, %v555_v49 }
  0xc2   : > { %v6195_v53 = vpop.eup %6194  ;;  %v476_v54 = vxor.u32 2147483648, %v6193_v52  ;;  %vm586_vm0 = vcmp.eq.s32.totalorder %v581_v37, 2  ;;  %vm583_vm1 = vcmp.eq.s32.totalorder %v581_v37, 0  ;;  %vm582_vm2 = vcmp.lt.s32.totalorder %v581_v37, 2 }
  0xc3   : > { %v473_v57 = vxor.u32 2147483648, %v6195_v53  ;;  %vm6075_vm13 = vcmp.lt.s32.totalorder %v6074_v55, 0 }
  0xc4   : > { %v477_v59 = vsel %vm475_vm9, %v476_v54, %v6195_v53  ;;  %651 = vbcast.lane.b32.xlu1 %v6802_v36, 360  ;;  %647 = vbcast.lane.b32.xlu0 %v6802_v36, 352  ;;  %v558_v60 = vsel %vm6075_vm13, 0, %v6074_v55  ;;  %v592_v54 = vmul.f32 %v591_v38, %v6492_v0  ;;  %v932_v38 = vrot.slane %v6784_v12, %v6842_v40 }
  0xc5   : > { %v474_v61 = vsel %vm472_vm10, %v6193_v52, %v473_v57  ;;  %v559_v32 = vsub.s32 32, %v558_v60  ;;  %v560_v63 = vshll.u32 %v551_v17, %v558_v60  ;;  %v563_v42 = vsub.s32 4294967266, %v558_v60 }
  0xc6   : > { %v478_v62 = vsel %vm471_vm11, %v474_v61, %v477_v59  ;;  %v731_v61 = vrot.slane %v6784_v12, %v6824_v5  ;;  %vm5801_vm9 = vcmask 97280   ;;  %vm5803_vm10 = vcmask 130048  }
  0xc7   : > { %v479_v1 = vsel %vm468_vm12, nan, %v478_v62  ;;  %v561_v4 = vshrl.u32 %v6832_v8, %v559_v32  ;;  %v564_v44 = vadd.s32 127, %v563_v42  ;;  %vm5805_vm11 = vcmask 162816  }
  0xc8   : > { %v482_v3 = vmul.f32 %v481_v24, %v479_v1  ;;  %659 = vbcast.lane.b32.xlu1 %v6802_v36, 376  ;;  %655 = vbcast.lane.b32.xlu0 %v6802_v36, 368  ;;  %vm5807_vm12 = vcmask 195584   ;;  %vm5809_vm13 = vcmask 228352  }
  0xc9   : > { %v562_v46 = vor.u32 %v561_v4, %v560_v63  ;;  %v565_v25 = vshll.u32 %v564_v44, 23 }
  0xca   : > { %v6905_v6 = vrot.slane %v482_v3, %v6626_v35  ;;  %v6908_v13 = vrot.slane %v482_v3, %v6684_v31  ;;  %v6911_v2 = vrot.slane %v482_v3, %v6824_v5  ;;  %v6914_v8 = vrot.slane %v482_v3, %v6827_v15 }
  0xcb   : > { %v6917_v11 = vrot.slane %v482_v3, %v6836_v48  ;;  %v6920_v18 = vrot.slane %v482_v3, %v6842_v40  ;;  %v566_v36 = vor.u32 4788187, %v565_v25  ;;  %v569_v10 = vcvt.s32.f32 %v562_v46 }
  0xcc   : > { %v6923_v50 = vrot.slane %v482_v3, %v6848_v22  ;;  %v6926_v56 = vrot.slane %v482_v3, %v6851_v20  ;;  %670 = vbcast.lane.b32.xlu1 %v664_v16, 264  ;;  %666 = vbcast.lane.b32.xlu0 %v664_v16, 256 }
  0xcd   : > { %v567_v21 = vand.u32 2147483647, %v566_v36 }
  0xcf   : > { %v570_v7 = vmul.f32 %v569_v10, %v567_v21 }
  0xd0   : > { %678 = vbcast.lane.b32.xlu1 %v664_v16, 280  ;;  %674 = vbcast.lane.b32.xlu0 %v664_v16, 272 }
  0xd1   : > { %v571_v41 = vxor.u32 2147483648, %v570_v7 }
  0xd3   : > { %v572_v45 = vsel %vm489_vm14, %v571_v41, %v570_v7  ;;  %vm5811_vm14 = vcmask 261120  }
  0xd4   : > { %686 = vbcast.lane.b32.xlu1 %v664_v16, 296  ;;  %682 = vbcast.lane.b32.xlu0 %v664_v16, 288  ;;  %v575_v17 = vsel %vm488_vm15, %v6634_v58, %v572_v45  ;;  %vm5813_vm15 = vcmask 293888  }
  0xd5   : > { %6196 = vcosq.f32 %v575_v17 }
  0xd6   : > { %6198 = vsinq.f32 %v575_v17 }
  0xd8   : > { %694 = vbcast.lane.b32.xlu1 %v664_v16, 312  ;;  %690 = vbcast.lane.b32.xlu0 %v664_v16, 304 }
  0xdc   : > { %702 = vbcast.lane.b32.xlu1 %v664_v16, 328  ;;  %698 = vbcast.lane.b32.xlu0 %v664_v16, 320 }
  0xdf   : > { %v6197_v49 = vpop.eup %6196 }
  0xe0   : > { %710 = vbcast.lane.b32.xlu1 %v664_v16, 344  ;;  %706 = vbcast.lane.b32.xlu0 %v664_v16, 336  ;;  %v6199_v14 = vpop.eup %6198  ;;  %v587_v52 = vxor.u32 2147483648, %v6197_v49 }
  0xe1   : > { %v584_v39 = vxor.u32 2147483648, %v6199_v14 }
  0xe2   : > { %v588_v53 = vsel %vm586_vm0, %v587_v52, %v6199_v14  ;;  %vm11254_vm0 = vcmask 326656  }
  0xe3   : > { %v585_v55 = vsel %vm583_vm1, %v6197_v49, %v584_v39  ;;  %vm11250_vm1 = vcmask 359424  }
  0xe4   : > { %718 = vbcast.lane.b32.xlu1 %v664_v16, 360  ;;  %714 = vbcast.lane.b32.xlu0 %v664_v16, 352  ;;  %v589_v57 = vsel %vm582_vm2, %v585_v55, %v588_v53  ;;  %vm11227_vm2 = vcmask 392192  }
  0xe5   : > { %v590_v59 = vsel %vm579_vm3, nan, %v589_v57  ;;  %vm11225_vm3 = vcmask 424960  }
  0xe6   : > { %v593_v24 = vmul.f32 %v592_v54, %v590_v59 }
  0xe8   : > { %726 = vbcast.lane.b32.xlu1 %v664_v16, 376  ;;  %722 = vbcast.lane.b32.xlu0 %v664_v16, 368  ;;  %v6939_v60 = vrot.slane %v593_v24, %v6626_v35  ;;  %v6942_v62 = vrot.slane %v593_v24, %v6684_v31  ;;  %v6945_v58 = vrot.slane %v593_v24, %v6824_v5 }
  0xe9   : > { %v6948_v0 = vrot.slane %v593_v24, %v6827_v15  ;;  %v6951_v32 = vrot.slane %v593_v24, %v6836_v48  ;;  %v6954_v63 = vrot.slane %v593_v24, %v6842_v40  ;;  %v6957_v42 = vrot.slane %v593_v24, %v6848_v22 }
  0xea   : > { %v6960_v35 = vrot.slane %v593_v24, %v6851_v20  ;;  %v798_v31 = vrot.slane %v6784_v12, %v6827_v15  ;;  %v865_v16 = vrot.slane %v6784_v12, %v6836_v48 }
  0xec   : > { %737 = vbcast.lane.b32.xlu1 %v731_v61, 264  ;;  %733 = vbcast.lane.b32.xlu0 %v731_v61, 256 }
  0xf0   : > { %745 = vbcast.lane.b32.xlu1 %v731_v61, 280  ;;  %741 = vbcast.lane.b32.xlu0 %v731_v61, 272 }
  0xf4   : > { %753 = vbcast.lane.b32.xlu1 %v731_v61, 296  ;;  %749 = vbcast.lane.b32.xlu0 %v731_v61, 288 }
  0xf8   : > { %761 = vbcast.lane.b32.xlu1 %v731_v61, 312  ;;  %757 = vbcast.lane.b32.xlu0 %v731_v61, 304 }
  0xfc   : > { %769 = vbcast.lane.b32.xlu1 %v731_v61, 328  ;;  %765 = vbcast.lane.b32.xlu0 %v731_v61, 320 }
 0x100   : > { %777 = vbcast.lane.b32.xlu1 %v731_v61, 344  ;;  %773 = vbcast.lane.b32.xlu0 %v731_v61, 336 }
 0x104   : > { %785 = vbcast.lane.b32.xlu1 %v731_v61, 360  ;;  %781 = vbcast.lane.b32.xlu0 %v731_v61, 352 }
 0x108   : > { %793 = vbcast.lane.b32.xlu1 %v731_v61, 376  ;;  %789 = vbcast.lane.b32.xlu0 %v731_v61, 368 }
 0x10c   : > { %804 = vbcast.lane.b32.xlu1 %v798_v31, 264  ;;  %800 = vbcast.lane.b32.xlu0 %v798_v31, 256 }
 0x110   : > { %812 = vbcast.lane.b32.xlu1 %v798_v31, 280  ;;  %808 = vbcast.lane.b32.xlu0 %v798_v31, 272 }
 0x114   : > { %820 = vbcast.lane.b32.xlu1 %v798_v31, 296  ;;  %816 = vbcast.lane.b32.xlu0 %v798_v31, 288 }
 0x118   : > { %828 = vbcast.lane.b32.xlu1 %v798_v31, 312  ;;  %824 = vbcast.lane.b32.xlu0 %v798_v31, 304 }
 0x11c   : > { %836 = vbcast.lane.b32.xlu1 %v798_v31, 328  ;;  %832 = vbcast.lane.b32.xlu0 %v798_v31, 320 }
 0x11e   : > { %v6964_v5 = vpop.permute.xlu1 %607  ;;  %v6966_v1 = vpop.permute.xlu0 %599 }
 0x120   : > { %844 = vbcast.lane.b32.xlu1 %v798_v31, 344  ;;  %840 = vbcast.lane.b32.xlu0 %v798_v31, 336 }
 0x122   : > { %v6968_v3 = vpop.permute.xlu1 %611  ;;  %v6970_v15 = vpop.permute.xlu0 %603 }
 0x124   : > { %852 = vbcast.lane.b32.xlu1 %v798_v31, 360  ;;  %848 = vbcast.lane.b32.xlu0 %v798_v31, 352 }
 0x126   : > { %v6972_v4 = vpop.permute.xlu1 %619  ;;  %v6974_v44 = vpop.permute.xlu0 %615 }
 0x128   : > { %860 = vbcast.lane.b32.xlu1 %v798_v31, 376  ;;  %856 = vbcast.lane.b32.xlu0 %v798_v31, 368 }
 0x12a   : > { %v6978_v46 = vpop.permute.xlu1 %627  ;;  %v6980_v25 = vpop.permute.xlu0 %623 }
 0x12c   : > { %871 = vbcast.lane.b32.xlu1 %v865_v16, 264  ;;  %867 = vbcast.lane.b32.xlu0 %v865_v16, 256 }
 0x12e   : > { %v6982_v36 = vpop.permute.xlu1 %635  ;;  %v6984_v10 = vpop.permute.xlu0 %631 }
 0x130   : > { %879 = vbcast.lane.b32.xlu1 %v865_v16, 280  ;;  %875 = vbcast.lane.b32.xlu0 %v865_v16, 272 }
 0x132   : > { %v6986_v21 = vpop.permute.xlu1 %643  ;;  %v6988_v33 = vpop.permute.xlu0 %639 }
 0x134   : > { %887 = vbcast.lane.b32.xlu1 %v865_v16, 296  ;;  %883 = vbcast.lane.b32.xlu0 %v865_v16, 288 }
 0x136   : > { %v6990_v48 = vpop.permute.xlu1 %651  ;;  %v6992_v7 = vpop.permute.xlu0 %647 }
 0x138   : > { %895 = vbcast.lane.b32.xlu1 %v865_v16, 312  ;;  %891 = vbcast.lane.b32.xlu0 %v865_v16, 304 }
 0x13a   : > { %v6994_v41 = vpop.permute.xlu1 %659  ;;  %v6996_v43 = vpop.permute.xlu0 %655 }
 0x13c   : > { %903 = vbcast.lane.b32.xlu1 %v865_v16, 328  ;;  %899 = vbcast.lane.b32.xlu0 %v865_v16, 320 }
 0x13e   : > { %v6998_v45 = vpop.permute.xlu1 %670  ;;  %v7000_v17 = vpop.permute.xlu0 %666 }
 0x140   : > { %911 = vbcast.lane.b32.xlu1 %v865_v16, 344  ;;  %907 = vbcast.lane.b32.xlu0 %v865_v16, 336 }
 0x142   : > { %v7002_v47 = vpop.permute.xlu1 %678  ;;  %v7004_v9 = vpop.permute.xlu0 %674 }
 0x143   : > { %11275 = vst [vmem:[#allocation16_spill] sm:$0xff] %v7002_v47  ;;  %11276 = vst [vmem:[#allocation17_spill] sm:$0xff] %v7004_v9 }
 0x144   : > { %919 = vbcast.lane.b32.xlu1 %v865_v16, 360  ;;  %915 = vbcast.lane.b32.xlu0 %v865_v16, 352 }
 0x146   : > { %v7006_v37 = vpop.permute.xlu1 %686  ;;  %v7008_v49 = vpop.permute.xlu0 %682 }
 0x147   : > { %11277 = vst [vmem:[#allocation18_spill] sm:$0xff] %v7006_v37  ;;  %11278 = vst [vmem:[#allocation19_spill] sm:$0xff] %v7008_v49 }
 0x148   : > { %927 = vbcast.lane.b32.xlu1 %v865_v16, 376  ;;  %923 = vbcast.lane.b32.xlu0 %v865_v16, 368 }
 0x14a   : > { %v7012_v14 = vpop.permute.xlu1 %694  ;;  %v7014_v52 = vpop.permute.xlu0 %690 }
 0x14b   : > { %11279 = vst [vmem:[#allocation20_spill] sm:$0xff] %v7012_v14  ;;  %11280 = vst [vmem:[#allocation21_spill] sm:$0xff] %v7014_v52 }
 0x14c   : > { %938 = vbcast.lane.b32.xlu1 %v932_v38, 264  ;;  %934 = vbcast.lane.b32.xlu0 %v932_v38, 256 }
 0x14e   : > { %v7016_v39 = vpop.permute.xlu1 %702  ;;  %v7018_v53 = vpop.permute.xlu0 %698 }
 0x14f   : > { %11281 = vst [vmem:[#allocation22_spill] sm:$0xff] %v7016_v39  ;;  %11282 = vst [vmem:[#allocation23_spill] sm:$0xff] %v7018_v53 }
 0x150   : > { %946 = vbcast.lane.b32.xlu1 %v932_v38, 280  ;;  %942 = vbcast.lane.b32.xlu0 %v932_v38, 272 }
 0x152   : > { %v7020_v54 = vpop.permute.xlu1 %710  ;;  %v7022_v55 = vpop.permute.xlu0 %706 }
 0x153   : > { %11283 = vst [vmem:[#allocation24_spill] sm:$0xff] %v7020_v54  ;;  %11284 = vst [vmem:[#allocation25_spill] sm:$0xff] %v7022_v55 }
 0x154   : > { %954 = vbcast.lane.b32.xlu1 %v932_v38, 296  ;;  %950 = vbcast.lane.b32.xlu0 %v932_v38, 288 }
 0x156   : > { %v7024_v40 = vpop.permute.xlu1 %718  ;;  %v7026_v57 = vpop.permute.xlu0 %714 }
 0x157   : > { %11285 = vst [vmem:[#allocation26_spill] sm:$0xff] %v7024_v40  ;;  %11286 = vst [vmem:[#allocation27_spill] sm:$0xff] %v7026_v57 }
 0x158   : > { %962 = vbcast.lane.b32.xlu1 %v932_v38, 312  ;;  %958 = vbcast.lane.b32.xlu0 %v932_v38, 304 }
 0x15a   : > { %v7028_v59 = vpop.permute.xlu1 %726  ;;  %v7030_v24 = vpop.permute.xlu0 %722 }
 0x15b   : > { %11287 = vst [vmem:[#allocation28_spill] sm:$0xff] %v7028_v59  ;;  %11288 = vst [vmem:[#allocation29_spill] sm:$0xff] %v7030_v24  ;;  %v999_v24 = vrot.slane %v6784_v12, %v6848_v22 }
 0x15c   : > { %970 = vbcast.lane.b32.xlu1 %v932_v38, 328  ;;  %966 = vbcast.lane.b32.xlu0 %v932_v38, 320 }
 0x15e   : > { %v7032_v61 = vpop.permute.xlu1 %737  ;;  %v7034_v31 = vpop.permute.xlu0 %733 }
 0x15f   : > { %11289 = vst [vmem:[#allocation30_spill] sm:$0xff] %v7032_v61  ;;  %11290 = vst [vmem:[#allocation31_spill] sm:$0xff] %v7034_v31 }
 0x160   : > { %978 = vbcast.lane.b32.xlu1 %v932_v38, 344  ;;  %974 = vbcast.lane.b32.xlu0 %v932_v38, 336 }
 0x162   : > { %v7036_v16 = vpop.permute.xlu1 %745  ;;  %v7038_v55 = vpop.permute.xlu0 %741 }
 0x163   : > { %11291 = vst [vmem:[#allocation32_spill] sm:$0xff] %v7036_v16  ;;  %11292 = vst [vmem:[#allocation33_spill] sm:$0xff] %v7038_v55 }
 0x164   : > { %986 = vbcast.lane.b32.xlu1 %v932_v38, 360  ;;  %982 = vbcast.lane.b32.xlu0 %v932_v38, 352 }
 0x166   : > { %v7040_v57 = vpop.permute.xlu1 %753  ;;  %v7042_v40 = vpop.permute.xlu0 %749 }
 0x167   : > { %11293 = vst [vmem:[#allocation34_spill] sm:$0xff] %v7040_v57  ;;  %11294 = vst [vmem:[#allocation35_spill] sm:$0xff] %v7042_v40 }
 0x168   : > { %994 = vbcast.lane.b32.xlu1 %v932_v38, 376  ;;  %990 = vbcast.lane.b32.xlu0 %v932_v38, 368 }
 0x16a   : > { %v7046_v61 = vpop.permute.xlu1 %761  ;;  %v7048_v31 = vpop.permute.xlu0 %757 }
 0x16b   : > { %11295 = vst [vmem:[#allocation36_spill] sm:$0xff] %v7046_v61  ;;  %11296 = vst [vmem:[#allocation37_spill] sm:$0xff] %v7048_v31 }
 0x16c   : > { %1005 = vbcast.lane.b32.xlu1 %v999_v24, 264  ;;  %1001 = vbcast.lane.b32.xlu0 %v999_v24, 256 }
 0x16e   : > { %v7050_v16 = vpop.permute.xlu1 %769  ;;  %v7052_v55 = vpop.permute.xlu0 %765 }
 0x16f   : > { %11297 = vst [vmem:[#allocation38_spill] sm:$0xff] %v7050_v16  ;;  %11298 = vst [vmem:[#allocation39_spill] sm:$0xff] %v7052_v55 }
 0x170   : > { %1013 = vbcast.lane.b32.xlu1 %v999_v24, 280  ;;  %1009 = vbcast.lane.b32.xlu0 %v999_v24, 272 }
 0x172   : > { %v7054_v57 = vpop.permute.xlu1 %777  ;;  %v7056_v40 = vpop.permute.xlu0 %773 }
 0x173   : > { %11299 = vst [vmem:[#allocation40_spill] sm:$0xff] %v7054_v57  ;;  %11300 = vst [vmem:[#allocation41_spill] sm:$0xff] %v7056_v40 }
 0x174   : > { %1021 = vbcast.lane.b32.xlu1 %v999_v24, 296  ;;  %1017 = vbcast.lane.b32.xlu0 %v999_v24, 288 }
 0x176   : > { %v7058_v22 = vpop.permute.xlu1 %785  ;;  %v7060_v38 = vpop.permute.xlu0 %781 }
 0x177   : > { %11301 = vst [vmem:[#allocation42_spill] sm:$0xff] %v7058_v22  ;;  %11302 = vst [vmem:[#allocation43_spill] sm:$0xff] %v7060_v38 }
 0x178   : > { %1029 = vbcast.lane.b32.xlu1 %v999_v24, 312  ;;  %1025 = vbcast.lane.b32.xlu0 %v999_v24, 304 }
 0x17a   : > { %v7062_v31 = vpop.permute.xlu1 %793  ;;  %v7064_v61 = vpop.permute.xlu0 %789 }
 0x17b   : > { %11303 = vst [vmem:[#allocation44_spill] sm:$0xff] %v7062_v31  ;;  %11304 = vst [vmem:[#allocation45_spill] sm:$0xff] %v7064_v61  ;;  %v1066_v61 = vrot.slane %v6784_v12, %v6851_v20 }
 0x17c   : > { %1037 = vbcast.lane.b32.xlu1 %v999_v24, 328  ;;  %1033 = vbcast.lane.b32.xlu0 %v999_v24, 320 }
 0x17e   : > { %v7066_v55 = vpop.permute.xlu1 %804  ;;  %v7068_v16 = vpop.permute.xlu0 %800 }
 0x17f   : > { %11305 = vst [vmem:[#allocation46_spill] sm:$0xff] %v7066_v55  ;;  %11306 = vst [vmem:[#allocation47_spill] sm:$0xff] %v7068_v16 }
 0x180   : > { %1045 = vbcast.lane.b32.xlu1 %v999_v24, 344  ;;  %1041 = vbcast.lane.b32.xlu0 %v999_v24, 336 }
 0x182   : > { %v7070_v40 = vpop.permute.xlu1 %812  ;;  %v7072_v57 = vpop.permute.xlu0 %808 }
 0x183   : > { %11307 = vst [vmem:[#allocation48_spill] sm:$0xff] %v7070_v40  ;;  %11308 = vst [vmem:[#allocation49_spill] sm:$0xff] %v7072_v57 }
 0x184   : > { %1053 = vbcast.lane.b32.xlu1 %v999_v24, 360  ;;  %1049 = vbcast.lane.b32.xlu0 %v999_v24, 352 }
 0x186   : > { %v7074_v38 = vpop.permute.xlu1 %820  ;;  %v7076_v22 = vpop.permute.xlu0 %816 }
 0x187   : > { %11309 = vst [vmem:[#allocation50_spill] sm:$0xff] %v7074_v38  ;;  %11310 = vst [vmem:[#allocation51_spill] sm:$0xff] %v7076_v22 }
 0x188   : > { %1061 = vbcast.lane.b32.xlu1 %v999_v24, 376  ;;  %1057 = vbcast.lane.b32.xlu0 %v999_v24, 368 }
 0x18a   : > { %v7080_v55 = vpop.permute.xlu1 %828  ;;  %v7082_v31 = vpop.permute.xlu0 %824 }
 0x18b   : > { %11311 = vst [vmem:[#allocation52_spill] sm:$0xff] %v7080_v55  ;;  %11312 = vst [vmem:[#allocation53_spill] sm:$0xff] %v7082_v31 }
 0x18c   : > { %1072 = vbcast.lane.b32.xlu1 %v1066_v61, 264  ;;  %1068 = vbcast.lane.b32.xlu0 %v1066_v61, 256 }
 0x18e   : > { %v7084_v40 = vpop.permute.xlu1 %836  ;;  %v7086_v57 = vpop.permute.xlu0 %832 }
 0x18f   : > { %11313 = vst [vmem:[#allocation54_spill] sm:$0xff] %v7084_v40  ;;  %11314 = vst [vmem:[#allocation55_spill] sm:$0xff] %v7086_v57 }
 0x190   : > { %1080 = vbcast.lane.b32.xlu1 %v1066_v61, 280  ;;  %1076 = vbcast.lane.b32.xlu0 %v1066_v61, 272 }
 0x192   : > { %v7088_v38 = vpop.permute.xlu1 %844  ;;  %v7090_v22 = vpop.permute.xlu0 %840 }
 0x193   : > { %11315 = vst [vmem:[#allocation56_spill] sm:$0xff] %v7088_v38  ;;  %11316 = vst [vmem:[#allocation57_spill] sm:$0xff] %v7090_v22 }
 0x194   : > { %1088 = vbcast.lane.b32.xlu1 %v1066_v61, 296  ;;  %1084 = vbcast.lane.b32.xlu0 %v1066_v61, 288 }
 0x196   : > { %v7092_v12 = vpop.permute.xlu1 %852  ;;  %v7094_v20 = vpop.permute.xlu0 %848 }
 0x197   : > { %11317 = vst [vmem:[#allocation58_spill] sm:$0xff] %v7092_v12  ;;  %11318 = vst [vmem:[#allocation59_spill] sm:$0xff] %v7094_v20 }
 0x198   : > { %1096 = vbcast.lane.b32.xlu1 %v1066_v61, 312  ;;  %1092 = vbcast.lane.b32.xlu0 %v1066_v61, 304 }
 0x19a   : > { %v7096_v24 = vpop.permute.xlu1 %860  ;;  %v7098_v31 = vpop.permute.xlu0 %856 }
 0x19b   : > { %11319 = vst [vmem:[#allocation60_spill] sm:$0xff] %v7096_v24  ;;  %11320 = vst [vmem:[#allocation61_spill] sm:$0xff] %v7098_v31 }
 0x19c   : > { %1104 = vbcast.lane.b32.xlu1 %v1066_v61, 328  ;;  %1100 = vbcast.lane.b32.xlu0 %v1066_v61, 320 }
 0x19e   : > { %v7100_v57 = vpop.permute.xlu1 %871  ;;  %v7102_v40 = vpop.permute.xlu0 %867 }
 0x19f   : > { %11321 = vst [vmem:[#allocation62_spill] sm:$0xff] %v7100_v57  ;;  %11322 = vst [vmem:[#allocation63_spill] sm:$0xff] %v7102_v40 }
 0x1a0   : > { %1112 = vbcast.lane.b32.xlu1 %v1066_v61, 344  ;;  %1108 = vbcast.lane.b32.xlu0 %v1066_v61, 336 }
 0x1a2   : > { %v7104_v22 = vpop.permute.xlu1 %879  ;;  %v7106_v38 = vpop.permute.xlu0 %875 }
 0x1a3   : > { %11323 = vst [vmem:[#allocation64_spill] sm:$0xff] %v7104_v22  ;;  %11324 = vst [vmem:[#allocation65_spill] sm:$0xff] %v7106_v38 }
 0x1a4   : > { %1120 = vbcast.lane.b32.xlu1 %v1066_v61, 360  ;;  %1116 = vbcast.lane.b32.xlu0 %v1066_v61, 352 }
 0x1a6   : > { %v7108_v20 = vpop.permute.xlu1 %887  ;;  %v7110_v12 = vpop.permute.xlu0 %883 }
 0x1a7   : > { %11325 = vst [vmem:[#allocation66_spill] sm:$0xff] %v7108_v20  ;;  %11326 = vst [vmem:[#allocation67_spill] sm:$0xff] %v7110_v12 }
 0x1a8   : > { %1128 = vbcast.lane.b32.xlu1 %v1066_v61, 376  ;;  %1124 = vbcast.lane.b32.xlu0 %v1066_v61, 368 }
 0x1aa   : > { %v7112_v31 = vpop.permute.xlu1 %895  ;;  %v7114_v24 = vpop.permute.xlu0 %891 }
 0x1ab   : > { %11327 = vst [vmem:[#allocation68_spill] sm:$0xff] %v7112_v31  ;;  %11328 = vst [vmem:[#allocation69_spill] sm:$0xff] %v7114_v24 }
 0x1ac   : > { %1139 = vbcast.lane.b32.xlu1 %v6854_v23, 264  ;;  %1135 = vbcast.lane.b32.xlu0 %v6854_v23, 256 }
 0x1ae   : > { %v7118_v57 = vpop.permute.xlu1 %903  ;;  %v7120_v22 = vpop.permute.xlu0 %899 }
 0x1af   : > { %11329 = vst [vmem:[#allocation70_spill] sm:$0xff] %v7118_v57  ;;  %11330 = vst [vmem:[#allocation71_spill] sm:$0xff] %v7120_v22 }
 0x1b0   : > { %1147 = vbcast.lane.b32.xlu1 %v6854_v23, 280  ;;  %1143 = vbcast.lane.b32.xlu0 %v6854_v23, 272 }
 0x1b2   : > { %v7124_v20 = vpop.permute.xlu1 %911  ;;  %v7126_v12 = vpop.permute.xlu0 %907 }
 0x1b3   : > { %11331 = vst [vmem:[#allocation72_spill] sm:$0xff] %v7124_v20  ;;  %11332 = vst [vmem:[#allocation73_spill] sm:$0xff] %v7126_v12 }
 0x1b4   : > { %1155 = vbcast.lane.b32.xlu1 %v6854_v23, 296  ;;  %1151 = vbcast.lane.b32.xlu0 %v6854_v23, 288 }
 0x1b6   : > { %v7130_v61 = vpop.permute.xlu1 %919  ;;  %v7132_v24 = vpop.permute.xlu0 %915 }
 0x1b7   : > { %11333 = vst [vmem:[#allocation74_spill] sm:$0xff] %v7130_v61  ;;  %11334 = vst [vmem:[#allocation75_spill] sm:$0xff] %v7132_v24 }
 0x1b8   : > { %1163 = vbcast.lane.b32.xlu1 %v6854_v23, 312  ;;  %1159 = vbcast.lane.b32.xlu0 %v6854_v23, 304 }
 0x1ba   : > { %v7136_v22 = vpop.permute.xlu1 %927  ;;  %v7138_v57 = vpop.permute.xlu0 %923 }
 0x1bb   : > { %11335 = vst [vmem:[#allocation76_spill] sm:$0xff] %v7136_v22  ;;  %11336 = vst [vmem:[#allocation77_spill] sm:$0xff] %v7138_v57 }
 0x1bc   : > { %1171 = vbcast.lane.b32.xlu1 %v6854_v23, 328  ;;  %1167 = vbcast.lane.b32.xlu0 %v6854_v23, 320 }
 0x1be   : > { %v7142_v12 = vpop.permute.xlu1 %938  ;;  %v7144_v20 = vpop.permute.xlu0 %934 }
 0x1bf   : > { %11337 = vst [vmem:[#allocation78_spill] sm:$0xff] %v7142_v12  ;;  %11338 = vst [vmem:[#allocation79_spill] sm:$0xff] %v7144_v20 }
 0x1c0   : > { %1179 = vbcast.lane.b32.xlu1 %v6854_v23, 344  ;;  %1175 = vbcast.lane.b32.xlu0 %v6854_v23, 336 }
 0x1c2   : > { %v7148_v24 = vpop.permute.xlu1 %946  ;;  %v7150_v61 = vpop.permute.xlu0 %942 }
 0x1c3   : > { %11339 = vst [vmem:[#allocation80_spill] sm:$0xff] %v7148_v24  ;;  %11340 = vst [vmem:[#allocation81_spill] sm:$0xff] %v7150_v61 }
 0x1c4   : > { %1187 = vbcast.lane.b32.xlu1 %v6854_v23, 360  ;;  %1183 = vbcast.lane.b32.xlu0 %v6854_v23, 352 }
 0x1c6   : > { %v7154_v57 = vpop.permute.xlu1 %954  ;;  %v7156_v22 = vpop.permute.xlu0 %950 }
 0x1c7   : > { %11341 = vst [vmem:[#allocation82_spill] sm:$0xff] %v7154_v57  ;;  %11342 = vst [vmem:[#allocation83_spill] sm:$0xff] %v7156_v22 }
 0x1c8   : > { %1195 = vbcast.lane.b32.xlu1 %v6854_v23, 376  ;;  %1191 = vbcast.lane.b32.xlu0 %v6854_v23, 368 }
 0x1ca   : > { %v7160_v12 = vpop.permute.xlu1 %962  ;;  %v7162_v31 = vpop.permute.xlu0 %958 }
 0x1cb   : > { %11343 = vst [vmem:[#allocation84_spill] sm:$0xff] %v7160_v12  ;;  %11344 = vst [vmem:[#allocation85_spill] sm:$0xff] %v7162_v31 }
 0x1cc   : > { %1206 = vbcast.lane.b32.xlu1 %v6857_v26, 264  ;;  %1202 = vbcast.lane.b32.xlu0 %v6857_v26, 256 }
 0x1ce   : > { %v7166_v61 = vpop.permute.xlu1 %970  ;;  %v7168_v24 = vpop.permute.xlu0 %966 }
 0x1cf   : > { %11345 = vst [vmem:[#allocation86_spill] sm:$0xff] %v7166_v61  ;;  %11346 = vst [vmem:[#allocation87_spill] sm:$0xff] %v7168_v24 }
 0x1d0   : > { %1214 = vbcast.lane.b32.xlu1 %v6857_v26, 280  ;;  %1210 = vbcast.lane.b32.xlu0 %v6857_v26, 272 }
 0x1d2   : > { %v7172_v22 = vpop.permute.xlu1 %978  ;;  %v7174_v57 = vpop.permute.xlu0 %974 }
 0x1d3   : > { %11347 = vst [vmem:[#allocation88_spill] sm:$0xff] %v7172_v22  ;;  %11348 = vst [vmem:[#allocation89_spill] sm:$0xff] %v7174_v57 }
 0x1d4   : > { %1222 = vbcast.lane.b32.xlu1 %v6857_v26, 296  ;;  %1218 = vbcast.lane.b32.xlu0 %v6857_v26, 288 }
 0x1d6   : > { %v7178_v23 = vpop.permute.xlu1 %986  ;;  %v7180_v31 = vpop.permute.xlu0 %982 }
 0x1d7   : > { %11349 = vst [vmem:[#allocation90_spill] sm:$0xff] %v7178_v23  ;;  %11350 = vst [vmem:[#allocation91_spill] sm:$0xff] %v7180_v31 }
 0x1d8   : > { %1230 = vbcast.lane.b32.xlu1 %v6857_v26, 312  ;;  %1226 = vbcast.lane.b32.xlu0 %v6857_v26, 304 }
 0x1da   : > { %v7184_v61 = vpop.permute.xlu1 %994  ;;  %v7186_v24 = vpop.permute.xlu0 %990 }
 0x1db   : > { %11351 = vst [vmem:[#allocation92_spill] sm:$0xff] %v7184_v61  ;;  %11352 = vst [vmem:[#allocation93_spill] sm:$0xff] %v7186_v24 }
 0x1dc   : > { %1238 = vbcast.lane.b32.xlu1 %v6857_v26, 328  ;;  %1234 = vbcast.lane.b32.xlu0 %v6857_v26, 320 }
 0x1de   : > { %v7190_v57 = vpop.permute.xlu1 %1005  ;;  %v7192_v22 = vpop.permute.xlu0 %1001 }
 0x1df   : > { %11353 = vst [vmem:[#allocation94_spill] sm:$0xff] %v7190_v57  ;;  %11354 = vst [vmem:[#allocation95_spill] sm:$0xff] %v7192_v22 }
 0x1e0   : > { %1246 = vbcast.lane.b32.xlu1 %v6857_v26, 344  ;;  %1242 = vbcast.lane.b32.xlu0 %v6857_v26, 336 }
 0x1e2   : > { %v7196_v23 = vpop.permute.xlu1 %1013  ;;  %v7198_v31 = vpop.permute.xlu0 %1009 }
 0x1e3   : > { %11355 = vst [vmem:[#allocation96_spill] sm:$0xff] %v7196_v23  ;;  %11356 = vst [vmem:[#allocation97_spill] sm:$0xff] %v7198_v31 }
 0x1e4   : > { %1254 = vbcast.lane.b32.xlu1 %v6857_v26, 360  ;;  %1250 = vbcast.lane.b32.xlu0 %v6857_v26, 352 }
 0x1e6   : > { %v7202_v24 = vpop.permute.xlu1 %1021  ;;  %v7204_v61 = vpop.permute.xlu0 %1017 }
 0x1e7   : > { %11357 = vst [vmem:[#allocation98_spill] sm:$0xff] %v7202_v24  ;;  %11358 = vst [vmem:[#allocation99_spill] sm:$0xff] %v7204_v61 }
 0x1e8   : > { %1262 = vbcast.lane.b32.xlu1 %v6857_v26, 376  ;;  %1258 = vbcast.lane.b32.xlu0 %v6857_v26, 368 }
 0x1ea   : > { %v7208_v57 = vpop.permute.xlu1 %1029  ;;  %v7210_v12 = vpop.permute.xlu0 %1025 }
 0x1eb   : > { %11359 = vst [vmem:[#allocation100_spill] sm:$0xff] %v7208_v57  ;;  %11360 = vst [vmem:[#allocation101_spill] sm:$0xff] %v7210_v12 }
 0x1ec   : > { %1273 = vbcast.lane.b32.xlu1 %v6860_v27, 264  ;;  %1269 = vbcast.lane.b32.xlu0 %v6860_v27, 256 }
 0x1ee   : > { %v7214_v31 = vpop.permute.xlu1 %1037  ;;  %v7216_v23 = vpop.permute.xlu0 %1033 }
 0x1ef   : > { %11361 = vst [vmem:[#allocation102_spill] sm:$0xff] %v7214_v31  ;;  %11362 = vst [vmem:[#allocation103_spill] sm:$0xff] %v7216_v23 }
 0x1f0   : > { %1281 = vbcast.lane.b32.xlu1 %v6860_v27, 280  ;;  %1277 = vbcast.lane.b32.xlu0 %v6860_v27, 272 }
 0x1f2   : > { %v7220_v61 = vpop.permute.xlu1 %1045  ;;  %v7222_v24 = vpop.permute.xlu0 %1041 }
 0x1f3   : > { %11363 = vst [vmem:[#allocation104_spill] sm:$0xff] %v7220_v61  ;;  %11364 = vst [vmem:[#allocation105_spill] sm:$0xff] %v7222_v24 }
 0x1f4   : > { %1289 = vbcast.lane.b32.xlu1 %v6860_v27, 296  ;;  %1285 = vbcast.lane.b32.xlu0 %v6860_v27, 288 }
 0x1f6   : > { %v7226_v26 = vpop.permute.xlu1 %1053  ;;  %v7228_v57 = vpop.permute.xlu0 %1049 }
 0x1f7   : > { %11365 = vst [vmem:[#allocation106_spill] sm:$0xff] %v7226_v26  ;;  %11366 = vst [vmem:[#allocation107_spill] sm:$0xff] %v7228_v57 }
 0x1f8   : > { %1297 = vbcast.lane.b32.xlu1 %v6860_v27, 312  ;;  %1293 = vbcast.lane.b32.xlu0 %v6860_v27, 304 }
 0x1fa   : > { %v7232_v31 = vpop.permute.xlu1 %1061  ;;  %v7234_v12 = vpop.permute.xlu0 %1057 }
 0x1fb   : > { %11367 = vst [vmem:[#allocation108_spill] sm:$0xff] %v7232_v31  ;;  %11368 = vst [vmem:[#allocation109_spill] sm:$0xff] %v7234_v12 }
 0x1fc   : > { %1305 = vbcast.lane.b32.xlu1 %v6860_v27, 328  ;;  %1301 = vbcast.lane.b32.xlu0 %v6860_v27, 320 }
 0x1fe   : > { %v7238_v24 = vpop.permute.xlu1 %1072  ;;  %v7240_v61 = vpop.permute.xlu0 %1068 }
 0x1ff   : > { %11369 = vst [vmem:[#allocation110_spill] sm:$0xff] %v7238_v24  ;;  %11370 = vst [vmem:[#allocation111_spill] sm:$0xff] %v7240_v61 }
 0x200   : > { %1313 = vbcast.lane.b32.xlu1 %v6860_v27, 344  ;;  %1309 = vbcast.lane.b32.xlu0 %v6860_v27, 336 }
 0x202   : > { %v7244_v26 = vpop.permute.xlu1 %1080  ;;  %v7246_v57 = vpop.permute.xlu0 %1076 }
 0x203   : > { %11371 = vst [vmem:[#allocation112_spill] sm:$0xff] %v7244_v26  ;;  %11372 = vst [vmem:[#allocation113_spill] sm:$0xff] %v7246_v57 }
 0x204   : > { %1321 = vbcast.lane.b32.xlu1 %v6860_v27, 360  ;;  %1317 = vbcast.lane.b32.xlu0 %v6860_v27, 352 }
 0x206   : > { %v7250_v12 = vpop.permute.xlu1 %1088  ;;  %v7252_v31 = vpop.permute.xlu0 %1084 }
 0x207   : > { %11373 = vst [vmem:[#allocation114_spill] sm:$0xff] %v7250_v12  ;;  %11374 = vst [vmem:[#allocation115_spill] sm:$0xff] %v7252_v31 }
 0x208   : > { %1329 = vbcast.lane.b32.xlu1 %v6860_v27, 376  ;;  %1325 = vbcast.lane.b32.xlu0 %v6860_v27, 368 }
 0x20a   : > { %v7256_v24 = vpop.permute.xlu1 %1096  ;;  %v7258_v23 = vpop.permute.xlu0 %1092 }
 0x20b   : > { %11375 = vst [vmem:[#allocation116_spill] sm:$0xff] %v7256_v24  ;;  %11376 = vst [vmem:[#allocation117_spill] sm:$0xff] %v7258_v23 }
 0x20c   : > { %1340 = vbcast.lane.b32.xlu1 %v6863_v30, 264  ;;  %1336 = vbcast.lane.b32.xlu0 %v6863_v30, 256 }
 0x20e   : > { %v7262_v57 = vpop.permute.xlu1 %1104  ;;  %v7264_v26 = vpop.permute.xlu0 %1100 }
 0x20f   : > { %11377 = vst [vmem:[#allocation118_spill] sm:$0xff] %v7262_v57  ;;  %11378 = vst [vmem:[#allocation119_spill] sm:$0xff] %v7264_v26 }
 0x210   : > { %1348 = vbcast.lane.b32.xlu1 %v6863_v30, 280  ;;  %1344 = vbcast.lane.b32.xlu0 %v6863_v30, 272 }
 0x212   : > { %v7268_v31 = vpop.permute.xlu1 %1112  ;;  %v7270_v12 = vpop.permute.xlu0 %1108 }
 0x213   : > { %11379 = vst [vmem:[#allocation120_spill] sm:$0xff] %v7268_v31  ;;  %11380 = vst [vmem:[#allocation121_spill] sm:$0xff] %v7270_v12 }
 0x214   : > { %1356 = vbcast.lane.b32.xlu1 %v6863_v30, 296  ;;  %1352 = vbcast.lane.b32.xlu0 %v6863_v30, 288 }
 0x216   : > { %v7274_v27 = vpop.permute.xlu1 %1120  ;;  %v7276_v24 = vpop.permute.xlu0 %1116 }
 0x217   : > { %11381 = vst [vmem:[#allocation122_spill] sm:$0xff] %v7274_v27  ;;  %11382 = vst [vmem:[#allocation123_spill] sm:$0xff] %v7276_v24 }
 0x218   : > { %1364 = vbcast.lane.b32.xlu1 %v6863_v30, 312  ;;  %1360 = vbcast.lane.b32.xlu0 %v6863_v30, 304 }
 0x21a   : > { %v7280_v57 = vpop.permute.xlu1 %1128  ;;  %v7282_v23 = vpop.permute.xlu0 %1124 }
 0x21b   : > { %11383 = vst [vmem:[#allocation124_spill] sm:$0xff] %v7280_v57  ;;  %11384 = vst [vmem:[#allocation125_spill] sm:$0xff] %v7282_v23 }
 0x21c   : > { %1372 = vbcast.lane.b32.xlu1 %v6863_v30, 328  ;;  %1368 = vbcast.lane.b32.xlu0 %v6863_v30, 320 }
 0x21e   : > { %v7286_v12 = vpop.permute.xlu1 %1139  ;;  %v7288_v31 = vpop.permute.xlu0 %1135 }
 0x220   : > { %1380 = vbcast.lane.b32.xlu1 %v6863_v30, 344  ;;  %1376 = vbcast.lane.b32.xlu0 %v6863_v30, 336 }
 0x222   : > { %v7292_v27 = vpop.permute.xlu1 %1147  ;;  %v7294_v24 = vpop.permute.xlu0 %1143 }
 0x224   : > { %1388 = vbcast.lane.b32.xlu1 %v6863_v30, 360  ;;  %1384 = vbcast.lane.b32.xlu0 %v6863_v30, 352 }
 0x226   : > { %v7298_v23 = vpop.permute.xlu1 %1155  ;;  %v7300_v57 = vpop.permute.xlu0 %1151 }
 0x228   : > { %1396 = vbcast.lane.b32.xlu1 %v6863_v30, 376  ;;  %1392 = vbcast.lane.b32.xlu0 %v6863_v30, 368 }
 0x22a   : > { %v7304_v26 = vpop.permute.xlu1 %1163  ;;  %v7306_v38 = vpop.permute.xlu0 %1159 }
 0x22c   : > { %1407 = vbcast.lane.b32.xlu1 %v6866_v29, 264  ;;  %1403 = vbcast.lane.b32.xlu0 %v6866_v29, 256 }
 0x22e   : > { %v7310_v55 = vpop.permute.xlu1 %1171  ;;  %v7312_v61 = vpop.permute.xlu0 %1167 }
 0x230   : > { %1415 = vbcast.lane.b32.xlu1 %v6866_v29, 280  ;;  %1411 = vbcast.lane.b32.xlu0 %v6866_v29, 272 }
 0x232   : > { %v7316_v20 = vpop.permute.xlu1 %1179  ;;  %v7318_v40 = vpop.permute.xlu0 %1175 }
 0x234   : > { %1423 = vbcast.lane.b32.xlu1 %v6866_v29, 296  ;;  %1419 = vbcast.lane.b32.xlu0 %v6866_v29, 288 }
 0x236   : > { %v7322_v30 = vpop.permute.xlu1 %1187  ;;  %v7324_v22 = vpop.permute.xlu0 %1183 }
 0x238   : > { %1431 = vbcast.lane.b32.xlu1 %v6866_v29, 312  ;;  %1427 = vbcast.lane.b32.xlu0 %v6866_v29, 304 }
 0x23a   : > { %v7328_v16 = vpop.permute.xlu1 %1195  ;;  %v7330_v59 = vpop.permute.xlu0 %1191 }
 0x23c   : > { %1439 = vbcast.lane.b32.xlu1 %v6866_v29, 328  ;;  %1435 = vbcast.lane.b32.xlu0 %v6866_v29, 320 }
 0x23e   : > { %v7334_v54 = vpop.permute.xlu1 %1206  ;;  %v7336_v53 = vpop.permute.xlu0 %1202 }
 0x240   : > { %1447 = vbcast.lane.b32.xlu1 %v6866_v29, 344  ;;  %1443 = vbcast.lane.b32.xlu0 %v6866_v29, 336 }
 0x242   : > { %v7340_v39 = vpop.permute.xlu1 %1214  ;;  %v7342_v52 = vpop.permute.xlu0 %1210 }
 0x243   : > { %11385 = vst [vmem:[#allocation126_spill] sm:$0xff] %v7342_v52 }
 0x244   : > { %1455 = vbcast.lane.b32.xlu1 %v6866_v29, 360  ;;  %1451 = vbcast.lane.b32.xlu0 %v6866_v29, 352 }
 0x246   : > { %v7346_v14 = vpop.permute.xlu1 %1222  ;;  %v7348_v49 = vpop.permute.xlu0 %1218 }
 0x247   : > { %11386 = vst [vmem:[#allocation127_spill] sm:$0xff] %v7346_v14  ;;  %11387 = vst [vmem:[#allocation128_spill] sm:$0xff] %v7348_v49 }
 0x248   : > { %1463 = vbcast.lane.b32.xlu1 %v6866_v29, 376  ;;  %1459 = vbcast.lane.b32.xlu0 %v6866_v29, 368 }
 0x24a   : > { %v7352_v37 = vpop.permute.xlu1 %1230  ;;  %v7354_v9 = vpop.permute.xlu0 %1226 }
 0x24b   : > { %11388 = vst [vmem:[#allocation129_spill] sm:$0xff] %v7354_v9 }
 0x24c   : > { %1474 = vbcast.lane.b32.xlu1 %v6869_v28, 264  ;;  %1470 = vbcast.lane.b32.xlu0 %v6869_v28, 256 }
 0x24e   : > { %v7358_v52 = vpop.permute.xlu1 %1238  ;;  %v7360_v47 = vpop.permute.xlu0 %1234 }
 0x24f   : > { %11389 = vst [vmem:[#allocation130_spill] sm:$0xff] %v7358_v52  ;;  %11390 = vst [vmem:[#allocation131_spill] sm:$0xff] %v7360_v47 }
 0x250   : > { %1482 = vbcast.lane.b32.xlu1 %v6869_v28, 280  ;;  %1478 = vbcast.lane.b32.xlu0 %v6869_v28, 272 }
 0x252   : > { %v7364_v49 = vpop.permute.xlu1 %1246  ;;  %v7366_v14 = vpop.permute.xlu0 %1242 }
 0x253   : > { %11391 = vst [vmem:[#allocation132_spill] sm:$0xff] %v7364_v49  ;;  %11392 = vst [vmem:[#allocation133_spill] sm:$0xff] %v7366_v14 }
 0x254   : > { %1490 = vbcast.lane.b32.xlu1 %v6869_v28, 296  ;;  %1486 = vbcast.lane.b32.xlu0 %v6869_v28, 288 }
 0x256   : > { %v7370_v29 = vpop.permute.xlu1 %1254  ;;  %v7372_v9 = vpop.permute.xlu0 %1250 }
 0x257   : > { %11393 = vst [vmem:[#allocation134_spill] sm:$0xff] %v7370_v29  ;;  %11394 = vst [vmem:[#allocation135_spill] sm:$0xff] %v7372_v9 }
 0x258   : > { %1498 = vbcast.lane.b32.xlu1 %v6869_v28, 312  ;;  %1494 = vbcast.lane.b32.xlu0 %v6869_v28, 304 }
 0x25a   : > { %v7376_v47 = vpop.permute.xlu1 %1262  ;;  %v7378_v52 = vpop.permute.xlu0 %1258 }
 0x25b   : > { %11395 = vst [vmem:[#allocation136_spill] sm:$0xff] %v7376_v47  ;;  %11396 = vst [vmem:[#allocation137_spill] sm:$0xff] %v7378_v52 }
 0x25c   : > { %1506 = vbcast.lane.b32.xlu1 %v6869_v28, 328  ;;  %1502 = vbcast.lane.b32.xlu0 %v6869_v28, 320 }
 0x25e   : > { %v7382_v14 = vpop.permute.xlu1 %1273  ;;  %v7384_v49 = vpop.permute.xlu0 %1269 }
 0x25f   : > { %11397 = vst [vmem:[#allocation138_spill] sm:$0xff] %v7382_v14  ;;  %11398 = vst [vmem:[#allocation139_spill] sm:$0xff] %v7384_v49 }
 0x260   : > { %1514 = vbcast.lane.b32.xlu1 %v6869_v28, 344  ;;  %1510 = vbcast.lane.b32.xlu0 %v6869_v28, 336 }
 0x262   : > { %v7388_v9 = vpop.permute.xlu1 %1281  ;;  %v7390_v29 = vpop.permute.xlu0 %1277 }
 0x263   : > { %11399 = vst [vmem:[#allocation140_spill] sm:$0xff] %v7388_v9  ;;  %11400 = vst [vmem:[#allocation141_spill] sm:$0xff] %v7390_v29 }
 0x264   : > { %1522 = vbcast.lane.b32.xlu1 %v6869_v28, 360  ;;  %1518 = vbcast.lane.b32.xlu0 %v6869_v28, 352 }
 0x266   : > { %v7394_v52 = vpop.permute.xlu1 %1289  ;;  %v7396_v47 = vpop.permute.xlu0 %1285 }
 0x267   : > { %11401 = vst [vmem:[#allocation142_spill] sm:$0xff] %v7394_v52  ;;  %11402 = vst [vmem:[#allocation143_spill] sm:$0xff] %v7396_v47 }
 0x268   : > { %1530 = vbcast.lane.b32.xlu1 %v6869_v28, 376  ;;  %1526 = vbcast.lane.b32.xlu0 %v6869_v28, 368 }
 0x26a   : > { %v7400_v49 = vpop.permute.xlu1 %1297  ;;  %v7402_v14 = vpop.permute.xlu0 %1293 }
 0x26b   : > { %11403 = vst [vmem:[#allocation144_spill] sm:$0xff] %v7402_v14 }
 0x26c   : > { %1541 = vbcast.lane.b32.xlu1 %v6876_v51, 264  ;;  %1537 = vbcast.lane.b32.xlu0 %v6876_v51, 256 }
 0x26e   : > { %v7406_v29 = vpop.permute.xlu1 %1305  ;;  %v7408_v9 = vpop.permute.xlu0 %1301 }
 0x26f   : > { %11404 = vst [vmem:[#allocation145_spill] sm:$0xff] %v7406_v29  ;;  %11405 = vst [vmem:[#allocation146_spill] sm:$0xff] %v7408_v9 }
 0x270   : > { %1549 = vbcast.lane.b32.xlu1 %v6876_v51, 280  ;;  %1545 = vbcast.lane.b32.xlu0 %v6876_v51, 272 }
 0x272   : > { %v7412_v47 = vpop.permute.xlu1 %1313  ;;  %v7414_v52 = vpop.permute.xlu0 %1309 }
 0x273   : > { %11406 = vst [vmem:[#allocation147_spill] sm:$0xff] %v7412_v47  ;;  %11407 = vst [vmem:[#allocation148_spill] sm:$0xff] %v7414_v52 }
 0x274   : > { %1557 = vbcast.lane.b32.xlu1 %v6876_v51, 296  ;;  %1553 = vbcast.lane.b32.xlu0 %v6876_v51, 288 }
 0x276   : > { %v7418_v28 = vpop.permute.xlu1 %1321  ;;  %v7420_v14 = vpop.permute.xlu0 %1317 }
 0x277   : > { %11408 = vst [vmem:[#allocation149_spill] sm:$0xff] %v7418_v28  ;;  %11409 = vst [vmem:[#allocation150_spill] sm:$0xff] %v7420_v14 }
 0x278   : > { %1565 = vbcast.lane.b32.xlu1 %v6876_v51, 312  ;;  %1561 = vbcast.lane.b32.xlu0 %v6876_v51, 304 }
 0x27a   : > { %v7424_v9 = vpop.permute.xlu1 %1329  ;;  %v7426_v29 = vpop.permute.xlu0 %1325 }
 0x27b   : > { %11410 = vst [vmem:[#allocation151_spill] sm:$0xff] %v7424_v9  ;;  %11411 = vst [vmem:[#allocation152_spill] sm:$0xff] %v7426_v29 }
 0x27c   : > { %1573 = vbcast.lane.b32.xlu1 %v6876_v51, 328  ;;  %1569 = vbcast.lane.b32.xlu0 %v6876_v51, 320 }
 0x27e   : > { %v7430_v52 = vpop.permute.xlu1 %1340  ;;  %v7432_v47 = vpop.permute.xlu0 %1336 }
 0x27f   : > { %11412 = vst [vmem:[#allocation153_spill] sm:$0xff] %v7430_v52  ;;  %11413 = vst [vmem:[#allocation154_spill] sm:$0xff] %v7432_v47 }
 0x280   : > { %1581 = vbcast.lane.b32.xlu1 %v6876_v51, 344  ;;  %1577 = vbcast.lane.b32.xlu0 %v6876_v51, 336 }
 0x282   : > { %v7436_v14 = vpop.permute.xlu1 %1348  ;;  %v7438_v28 = vpop.permute.xlu0 %1344 }
 0x283   : > { %11414 = vst [vmem:[#allocation155_spill] sm:$0xff] %v7436_v14  ;;  %11415 = vst [vmem:[#allocation156_spill] sm:$0xff] %v7438_v28 }
 0x284   : > { %1589 = vbcast.lane.b32.xlu1 %v6876_v51, 360  ;;  %1585 = vbcast.lane.b32.xlu0 %v6876_v51, 352 }
 0x286   : > { %v7442_v29 = vpop.permute.xlu1 %1356  ;;  %v7444_v9 = vpop.permute.xlu0 %1352 }
 0x287   : > { %11416 = vst [vmem:[#allocation157_spill] sm:$0xff] %v7442_v29  ;;  %11417 = vst [vmem:[#allocation158_spill] sm:$0xff] %v7444_v9 }
 0x288   : > { %1597 = vbcast.lane.b32.xlu1 %v6876_v51, 376  ;;  %1593 = vbcast.lane.b32.xlu0 %v6876_v51, 368 }
 0x28a   : > { %v7448_v52 = vpop.permute.xlu1 %1364  ;;  %v7450_v47 = vpop.permute.xlu0 %1360 }
 0x28b   : > { %11418 = vst [vmem:[#allocation159_spill] sm:$0xff] %v7448_v52  ;;  %11419 = vst [vmem:[#allocation160_spill] sm:$0xff] %v7450_v47 }
 0x28c   : > { %1608 = vbcast.lane.b32.xlu1 %v6879_v34, 264  ;;  %1604 = vbcast.lane.b32.xlu0 %v6879_v34, 256 }
 0x28e   : > { %v7454_v28 = vpop.permute.xlu1 %1372  ;;  %v7456_v14 = vpop.permute.xlu0 %1368 }
 0x28f   : > { %11420 = vst [vmem:[#allocation161_spill] sm:$0xff] %v7454_v28  ;;  %11421 = vst [vmem:[#allocation162_spill] sm:$0xff] %v7456_v14 }
 0x290   : > { %1616 = vbcast.lane.b32.xlu1 %v6879_v34, 280  ;;  %1612 = vbcast.lane.b32.xlu0 %v6879_v34, 272 }
 0x292   : > { %v7460_v9 = vpop.permute.xlu1 %1380  ;;  %v7462_v29 = vpop.permute.xlu0 %1376 }
 0x293   : > { %11422 = vst [vmem:[#allocation163_spill] sm:$0xff] %v7460_v9  ;;  %11423 = vst [vmem:[#allocation164_spill] sm:$0xff] %v7462_v29 }
 0x294   : > { %1624 = vbcast.lane.b32.xlu1 %v6879_v34, 296  ;;  %1620 = vbcast.lane.b32.xlu0 %v6879_v34, 288 }
 0x296   : > { %v7466_v51 = vpop.permute.xlu1 %1388  ;;  %v7468_v47 = vpop.permute.xlu0 %1384 }
 0x297   : > { %11424 = vst [vmem:[#allocation165_spill] sm:$0xff] %v7466_v51  ;;  %11425 = vst [vmem:[#allocation166_spill] sm:$0xff] %v7468_v47 }
 0x298   : > { %1632 = vbcast.lane.b32.xlu1 %v6879_v34, 312  ;;  %1628 = vbcast.lane.b32.xlu0 %v6879_v34, 304 }
 0x29a   : > { %v7472_v14 = vpop.permute.xlu1 %1396  ;;  %v7474_v28 = vpop.permute.xlu0 %1392 }
 0x29b   : > { %11426 = vst [vmem:[#allocation167_spill] sm:$0xff] %v7472_v14  ;;  %11427 = vst [vmem:[#allocation168_spill] sm:$0xff] %v7474_v28 }
 0x29c   : > { %1640 = vbcast.lane.b32.xlu1 %v6879_v34, 328  ;;  %1636 = vbcast.lane.b32.xlu0 %v6879_v34, 320 }
 0x29e   : > { %v7478_v29 = vpop.permute.xlu1 %1407  ;;  %v7480_v9 = vpop.permute.xlu0 %1403 }
 0x29f   : > { %11428 = vst [vmem:[#allocation169_spill] sm:$0xff] %v7478_v29 }
 0x2a0   : > { %1648 = vbcast.lane.b32.xlu1 %v6879_v34, 344  ;;  %1644 = vbcast.lane.b32.xlu0 %v6879_v34, 336 }
 0x2a2   : > { %v7484_v47 = vpop.permute.xlu1 %1415  ;;  %v7486_v51 = vpop.permute.xlu0 %1411 }
 0x2a3   : > { %11429 = vst [vmem:[#allocation170_spill] sm:$0xff] %v7484_v47  ;;  %11430 = vst [vmem:[#allocation171_spill] sm:$0xff] %v7486_v51 }
 0x2a4   : > { %1656 = vbcast.lane.b32.xlu1 %v6879_v34, 360  ;;  %1652 = vbcast.lane.b32.xlu0 %v6879_v34, 352 }
 0x2a6   : > { %v7490_v28 = vpop.permute.xlu1 %1423  ;;  %v7492_v14 = vpop.permute.xlu0 %1419 }
 0x2a7   : > { %11431 = vst [vmem:[#allocation172_spill] sm:$0xff] %v7490_v28  ;;  %11432 = vst [vmem:[#allocation173_spill] sm:$0xff] %v7492_v14 }
 0x2a8   : > { %1664 = vbcast.lane.b32.xlu1 %v6879_v34, 376  ;;  %1660 = vbcast.lane.b32.xlu0 %v6879_v34, 368 }
 0x2aa   : > { %v7496_v29 = vpop.permute.xlu1 %1431  ;;  %v7498_v52 = vpop.permute.xlu0 %1427 }
 0x2ab   : > { %11433 = vst [vmem:[#allocation174_spill] sm:$0xff] %v7496_v29  ;;  %11434 = vst [vmem:[#allocation175_spill] sm:$0xff] %v7498_v52 }
 0x2ac   : > { %1675 = vbcast.lane.b32.xlu1 %v6905_v6, 264  ;;  %1671 = vbcast.lane.b32.xlu0 %v6905_v6, 256 }
 0x2ae   : > { %v7502_v51 = vpop.permute.xlu1 %1439  ;;  %v7504_v47 = vpop.permute.xlu0 %1435 }
 0x2af   : > { %11435 = vst [vmem:[#allocation176_spill] sm:$0xff] %v7502_v51  ;;  %11436 = vst [vmem:[#allocation177_spill] sm:$0xff] %v7504_v47 }
 0x2b0   : > { %1683 = vbcast.lane.b32.xlu1 %v6905_v6, 280  ;;  %1679 = vbcast.lane.b32.xlu0 %v6905_v6, 272 }
 0x2b2   : > { %v7508_v14 = vpop.permute.xlu1 %1447  ;;  %v7510_v28 = vpop.permute.xlu0 %1443 }
 0x2b3   : > { %11437 = vst [vmem:[#allocation178_spill] sm:$0xff] %v7508_v14  ;;  %11438 = vst [vmem:[#allocation179_spill] sm:$0xff] %v7510_v28 }
 0x2b4   : > { %1691 = vbcast.lane.b32.xlu1 %v6905_v6, 296  ;;  %1687 = vbcast.lane.b32.xlu0 %v6905_v6, 288 }
 0x2b6   : > { %v7514_v34 = vpop.permute.xlu1 %1455  ;;  %v7516_v52 = vpop.permute.xlu0 %1451 }
 0x2b7   : > { %11439 = vst [vmem:[#allocation180_spill] sm:$0xff] %v7514_v34  ;;  %11440 = vst [vmem:[#allocation181_spill] sm:$0xff] %v7516_v52 }
 0x2b8   : > { %1699 = vbcast.lane.b32.xlu1 %v6905_v6, 312  ;;  %1695 = vbcast.lane.b32.xlu0 %v6905_v6, 304 }
 0x2ba   : > { %v7520_v47 = vpop.permute.xlu1 %1463  ;;  %v7522_v51 = vpop.permute.xlu0 %1459 }
 0x2bb   : > { %11441 = vst [vmem:[#allocation182_spill] sm:$0xff] %v7520_v47  ;;  %11442 = vst [vmem:[#allocation183_spill] sm:$0xff] %v7522_v51 }
 0x2bc   : > { %1707 = vbcast.lane.b32.xlu1 %v6905_v6, 328  ;;  %1703 = vbcast.lane.b32.xlu0 %v6905_v6, 320 }
 0x2be   : > { %v7526_v28 = vpop.permute.xlu1 %1474  ;;  %v7528_v14 = vpop.permute.xlu0 %1470 }
 0x2bf   : > { %11443 = vst [vmem:[#allocation184_spill] sm:$0xff] %v7526_v28  ;;  %11444 = vst [vmem:[#allocation185_spill] sm:$0xff] %v7528_v14  ;;  %v6319_v14 = vmov 1934713408  }
 0x2c0   : > { %1715 = vbcast.lane.b32.xlu1 %v6905_v6, 344  ;;  %1711 = vbcast.lane.b32.xlu0 %v6905_v6, 336 }
 0x2c2   : > { %v7532_v52 = vpop.permute.xlu1 %1482  ;;  %v7534_v34 = vpop.permute.xlu0 %1478 }
 0x2c3   : > { %11445 = vst [vmem:[#allocation186_spill] sm:$0xff] %v7532_v52  ;;  %11446 = vst [vmem:[#allocation187_spill] sm:$0xff] %v7534_v34 }
 0x2c4   : > { %1723 = vbcast.lane.b32.xlu1 %v6905_v6, 360  ;;  %1719 = vbcast.lane.b32.xlu0 %v6905_v6, 352 }
 0x2c6   : > { %v7538_v51 = vpop.permute.xlu1 %1490  ;;  %v7540_v47 = vpop.permute.xlu0 %1486 }
 0x2c7   : > { %11447 = vst [vmem:[#allocation188_spill] sm:$0xff] %v7538_v51  ;;  %11448 = vst [vmem:[#allocation189_spill] sm:$0xff] %v7540_v47 }
 0x2c8   : > { %1731 = vbcast.lane.b32.xlu1 %v6905_v6, 376  ;;  %1727 = vbcast.lane.b32.xlu0 %v6905_v6, 368 }
 0x2ca   : > { %v7544_v28 = vpop.permute.xlu1 %1498  ;;  %v7546_v29 = vpop.permute.xlu0 %1494 }
 0x2cb   : > { %11449 = vst [vmem:[#allocation190_spill] sm:$0xff] %v7544_v28  ;;  %11450 = vst [vmem:[#allocation191_spill] sm:$0xff] %v7546_v29 }
 0x2cc   : > { %1742 = vbcast.lane.b32.xlu1 %v6908_v13, 264  ;;  %1738 = vbcast.lane.b32.xlu0 %v6908_v13, 256 }
 0x2ce   : > { %v7550_v34 = vpop.permute.xlu1 %1506  ;;  %v7552_v52 = vpop.permute.xlu0 %1502 }
 0x2cf   : > { %11451 = vst [vmem:[#allocation192_spill] sm:$0xff] %v7550_v34  ;;  %11452 = vst [vmem:[#allocation193_spill] sm:$0xff] %v7552_v52 }
 0x2d0   : > { %1750 = vbcast.lane.b32.xlu1 %v6908_v13, 280  ;;  %1746 = vbcast.lane.b32.xlu0 %v6908_v13, 272 }
 0x2d2   : > { %v7556_v47 = vpop.permute.xlu1 %1514  ;;  %v7558_v51 = vpop.permute.xlu0 %1510 }
 0x2d3   : > { %11453 = vst [vmem:[#allocation194_spill] sm:$0xff] %v7556_v47  ;;  %11454 = vst [vmem:[#allocation195_spill] sm:$0xff] %v7558_v51 }
 0x2d4   : > { %1758 = vbcast.lane.b32.xlu1 %v6908_v13, 296  ;;  %1754 = vbcast.lane.b32.xlu0 %v6908_v13, 288 }
 0x2d6   : > { %v7562_v6 = vpop.permute.xlu1 %1522  ;;  %v7564_v29 = vpop.permute.xlu0 %1518 }
 0x2d7   : > { %11455 = vst [vmem:[#allocation196_spill] sm:$0xff] %v7562_v6  ;;  %11456 = vst [vmem:[#allocation197_spill] sm:$0xff] %v7564_v29 }
 0x2d8   : > { %1766 = vbcast.lane.b32.xlu1 %v6908_v13, 312  ;;  %1762 = vbcast.lane.b32.xlu0 %v6908_v13, 304 }
 0x2da   : > { %v7568_v34 = vpop.permute.xlu1 %1530  ;;  %v7570_v52 = vpop.permute.xlu0 %1526 }
 0x2db   : > { %11457 = vst [vmem:[#allocation198_spill] sm:$0xff] %v7568_v34  ;;  %11458 = vst [vmem:[#allocation199_spill] sm:$0xff] %v7570_v52 }
 0x2dc   : > { %1774 = vbcast.lane.b32.xlu1 %v6908_v13, 328  ;;  %1770 = vbcast.lane.b32.xlu0 %v6908_v13, 320 }
 0x2de   : > { %v7574_v51 = vpop.permute.xlu1 %1541  ;;  %v7576_v47 = vpop.permute.xlu0 %1537 }
 0x2df   : > { %11459 = vst [vmem:[#allocation200_spill] sm:$0xff] %v7574_v51 }
 0x2e0   : > { %1782 = vbcast.lane.b32.xlu1 %v6908_v13, 344  ;;  %1778 = vbcast.lane.b32.xlu0 %v6908_v13, 336 }
 0x2e2   : > { %v7580_v6 = vpop.permute.xlu1 %1549  ;;  %v7582_v29 = vpop.permute.xlu0 %1545 }
 0x2e3   : > { %11460 = vst [vmem:[#allocation201_spill] sm:$0xff] %v7580_v6  ;;  %11461 = vst [vmem:[#allocation202_spill] sm:$0xff] %v7582_v29 }
 0x2e4   : > { %1790 = vbcast.lane.b32.xlu1 %v6908_v13, 360  ;;  %1786 = vbcast.lane.b32.xlu0 %v6908_v13, 352 }
 0x2e6   : > { %v7586_v52 = vpop.permute.xlu1 %1557  ;;  %v7588_v34 = vpop.permute.xlu0 %1553 }
 0x2e7   : > { %11462 = vst [vmem:[#allocation203_spill] sm:$0xff] %v7586_v52  ;;  %11463 = vst [vmem:[#allocation204_spill] sm:$0xff] %v7588_v34 }
 0x2e8   : > { %1798 = vbcast.lane.b32.xlu1 %v6908_v13, 376  ;;  %1794 = vbcast.lane.b32.xlu0 %v6908_v13, 368 }
 0x2ea   : > { %v7592_v51 = vpop.permute.xlu1 %1565  ;;  %v7594_v28 = vpop.permute.xlu0 %1561 }
 0x2eb   : > { %11464 = vst [vmem:[#allocation205_spill] sm:$0xff] %v7592_v51  ;;  %11465 = vst [vmem:[#allocation206_spill] sm:$0xff] %v7594_v28 }
 0x2ec   : > { %1809 = vbcast.lane.b32.xlu1 %v6911_v2, 264  ;;  %1805 = vbcast.lane.b32.xlu0 %v6911_v2, 256 }
 0x2ee   : > { %v7598_v29 = vpop.permute.xlu1 %1573  ;;  %v7600_v6 = vpop.permute.xlu0 %1569 }
 0x2ef   : > { %11466 = vst [vmem:[#allocation207_spill] sm:$0xff] %v7598_v29  ;;  %11467 = vst [vmem:[#allocation208_spill] sm:$0xff] %v7600_v6 }
 0x2f0   : > { %1817 = vbcast.lane.b32.xlu1 %v6911_v2, 280  ;;  %1813 = vbcast.lane.b32.xlu0 %v6911_v2, 272 }
 0x2f2   : > { %v7604_v34 = vpop.permute.xlu1 %1581  ;;  %v7606_v52 = vpop.permute.xlu0 %1577 }
 0x2f3   : > { %11468 = vst [vmem:[#allocation209_spill] sm:$0xff] %v7604_v34  ;;  %11469 = vst [vmem:[#allocation210_spill] sm:$0xff] %v7606_v52 }
 0x2f4   : > { %1825 = vbcast.lane.b32.xlu1 %v6911_v2, 296  ;;  %1821 = vbcast.lane.b32.xlu0 %v6911_v2, 288 }
 0x2f6   : > { %v7610_v13 = vpop.permute.xlu1 %1589  ;;  %v7612_v51 = vpop.permute.xlu0 %1585 }
 0x2f7   : > { %11470 = vst [vmem:[#allocation211_spill] sm:$0xff] %v7610_v13  ;;  %11471 = vst [vmem:[#allocation212_spill] sm:$0xff] %v7612_v51 }
 0x2f8   : > { %1833 = vbcast.lane.b32.xlu1 %v6911_v2, 312  ;;  %1829 = vbcast.lane.b32.xlu0 %v6911_v2, 304 }
 0x2fa   : > { %v7616_v29 = vpop.permute.xlu1 %1597  ;;  %v7618_v28 = vpop.permute.xlu0 %1593 }
 0x2fb   : > { %11472 = vst [vmem:[#allocation213_spill] sm:$0xff] %v7616_v29  ;;  %11473 = vst [vmem:[#allocation214_spill] sm:$0xff] %v7618_v28 }
 0x2fc   : > { %1841 = vbcast.lane.b32.xlu1 %v6911_v2, 328  ;;  %1837 = vbcast.lane.b32.xlu0 %v6911_v2, 320 }
 0x2fe   : > { %v7622_v52 = vpop.permute.xlu1 %1608  ;;  %v7624_v34 = vpop.permute.xlu0 %1604 }
 0x2ff   : > { %11474 = vst [vmem:[#allocation215_spill] sm:$0xff] %v7622_v52  ;;  %11475 = vst [vmem:[#allocation216_spill] sm:$0xff] %v7624_v34 }
 0x300   : > { %1849 = vbcast.lane.b32.xlu1 %v6911_v2, 344  ;;  %1845 = vbcast.lane.b32.xlu0 %v6911_v2, 336 }
 0x302   : > { %v7628_v13 = vpop.permute.xlu1 %1616  ;;  %v7630_v51 = vpop.permute.xlu0 %1612 }
 0x303   : > { %11476 = vst [vmem:[#allocation217_spill] sm:$0xff] %v7628_v13  ;;  %11477 = vst [vmem:[#allocation218_spill] sm:$0xff] %v7630_v51 }
 0x304   : > { %1857 = vbcast.lane.b32.xlu1 %v6911_v2, 360  ;;  %1853 = vbcast.lane.b32.xlu0 %v6911_v2, 352 }
 0x306   : > { %v7634_v28 = vpop.permute.xlu1 %1624  ;;  %v7636_v29 = vpop.permute.xlu0 %1620 }
 0x307   : > { %11478 = vst [vmem:[#allocation219_spill] sm:$0xff] %v7634_v28  ;;  %11479 = vst [vmem:[#allocation220_spill] sm:$0xff] %v7636_v29 }
 0x308   : > { %1865 = vbcast.lane.b32.xlu1 %v6911_v2, 376  ;;  %1861 = vbcast.lane.b32.xlu0 %v6911_v2, 368 }
 0x30a   : > { %v7640_v52 = vpop.permute.xlu1 %1632  ;;  %v7642_v6 = vpop.permute.xlu0 %1628 }
 0x30b   : > { %11480 = vst [vmem:[#allocation221_spill] sm:$0xff] %v7640_v52  ;;  %11481 = vst [vmem:[#allocation222_spill] sm:$0xff] %v7642_v6 }
 0x30c   : > { %1876 = vbcast.lane.b32.xlu1 %v6914_v8, 264  ;;  %1872 = vbcast.lane.b32.xlu0 %v6914_v8, 256 }
 0x30e   : > { %v7646_v51 = vpop.permute.xlu1 %1640  ;;  %v7648_v13 = vpop.permute.xlu0 %1636 }
 0x30f   : > { %11482 = vst [vmem:[#allocation223_spill] sm:$0xff] %v7646_v51  ;;  %11483 = vst [vmem:[#allocation224_spill] sm:$0xff] %v7648_v13 }
 0x310   : > { %1884 = vbcast.lane.b32.xlu1 %v6914_v8, 280  ;;  %1880 = vbcast.lane.b32.xlu0 %v6914_v8, 272 }
 0x312   : > { %v7652_v29 = vpop.permute.xlu1 %1648  ;;  %v7654_v28 = vpop.permute.xlu0 %1644 }
 0x313   : > { %11484 = vst [vmem:[#allocation225_spill] sm:$0xff] %v7652_v29  ;;  %11485 = vst [vmem:[#allocation226_spill] sm:$0xff] %v7654_v28 }
 0x314   : > { %1892 = vbcast.lane.b32.xlu1 %v6914_v8, 296  ;;  %1888 = vbcast.lane.b32.xlu0 %v6914_v8, 288 }
 0x316   : > { %v7658_v2 = vpop.permute.xlu1 %1656  ;;  %v7660_v52 = vpop.permute.xlu0 %1652 }
 0x317   : > { %11486 = vst [vmem:[#allocation227_spill] sm:$0xff] %v7658_v2  ;;  %11487 = vst [vmem:[#allocation228_spill] sm:$0xff] %v7660_v52 }
 0x318   : > { %1900 = vbcast.lane.b32.xlu1 %v6914_v8, 312  ;;  %1896 = vbcast.lane.b32.xlu0 %v6914_v8, 304 }
 0x31a   : > { %v7664_v51 = vpop.permute.xlu1 %1664  ;;  %v7666_v6 = vpop.permute.xlu0 %1660 }
 0x31b   : > { %11488 = vst [vmem:[#allocation229_spill] sm:$0xff] %v7664_v51  ;;  %11489 = vst [vmem:[#allocation230_spill] sm:$0xff] %v7666_v6 }
 0x31c   : > { %1908 = vbcast.lane.b32.xlu1 %v6914_v8, 328  ;;  %1904 = vbcast.lane.b32.xlu0 %v6914_v8, 320 }
 0x31e   : > { %v7670_v28 = vpop.permute.xlu1 %1675  ;;  %v7672_v29 = vpop.permute.xlu0 %1671 }
 0x31f   : > { %11490 = vst [vmem:[#allocation231_spill] sm:$0xff] %v7670_v28 }
 0x320   : > { %1916 = vbcast.lane.b32.xlu1 %v6914_v8, 344  ;;  %1912 = vbcast.lane.b32.xlu0 %v6914_v8, 336 }
 0x322   : > { %v7676_v2 = vpop.permute.xlu1 %1683  ;;  %v7678_v52 = vpop.permute.xlu0 %1679 }
 0x323   : > { %11491 = vst [vmem:[#allocation232_spill] sm:$0xff] %v7676_v2  ;;  %11492 = vst [vmem:[#allocation233_spill] sm:$0xff] %v7678_v52 }
 0x324   : > { %1924 = vbcast.lane.b32.xlu1 %v6914_v8, 360  ;;  %1920 = vbcast.lane.b32.xlu0 %v6914_v8, 352 }
 0x326   : > { %v7682_v6 = vpop.permute.xlu1 %1691  ;;  %v7684_v51 = vpop.permute.xlu0 %1687 }
 0x327   : > { %11493 = vst [vmem:[#allocation234_spill] sm:$0xff] %v7682_v6  ;;  %11494 = vst [vmem:[#allocation235_spill] sm:$0xff] %v7684_v51 }
 0x328   : > { %1932 = vbcast.lane.b32.xlu1 %v6914_v8, 376  ;;  %1928 = vbcast.lane.b32.xlu0 %v6914_v8, 368 }
 0x32a   : > { %v7688_v28 = vpop.permute.xlu1 %1699  ;;  %v7690_v13 = vpop.permute.xlu0 %1695 }
 0x32b   : > { %11495 = vst [vmem:[#allocation236_spill] sm:$0xff] %v7688_v28  ;;  %11496 = vst [vmem:[#allocation237_spill] sm:$0xff] %v7690_v13 }
 0x32c   : > { %1943 = vbcast.lane.b32.xlu1 %v6917_v11, 264  ;;  %1939 = vbcast.lane.b32.xlu0 %v6917_v11, 256 }
 0x32e   : > { %v7694_v52 = vpop.permute.xlu1 %1707  ;;  %v7696_v2 = vpop.permute.xlu0 %1703 }
 0x32f   : > { %11497 = vst [vmem:[#allocation238_spill] sm:$0xff] %v7694_v52  ;;  %11498 = vst [vmem:[#allocation239_spill] sm:$0xff] %v7696_v2 }
 0x330   : > { %1951 = vbcast.lane.b32.xlu1 %v6917_v11, 280  ;;  %1947 = vbcast.lane.b32.xlu0 %v6917_v11, 272 }
 0x332   : > { %v7700_v51 = vpop.permute.xlu1 %1715  ;;  %v7702_v6 = vpop.permute.xlu0 %1711 }
 0x333   : > { %11499 = vst [vmem:[#allocation240_spill] sm:$0xff] %v7700_v51  ;;  %11500 = vst [vmem:[#allocation241_spill] sm:$0xff] %v7702_v6 }
 0x334   : > { %1959 = vbcast.lane.b32.xlu1 %v6917_v11, 296  ;;  %1955 = vbcast.lane.b32.xlu0 %v6917_v11, 288 }
 0x336   : > { %v7706_v8 = vpop.permute.xlu1 %1723  ;;  %v7708_v28 = vpop.permute.xlu0 %1719 }
 0x337   : > { %11501 = vst [vmem:[#allocation242_spill] sm:$0xff] %v7706_v8  ;;  %11502 = vst [vmem:[#allocation243_spill] sm:$0xff] %v7708_v28 }
 0x338   : > { %1967 = vbcast.lane.b32.xlu1 %v6917_v11, 312  ;;  %1963 = vbcast.lane.b32.xlu0 %v6917_v11, 304 }
 0x33a   : > { %v7712_v52 = vpop.permute.xlu1 %1731  ;;  %v7714_v13 = vpop.permute.xlu0 %1727 }
 0x33b   : > { %11503 = vst [vmem:[#allocation244_spill] sm:$0xff] %v7712_v52  ;;  %11504 = vst [vmem:[#allocation245_spill] sm:$0xff] %v7714_v13 }
 0x33c   : > { %1975 = vbcast.lane.b32.xlu1 %v6917_v11, 328  ;;  %1971 = vbcast.lane.b32.xlu0 %v6917_v11, 320 }
 0x33e   : > { %v7718_v6 = vpop.permute.xlu1 %1742  ;;  %v7720_v51 = vpop.permute.xlu0 %1738 }
 0x33f   : > { %11505 = vst [vmem:[#allocation246_spill] sm:$0xff] %v7718_v6 }
 0x340   : > { %1983 = vbcast.lane.b32.xlu1 %v6917_v11, 344  ;;  %1979 = vbcast.lane.b32.xlu0 %v6917_v11, 336 }
 0x342   : > { %v7724_v8 = vpop.permute.xlu1 %1750  ;;  %v7726_v28 = vpop.permute.xlu0 %1746 }
 0x343   : > { %11506 = vst [vmem:[#allocation247_spill] sm:$0xff] %v7724_v8  ;;  %11507 = vst [vmem:[#allocation248_spill] sm:$0xff] %v7726_v28 }
 0x344   : > { %1991 = vbcast.lane.b32.xlu1 %v6917_v11, 360  ;;  %1987 = vbcast.lane.b32.xlu0 %v6917_v11, 352 }
 0x346   : > { %v7730_v13 = vpop.permute.xlu1 %1758  ;;  %v7732_v52 = vpop.permute.xlu0 %1754 }
 0x347   : > { %11508 = vst [vmem:[#allocation249_spill] sm:$0xff] %v7730_v13  ;;  %11509 = vst [vmem:[#allocation250_spill] sm:$0xff] %v7732_v52 }
 0x348   : > { %1999 = vbcast.lane.b32.xlu1 %v6917_v11, 376  ;;  %1995 = vbcast.lane.b32.xlu0 %v6917_v11, 368 }
 0x34a   : > { %v7736_v6 = vpop.permute.xlu1 %1766  ;;  %v7738_v2 = vpop.permute.xlu0 %1762 }
 0x34b   : > { %11510 = vst [vmem:[#allocation251_spill] sm:$0xff] %v7736_v6  ;;  %11511 = vst [vmem:[#allocation252_spill] sm:$0xff] %v7738_v2 }
 0x34c   : > { %2010 = vbcast.lane.b32.xlu1 %v6920_v18, 264  ;;  %2006 = vbcast.lane.b32.xlu0 %v6920_v18, 256 }
 0x34e   : > { %v7742_v28 = vpop.permute.xlu1 %1774  ;;  %v7744_v8 = vpop.permute.xlu0 %1770 }
 0x34f   : > { %11512 = vst [vmem:[#allocation253_spill] sm:$0xff] %v7742_v28  ;;  %11513 = vst [vmem:[#allocation254_spill] sm:$0xff] %v7744_v8 }
 0x350   : > { %2018 = vbcast.lane.b32.xlu1 %v6920_v18, 280  ;;  %2014 = vbcast.lane.b32.xlu0 %v6920_v18, 272 }
 0x352   : > { %v7748_v52 = vpop.permute.xlu1 %1782  ;;  %v7750_v13 = vpop.permute.xlu0 %1778 }
 0x353   : > { %11514 = vst [vmem:[#allocation255_spill] sm:$0xff] %v7748_v52  ;;  %11515 = vst [vmem:[#allocation256_spill] sm:$0xff] %v7750_v13 }
 0x354   : > { %2026 = vbcast.lane.b32.xlu1 %v6920_v18, 296  ;;  %2022 = vbcast.lane.b32.xlu0 %v6920_v18, 288 }
 0x356   : > { %v7754_v11 = vpop.permute.xlu1 %1790  ;;  %v7756_v6 = vpop.permute.xlu0 %1786 }
 0x357   : > { %11516 = vst [vmem:[#allocation257_spill] sm:$0xff] %v7754_v11  ;;  %11517 = vst [vmem:[#allocation258_spill] sm:$0xff] %v7756_v6 }
 0x358   : > { %2034 = vbcast.lane.b32.xlu1 %v6920_v18, 312  ;;  %2030 = vbcast.lane.b32.xlu0 %v6920_v18, 304 }
 0x35a   : > { %v7760_v28 = vpop.permute.xlu1 %1798  ;;  %v7762_v2 = vpop.permute.xlu0 %1794 }
 0x35b   : > { %11518 = vst [vmem:[#allocation259_spill] sm:$0xff] %v7760_v28  ;;  %11519 = vst [vmem:[#allocation260_spill] sm:$0xff] %v7762_v2 }
 0x35c   : > { %2042 = vbcast.lane.b32.xlu1 %v6920_v18, 328  ;;  %2038 = vbcast.lane.b32.xlu0 %v6920_v18, 320 }
 0x35e   : > { %v7766_v13 = vpop.permute.xlu1 %1809  ;;  %v7768_v52 = vpop.permute.xlu0 %1805 }
 0x35f   : > { %11520 = vst [vmem:[#allocation261_spill] sm:$0xff] %v7766_v13 }
 0x360   : > { %2050 = vbcast.lane.b32.xlu1 %v6920_v18, 344  ;;  %2046 = vbcast.lane.b32.xlu0 %v6920_v18, 336 }
 0x362   : > { %v7772_v11 = vpop.permute.xlu1 %1817  ;;  %v7774_v6 = vpop.permute.xlu0 %1813 }
 0x363   : > { %11521 = vst [vmem:[#allocation262_spill] sm:$0xff] %v7772_v11  ;;  %11522 = vst [vmem:[#allocation263_spill] sm:$0xff] %v7774_v6 }
 0x364   : > { %2058 = vbcast.lane.b32.xlu1 %v6920_v18, 360  ;;  %2054 = vbcast.lane.b32.xlu0 %v6920_v18, 352 }
 0x366   : > { %v7778_v28 = vpop.permute.xlu1 %1825  ;;  %v7780_v2 = vpop.permute.xlu0 %1821 }
 0x367   : > { %11523 = vst [vmem:[#allocation264_spill] sm:$0xff] %v7778_v28  ;;  %11524 = vst [vmem:[#allocation265_spill] sm:$0xff] %v7780_v2 }
 0x368   : > { %2066 = vbcast.lane.b32.xlu1 %v6920_v18, 376  ;;  %2062 = vbcast.lane.b32.xlu0 %v6920_v18, 368 }
 0x36a   : > { %v7784_v8 = vpop.permute.xlu1 %1833  ;;  %v7786_v13 = vpop.permute.xlu0 %1829 }
 0x36b   : > { %11525 = vst [vmem:[#allocation266_spill] sm:$0xff] %v7784_v8  ;;  %11526 = vst [vmem:[#allocation267_spill] sm:$0xff] %v7786_v13 }
 0x36c   : > { %2077 = vbcast.lane.b32.xlu1 %v6923_v50, 264  ;;  %2073 = vbcast.lane.b32.xlu0 %v6923_v50, 256 }
 0x36e   : > { %v7790_v6 = vpop.permute.xlu1 %1841  ;;  %v7792_v11 = vpop.permute.xlu0 %1837 }
 0x36f   : > { %11527 = vst [vmem:[#allocation268_spill] sm:$0xff] %v7790_v6  ;;  %11528 = vst [vmem:[#allocation269_spill] sm:$0xff] %v7792_v11 }
 0x370   : > { %2085 = vbcast.lane.b32.xlu1 %v6923_v50, 280  ;;  %2081 = vbcast.lane.b32.xlu0 %v6923_v50, 272 }
 0x372   : > { %v7796_v2 = vpop.permute.xlu1 %1849  ;;  %v7798_v28 = vpop.permute.xlu0 %1845 }
 0x373   : > { %11529 = vst [vmem:[#allocation270_spill] sm:$0xff] %v7796_v2  ;;  %11530 = vst [vmem:[#allocation271_spill] sm:$0xff] %v7798_v28 }
 0x374   : > { %2093 = vbcast.lane.b32.xlu1 %v6923_v50, 296  ;;  %2089 = vbcast.lane.b32.xlu0 %v6923_v50, 288 }
 0x376   : > { %v7802_v18 = vpop.permute.xlu1 %1857  ;;  %v7804_v8 = vpop.permute.xlu0 %1853 }
 0x377   : > { %11531 = vst [vmem:[#allocation272_spill] sm:$0xff] %v7802_v18  ;;  %11532 = vst [vmem:[#allocation273_spill] sm:$0xff] %v7804_v8 }
 0x378   : > { %2101 = vbcast.lane.b32.xlu1 %v6923_v50, 312  ;;  %2097 = vbcast.lane.b32.xlu0 %v6923_v50, 304 }
 0x37a   : > { %v7808_v6 = vpop.permute.xlu1 %1865  ;;  %v7810_v13 = vpop.permute.xlu0 %1861 }
 0x37b   : > { %11533 = vst [vmem:[#allocation274_spill] sm:$0xff] %v7808_v6  ;;  %11534 = vst [vmem:[#allocation275_spill] sm:$0xff] %v7810_v13 }
 0x37c   : > { %2109 = vbcast.lane.b32.xlu1 %v6923_v50, 328  ;;  %2105 = vbcast.lane.b32.xlu0 %v6923_v50, 320 }
 0x37e   : > { %v7814_v2 = vpop.permute.xlu1 %1876  ;;  %v7816_v28 = vpop.permute.xlu0 %1872 }
 0x37f   : > { %11535 = vst [vmem:[#allocation276_spill] sm:$0xff] %v7814_v2 }
 0x380   : > { %2117 = vbcast.lane.b32.xlu1 %v6923_v50, 344  ;;  %2113 = vbcast.lane.b32.xlu0 %v6923_v50, 336 }
 0x382   : > { %v7820_v18 = vpop.permute.xlu1 %1884  ;;  %v7822_v8 = vpop.permute.xlu0 %1880 }
 0x383   : > { %11536 = vst [vmem:[#allocation277_spill] sm:$0xff] %v7820_v18  ;;  %11537 = vst [vmem:[#allocation278_spill] sm:$0xff] %v7822_v8 }
 0x384   : > { %2125 = vbcast.lane.b32.xlu1 %v6923_v50, 360  ;;  %2121 = vbcast.lane.b32.xlu0 %v6923_v50, 352 }
 0x386   : > { %v7826_v6 = vpop.permute.xlu1 %1892  ;;  %v7828_v13 = vpop.permute.xlu0 %1888 }
 0x387   : > { %11538 = vst [vmem:[#allocation279_spill] sm:$0xff] %v7826_v6  ;;  %11539 = vst [vmem:[#allocation280_spill] sm:$0xff] %v7828_v13 }
 0x388   : > { %2133 = vbcast.lane.b32.xlu1 %v6923_v50, 376  ;;  %2129 = vbcast.lane.b32.xlu0 %v6923_v50, 368 }
 0x38a   : > { %v7832_v11 = vpop.permute.xlu1 %1900  ;;  %v7834_v2 = vpop.permute.xlu0 %1896 }
 0x38b   : > { %11540 = vst [vmem:[#allocation281_spill] sm:$0xff] %v7832_v11  ;;  %11541 = vst [vmem:[#allocation282_spill] sm:$0xff] %v7834_v2 }
 0x38c   : > { %2144 = vbcast.lane.b32.xlu1 %v6926_v56, 264  ;;  %2140 = vbcast.lane.b32.xlu0 %v6926_v56, 256 }
 0x38e   : > { %v7838_v8 = vpop.permute.xlu1 %1908  ;;  %v7840_v18 = vpop.permute.xlu0 %1904 }
 0x38f   : > { %11542 = vst [vmem:[#allocation283_spill] sm:$0xff] %v7838_v8  ;;  %11543 = vst [vmem:[#allocation284_spill] sm:$0xff] %v7840_v18 }
 0x390   : > { %2152 = vbcast.lane.b32.xlu1 %v6926_v56, 280  ;;  %2148 = vbcast.lane.b32.xlu0 %v6926_v56, 272 }
 0x392   : > { %v7844_v13 = vpop.permute.xlu1 %1916  ;;  %v7846_v6 = vpop.permute.xlu0 %1912 }
 0x393   : > { %11544 = vst [vmem:[#allocation285_spill] sm:$0xff] %v7844_v13  ;;  %11545 = vst [vmem:[#allocation286_spill] sm:$0xff] %v7846_v6 }
 0x394   : > { %2160 = vbcast.lane.b32.xlu1 %v6926_v56, 296  ;;  %2156 = vbcast.lane.b32.xlu0 %v6926_v56, 288 }
 0x396   : > { %v7850_v50 = vpop.permute.xlu1 %1924  ;;  %v7852_v11 = vpop.permute.xlu0 %1920 }
 0x397   : > { %11546 = vst [vmem:[#allocation287_spill] sm:$0xff] %v7850_v50  ;;  %11547 = vst [vmem:[#allocation288_spill] sm:$0xff] %v7852_v11 }
 0x398   : > { %2168 = vbcast.lane.b32.xlu1 %v6926_v56, 312  ;;  %2164 = vbcast.lane.b32.xlu0 %v6926_v56, 304 }
 0x39a   : > { %v7856_v8 = vpop.permute.xlu1 %1932  ;;  %v7858_v2 = vpop.permute.xlu0 %1928 }
 0x39b   : > { %11548 = vst [vmem:[#allocation289_spill] sm:$0xff] %v7856_v8  ;;  %11549 = vst [vmem:[#allocation290_spill] sm:$0xff] %v7858_v2 }
 0x39c   : > { %2176 = vbcast.lane.b32.xlu1 %v6926_v56, 328  ;;  %2172 = vbcast.lane.b32.xlu0 %v6926_v56, 320 }
 0x39e   : > { %v7862_v13 = vpop.permute.xlu1 %1943  ;;  %v7864_v6 = vpop.permute.xlu0 %1939 }
 0x39f   : > { %11550 = vst [vmem:[#allocation291_spill] sm:$0xff] %v7862_v13 }
 0x3a0   : > { %2184 = vbcast.lane.b32.xlu1 %v6926_v56, 344  ;;  %2180 = vbcast.lane.b32.xlu0 %v6926_v56, 336 }
 0x3a2   : > { %v7868_v50 = vpop.permute.xlu1 %1951  ;;  %v7870_v11 = vpop.permute.xlu0 %1947 }
 0x3a3   : > { %11551 = vst [vmem:[#allocation292_spill] sm:$0xff] %v7868_v50  ;;  %11552 = vst [vmem:[#allocation293_spill] sm:$0xff] %v7870_v11 }
 0x3a4   : > { %2192 = vbcast.lane.b32.xlu1 %v6926_v56, 360  ;;  %2188 = vbcast.lane.b32.xlu0 %v6926_v56, 352 }
 0x3a6   : > { %v7874_v8 = vpop.permute.xlu1 %1959  ;;  %v7876_v2 = vpop.permute.xlu0 %1955 }
 0x3a7   : > { %11553 = vst [vmem:[#allocation294_spill] sm:$0xff] %v7874_v8  ;;  %11554 = vst [vmem:[#allocation295_spill] sm:$0xff] %v7876_v2 }
 0x3a8   : > { %2200 = vbcast.lane.b32.xlu1 %v6926_v56, 376  ;;  %2196 = vbcast.lane.b32.xlu0 %v6926_v56, 368 }
 0x3aa   : > { %v7880_v18 = vpop.permute.xlu1 %1967  ;;  %v7882_v13 = vpop.permute.xlu0 %1963 }
 0x3ab   : > { %11555 = vst [vmem:[#allocation296_spill] sm:$0xff] %v7880_v18  ;;  %11556 = vst [vmem:[#allocation297_spill] sm:$0xff] %v7882_v13 }
 0x3ac   : > { %2211 = vbcast.lane.b32.xlu1 %v6939_v60, 264  ;;  %2207 = vbcast.lane.b32.xlu0 %v6939_v60, 256 }
 0x3ae   : > { %v7886_v11 = vpop.permute.xlu1 %1975  ;;  %v7888_v50 = vpop.permute.xlu0 %1971 }
 0x3af   : > { %11557 = vst [vmem:[#allocation298_spill] sm:$0xff] %v7886_v11  ;;  %11558 = vst [vmem:[#allocation299_spill] sm:$0xff] %v7888_v50 }
 0x3b0   : > { %2219 = vbcast.lane.b32.xlu1 %v6939_v60, 280  ;;  %2215 = vbcast.lane.b32.xlu0 %v6939_v60, 272 }
 0x3b2   : > { %v7892_v2 = vpop.permute.xlu1 %1983  ;;  %v7894_v8 = vpop.permute.xlu0 %1979 }
 0x3b3   : > { %11559 = vst [vmem:[#allocation300_spill] sm:$0xff] %v7892_v2  ;;  %11560 = vst [vmem:[#allocation301_spill] sm:$0xff] %v7894_v8 }
 0x3b4   : > { %2227 = vbcast.lane.b32.xlu1 %v6939_v60, 296  ;;  %2223 = vbcast.lane.b32.xlu0 %v6939_v60, 288 }
 0x3b6   : > { %v7898_v56 = vpop.permute.xlu1 %1991  ;;  %v7900_v18 = vpop.permute.xlu0 %1987 }
 0x3b7   : > { %11561 = vst [vmem:[#allocation302_spill] sm:$0xff] %v7898_v56  ;;  %11562 = vst [vmem:[#allocation303_spill] sm:$0xff] %v7900_v18 }
 0x3b8   : > { %2235 = vbcast.lane.b32.xlu1 %v6939_v60, 312  ;;  %2231 = vbcast.lane.b32.xlu0 %v6939_v60, 304 }
 0x3ba   : > { %v7904_v11 = vpop.permute.xlu1 %1999  ;;  %v7906_v13 = vpop.permute.xlu0 %1995 }
 0x3bb   : > { %11563 = vst [vmem:[#allocation304_spill] sm:$0xff] %v7904_v11  ;;  %11564 = vst [vmem:[#allocation305_spill] sm:$0xff] %v7906_v13 }
 0x3bc   : > { %2243 = vbcast.lane.b32.xlu1 %v6939_v60, 328  ;;  %2239 = vbcast.lane.b32.xlu0 %v6939_v60, 320 }
 0x3be   : > { %v7910_v2 = vpop.permute.xlu1 %2010  ;;  %v7912_v8 = vpop.permute.xlu0 %2006 }
 0x3bf   : > { %11565 = vst [vmem:[#allocation306_spill] sm:$0xff] %v7910_v2  ;;  %11566 = vst [vmem:[#allocation307_spill] sm:$0xff] %v7912_v8 }
 0x3c0   : > { %2251 = vbcast.lane.b32.xlu1 %v6939_v60, 344  ;;  %2247 = vbcast.lane.b32.xlu0 %v6939_v60, 336 }
 0x3c2   : > { %v7916_v56 = vpop.permute.xlu1 %2018  ;;  %v7918_v18 = vpop.permute.xlu0 %2014 }
 0x3c3   : > { %11567 = vst [vmem:[#allocation308_spill] sm:$0xff] %v7916_v56  ;;  %11568 = vst [vmem:[#allocation309_spill] sm:$0xff] %v7918_v18 }
 0x3c4   : > { %2259 = vbcast.lane.b32.xlu1 %v6939_v60, 360  ;;  %2255 = vbcast.lane.b32.xlu0 %v6939_v60, 352 }
 0x3c6   : > { %v7922_v11 = vpop.permute.xlu1 %2026  ;;  %v7924_v13 = vpop.permute.xlu0 %2022 }
 0x3c7   : > { %11569 = vst [vmem:[#allocation310_spill] sm:$0xff] %v7922_v11  ;;  %11570 = vst [vmem:[#allocation311_spill] sm:$0xff] %v7924_v13 }
 0x3c8   : > { %2267 = vbcast.lane.b32.xlu1 %v6939_v60, 376  ;;  %2263 = vbcast.lane.b32.xlu0 %v6939_v60, 368 }
 0x3ca   : > { %v7928_v50 = vpop.permute.xlu1 %2034  ;;  %v7930_v2 = vpop.permute.xlu0 %2030 }
 0x3cb   : > { %11571 = vst [vmem:[#allocation312_spill] sm:$0xff] %v7928_v50  ;;  %11572 = vst [vmem:[#allocation313_spill] sm:$0xff] %v7930_v2 }
 0x3cc   : > { %2278 = vbcast.lane.b32.xlu1 %v6942_v62, 264  ;;  %2274 = vbcast.lane.b32.xlu0 %v6942_v62, 256 }
 0x3ce   : > { %v7934_v18 = vpop.permute.xlu1 %2042  ;;  %v7936_v56 = vpop.permute.xlu0 %2038 }
 0x3cf   : > { %11573 = vst [vmem:[#allocation314_spill] sm:$0xff] %v7934_v18  ;;  %11574 = vst [vmem:[#allocation315_spill] sm:$0xff] %v7936_v56 }
 0x3d0   : > { %2286 = vbcast.lane.b32.xlu1 %v6942_v62, 280  ;;  %2282 = vbcast.lane.b32.xlu0 %v6942_v62, 272 }
 0x3d2   : > { %v7940_v11 = vpop.permute.xlu1 %2050  ;;  %v7942_v13 = vpop.permute.xlu0 %2046 }
 0x3d3   : > { %11575 = vst [vmem:[#allocation316_spill] sm:$0xff] %v7940_v11  ;;  %11576 = vst [vmem:[#allocation317_spill] sm:$0xff] %v7942_v13 }
 0x3d4   : > { %2294 = vbcast.lane.b32.xlu1 %v6942_v62, 296  ;;  %2290 = vbcast.lane.b32.xlu0 %v6942_v62, 288 }
 0x3d6   : > { %v7946_v60 = vpop.permute.xlu1 %2058  ;;  %v7948_v50 = vpop.permute.xlu0 %2054 }
 0x3d7   : > { %11577 = vst [vmem:[#allocation318_spill] sm:$0xff] %v7946_v60  ;;  %11578 = vst [vmem:[#allocation319_spill] sm:$0xff] %v7948_v50 }
 0x3d8   : > { %2302 = vbcast.lane.b32.xlu1 %v6942_v62, 312  ;;  %2298 = vbcast.lane.b32.xlu0 %v6942_v62, 304 }
 0x3da   : > { %v7952_v18 = vpop.permute.xlu1 %2066  ;;  %v7954_v2 = vpop.permute.xlu0 %2062 }
 0x3db   : > { %11579 = vst [vmem:[#allocation320_spill] sm:$0xff] %v7952_v18  ;;  %11580 = vst [vmem:[#allocation321_spill] sm:$0xff] %v7954_v2 }
 0x3dc   : > { %2310 = vbcast.lane.b32.xlu1 %v6942_v62, 328  ;;  %2306 = vbcast.lane.b32.xlu0 %v6942_v62, 320 }
 0x3de   : > { %v7958_v11 = vpop.permute.xlu1 %2077  ;;  %v7960_v13 = vpop.permute.xlu0 %2073 }
 0x3df   : > { %11581 = vst [vmem:[#allocation322_spill] sm:$0xff] %v7958_v11 }
 0x3e0   : > { %2318 = vbcast.lane.b32.xlu1 %v6942_v62, 344  ;;  %2314 = vbcast.lane.b32.xlu0 %v6942_v62, 336 }
 0x3e2   : > { %v7964_v60 = vpop.permute.xlu1 %2085  ;;  %v7966_v50 = vpop.permute.xlu0 %2081 }
 0x3e3   : > { %11582 = vst [vmem:[#allocation323_spill] sm:$0xff] %v7964_v60  ;;  %11583 = vst [vmem:[#allocation324_spill] sm:$0xff] %v7966_v50 }
 0x3e4   : > { %2326 = vbcast.lane.b32.xlu1 %v6942_v62, 360  ;;  %2322 = vbcast.lane.b32.xlu0 %v6942_v62, 352 }
 0x3e6   : > { %v7970_v18 = vpop.permute.xlu1 %2093  ;;  %v7972_v2 = vpop.permute.xlu0 %2089 }
 0x3e7   : > { %11584 = vst [vmem:[#allocation325_spill] sm:$0xff] %v7970_v18  ;;  %11585 = vst [vmem:[#allocation326_spill] sm:$0xff] %v7972_v2 }
 0x3e8   : > { %2334 = vbcast.lane.b32.xlu1 %v6942_v62, 376  ;;  %2330 = vbcast.lane.b32.xlu0 %v6942_v62, 368 }
 0x3ea   : > { %v7976_v56 = vpop.permute.xlu1 %2101  ;;  %v7978_v11 = vpop.permute.xlu0 %2097 }
 0x3eb   : > { %11586 = vst [vmem:[#allocation327_spill] sm:$0xff] %v7976_v56  ;;  %11587 = vst [vmem:[#allocation328_spill] sm:$0xff] %v7978_v11 }
 0x3ec   : > { %2345 = vbcast.lane.b32.xlu1 %v6945_v58, 264  ;;  %2341 = vbcast.lane.b32.xlu0 %v6945_v58, 256 }
 0x3ee   : > { %v7982_v50 = vpop.permute.xlu1 %2109  ;;  %v7984_v60 = vpop.permute.xlu0 %2105 }
 0x3ef   : > { %11588 = vst [vmem:[#allocation329_spill] sm:$0xff] %v7982_v50  ;;  %11589 = vst [vmem:[#allocation330_spill] sm:$0xff] %v7984_v60 }
 0x3f0   : > { %2353 = vbcast.lane.b32.xlu1 %v6945_v58, 280  ;;  %2349 = vbcast.lane.b32.xlu0 %v6945_v58, 272 }
 0x3f2   : > { %v7988_v18 = vpop.permute.xlu1 %2117  ;;  %v7990_v2 = vpop.permute.xlu0 %2113 }
 0x3f3   : > { %11590 = vst [vmem:[#allocation331_spill] sm:$0xff] %v7988_v18  ;;  %11591 = vst [vmem:[#allocation332_spill] sm:$0xff] %v7990_v2 }
 0x3f4   : > { %2361 = vbcast.lane.b32.xlu1 %v6945_v58, 296  ;;  %2357 = vbcast.lane.b32.xlu0 %v6945_v58, 288 }
 0x3f6   : > { %v7994_v62 = vpop.permute.xlu1 %2125  ;;  %v7996_v56 = vpop.permute.xlu0 %2121 }
 0x3f7   : > { %11592 = vst [vmem:[#allocation333_spill] sm:$0xff] %v7994_v62  ;;  %11593 = vst [vmem:[#allocation334_spill] sm:$0xff] %v7996_v56 }
 0x3f8   : > { %2369 = vbcast.lane.b32.xlu1 %v6945_v58, 312  ;;  %2365 = vbcast.lane.b32.xlu0 %v6945_v58, 304 }
 0x3fa   : > { %v8000_v50 = vpop.permute.xlu1 %2133  ;;  %v8002_v11 = vpop.permute.xlu0 %2129 }
 0x3fb   : > { %11594 = vst [vmem:[#allocation335_spill] sm:$0xff] %v8000_v50  ;;  %11595 = vst [vmem:[#allocation336_spill] sm:$0xff] %v8002_v11 }
 0x3fc   : > { %2377 = vbcast.lane.b32.xlu1 %v6945_v58, 328  ;;  %2373 = vbcast.lane.b32.xlu0 %v6945_v58, 320 }
 0x3fe   : > { %v8006_v18 = vpop.permute.xlu1 %2144  ;;  %v8008_v2 = vpop.permute.xlu0 %2140 }
 0x3ff   : > { %11596 = vst [vmem:[#allocation337_spill] sm:$0xff] %v8006_v18  ;;  %11597 = vst [vmem:[#allocation338_spill] sm:$0xff] %v8008_v2 }
 0x400   : > { %2385 = vbcast.lane.b32.xlu1 %v6945_v58, 344  ;;  %2381 = vbcast.lane.b32.xlu0 %v6945_v58, 336 }
 0x402   : > { %v8012_v62 = vpop.permute.xlu1 %2152  ;;  %v8014_v56 = vpop.permute.xlu0 %2148 }
 0x403   : > { %11598 = vst [vmem:[#allocation339_spill] sm:$0xff] %v8012_v62  ;;  %11599 = vst [vmem:[#allocation340_spill] sm:$0xff] %v8014_v56 }
 0x404   : > { %2393 = vbcast.lane.b32.xlu1 %v6945_v58, 360  ;;  %2389 = vbcast.lane.b32.xlu0 %v6945_v58, 352 }
 0x406   : > { %v8018_v50 = vpop.permute.xlu1 %2160  ;;  %v8020_v11 = vpop.permute.xlu0 %2156 }
 0x407   : > { %11600 = vst [vmem:[#allocation341_spill] sm:$0xff] %v8018_v50  ;;  %11601 = vst [vmem:[#allocation342_spill] sm:$0xff] %v8020_v11 }
 0x408   : > { %2401 = vbcast.lane.b32.xlu1 %v6945_v58, 376  ;;  %2397 = vbcast.lane.b32.xlu0 %v6945_v58, 368 }
 0x40a   : > { %v8024_v60 = vpop.permute.xlu1 %2168  ;;  %v8026_v18 = vpop.permute.xlu0 %2164 }
 0x40b   : > { %11602 = vst [vmem:[#allocation343_spill] sm:$0xff] %v8024_v60  ;;  %11603 = vst [vmem:[#allocation344_spill] sm:$0xff] %v8026_v18 }
 0x40c   : > { %2412 = vbcast.lane.b32.xlu1 %v6948_v0, 264  ;;  %2408 = vbcast.lane.b32.xlu0 %v6948_v0, 256 }
 0x40e   : > { %v8030_v62 = vpop.permute.xlu1 %2176  ;;  %v8032_v56 = vpop.permute.xlu0 %2172 }
 0x40f   : > { %11604 = vst [vmem:[#allocation345_spill] sm:$0xff] %v8030_v62  ;;  %11605 = vst [vmem:[#allocation346_spill] sm:$0xff] %v8032_v56 }
 0x410   : > { %2420 = vbcast.lane.b32.xlu1 %v6948_v0, 280  ;;  %2416 = vbcast.lane.b32.xlu0 %v6948_v0, 272 }
 0x412   : > { %v8036_v50 = vpop.permute.xlu1 %2184  ;;  %v8038_v11 = vpop.permute.xlu0 %2180 }
 0x413   : > { %11606 = vst [vmem:[#allocation347_spill] sm:$0xff] %v8036_v50  ;;  %11607 = vst [vmem:[#allocation348_spill] sm:$0xff] %v8038_v11 }
 0x414   : > { %2428 = vbcast.lane.b32.xlu1 %v6948_v0, 296  ;;  %2424 = vbcast.lane.b32.xlu0 %v6948_v0, 288 }
 0x416   : > { %v8042_v58 = vpop.permute.xlu1 %2192  ;;  %v8044_v60 = vpop.permute.xlu0 %2188 }
 0x417   : > { %11608 = vst [vmem:[#allocation349_spill] sm:$0xff] %v8042_v58  ;;  %11609 = vst [vmem:[#allocation350_spill] sm:$0xff] %v8044_v60 }
 0x418   : > { %2436 = vbcast.lane.b32.xlu1 %v6948_v0, 312  ;;  %2432 = vbcast.lane.b32.xlu0 %v6948_v0, 304 }
 0x41a   : > { %v8048_v62 = vpop.permute.xlu1 %2200  ;;  %v8050_v18 = vpop.permute.xlu0 %2196 }
 0x41b   : > { %11610 = vst [vmem:[#allocation351_spill] sm:$0xff] %v8048_v62  ;;  %11611 = vst [vmem:[#allocation352_spill] sm:$0xff] %v8050_v18 }
 0x41c   : > { %2444 = vbcast.lane.b32.xlu1 %v6948_v0, 328  ;;  %2440 = vbcast.lane.b32.xlu0 %v6948_v0, 320 }
 0x41e   : > { %v8054_v50 = vpop.permute.xlu1 %2211  ;;  %v8056_v11 = vpop.permute.xlu0 %2207 }
 0x41f   : > { %11612 = vst [vmem:[#allocation353_spill] sm:$0xff] %v8054_v50  ;;  %11613 = vst [vmem:[#allocation354_spill] sm:$0xff] %v8056_v11 }
 0x420   : > { %2452 = vbcast.lane.b32.xlu1 %v6948_v0, 344  ;;  %2448 = vbcast.lane.b32.xlu0 %v6948_v0, 336 }
 0x422   : > { %v8060_v58 = vpop.permute.xlu1 %2219  ;;  %v8062_v60 = vpop.permute.xlu0 %2215 }
 0x423   : > { %11614 = vst [vmem:[#allocation355_spill] sm:$0xff] %v8060_v58  ;;  %11615 = vst [vmem:[#allocation356_spill] sm:$0xff] %v8062_v60 }
 0x424   : > { %2460 = vbcast.lane.b32.xlu1 %v6948_v0, 360  ;;  %2456 = vbcast.lane.b32.xlu0 %v6948_v0, 352 }
 0x426   : > { %v8066_v62 = vpop.permute.xlu1 %2227  ;;  %v8068_v18 = vpop.permute.xlu0 %2223 }
 0x427   : > { %11616 = vst [vmem:[#allocation357_spill] sm:$0xff] %v8066_v62  ;;  %11617 = vst [vmem:[#allocation358_spill] sm:$0xff] %v8068_v18 }
 0x428   : > { %2468 = vbcast.lane.b32.xlu1 %v6948_v0, 376  ;;  %2464 = vbcast.lane.b32.xlu0 %v6948_v0, 368 }
 0x42a   : > { %v8072_v56 = vpop.permute.xlu1 %2235  ;;  %v8074_v50 = vpop.permute.xlu0 %2231 }
 0x42b   : > { %11618 = vst [vmem:[#allocation359_spill] sm:$0xff] %v8072_v56  ;;  %11619 = vst [vmem:[#allocation360_spill] sm:$0xff] %v8074_v50 }
 0x42c   : > { %2479 = vbcast.lane.b32.xlu1 %v6951_v32, 264  ;;  %2475 = vbcast.lane.b32.xlu0 %v6951_v32, 256 }
 0x42e   : > { %v8078_v58 = vpop.permute.xlu1 %2243  ;;  %v8080_v60 = vpop.permute.xlu0 %2239 }
 0x42f   : > { %11620 = vst [vmem:[#allocation361_spill] sm:$0xff] %v8078_v58  ;;  %11621 = vst [vmem:[#allocation362_spill] sm:$0xff] %v8080_v60 }
 0x430   : > { %2487 = vbcast.lane.b32.xlu1 %v6951_v32, 280  ;;  %2483 = vbcast.lane.b32.xlu0 %v6951_v32, 272 }
 0x432   : > { %v8084_v62 = vpop.permute.xlu1 %2251  ;;  %v8086_v18 = vpop.permute.xlu0 %2247 }
 0x433   : > { %11622 = vst [vmem:[#allocation363_spill] sm:$0xff] %v8084_v62  ;;  %11623 = vst [vmem:[#allocation364_spill] sm:$0xff] %v8086_v18 }
 0x434   : > { %2495 = vbcast.lane.b32.xlu1 %v6951_v32, 296  ;;  %2491 = vbcast.lane.b32.xlu0 %v6951_v32, 288 }
 0x436   : > { %v8090_v0 = vpop.permute.xlu1 %2259  ;;  %v8092_v56 = vpop.permute.xlu0 %2255 }
 0x437   : > { %11624 = vst [vmem:[#allocation365_spill] sm:$0xff] %v8090_v0  ;;  %11625 = vst [vmem:[#allocation366_spill] sm:$0xff] %v8092_v56 }
 0x438   : > { %2503 = vbcast.lane.b32.xlu1 %v6951_v32, 312  ;;  %2499 = vbcast.lane.b32.xlu0 %v6951_v32, 304 }
 0x43a   : > { %v8096_v58 = vpop.permute.xlu1 %2267  ;;  %v8098_v50 = vpop.permute.xlu0 %2263 }
 0x43b   : > { %11626 = vst [vmem:[#allocation367_spill] sm:$0xff] %v8096_v58  ;;  %11627 = vst [vmem:[#allocation368_spill] sm:$0xff] %v8098_v50 }
 0x43c   : > { %2511 = vbcast.lane.b32.xlu1 %v6951_v32, 328  ;;  %2507 = vbcast.lane.b32.xlu0 %v6951_v32, 320 }
 0x43e   : > { %v8102_v62 = vpop.permute.xlu1 %2278  ;;  %v8104_v18 = vpop.permute.xlu0 %2274 }
 0x43f   : > { %11628 = vst [vmem:[#allocation369_spill] sm:$0xff] %v8102_v62 }
 0x440   : > { %2519 = vbcast.lane.b32.xlu1 %v6951_v32, 344  ;;  %2515 = vbcast.lane.b32.xlu0 %v6951_v32, 336 }
 0x442   : > { %v8108_v0 = vpop.permute.xlu1 %2286  ;;  %v8110_v56 = vpop.permute.xlu0 %2282 }
 0x443   : > { %11629 = vst [vmem:[#allocation370_spill] sm:$0xff] %v8108_v0  ;;  %11630 = vst [vmem:[#allocation371_spill] sm:$0xff] %v8110_v56 }
 0x444   : > { %2527 = vbcast.lane.b32.xlu1 %v6951_v32, 360  ;;  %2523 = vbcast.lane.b32.xlu0 %v6951_v32, 352 }
 0x446   : > { %v8114_v58 = vpop.permute.xlu1 %2294  ;;  %v8116_v50 = vpop.permute.xlu0 %2290 }
 0x447   : > { %11631 = vst [vmem:[#allocation372_spill] sm:$0xff] %v8114_v58  ;;  %11632 = vst [vmem:[#allocation373_spill] sm:$0xff] %v8116_v50 }
 0x448   : > { %2535 = vbcast.lane.b32.xlu1 %v6951_v32, 376  ;;  %2531 = vbcast.lane.b32.xlu0 %v6951_v32, 368 }
 0x44a   : > { %v8120_v60 = vpop.permute.xlu1 %2302  ;;  %v8122_v62 = vpop.permute.xlu0 %2298 }
 0x44b   : > { %11633 = vst [vmem:[#allocation374_spill] sm:$0xff] %v8120_v60  ;;  %11634 = vst [vmem:[#allocation375_spill] sm:$0xff] %v8122_v62 }
 0x44c   : > { %2546 = vbcast.lane.b32.xlu1 %v6954_v63, 264  ;;  %2542 = vbcast.lane.b32.xlu0 %v6954_v63, 256 }
 0x44e   : > { %v8126_v0 = vpop.permute.xlu1 %2310  ;;  %v8128_v56 = vpop.permute.xlu0 %2306 }
 0x44f   : > { %11635 = vst [vmem:[#allocation376_spill] sm:$0xff] %v8126_v0  ;;  %11636 = vst [vmem:[#allocation377_spill] sm:$0xff] %v8128_v56 }
 0x450   : > { %2554 = vbcast.lane.b32.xlu1 %v6954_v63, 280  ;;  %2550 = vbcast.lane.b32.xlu0 %v6954_v63, 272 }
 0x452   : > { %v8132_v58 = vpop.permute.xlu1 %2318  ;;  %v8134_v50 = vpop.permute.xlu0 %2314 }
 0x453   : > { %11637 = vst [vmem:[#allocation378_spill] sm:$0xff] %v8132_v58  ;;  %11638 = vst [vmem:[#allocation379_spill] sm:$0xff] %v8134_v50 }
 0x454   : > { %2562 = vbcast.lane.b32.xlu1 %v6954_v63, 296  ;;  %2558 = vbcast.lane.b32.xlu0 %v6954_v63, 288 }
 0x456   : > { %v8138_v32 = vpop.permute.xlu1 %2326  ;;  %v8140_v60 = vpop.permute.xlu0 %2322 }
 0x457   : > { %11639 = vst [vmem:[#allocation380_spill] sm:$0xff] %v8138_v32  ;;  %11640 = vst [vmem:[#allocation381_spill] sm:$0xff] %v8140_v60 }
 0x458   : > { %2570 = vbcast.lane.b32.xlu1 %v6954_v63, 312  ;;  %2566 = vbcast.lane.b32.xlu0 %v6954_v63, 304 }
 0x45a   : > { %v8144_v0 = vpop.permute.xlu1 %2334  ;;  %v8146_v62 = vpop.permute.xlu0 %2330 }
 0x45b   : > { %11641 = vst [vmem:[#allocation382_spill] sm:$0xff] %v8144_v0  ;;  %11642 = vst [vmem:[#allocation383_spill] sm:$0xff] %v8146_v62 }
 0x45c   : > { %2578 = vbcast.lane.b32.xlu1 %v6954_v63, 328  ;;  %2574 = vbcast.lane.b32.xlu0 %v6954_v63, 320 }
 0x45e   : > { %v8150_v58 = vpop.permute.xlu1 %2345  ;;  %v8152_v50 = vpop.permute.xlu0 %2341 }
 0x45f   : > { %11643 = vst [vmem:[#allocation384_spill] sm:$0xff] %v8150_v58 }
 0x460   : > { %2586 = vbcast.lane.b32.xlu1 %v6954_v63, 344  ;;  %2582 = vbcast.lane.b32.xlu0 %v6954_v63, 336 }
 0x462   : > { %v8156_v32 = vpop.permute.xlu1 %2353  ;;  %v8158_v60 = vpop.permute.xlu0 %2349 }
 0x463   : > { %11644 = vst [vmem:[#allocation385_spill] sm:$0xff] %v8156_v32  ;;  %11645 = vst [vmem:[#allocation386_spill] sm:$0xff] %v8158_v60 }
 0x464   : > { %2594 = vbcast.lane.b32.xlu1 %v6954_v63, 360  ;;  %2590 = vbcast.lane.b32.xlu0 %v6954_v63, 352 }
 0x466   : > { %v8162_v0 = vpop.permute.xlu1 %2361  ;;  %v8164_v62 = vpop.permute.xlu0 %2357 }
 0x467   : > { %11646 = vst [vmem:[#allocation387_spill] sm:$0xff] %v8162_v0  ;;  %11647 = vst [vmem:[#allocation388_spill] sm:$0xff] %v8164_v62 }
 0x468   : > { %2602 = vbcast.lane.b32.xlu1 %v6954_v63, 376  ;;  %2598 = vbcast.lane.b32.xlu0 %v6954_v63, 368 }
 0x46a   : > { %v8168_v56 = vpop.permute.xlu1 %2369  ;;  %v8170_v58 = vpop.permute.xlu0 %2365 }
 0x46b   : > { %11648 = vst [vmem:[#allocation389_spill] sm:$0xff] %v8168_v56  ;;  %11649 = vst [vmem:[#allocation390_spill] sm:$0xff] %v8170_v58 }
 0x46c   : > { %2613 = vbcast.lane.b32.xlu1 %v6957_v42, 264  ;;  %2609 = vbcast.lane.b32.xlu0 %v6957_v42, 256 }
 0x46e   : > { %v8174_v32 = vpop.permute.xlu1 %2377  ;;  %v8176_v60 = vpop.permute.xlu0 %2373 }
 0x46f   : > { %11650 = vst [vmem:[#allocation391_spill] sm:$0xff] %v8174_v32  ;;  %11651 = vst [vmem:[#allocation392_spill] sm:$0xff] %v8176_v60 }
 0x470   : > { %2621 = vbcast.lane.b32.xlu1 %v6957_v42, 280  ;;  %2617 = vbcast.lane.b32.xlu0 %v6957_v42, 272 }
 0x472   : > { %v8180_v0 = vpop.permute.xlu1 %2385  ;;  %v8182_v62 = vpop.permute.xlu0 %2381 }
 0x473   : > { %11652 = vst [vmem:[#allocation393_spill] sm:$0xff] %v8180_v0  ;;  %11653 = vst [vmem:[#allocation394_spill] sm:$0xff] %v8182_v62 }
 0x474   : > { %2629 = vbcast.lane.b32.xlu1 %v6957_v42, 296  ;;  %2625 = vbcast.lane.b32.xlu0 %v6957_v42, 288 }
 0x476   : > { %v8186_v63 = vpop.permute.xlu1 %2393  ;;  %v8188_v56 = vpop.permute.xlu0 %2389 }
 0x477   : > { %11654 = vst [vmem:[#allocation395_spill] sm:$0xff] %v8186_v63  ;;  %11655 = vst [vmem:[#allocation396_spill] sm:$0xff] %v8188_v56 }
 0x478   : > { %2637 = vbcast.lane.b32.xlu1 %v6957_v42, 312  ;;  %2633 = vbcast.lane.b32.xlu0 %v6957_v42, 304 }
 0x47a   : > { %v8192_v32 = vpop.permute.xlu1 %2401  ;;  %v8194_v58 = vpop.permute.xlu0 %2397 }
 0x47b   : > { %11656 = vst [vmem:[#allocation397_spill] sm:$0xff] %v8192_v32  ;;  %11657 = vst [vmem:[#allocation398_spill] sm:$0xff] %v8194_v58 }
 0x47c   : > { %2645 = vbcast.lane.b32.xlu1 %v6957_v42, 328  ;;  %2641 = vbcast.lane.b32.xlu0 %v6957_v42, 320 }
 0x47e   : > { %v8198_v0 = vpop.permute.xlu1 %2412  ;;  %v8200_v62 = vpop.permute.xlu0 %2408 }
 0x47f   : > { %11658 = vst [vmem:[#allocation399_spill] sm:$0xff] %v8198_v0 }
 0x480   : > { %2653 = vbcast.lane.b32.xlu1 %v6957_v42, 344  ;;  %2649 = vbcast.lane.b32.xlu0 %v6957_v42, 336 }
 0x482   : > { %v8204_v63 = vpop.permute.xlu1 %2420  ;;  %v8206_v56 = vpop.permute.xlu0 %2416 }
 0x483   : > { %11659 = vst [vmem:[#allocation400_spill] sm:$0xff] %v8204_v63  ;;  %11660 = vst [vmem:[#allocation401_spill] sm:$0xff] %v8206_v56 }
 0x484   : > { %2661 = vbcast.lane.b32.xlu1 %v6957_v42, 360  ;;  %2657 = vbcast.lane.b32.xlu0 %v6957_v42, 352 }
 0x486   : > { %v8210_v32 = vpop.permute.xlu1 %2428  ;;  %v8212_v58 = vpop.permute.xlu0 %2424 }
 0x487   : > { %11661 = vst [vmem:[#allocation402_spill] sm:$0xff] %v8210_v32  ;;  %11662 = vst [vmem:[#allocation403_spill] sm:$0xff] %v8212_v58 }
 0x488   : > { %2669 = vbcast.lane.b32.xlu1 %v6957_v42, 376  ;;  %2665 = vbcast.lane.b32.xlu0 %v6957_v42, 368 }
 0x48a   : > { %v8216_v60 = vpop.permute.xlu1 %2436  ;;  %v8218_v0 = vpop.permute.xlu0 %2432 }
 0x48b   : > { %11663 = vst [vmem:[#allocation404_spill] sm:$0xff] %v8216_v60  ;;  %11664 = vst [vmem:[#allocation405_spill] sm:$0xff] %v8218_v0 }
 0x48c   : > { %2680 = vbcast.lane.b32.xlu1 %v6960_v35, 264  ;;  %2676 = vbcast.lane.b32.xlu0 %v6960_v35, 256 }
 0x48e   : > { %v8222_v63 = vpop.permute.xlu1 %2444  ;;  %v8224_v56 = vpop.permute.xlu0 %2440 }
 0x48f   : > { %11665 = vst [vmem:[#allocation406_spill] sm:$0xff] %v8222_v63  ;;  %11666 = vst [vmem:[#allocation407_spill] sm:$0xff] %v8224_v56 }
 0x490   : > { %2688 = vbcast.lane.b32.xlu1 %v6960_v35, 280  ;;  %2684 = vbcast.lane.b32.xlu0 %v6960_v35, 272 }
 0x492   : > { %v8228_v32 = vpop.permute.xlu1 %2452  ;;  %v8230_v58 = vpop.permute.xlu0 %2448 }
 0x493   : > { %11667 = vst [vmem:[#allocation408_spill] sm:$0xff] %v8228_v32  ;;  %11668 = vst [vmem:[#allocation409_spill] sm:$0xff] %v8230_v58 }
 0x494   : > { %2696 = vbcast.lane.b32.xlu1 %v6960_v35, 296  ;;  %2692 = vbcast.lane.b32.xlu0 %v6960_v35, 288 }
 0x496   : > { %v8234_v42 = vpop.permute.xlu1 %2460  ;;  %v8236_v60 = vpop.permute.xlu0 %2456 }
 0x497   : > { %11669 = vst [vmem:[#allocation410_spill] sm:$0xff] %v8234_v42  ;;  %11670 = vst [vmem:[#allocation411_spill] sm:$0xff] %v8236_v60 }
 0x498   : > { %2704 = vbcast.lane.b32.xlu1 %v6960_v35, 312  ;;  %2700 = vbcast.lane.b32.xlu0 %v6960_v35, 304 }
 0x49a   : > { %v8240_v63 = vpop.permute.xlu1 %2468  ;;  %v8242_v0 = vpop.permute.xlu0 %2464 }
 0x49b   : > { %11671 = vst [vmem:[#allocation412_spill] sm:$0xff] %v8240_v63  ;;  %11672 = vst [vmem:[#allocation413_spill] sm:$0xff] %v8242_v0 }
 0x49c   : > { %2712 = vbcast.lane.b32.xlu1 %v6960_v35, 328  ;;  %2708 = vbcast.lane.b32.xlu0 %v6960_v35, 320 }
 0x49e   : > { %v8246_v32 = vpop.permute.xlu1 %2479  ;;  %v8248_v58 = vpop.permute.xlu0 %2475 }
 0x49f   : > { %11673 = vst [vmem:[#allocation414_spill] sm:$0xff] %v8246_v32  ;;  %11674 = vst [vmem:[#allocation415_spill] sm:$0xff] %v8248_v58 }
 0x4a0   : > { %2720 = vbcast.lane.b32.xlu1 %v6960_v35, 344  ;;  %2716 = vbcast.lane.b32.xlu0 %v6960_v35, 336 }
 0x4a2   : > { %v8252_v42 = vpop.permute.xlu1 %2487  ;;  %v8254_v60 = vpop.permute.xlu0 %2483 }
 0x4a3   : > { %11675 = vst [vmem:[#allocation416_spill] sm:$0xff] %v8252_v42  ;;  %11676 = vst [vmem:[#allocation417_spill] sm:$0xff] %v8254_v60 }
 0x4a4   : > { %2728 = vbcast.lane.b32.xlu1 %v6960_v35, 360  ;;  %2724 = vbcast.lane.b32.xlu0 %v6960_v35, 352 }
 0x4a6   : > { %v8258_v63 = vpop.permute.xlu1 %2495  ;;  %v8260_v0 = vpop.permute.xlu0 %2491 }
 0x4a7   : > { %11677 = vst [vmem:[#allocation418_spill] sm:$0xff] %v8258_v63  ;;  %11678 = vst [vmem:[#allocation419_spill] sm:$0xff] %v8260_v0 }
 0x4a8   : > { %2736 = vbcast.lane.b32.xlu1 %v6960_v35, 376  ;;  %2732 = vbcast.lane.b32.xlu0 %v6960_v35, 368 }
 0x4aa   : > { %v8264_v56 = vpop.permute.xlu1 %2503  ;;  %v8266_v32 = vpop.permute.xlu0 %2499 }
 0x4ab   : > { %11679 = vst [vmem:[#allocation420_spill] sm:$0xff] %v8264_v56  ;;  %11680 = vst [vmem:[#allocation421_spill] sm:$0xff] %v8266_v32 }
 0x4ae   : > { %v8268_v2 = vpop.permute.xlu1 %2511  ;;  %v8270_v42 = vpop.permute.xlu0 %2507 }
 0x4af   : > { %11681 = vst [vmem:[#allocation422_spill] sm:$0xff] %v8268_v2  ;;  %11682 = vst [vmem:[#allocation423_spill] sm:$0xff] %v8270_v42 }
 0x4b2   : > { %v8272_v60 = vpop.permute.xlu1 %2519  ;;  %v8274_v8 = vpop.permute.xlu0 %2515 }
 0x4b3   : > { %11683 = vst [vmem:[#allocation424_spill] sm:$0xff] %v8272_v60  ;;  %11684 = vst [vmem:[#allocation425_spill] sm:$0xff] %v8274_v8 }
 0x4b6   : > { %v8276_v58 = vpop.permute.xlu1 %2527  ;;  %v8278_v63 = vpop.permute.xlu0 %2523 }
 0x4b7   : > { %11685 = vst [vmem:[#allocation426_spill] sm:$0xff] %v8276_v58  ;;  %11686 = vst [vmem:[#allocation427_spill] sm:$0xff] %v8278_v63 }
 0x4ba   : > { %v8280_v0 = vpop.permute.xlu1 %2535  ;;  %v8282_v34 = vpop.permute.xlu0 %2531 }
 0x4bb   : > { %11687 = vst [vmem:[#allocation428_spill] sm:$0xff] %v8280_v0  ;;  %11688 = vst [vmem:[#allocation429_spill] sm:$0xff] %v8282_v34 }
 0x4be   : > { %v8284_v35 = vpop.permute.xlu1 %2546  ;;  %v8286_v56 = vpop.permute.xlu0 %2542 }
 0x4bf   : > { %11689 = vst [vmem:[#allocation430_spill] sm:$0xff] %v8284_v35  ;;  %11690 = vst [vmem:[#allocation431_spill] sm:$0xff] %v8286_v56 }
 0x4c2   : > { %v8288_v32 = vpop.permute.xlu1 %2554  ;;  %v8290_v2 = vpop.permute.xlu0 %2550 }
 0x4c3   : > { %11691 = vst [vmem:[#allocation432_spill] sm:$0xff] %v8288_v32  ;;  %11692 = vst [vmem:[#allocation433_spill] sm:$0xff] %v8290_v2 }
 0x4c6   : > { %v8292_v42 = vpop.permute.xlu1 %2562  ;;  %v8294_v60 = vpop.permute.xlu0 %2558 }
 0x4c7   : > { %11693 = vst [vmem:[#allocation434_spill] sm:$0xff] %v8292_v42  ;;  %11694 = vst [vmem:[#allocation435_spill] sm:$0xff] %v8294_v60 }
 0x4ca   : > { %v8296_v8 = vpop.permute.xlu1 %2570  ;;  %v8298_v58 = vpop.permute.xlu0 %2566 }
 0x4cb   : > { %11695 = vst [vmem:[#allocation436_spill] sm:$0xff] %v8296_v8  ;;  %11696 = vst [vmem:[#allocation437_spill] sm:$0xff] %v8298_v58 }
 0x4ce   : > { %v8300_v63 = vpop.permute.xlu1 %2578  ;;  %v8302_v0 = vpop.permute.xlu0 %2574 }
 0x4cf   : > { %11697 = vst [vmem:[#allocation438_spill] sm:$0xff] %v8300_v63  ;;  %11698 = vst [vmem:[#allocation439_spill] sm:$0xff] %v8302_v0  ;;  %v6318_v63 = vmov 1983009808  }
 0x4d0   : > { %v3128_v0 = vunpack.c.l.s4 %v6318_v63  ;;  %v8337_v63 = vsel %vm2738_vm4, %v6970_v15, %v7286_v12  ;;  %v8357_v15 = vsel %vm2738_vm4, %v6972_v4, %v7298_v23  ;;  %v8379_v4 = vsel %vm2738_vm4, %v6982_v36, %v7310_v55  ;;  %v11720_v55 = vld [vmem:[#allocation16_spill] sm:$0xff]  ;;  %v11733_v23 = vld [vmem:[#allocation22_spill] sm:$0xff] }
 0x4d1   : > { %11713 = vst [vmem:[#allocation454_spill] sm:$0xff] %v8379_v4  ;;  %v8401_v36 = vsel %vm2738_vm4, %v6990_v48, %v7322_v30  ;;  %v8421_v48 = vsel %vm2738_vm4, %v6998_v45, %v7334_v54  ;;  %v11725_v45 = vld [vmem:[#allocation128_spill] sm:$0xff]  ;;  %v11726_v54 = vld [vmem:[#allocation19_spill] sm:$0xff] }
 0x4d2   : > { %v8304_v34 = vpop.permute.xlu1 %2586  ;;  %v8306_v35 = vpop.permute.xlu0 %2582  ;;  %11717 = vst [vmem:[#allocation458_spill] sm:$0xff] %v8401_v36  ;;  %v8444_v12 = vsel %vm2738_vm4, %v11726_v54, %v11725_v45  ;;  %v11736_v30 = vld [vmem:[#allocation23_spill] sm:$0xff]  ;;  %v11745_v45 = vld [vmem:[#allocation26_spill] sm:$0xff] }
 0x4d3   : > { %11699 = vst [vmem:[#allocation440_spill] sm:$0xff] %v8304_v34  ;;  %11700 = vst [vmem:[#allocation441_spill] sm:$0xff] %v8306_v35  ;;  %v3192_v34 = vunpack.c.l.s4 %v6319_v14  ;;  %v3129_v35 = vunpack.c.0.s8 %v3128_v0  ;;  %v8342_v14 = vsel %vm2738_vm4, %v6966_v1, %v7288_v31  ;;  %v8362_v1 = vsel %vm2738_vm4, %v6974_v44, %v7300_v57  ;;  %v11779_v36 = vld [vmem:[#allocation146_spill] sm:$0xff] }
 0x4d4   : > { %v8384_v44 = vsel %vm2738_vm4, %v6984_v10, %v7312_v61  ;;  %v8406_v10 = vsel %vm2738_vm4, %v6992_v7, %v7324_v22  ;;  %v2755_v7 = vsel %vm2738_vm4, %v7000_v17, %v7336_v53  ;;  %v11727_v17 = vld [vmem:[#allocation20_spill] sm:$0xff]  ;;  %v11729_v53 = vld [vmem:[#allocation129_spill] sm:$0xff]  ;;  %v11732_v61 = vld [vmem:[#allocation130_spill] sm:$0xff] }
 0x4d6   : > { %v8308_v56 = vpop.permute.xlu1 %2594  ;;  %v8310_v32 = vpop.permute.xlu0 %2590 }
 0x4d7   : > { %11701 = vst [vmem:[#allocation442_spill] sm:$0xff] %v8308_v56  ;;  %11702 = vst [vmem:[#allocation443_spill] sm:$0xff] %v8310_v32  ;;  %v3193_v32 = vunpack.c.0.s8 %v3192_v34  ;;  %v8347_v34 = vsel %vm2738_vm4, %v6968_v3, %v7292_v27  ;;  %v8367_v3 = vsel %vm2738_vm4, %v6978_v46, %v7304_v26  ;;  %v8389_v46 = vsel %vm2738_vm4, %v6986_v21, %v7316_v20  ;;  %v11730_v20 = vld [vmem:[#allocation21_spill] sm:$0xff]  ;;  %v11735_v27 = vld [vmem:[#allocation131_spill] sm:$0xff] }
 0x4d8   : > { %11710 = vst [vmem:[#allocation451_spill] sm:$0xff] %v8367_v3  ;;  %11714 = vst [vmem:[#allocation455_spill] sm:$0xff] %v8389_v46  ;;  %v8411_v21 = vsel %vm2738_vm4, %v6994_v41, %v7328_v16  ;;  %v11721_v41 = vld [vmem:[#allocation126_spill] sm:$0xff]  ;;  %v11722_v16 = vld [vmem:[#allocation17_spill] sm:$0xff]  ;;  %v8459_v26 = vsel %vm2738_vm4, %v11733_v23, %v11732_v61  ;;  %v8464_v0 = vsel %vm2738_vm4, %v11736_v30, %v11735_v27 }
 0x4d9   : > { %11718 = vst [vmem:[#allocation459_spill] sm:$0xff] %v8411_v21  ;;  %v8434_v22 = vsel %vm2738_vm4, %v11722_v16, %v11721_v41  ;;  %11734 = vst [vmem:[#allocation17_spill] sm:$0xff] %v8459_v26  ;;  %v11741_v41 = vld [vmem:[#allocation133_spill] sm:$0xff]  ;;  %v11749_v61 = vld [vmem:[#allocation136_spill] sm:$0xff] }
 0x4da   : > { %v8312_v2 = vpop.permute.xlu0 %2598  ;;  %v8314_v42 = vpop.permute.xlu1 %2602  ;;  %v11742_v16 = vld [vmem:[#allocation25_spill] sm:$0xff]  ;;  %v11750_v23 = vld [vmem:[#allocation28_spill] sm:$0xff]  ;;  %v11777_v21 = vld [vmem:[#allocation47_spill] sm:$0xff] }
 0x4db   : > { %11703 = vst [vmem:[#allocation444_spill] sm:$0xff] %v8312_v2  ;;  %11704 = vst [vmem:[#allocation445_spill] sm:$0xff] %v8314_v42  ;;  %v8329_v42 = vsub.s32 %v3129_v35, %v6600_v19  ;;  %v11738_v35 = vld [vmem:[#allocation24_spill] sm:$0xff]  ;;  %v8491_v27 = vsel %vm2738_vm4, %v11750_v23, %v11749_v61  ;;  %v11762_v23 = vld [vmem:[#allocation141_spill] sm:$0xff] }
 0x4dc   : > { %11751 = vst [vmem:[#allocation20_spill] sm:$0xff] %v8491_v27  ;;  %v11763_v27 = vld [vmem:[#allocation33_spill] sm:$0xff]  ;;  %v11788_v46 = vld [vmem:[#allocation42_spill] sm:$0xff]  ;;  %v11834_v3 = vld [vmem:[#allocation56_spill] sm:$0xff] }
 0x4de   : > { %v8316_v60 = vpop.permute.xlu0 %2609  ;;  %v8318_v8 = vpop.permute.xlu1 %2613 }
 0x4df   : > { %11705 = vst [vmem:[#allocation446_spill] sm:$0xff] %v8318_v8  ;;  %v8332_v8 = vsub.s32 %v3193_v32, %v6600_v19  ;;  %v8352_v19 = vsel %vm2738_vm4, %v6964_v5, %v7294_v24  ;;  %v8374_v5 = vsel %vm2738_vm4, %v6980_v25, %v7306_v38  ;;  %v8396_v25 = vsel %vm2738_vm4, %v6988_v33, %v7318_v40  ;;  %v11737_v32 = vld [vmem:[#allocation132_spill] sm:$0xff] }
 0x4e0   : > { %11712 = vst [vmem:[#allocation453_spill] sm:$0xff] %v8374_v5  ;;  %11716 = vst [vmem:[#allocation457_spill] sm:$0xff] %v8396_v25  ;;  %v8416_v33 = vsel %vm2738_vm4, %v6996_v43, %v7330_v59  ;;  %v8429_v40 = vsel %vm2738_vm4, %v11720_v55, %v7340_v39  ;;  %v11723_v43 = vld [vmem:[#allocation127_spill] sm:$0xff]  ;;  %v11724_v59 = vld [vmem:[#allocation18_spill] sm:$0xff]  ;;  %v8449_v39 = vsel %vm2738_vm4, %v11727_v17, %v7352_v37 }
 0x4e1   : > { %11719 = vst [vmem:[#allocation460_spill] sm:$0xff] %v8416_v33  ;;  %v8439_v38 = vsel %vm2738_vm4, %v11724_v59, %v11723_v43  ;;  %11728 = vst [vmem:[#allocation16_spill] sm:$0xff] %v8449_v39  ;;  %v8454_v24 = vsel %vm2738_vm4, %v11730_v20, %v11729_v53  ;;  %v8469_v37 = vsel %vm2738_vm4, %v11738_v35, %v11737_v32  ;;  %v11744_v59 = vld [vmem:[#allocation134_spill] sm:$0xff]  ;;  %v11747_v17 = vld [vmem:[#allocation135_spill] sm:$0xff] }
 0x4e2   : > { %v8320_v58 = vpop.permute.xlu0 %2617  ;;  %v8324_v56 = vpop.permute.xlu1 %2621  ;;  %11731 = vst [vmem:[#allocation126_spill] sm:$0xff] %v8454_v24  ;;  %11739 = vst [vmem:[#allocation127_spill] sm:$0xff] %v8469_v37  ;;  %v8476_v43 = vsel %vm2738_vm4, %v11742_v16, %v11741_v41  ;;  %v8481_v54 = vsel %vm2738_vm4, %v11745_v45, %v11744_v59  ;;  %v11748_v53 = vld [vmem:[#allocation27_spill] sm:$0xff]  ;;  %v11753_v32 = vld [vmem:[#allocation137_spill] sm:$0xff]  ;;  %v8516_v37 = vsel %vm2738_vm4, %v11763_v27, %v11762_v23 }
 0x4e3   : > { %11706 = vst [vmem:[#allocation447_spill] sm:$0xff] %v8320_v58  ;;  %11708 = vst [vmem:[#allocation449_spill] sm:$0xff] %v8324_v56  ;;  %v8486_v20 = vsel %vm2738_vm4, %v11748_v53, %v11747_v17  ;;  %v11754_v35 = vld [vmem:[#allocation29_spill] sm:$0xff]  ;;  %v11756_v16 = vld [vmem:[#allocation138_spill] sm:$0xff] }
 0x4e4   : > { %11743 = vst [vmem:[#allocation128_spill] sm:$0xff] %v8476_v43  ;;  %11746 = vst [vmem:[#allocation19_spill] sm:$0xff] %v8481_v54  ;;  %v8498_v41 = vsel %vm2738_vm4, %v11754_v35, %v11753_v32  ;;  %v11757_v59 = vld [vmem:[#allocation30_spill] sm:$0xff]  ;;  %v11759_v17 = vld [vmem:[#allocation31_spill] sm:$0xff] }
 0x4e5   : > { %11755 = vst [vmem:[#allocation21_spill] sm:$0xff] %v8498_v41  ;;  %v8503_v45 = vsel %vm2738_vm4, %v11757_v59, %v11756_v16  ;;  %v11760_v54 = vld [vmem:[#allocation140_spill] sm:$0xff]  ;;  %v11764_v32 = vld [vmem:[#allocation142_spill] sm:$0xff]  ;;  %v11766_v16 = vld [vmem:[#allocation143_spill] sm:$0xff] }
 0x4e6   : > { %v8322_v11 = vpop.permute.xlu0 %2625  ;;  %v8369_v31 = vpop.permute.xlu1 %2629  ;;  %v11761_v43 = vld [vmem:[#allocation32_spill] sm:$0xff]  ;;  %v11765_v35 = vld [vmem:[#allocation34_spill] sm:$0xff]  ;;  %v11767_v59 = vld [vmem:[#allocation35_spill] sm:$0xff] }
 0x4e7   : > { %11707 = vst [vmem:[#allocation448_spill] sm:$0xff] %v8322_v11  ;;  %11711 = vst [vmem:[#allocation452_spill] sm:$0xff] %v8369_v31  ;;  %v8511_v61 = vsel %vm2738_vm4, %v11761_v43, %v11760_v54  ;;  %v8521_v41 = vsel %vm2738_vm4, %v11765_v35, %v11764_v32  ;;  %v8526_v26 = vsel %vm2738_vm4, %v11767_v59, %v11766_v16  ;;  %v11770_v54 = vld [vmem:[#allocation144_spill] sm:$0xff]  ;;  %v11773_v23 = vld [vmem:[#allocation145_spill] sm:$0xff] }
 0x4e8   : > { %v11774_v33 = vld [vmem:[#allocation38_spill] sm:$0xff]  ;;  %v11781_v25 = vld [vmem:[#allocation147_spill] sm:$0xff]  ;;  %v11862_v31 = vld [vmem:[#allocation68_spill] sm:$0xff] }
 0x4e9   : > { %v8541_v32 = vsel %vm2738_vm4, %v11774_v33, %v11773_v23  ;;  %v11776_v35 = vld [vmem:[#allocation154_spill] sm:$0xff]  ;;  %v11784_v23 = vld [vmem:[#allocation148_spill] sm:$0xff]  ;;  %v11832_v39 = vld [vmem:[#allocation55_spill] sm:$0xff] }
 0x4ea   : > { %v8326_v2 = vpop.permute.xlu0 %2633  ;;  %v8493_v30 = vpop.permute.xlu1 %2637  ;;  %11775 = vst [vmem:[#allocation131_spill] sm:$0xff] %v8541_v32  ;;  %v2787_v16 = vsel %vm2738_vm4, %v11777_v21, %v11776_v35  ;;  %v11785_v32 = vld [vmem:[#allocation41_spill] sm:$0xff]  ;;  %v11857_v24 = vld [vmem:[#allocation66_spill] sm:$0xff] }
 0x4eb   : > { %11709 = vst [vmem:[#allocation450_spill] sm:$0xff] %v8326_v2  ;;  %11752 = vst [vmem:[#allocation129_spill] sm:$0xff] %v8493_v30  ;;  %v2916_v33 = vsel %vm2867_vm5, %v2787_v16, %v7816_v28  ;;  %v8563_v21 = vsel %vm2738_vm4, %v11785_v32, %v11784_v23  ;;  %v11787_v35 = vld [vmem:[#allocation149_spill] sm:$0xff]  ;;  %v11792_v28 = vld [vmem:[#allocation151_spill] sm:$0xff] }
 0x4ec   : > { %11786 = vst [vmem:[#allocation24_spill] sm:$0xff] %v8563_v21  ;;  %v8568_v4 = vsel %vm2738_vm4, %v11788_v46, %v11787_v35  ;;  %v11793_v16 = vld [vmem:[#allocation44_spill] sm:$0xff]  ;;  %v11795_v32 = vld [vmem:[#allocation95_spill] sm:$0xff]  ;;  %v2884_v46 = vsel %vm2867_vm5, %v2755_v7, %v7720_v51  ;;  %v11839_v2 = vld [vmem:[#allocation165_spill] sm:$0xff] }
 0x4ed   : > { %11789 = vst [vmem:[#allocation133_spill] sm:$0xff] %v8568_v4  ;;  %v2835_v23 = vsel %vm2738_vm4, %v11795_v32, %v7576_v47  ;;  %v11802_v32 = vld [vmem:[#allocation153_spill] sm:$0xff]  ;;  %v11821_v4 = vld [vmem:[#allocation51_spill] sm:$0xff]  ;;  %v11823_v21 = vld [vmem:[#allocation52_spill] sm:$0xff] }
 0x4ee   : > { %v8391_v57 = vpop.permute.xlu0 %2641  ;;  %v11861_v5 = vld [vmem:[#allocation174_spill] sm:$0xff]  ;;  %v11918_v58 = vld [vmem:[#allocation201_spill] sm:$0xff] }
 0x4ef   : > { %11715 = vst [vmem:[#allocation456_spill] sm:$0xff] %v8391_v57  ;;  %v11892_v57 = vld [vmem:[#allocation80_spill] sm:$0xff] }
 0x4f2   : > { %v8471_v55 = vpop.permute.xlu0 %2649 }
 0x4f3   : > { %11740 = vst [vmem:[#allocation18_spill] sm:$0xff] %v8471_v55  ;;  %v11758_v55 = vld [vmem:[#allocation139_spill] sm:$0xff] }
 0x4f4   : > { %v2771_v53 = vsel %vm2738_vm4, %v11759_v17, %v11758_v55  ;;  %v11768_v55 = vld [vmem:[#allocation36_spill] sm:$0xff]  ;;  %v11771_v17 = vld [vmem:[#allocation37_spill] sm:$0xff] }
 0x4f5   : > { %v8531_v43 = vsel %vm2738_vm4, %v11768_v55, %v7400_v49  ;;  %v8536_v27 = vsel %vm2738_vm4, %v11771_v17, %v11770_v54  ;;  %v11780_v49 = vld [vmem:[#allocation39_spill] sm:$0xff]  ;;  %v11782_v54 = vld [vmem:[#allocation40_spill] sm:$0xff]  ;;  %v2900_v35 = vsel %vm2867_vm5, %v2771_v53, %v7768_v52  ;;  %v2868_v53 = vsel %vm2867_vm5, %v8342_v14, %v7672_v29  ;;  %v11806_v29 = vld [vmem:[#allocation354_spill] sm:$0xff] }
 0x4f6   : > { %11769 = vst [vmem:[#allocation130_spill] sm:$0xff] %v8531_v43  ;;  %11772 = vst [vmem:[#allocation22_spill] sm:$0xff] %v8536_v27  ;;  %v8546_v59 = vpop.permute.xlu0 %2657  ;;  %v8551_v55 = vsel %vm2738_vm4, %v11780_v49, %v11779_v36  ;;  %v8556_v17 = vsel %vm2738_vm4, %v11782_v54, %v11781_v25  ;;  %v11790_v36 = vld [vmem:[#allocation150_spill] sm:$0xff]  ;;  %v11791_v49 = vld [vmem:[#allocation43_spill] sm:$0xff]  ;;  %v8577_v25 = vsel %vm2996_vm6, %v2916_v33, %v8200_v62 }
 0x4f7   : > { %11778 = vst [vmem:[#allocation23_spill] sm:$0xff] %v8546_v59  ;;  %11783 = vst [vmem:[#allocation132_spill] sm:$0xff] %v8556_v17  ;;  %v8573_v30 = vsel %vm2738_vm4, %v11791_v49, %v11790_v36  ;;  %v8582_v54 = vsel %vm2738_vm4, %v11793_v16, %v11792_v28  ;;  %v8591_v36 = vpop.permute.xlu1 %2645  ;;  %v11797_v49 = vld [vmem:[#allocation152_spill] sm:$0xff]  ;;  %v11798_v62 = vld [vmem:[#allocation45_spill] sm:$0xff]  ;;  %v2964_v28 = vsel %vm2867_vm5, %v2835_v23, %v7960_v13 }
 0x4f8   : > { %11794 = vst [vmem:[#allocation25_spill] sm:$0xff] %v8582_v54  ;;  %11796 = vst [vmem:[#allocation134_spill] sm:$0xff] %v8591_v36  ;;  %v8596_v33 = vsel %vm2738_vm4, %v11798_v62, %v11797_v49  ;;  %v8602_v16 = vsel %vm2996_vm6, %v2884_v46, %v8104_v18  ;;  %v8606_v47 = vsel %vm2996_vm6, %v2900_v35, %v8152_v50  ;;  %v11801_v52 = vld [vmem:[#allocation63_spill] sm:$0xff]  ;;  %v11803_v23 = vld [vmem:[#allocation46_spill] sm:$0xff] }
 0x4f9   : > { %11799 = vst [vmem:[#allocation26_spill] sm:$0xff] %v8596_v33  ;;  %v2803_v7 = vsel %vm2738_vm4, %v11801_v52, %v7480_v9  ;;  %v3141_v13 = vcombine.low %v8602_v16, %v8577_v25  ;;  %v3093_v18 = vsel %vm2996_vm6, %v2964_v28, %v8316_v60  ;;  %v8623_v50 = vsel %vm2738_vm4, %v11803_v23, %v11802_v32  ;;  %v11804_v46 = vld [vmem:[#allocation155_spill] sm:$0xff]  ;;  %v11805_v35 = vld [vmem:[#allocation48_spill] sm:$0xff]  ;;  %v11807_v62 = vld [vmem:[#allocation185_spill] sm:$0xff] }
 0x4fa   : > { %v8608_v51 = vpop.permute.xlu0 %2665  ;;  %v8628_v49 = vsel %vm2738_vm4, %v11805_v35, %v11804_v46  ;;  %v2932_v9 = vsel %vm2867_vm5, %v2803_v7, %v7864_v6  ;;  %v8634_v14 = vsel %vm2996_vm6, %v2868_v53, %v11806_v29  ;;  %v11808_v52 = vld [vmem:[#allocation79_spill] sm:$0xff]  ;;  %v11809_v28 = vld [vmem:[#allocation216_spill] sm:$0xff]  ;;  %v11813_v6 = vld [vmem:[#allocation49_spill] sm:$0xff] }
 0x4fb   : > { %11800 = vst [vmem:[#allocation135_spill] sm:$0xff] %v8608_v51  ;;  %v2819_v60 = vsel %vm2738_vm4, %v11808_v52, %v11807_v62  ;;  %v11810_v54 = vld [vmem:[#allocation111_spill] sm:$0xff]  ;;  %v3125_v23 = vcombine.low %v8634_v14, %v8606_v47  ;;  %v11812_v17 = vld [vmem:[#allocation156_spill] sm:$0xff]  ;;  %v11815_v51 = vld [vmem:[#allocation338_spill] sm:$0xff] }
 0x4fc   : > { %v2851_v32 = vsel %vm2738_vm4, %v11810_v54, %v11809_v28  ;;  %v11811_v46 = vld [vmem:[#allocation415_spill] sm:$0xff]  ;;  %v8649_v7 = vsel %vm2738_vm4, %v11813_v6, %v11812_v17  ;;  %v11816_v54 = vld [vmem:[#allocation157_spill] sm:$0xff]  ;;  %v11817_v28 = vld [vmem:[#allocation50_spill] sm:$0xff]  ;;  %v8665_v6 = vpop.permute.xlu1 %2653 }
 0x4fd   : > { %v3061_v35 = vsel %vm2996_vm6, %v2932_v9, %v11811_v46  ;;  %v11814_v53 = vld [vmem:[#allocation307_spill] sm:$0xff]  ;;  %v2980_v62 = vsel %vm2867_vm5, %v2851_v32, %v11815_v51  ;;  %v8658_v33 = vsel %vm2738_vm4, %v11817_v28, %v11816_v54  ;;  %v8661_v9 = vrot.slane %v3141_v13, %v8329_v42  ;;  %11819 = vst [vmem:[#allocation27_spill] sm:$0xff] %v8665_v6  ;;  %v11825_v28 = vld [vmem:[#allocation160_spill] sm:$0xff]  ;;  %v11826_v13 = vld [vmem:[#allocation53_spill] sm:$0xff] }
 0x4fe   : > { %v2948_v29 = vsel %vm2867_vm5, %v2819_v60, %v11814_v53  ;;  %v3157_v52 = vcombine.low %v3061_v35, %v3093_v18  ;;  %v2677_v36 = vpop.permute.xlu0 %2676  ;;  %v11818_v46 = vld [vmem:[#allocation431_spill] sm:$0xff]  ;;  %v11820_v53 = vld [vmem:[#allocation158_spill] sm:$0xff]  ;;  %v8681_v43 = vsel %vm2738_vm4, %v11826_v13, %v11825_v28  ;;  %v11836_v28 = vld [vmem:[#allocation164_spill] sm:$0xff] }
 0x4ff   : > { %v3077_v17 = vsel %vm2996_vm6, %v2948_v29, %v11818_v46  ;;  %v3109_v60 = vsel %vm2996_vm6, %v2980_v62, %v2677_v36  ;;  %v8671_v51 = vsel %vm2738_vm4, %v11821_v4, %v11820_v53  ;;  %v11822_v32 = vld [vmem:[#allocation159_spill] sm:$0xff]  ;;  %11827 = vst [vmem:[#allocation28_spill] sm:$0xff] %v8681_v43  ;;  %v11828_v46 = vld [vmem:[#allocation161_spill] sm:$0xff]  ;;  %v11829_v6 = vld [vmem:[#allocation54_spill] sm:$0xff] }
 0x500   : > { %v8676_v54 = vsel %vm2738_vm4, %v11823_v21, %v11822_v32  ;;  %v3173_v29 = vcombine.low %v3077_v17, %v3109_v60  ;;  %v8686_v36 = vsel %vm2738_vm4, %v11829_v6, %v11828_v46  ;;  %v11831_v62 = vld [vmem:[#allocation162_spill] sm:$0xff]  ;;  %v11833_v53 = vld [vmem:[#allocation163_spill] sm:$0xff]  ;;  %v3133_v32 = vrot.slane %v3125_v23, %v8329_v42  ;;  %v11837_v13 = vld [vmem:[#allocation57_spill] sm:$0xff] }
 0x501   : > { %11824 = vst [vmem:[#allocation136_spill] sm:$0xff] %v8676_v54  ;;  %11830 = vst [vmem:[#allocation137_spill] sm:$0xff] %v8686_v36  ;;  %v8691_v4 = vsel %vm2738_vm4, %v11832_v39, %v11831_v62  ;;  %v8696_v21 = vsel %vm2738_vm4, %v11834_v3, %v11833_v53  ;;  %v8702_v54 = vsel %vm2738_vm4, %v11837_v13, %v11836_v28  ;;  %v11840_v6 = vld [vmem:[#allocation58_spill] sm:$0xff]  ;;  %v11843_v43 = vld [vmem:[#allocation59_spill] sm:$0xff] }
 0x502   : > { %11835 = vst [vmem:[#allocation29_spill] sm:$0xff] %v8696_v21  ;;  %11838 = vst [vmem:[#allocation138_spill] sm:$0xff] %v8702_v54  ;;  %v8707_v46 = vsel %vm2738_vm4, %v11840_v6, %v11839_v2  ;;  %v3165_v39 = vrot.slane %v3157_v52, %v8329_v42  ;;  %v3181_v62 = vrot.slane %v3173_v29, %v8329_v42  ;;  %v11842_v36 = vld [vmem:[#allocation166_spill] sm:$0xff]  ;;  %v11844_v23 = vld [vmem:[#allocation167_spill] sm:$0xff] }
 0x503   : > { %11841 = vst [vmem:[#allocation30_spill] sm:$0xff] %v8707_v46  ;;  %v8714_v3 = vsel %vm2738_vm4, %v11843_v43, %v11842_v36  ;;  %v11845_v53 = vld [vmem:[#allocation60_spill] sm:$0xff]  ;;  %v3190_v28 = vcombine.high %v3133_v32, %v8661_v9  ;;  %v3174_v13 = vcombine.high %v3077_v17, %v3109_v60  ;;  %v11848_v2 = vld [vmem:[#allocation61_spill] sm:$0xff]  ;;  %v11851_v29 = vld [vmem:[#allocation62_spill] sm:$0xff] }
 0x504   : > { %v8719_v21 = vsel %vm2738_vm4, %v11845_v53, %v11844_v23  ;;  %v11847_v54 = vld [vmem:[#allocation168_spill] sm:$0xff]  ;;  %v11850_v52 = vld [vmem:[#allocation169_spill] sm:$0xff]  ;;  %v11852_v43 = vld [vmem:[#allocation170_spill] sm:$0xff]  ;;  %v3222_v23 = vcombine.high %v3165_v39, %v3181_v62 }
 0x505   : > { %11846 = vst [vmem:[#allocation139_spill] sm:$0xff] %v8719_v21  ;;  %v8725_v6 = vsel %vm2738_vm4, %v11848_v2, %v11847_v54  ;;  %v8730_v46 = vsel %vm2738_vm4, %v11851_v29, %v11850_v52  ;;  %v11853_v36 = vld [vmem:[#allocation64_spill] sm:$0xff]  ;;  %v11854_v53 = vld [vmem:[#allocation171_spill] sm:$0xff]  ;;  %v11855_v21 = vld [vmem:[#allocation65_spill] sm:$0xff]  ;;  %v3142_v2 = vcombine.high %v8602_v16, %v8577_v25  ;;  %v3158_v52 = vcombine.high %v3061_v35, %v3093_v18  ;;  %v8749_v29 = vpop.permute.xlu1 %2661 }
 0x506   : > { %11849 = vst [vmem:[#allocation31_spill] sm:$0xff] %v8725_v6  ;;  %v8735_v27 = vsel %vm2738_vm4, %v11853_v36, %v11852_v43  ;;  %v8740_v17 = vsel %vm2738_vm4, %v11855_v21, %v11854_v53  ;;  %v11856_v60 = vld [vmem:[#allocation172_spill] sm:$0xff]  ;;  %11858 = vst [vmem:[#allocation140_spill] sm:$0xff] %v8749_v29  ;;  %v11859_v6 = vld [vmem:[#allocation173_spill] sm:$0xff]  ;;  %v8759_v21 = vsel %vm2738_vm4, %v11862_v31, %v11861_v5 }
 0x507   : > { %v8745_v54 = vsel %vm2738_vm4, %v11857_v24, %v11856_v60  ;;  %v11860_v43 = vld [vmem:[#allocation67_spill] sm:$0xff]  ;;  %11863 = vst [vmem:[#allocation32_spill] sm:$0xff] %v8759_v21  ;;  %v11865_v59 = vld [vmem:[#allocation69_spill] sm:$0xff]  ;;  %v8767_v25 = vrot.slane %v3222_v23, %v8332_v8  ;;  %v11867_v16 = vld [vmem:[#allocation176_spill] sm:$0xff]  ;;  %v8777_v60 = vrot.slane %v3190_v28, %v8332_v8  ;;  %v8780_v31 = vrot.slane %v3174_v13, %v8329_v42 }
 0x508   : > { %v8754_v36 = vsel %vm2738_vm4, %v11860_v43, %v11859_v6  ;;  %v11864_v53 = vld [vmem:[#allocation175_spill] sm:$0xff]  ;;  %v11868_v18 = vld [vmem:[#allocation70_spill] sm:$0xff]  ;;  %v3126_v6 = vcombine.high %v8634_v14, %v8606_v47  ;;  %v11870_v5 = vld [vmem:[#allocation177_spill] sm:$0xff]  ;;  %v3221_v14 = vcombine.low %v3165_v39, %v3181_v62  ;;  %v8803_v21 = vrot.slane %v3142_v2, %v8329_v42 }
 0x509   : > { %v8764_v24 = vsel %vm2738_vm4, %v11865_v59, %v11864_v53  ;;  %v8772_v35 = vsel %vm2738_vm4, %v11868_v18, %v11867_v16  ;;  %v11871_v59 = vld [vmem:[#allocation71_spill] sm:$0xff]  ;;  %v11872_v23 = vld [vmem:[#allocation178_spill] sm:$0xff]  ;;  %v11873_v53 = vld [vmem:[#allocation72_spill] sm:$0xff] }
 0x50a   : > { %11866 = vst [vmem:[#allocation141_spill] sm:$0xff] %v8764_v24  ;;  %11869 = vst [vmem:[#allocation33_spill] sm:$0xff] %v8772_v35  ;;  %v8785_v43 = vsel %vm2738_vm4, %v11871_v59, %v11870_v5  ;;  %v8790_v29 = vsel %vm2738_vm4, %v11873_v53, %v11872_v23  ;;  %v11875_v16 = vld [vmem:[#allocation179_spill] sm:$0xff]  ;;  %v11876_v18 = vld [vmem:[#allocation73_spill] sm:$0xff]  ;;  %v8806_v5 = vrot.slane %v3158_v52, %v8329_v42 }
 0x50b   : > { %11874 = vst [vmem:[#allocation142_spill] sm:$0xff] %v8790_v29  ;;  %v8795_v47 = vsel %vm2738_vm4, %v11876_v18, %v11875_v16  ;;  %v11878_v28 = vld [vmem:[#allocation180_spill] sm:$0xff]  ;;  %v11879_v35 = vld [vmem:[#allocation74_spill] sm:$0xff]  ;;  %v3255_v59 = vcombine.low %v8777_v60, %v8767_v25  ;;  %v11881_v23 = vld [vmem:[#allocation181_spill] sm:$0xff]  ;;  %v3189_v52 = vcombine.low %v3133_v32, %v8661_v9 }
 0x50c   : > { %11877 = vst [vmem:[#allocation34_spill] sm:$0xff] %v8795_v47  ;;  %v8800_v13 = vsel %vm2738_vm4, %v11879_v35, %v11878_v28  ;;  %v11882_v53 = vld [vmem:[#allocation75_spill] sm:$0xff]  ;;  %v11883_v39 = vld [vmem:[#allocation182_spill] sm:$0xff]  ;;  %v11884_v62 = vld [vmem:[#allocation76_spill] sm:$0xff] }
 0x50d   : > { %11880 = vst [vmem:[#allocation143_spill] sm:$0xff] %v8800_v13  ;;  %v8813_v16 = vsel %vm2738_vm4, %v11882_v53, %v11881_v23  ;;  %v8818_v18 = vsel %vm2738_vm4, %v11884_v62, %v11883_v39  ;;  %v11886_v35 = vld [vmem:[#allocation183_spill] sm:$0xff]  ;;  %v11887_v28 = vld [vmem:[#allocation77_spill] sm:$0xff]  ;;  %v11889_v29 = vld [vmem:[#allocation184_spill] sm:$0xff]  ;;  %v8835_v53 = vrot.slane %v3126_v6, %v8329_v42  ;;  %v8837_v39 = vpop.permute.xlu1 %2669  ;;  %v3237_v62 = vcombine.low %v8806_v5, %v8780_v31 }
 0x50e   : > { %11885 = vst [vmem:[#allocation35_spill] sm:$0xff] %v8818_v18  ;;  %v8823_v2 = vsel %vm2738_vm4, %v11887_v28, %v11886_v35  ;;  %v11890_v13 = vld [vmem:[#allocation78_spill] sm:$0xff]  ;;  %11893 = vst [vmem:[#allocation144_spill] sm:$0xff] %v8837_v39  ;;  %5306 = vrot.lane.b32.xlu1 %v3255_v59, %s11226_s25  ;;  %v11894_v9 = vld [vmem:[#allocation187_spill] sm:$0xff]  ;;  %v8858_v39 = vrot.slane %v3221_v14, %v8332_v8 }
 0x50f   : > { %11888 = vst [vmem:[#allocation36_spill] sm:$0xff] %v8823_v2  ;;  %v2820_v47 = vsel %vm2738_vm4, %v11890_v13, %v11889_v29  ;;  %v11891_v24 = vld [vmem:[#allocation186_spill] sm:$0xff]  ;;  %v11895_v32 = vld [vmem:[#allocation81_spill] sm:$0xff]  ;;  %v11897_v13 = vld [vmem:[#allocation188_spill] sm:$0xff] }
 0x510   : > { %v8832_v23 = vsel %vm2738_vm4, %v11892_v57, %v11891_v24  ;;  %v8845_v29 = vsel %vm2738_vm4, %v11895_v32, %v11894_v9  ;;  %v11898_v35 = vld [vmem:[#allocation82_spill] sm:$0xff]  ;;  %v11900_v24 = vld [vmem:[#allocation189_spill] sm:$0xff]  ;;  %v11901_v6 = vld [vmem:[#allocation83_spill] sm:$0xff]  ;;  %11903 = vst [vmem:[#allocation154_spill] sm:$0xff] %v8858_v39 }
 0x511   : > { %11896 = vst [vmem:[#allocation37_spill] sm:$0xff] %v8845_v29  ;;  %v8850_v57 = vsel %vm2738_vm4, %v11898_v35, %v11897_v13  ;;  %v8855_v28 = vsel %vm2738_vm4, %v11901_v6, %v11900_v24  ;;  %v11904_v18 = vld [vmem:[#allocation190_spill] sm:$0xff]  ;;  %v11905_v59 = vld [vmem:[#allocation84_spill] sm:$0xff]  ;;  %v11907_v9 = vld [vmem:[#allocation191_spill] sm:$0xff]  ;;  %v3205_v24 = vcombine.low %v8835_v53, %v8803_v21 }
 0x512   : > { %11899 = vst [vmem:[#allocation145_spill] sm:$0xff] %v8850_v57  ;;  %11902 = vst [vmem:[#allocation38_spill] sm:$0xff] %v8855_v28  ;;  %v8863_v2 = vsel %vm2738_vm4, %v11905_v59, %v11904_v18  ;;  %v11908_v32 = vld [vmem:[#allocation85_spill] sm:$0xff]  ;;  %v11911_v35 = vld [vmem:[#allocation87_spill] sm:$0xff] }
 0x513   : > { %11906 = vst [vmem:[#allocation47_spill] sm:$0xff] %v8863_v2  ;;  %v8868_v11 = vsel %vm2738_vm4, %v11908_v32, %v11907_v9  ;;  %v11910_v13 = vld [vmem:[#allocation193_spill] sm:$0xff]  ;;  %v11914_v6 = vld [vmem:[#allocation91_spill] sm:$0xff]  ;;  %v11916_v18 = vld [vmem:[#allocation200_spill] sm:$0xff] }
 0x514   : > { %11909 = vst [vmem:[#allocation146_spill] sm:$0xff] %v8868_v11  ;;  %v8873_v57 = vsel %vm2738_vm4, %v11911_v35, %v11910_v13  ;;  %v11913_v14 = vld [vmem:[#allocation197_spill] sm:$0xff]  ;;  %v11917_v59 = vld [vmem:[#allocation94_spill] sm:$0xff]  ;;  %v11919_v9 = vld [vmem:[#allocation96_spill] sm:$0xff]  ;;  %v8891_v13 = vrot.slane %v3189_v52, %v8332_v8 }
 0x515   : > { %11912 = vst [vmem:[#allocation39_spill] sm:$0xff] %v8873_v57  ;;  %v8880_v56 = vsel %vm2738_vm4, %v11914_v6, %v11913_v14  ;;  %v2836_v2 = vsel %vm2738_vm4, %v11917_v59, %v11916_v18  ;;  %v8888_v32 = vsel %vm2738_vm4, %v11919_v9, %v11918_v58  ;;  %v11922_v35 = vld [vmem:[#allocation202_spill] sm:$0xff]  ;;  %v11923_v11 = vld [vmem:[#allocation97_spill] sm:$0xff]  ;;  %v11925_v28 = vld [vmem:[#allocation203_spill] sm:$0xff]  ;;  %v8909_v58 = vrot.slane %v3237_v62, %v8332_v8 }
 0x516   : > { %11915 = vst [vmem:[#allocation147_spill] sm:$0xff] %v8880_v56  ;;  %11920 = vst [vmem:[#allocation40_spill] sm:$0xff] %v8888_v32  ;;  %v8896_v57 = vsel %vm2738_vm4, %v11923_v11, %v11922_v35  ;;  %v11926_v14 = vld [vmem:[#allocation98_spill] sm:$0xff]  ;;  %v11928_v56 = vld [vmem:[#allocation204_spill] sm:$0xff] }
 0x517   : > { %11921 = vst [vmem:[#allocation148_spill] sm:$0xff] %v8891_v13  ;;  %11924 = vst [vmem:[#allocation41_spill] sm:$0xff] %v8896_v57  ;;  %v8901_v6 = vsel %vm2738_vm4, %v11926_v14, %v11925_v28  ;;  %v11929_v18 = vld [vmem:[#allocation99_spill] sm:$0xff]  ;;  %v11931_v52 = vld [vmem:[#allocation208_spill] sm:$0xff] }
 0x518   : > { %11927 = vst [vmem:[#allocation149_spill] sm:$0xff] %v8901_v6  ;;  %v8906_v59 = vsel %vm2738_vm4, %v11929_v18, %v11928_v56  ;;  %v11932_v9 = vld [vmem:[#allocation103_spill] sm:$0xff]  ;;  %v11934_v11 = vld [vmem:[#allocation212_spill] sm:$0xff]  ;;  %v11938_v14 = vld [vmem:[#allocation110_spill] sm:$0xff]  ;;  %v3254_v56 = vcombine.high %v8891_v13, %v8858_v39 }
 0x519   : > { %11930 = vst [vmem:[#allocation42_spill] sm:$0xff] %v8906_v59  ;;  %v8914_v32 = vsel %vm2738_vm4, %v11932_v9, %v11931_v52  ;;  %v11935_v35 = vld [vmem:[#allocation107_spill] sm:$0xff]  ;;  %v11939_v18 = vld [vmem:[#allocation217_spill] sm:$0xff]  ;;  %v11940_v62 = vld [vmem:[#allocation112_spill] sm:$0xff] }
 0x51a   : > { %11933 = vst [vmem:[#allocation150_spill] sm:$0xff] %v8914_v32  ;;  %v8919_v57 = vsel %vm2738_vm4, %v11935_v35, %v11934_v11  ;;  %v11937_v28 = vld [vmem:[#allocation215_spill] sm:$0xff]  ;;  %v8929_v59 = vsel %vm2738_vm4, %v11940_v62, %v11939_v18  ;;  %v11942_v29 = vld [vmem:[#allocation218_spill] sm:$0xff]  ;;  %v11943_v52 = vld [vmem:[#allocation113_spill] sm:$0xff]  ;;  %5302 = vrot.lane.b32.xlu0 %v3254_v56, %s11230_s26 }
 0x51b   : > { %11936 = vst [vmem:[#allocation43_spill] sm:$0xff] %v8919_v57  ;;  %v2852_v6 = vsel %vm2738_vm4, %v11938_v14, %v11937_v28  ;;  %11941 = vst [vmem:[#allocation151_spill] sm:$0xff] %v8929_v59  ;;  %v8934_v9 = vsel %vm2738_vm4, %v11943_v52, %v11942_v29  ;;  %v11945_v32 = vld [vmem:[#allocation219_spill] sm:$0xff]  ;;  %v11946_v11 = vld [vmem:[#allocation114_spill] sm:$0xff]  ;;  %v8942_v28 = vrot.slane %v3205_v24, %v8332_v8  ;;  %v2681_v14 = vpop.permute.xlu1 %2680 }
 0x51c   : > { %11944 = vst [vmem:[#allocation44_spill] sm:$0xff] %v8934_v9  ;;  %v8939_v35 = vsel %vm2738_vm4, %v11946_v11, %v11945_v32  ;;  %v11948_v13 = vld [vmem:[#allocation220_spill] sm:$0xff]  ;;  %v11949_v39 = vld [vmem:[#allocation115_spill] sm:$0xff] }
 0x51d   : > { %11947 = vst [vmem:[#allocation95_spill] sm:$0xff] %v8939_v35  ;;  %v8947_v57 = vsel %vm2738_vm4, %v11949_v39, %v11948_v13  ;;  %v11950_v18 = vld [vmem:[#allocation224_spill] sm:$0xff]  ;;  %v11951_v62 = vld [vmem:[#allocation119_spill] sm:$0xff]  ;;  %v11956_v13 = vld [vmem:[#allocation233_spill] sm:$0xff] }
 0x51e   : > { %v8952_v59 = vsel %vm2738_vm4, %v11951_v62, %v11950_v18  ;;  %v11952_v29 = vld [vmem:[#allocation228_spill] sm:$0xff]  ;;  %v11953_v52 = vld [vmem:[#allocation123_spill] sm:$0xff]  ;;  %v8971_v18 = vsel %vm2867_vm5, %v8352_v19, %v11956_v13  ;;  %v11957_v62 = vld [vmem:[#allocation337_spill] sm:$0xff]  ;;  %v3256_v19 = vcombine.high %v8777_v60, %v8767_v25 }
 0x51f   : > { %v8957_v9 = vsel %vm2738_vm4, %v11953_v52, %v11952_v29  ;;  %v11954_v32 = vld [vmem:[#allocation231_spill] sm:$0xff]  ;;  %v11955_v11 = vld [vmem:[#allocation232_spill] sm:$0xff]  ;;  %v2981_v29 = vsel %vm2867_vm5, %v2852_v6, %v11957_v62  ;;  %v3257_v52 = vcombine.low %v8942_v28, %v8909_v58 }
 0x520   : > { %v2869_v24 = vsel %vm2867_vm5, %v8337_v63, %v11954_v32  ;;  %v8966_v39 = vsel %vm2867_vm5, %v8347_v34, %v11955_v11  ;;  %v11958_v63 = vld [vmem:[#allocation234_spill] sm:$0xff]  ;;  %v11960_v32 = vld [vmem:[#allocation235_spill] sm:$0xff]  ;;  %v8988_v11 = vsel %vm2996_vm6, %v2981_v29, %v2681_v14  ;;  %v11962_v62 = vld [vmem:[#allocation276_spill] sm:$0xff]  ;;  %5310 = vrot.lane.b32.xlu0 %v3256_v19, %s11228_s4 }
 0x521   : > { %v8980_v56 = vsel %vm2867_vm5, %v8357_v15, %v11958_v63  ;;  %v8985_v34 = vsel %vm2867_vm5, %v8362_v1, %v11960_v32  ;;  %v11961_v6 = vld [vmem:[#allocation239_spill] sm:$0xff]  ;;  %v2917_v15 = vsel %vm2867_vm5, %v8623_v50, %v11962_v62  ;;  %v11963_v63 = vld [vmem:[#allocation306_spill] sm:$0xff]  ;;  %5314 = vrot.lane.b32.xlu1 %v3257_v52, %s11223_s28  ;;  %v11970_v52 = vld [vmem:[#allocation261_spill] sm:$0xff] }
 0x522   : > { %11959 = vst [vmem:[#allocation152_spill] sm:$0xff] %v8980_v56  ;;  %v8995_v13 = vsel %vm2867_vm5, %v8384_v44, %v11961_v6  ;;  %v2949_v56 = vsel %vm2867_vm5, %v2820_v47, %v11963_v63  ;;  %v11964_v1 = vld [vmem:[#allocation322_spill] sm:$0xff]  ;;  %v11965_v14 = vld [vmem:[#allocation243_spill] sm:$0xff]  ;;  %v2901_v62 = vsel %vm2867_vm5, %v8503_v45, %v11970_v52  ;;  %v11973_v19 = vld [vmem:[#allocation369_spill] sm:$0xff] }
 0x523   : > { %v2965_v32 = vsel %vm2867_vm5, %v2836_v2, %v11964_v1  ;;  %v9008_v25 = vsel %vm2867_vm5, %v8406_v10, %v11965_v14  ;;  %v11966_v44 = vld [vmem:[#allocation399_spill] sm:$0xff]  ;;  %v11967_v29 = vld [vmem:[#allocation430_spill] sm:$0xff]  ;;  %v11977_v52 = vld [vmem:[#allocation249_spill] sm:$0xff] }
 0x524   : > { %v9012_v60 = vsel %vm2996_vm6, %v2917_v15, %v11966_v44  ;;  %v9016_v50 = vsel %vm2996_vm6, %v2949_v56, %v11967_v29  ;;  %v11968_v47 = vld [vmem:[#allocation446_spill] sm:$0xff]  ;;  %v11971_v15 = vld [vmem:[#allocation291_spill] sm:$0xff] }
 0x525   : > { %v9020_v6 = vsel %vm2996_vm6, %v2965_v32, %v11968_v47  ;;  %v11969_v2 = vld [vmem:[#allocation246_spill] sm:$0xff]  ;;  %v2933_v56 = vsel %vm2867_vm5, %v8730_v46, %v11971_v15  ;;  %v3309_v63 = vcombine.low %v9016_v50, %v8988_v11  ;;  %v11972_v1 = vld [vmem:[#allocation247_spill] sm:$0xff]  ;;  %v11976_v46 = vld [vmem:[#allocation248_spill] sm:$0xff] }
 0x526   : > { %v2885_v10 = vsel %vm2867_vm5, %v8421_v48, %v11969_v2  ;;  %v9037_v32 = vsel %vm2867_vm5, %v8429_v40, %v11972_v1  ;;  %v11974_v48 = vld [vmem:[#allocation384_spill] sm:$0xff]  ;;  %v11975_v45 = vld [vmem:[#allocation414_spill] sm:$0xff]  ;;  %v9054_v47 = vsel %vm2867_vm5, %v8434_v22, %v11976_v46 }
 0x527   : > { %v9041_v14 = vsel %vm2996_vm6, %v2885_v10, %v11973_v19  ;;  %v9045_v44 = vsel %vm2996_vm6, %v2901_v62, %v11974_v48  ;;  %v9049_v29 = vsel %vm2996_vm6, %v2933_v56, %v11975_v45  ;;  %v3238_v10 = vcombine.high %v8806_v5, %v8780_v31  ;;  %v11979_v15 = vld [vmem:[#allocation250_spill] sm:$0xff]  ;;  %v11981_v19 = vld [vmem:[#allocation353_spill] sm:$0xff] }
 0x528   : > { %v3277_v40 = vcombine.low %v9041_v14, %v9012_v60  ;;  %v3293_v2 = vcombine.low %v9049_v29, %v9020_v6  ;;  %v9065_v62 = vsel %vm2867_vm5, %v8439_v38, %v11977_v52  ;;  %v9070_v56 = vsel %vm2867_vm5, %v8444_v12, %v11979_v15  ;;  %v11980_v22 = vld [vmem:[#allocation254_spill] sm:$0xff] }
 0x529   : > { %11978 = vst [vmem:[#allocation45_spill] sm:$0xff] %v9065_v62  ;;  %v9075_v1 = vsel %vm2867_vm5, %v8464_v0, %v11980_v22  ;;  %v9079_v48 = vsel %vm2996_vm6, %v2869_v24, %v11981_v19  ;;  %v11982_v31 = vld [vmem:[#allocation258_spill] sm:$0xff]  ;;  %v3206_v12 = vcombine.high %v8835_v53, %v8803_v21  ;;  %v9091_v45 = vrot.slane %v3309_v63, %v8329_v42  ;;  %v11984_v24 = vld [vmem:[#allocation263_spill] sm:$0xff]  ;;  %v11987_v22 = vld [vmem:[#allocation265_spill] sm:$0xff] }
 0x52a   : > { %v9084_v5 = vsel %vm2867_vm5, %v8486_v20, %v11982_v31  ;;  %v3261_v38 = vcombine.low %v9079_v48, %v9045_v44  ;;  %v11983_v0 = vld [vmem:[#allocation262_spill] sm:$0xff]  ;;  %v9101_v52 = vsel %vm2867_vm5, %v8516_v37, %v11984_v24  ;;  %v11985_v20 = vld [vmem:[#allocation264_spill] sm:$0xff]  ;;  %v9111_v21 = vsel %vm2867_vm5, %v8526_v26, %v11987_v22  ;;  %v11988_v53 = vld [vmem:[#allocation269_spill] sm:$0xff] }
 0x52b   : > { %v9096_v46 = vsel %vm2867_vm5, %v8511_v61, %v11983_v0  ;;  %v9106_v15 = vsel %vm2867_vm5, %v8521_v41, %v11985_v20  ;;  %v9116_v61 = vsel %vm2867_vm5, %v8551_v55, %v11988_v53  ;;  %v9119_v63 = vrot.slane %v3277_v40, %v8329_v42  ;;  %v11989_v41 = vld [vmem:[#allocation273_spill] sm:$0xff]  ;;  %v11991_v55 = vld [vmem:[#allocation278_spill] sm:$0xff]  ;;  %v11992_v24 = vld [vmem:[#allocation279_spill] sm:$0xff] }
 0x52c   : > { %11986 = vst [vmem:[#allocation63_spill] sm:$0xff] %v9106_v15  ;;  %v9122_v37 = vrot.slane %v3293_v2, %v8329_v42  ;;  %v3252_v19 = vrot.slane %v3238_v10, %v8332_v8  ;;  %v9128_v31 = vsel %vm2867_vm5, %v8573_v30, %v11989_v41  ;;  %v11990_v26 = vld [vmem:[#allocation277_spill] sm:$0xff]  ;;  %v2918_v40 = vsel %vm2867_vm5, %v8649_v7, %v11991_v55  ;;  %v11994_v10 = vld [vmem:[#allocation280_spill] sm:$0xff]  ;;  %v11999_v55 = vld [vmem:[#allocation294_spill] sm:$0xff] }
 0x52d   : > { %v9133_v0 = vsel %vm2867_vm5, %v8628_v49, %v11990_v26  ;;  %v9141_v2 = vsel %vm2867_vm5, %v8658_v33, %v11992_v24  ;;  %v9146_v20 = vsel %vm2867_vm5, %v8671_v51, %v11994_v10  ;;  %v9149_v30 = vrot.slane %v3261_v38, %v8329_v42  ;;  %v11995_v53 = vld [vmem:[#allocation284_spill] sm:$0xff]  ;;  %v11998_v26 = vld [vmem:[#allocation293_spill] sm:$0xff]  ;;  %v12008_v62 = vld [vmem:[#allocation311_spill] sm:$0xff] }
 0x52e   : > { %11993 = vst [vmem:[#allocation153_spill] sm:$0xff] %v9141_v2  ;;  %v3220_v49 = vrot.slane %v3206_v12, %v8332_v8  ;;  %v3357_v22 = vcombine.low %v9122_v37, %v9091_v45  ;;  %v9157_v7 = vsel %vm2867_vm5, %v8691_v4, %v11995_v53  ;;  %v11996_v33 = vld [vmem:[#allocation288_spill] sm:$0xff]  ;;  %v2934_v12 = vsel %vm2867_vm5, %v8740_v17, %v11998_v26  ;;  %v12001_v4 = vld [vmem:[#allocation295_spill] sm:$0xff]  ;;  %v12021_v15 = vld [vmem:[#allocation330_spill] sm:$0xff] }
 0x52f   : > { %v9162_v41 = vsel %vm2867_vm5, %v8714_v3, %v11996_v33  ;;  %v11997_v51 = vld [vmem:[#allocation292_spill] sm:$0xff]  ;;  %v9175_v24 = vsel %vm2867_vm5, %v8745_v54, %v11999_v55  ;;  %v9180_v10 = vsel %vm2867_vm5, %v8754_v36, %v12001_v4  ;;  %v3325_v3 = vcombine.low %v9149_v30, %v9119_v63  ;;  %v12003_v17 = vld [vmem:[#allocation303_spill] sm:$0xff]  ;;  %v12006_v55 = vld [vmem:[#allocation309_spill] sm:$0xff] }
 0x530   : > { %v9167_v38 = vsel %vm2867_vm5, %v8735_v27, %v11997_v51  ;;  %12000 = vst [vmem:[#allocation46_spill] sm:$0xff] %v9175_v24  ;;  %v3259_v53 = vcombine.low %v3220_v49, %v3252_v19  ;;  %v12002_v27 = vld [vmem:[#allocation299_spill] sm:$0xff]  ;;  %v9192_v51 = vsel %vm2867_vm5, %v8813_v16, %v12003_v17  ;;  %v12005_v54 = vld [vmem:[#allocation308_spill] sm:$0xff]  ;;  %v3258_v36 = vcombine.high %v8942_v28, %v8909_v58  ;;  %v12007_v4 = vld [vmem:[#allocation37_spill] sm:$0xff] }
 0x531   : > { %v9187_v33 = vsel %vm2867_vm5, %v8785_v43, %v12002_v27  ;;  %12004 = vst [vmem:[#allocation155_spill] sm:$0xff] %v9192_v51  ;;  %v9197_v26 = vsel %vm2867_vm5, %v8832_v23, %v12005_v54  ;;  %v2950_v24 = vsel %vm2867_vm5, %v12007_v4, %v12006_v55  ;;  %v12009_v43 = vld [vmem:[#allocation38_spill] sm:$0xff]  ;;  %v3310_v16 = vcombine.high %v9016_v50, %v8988_v11  ;;  %v12010_v23 = vld [vmem:[#allocation315_spill] sm:$0xff]  ;;  %v12017_v50 = vld [vmem:[#allocation324_spill] sm:$0xff] }
 0x532   : > { %v9207_v27 = vsel %vm2867_vm5, %v12009_v43, %v12008_v62  ;;  %v9212_v17 = vrot.slane %v3357_v22, %v8332_v8  ;;  %5322 = vrot.lane.b32.xlu1 %v3259_v53, %s11222_s6  ;;  %v12011_v58 = vld [vmem:[#allocation39_spill] sm:$0xff]  ;;  %v12016_v43 = vld [vmem:[#allocation40_spill] sm:$0xff]  ;;  %v12018_v22 = vld [vmem:[#allocation41_spill] sm:$0xff]  ;;  %5318 = vrot.lane.b32.xlu0 %v3258_v36, %s11224_s7 }
 0x533   : > { %v9218_v28 = vsel %vm2867_vm5, %v12011_v58, %v12010_v23  ;;  %v12012_v54 = vld [vmem:[#allocation319_spill] sm:$0xff]  ;;  %v2966_v2 = vsel %vm2867_vm5, %v12018_v22, %v12017_v50  ;;  %v12019_v53 = vld [vmem:[#allocation326_spill] sm:$0xff] }
 0x534   : > { %v12013_v55 = vld [vmem:[#allocation147_spill] sm:$0xff]  ;;  %v12020_v23 = vld [vmem:[#allocation42_spill] sm:$0xff] }
 0x535   : > { %v9223_v4 = vsel %vm2867_vm5, %v12013_v55, %v12012_v54  ;;  %v12015_v62 = vld [vmem:[#allocation323_spill] sm:$0xff]  ;;  %v9237_v58 = vsel %vm2867_vm5, %v12020_v23, %v12019_v53  ;;  %v3278_v54 = vcombine.high %v9041_v14, %v9012_v60  ;;  %v3333_v55 = vrot.slane %v3325_v3, %v8332_v8  ;;  %v12022_v35 = vld [vmem:[#allocation150_spill] sm:$0xff]  ;;  %v12026_v53 = vld [vmem:[#allocation340_spill] sm:$0xff] }
 0x536   : > { %12014 = vst [vmem:[#allocation48_spill] sm:$0xff] %v9223_v4  ;;  %v9228_v11 = vsel %vm2867_vm5, %v12016_v43, %v12015_v62  ;;  %v3294_v62 = vcombine.high %v9049_v29, %v9020_v6  ;;  %v2685_v43 = vpop.permute.xlu0 %2684  ;;  %v9247_v50 = vsel %vm2867_vm5, %v12022_v35, %v12021_v15  ;;  %v12023_v36 = vld [vmem:[#allocation334_spill] sm:$0xff]  ;;  %v12024_v22 = vld [vmem:[#allocation43_spill] sm:$0xff]  ;;  %v12027_v23 = vld [vmem:[#allocation44_spill] sm:$0xff]  ;;  %v3262_v14 = vcombine.high %v9079_v48, %v9045_v44 }
 0x537   : > { %v9252_v51 = vsel %vm2867_vm5, %v12024_v22, %v12023_v36  ;;  %v2982_v60 = vsel %vm2867_vm5, %v12027_v23, %v12026_v53  ;;  %v3324_v6 = vrot.slane %v3310_v16, %v8329_v42  ;;  %v3358_v29 = vcombine.high %v9122_v37, %v9091_v45  ;;  %v12028_v3 = vld [vmem:[#allocation339_spill] sm:$0xff]  ;;  %v12030_v22 = vld [vmem:[#allocation342_spill] sm:$0xff]  ;;  %v12033_v16 = vld [vmem:[#allocation433_spill] sm:$0xff] }
 0x538   : > { %12025 = vst [vmem:[#allocation354_spill] sm:$0xff] %v9252_v51  ;;  %v3389_v35 = vcombine.low %v3333_v55, %v9212_v17  ;;  %v3260_v15 = vcombine.high %v3220_v49, %v3252_v19  ;;  %v12029_v4 = vld [vmem:[#allocation151_spill] sm:$0xff]  ;;  %v9271_v53 = vsel %vm2867_vm5, %v8947_v57, %v12030_v22  ;;  %v12031_v23 = vld [vmem:[#allocation346_spill] sm:$0xff]  ;;  %v9279_v48 = vsel %vm2996_vm6, %v2982_v60, %v2685_v43 }
 0x539   : > { %v9266_v36 = vsel %vm2867_vm5, %v12029_v4, %v12028_v3  ;;  %v9276_v44 = vsel %vm2867_vm5, %v8952_v59, %v12031_v23  ;;  %v3292_v45 = vrot.slane %v3278_v54, %v8329_v42  ;;  %v3326_v37 = vcombine.high %v9149_v30, %v9119_v63  ;;  %v12032_v59 = vld [vmem:[#allocation401_spill] sm:$0xff]  ;;  %v12034_v54 = vld [vmem:[#allocation447_spill] sm:$0xff]  ;;  %v12035_v30 = vld [vmem:[#allocation386_spill] sm:$0xff] }
 0x53a   : > { %v3308_v19 = vrot.slane %v3294_v62, %v8329_v42  ;;  %5330 = vrot.lane.b32.xlu1 %v3389_v35, %s11216_s8  ;;  %5326 = vrot.lane.b32.xlu0 %v3260_v15, %s11214_s10  ;;  %v3276_v57 = vrot.slane %v3262_v14, %v8329_v42  ;;  %v9290_v49 = vsel %vm2996_vm6, %v2918_v40, %v12032_v59  ;;  %v12036_v35 = vld [vmem:[#allocation350_spill] sm:$0xff]  ;;  %v12038_v15 = vld [vmem:[#allocation371_spill] sm:$0xff] }
 0x53b   : > { %v3079_v4 = vsel %vm2996_vm6, %v2950_v24, %v12033_v16  ;;  %v9296_v63 = vsel %vm2996_vm6, %v2966_v2, %v12034_v54  ;;  %v9301_v62 = vsel %vm2996_vm6, %v9101_v52, %v12035_v30  ;;  %v3372_v43 = vrot.slane %v3358_v29, %v8332_v8  ;;  %v12037_v24 = vld [vmem:[#allocation356_spill] sm:$0xff]  ;;  %v12039_v52 = vld [vmem:[#allocation417_spill] sm:$0xff]  ;;  %v9324_v16 = vpop.permute.xlu0 %2692  ;;  %v12040_v54 = vld [vmem:[#allocation355_spill] sm:$0xff] }
 0x53c   : > { %v3373_v60 = vcombine.low %v3308_v19, %v3324_v6  ;;  %v3445_v14 = vcombine.low %v3079_v4, %v9279_v48  ;;  %v9308_v40 = vsel %vm2867_vm5, %v8957_v9, %v12036_v35  ;;  %v2999_v2 = vsel %vm2996_vm6, %v8971_v18, %v12037_v24  ;;  %v12042_v51 = vld [vmem:[#allocation358_spill] sm:$0xff] }
 0x53d   : > { %v3015_v3 = vsel %vm2996_vm6, %v9054_v47, %v12038_v15  ;;  %v9318_v22 = vsel %vm2996_vm6, %v2934_v12, %v12039_v52  ;;  %v3340_v29 = vrot.slane %v3326_v37, %v8332_v8  ;;  %v3341_v23 = vcombine.low %v3276_v57, %v3292_v45  ;;  %v12041_v47 = vld [vmem:[#allocation385_spill] sm:$0xff] }
 0x53e   : > { %v3413_v59 = vcombine.low %v3015_v3, %v9290_v49  ;;  %v3429_v9 = vcombine.low %v9318_v22, %v9296_v63  ;;  %v9329_v18 = vsel %vm2996_vm6, %v8966_v39, %v12040_v54  ;;  %v9334_v12 = vsel %vm2996_vm6, %v9096_v46, %v12041_v47  ;;  %v12043_v54 = vld [vmem:[#allocation362_spill] sm:$0xff] }
 0x53f   : > { %v3397_v37 = vcombine.low %v2999_v2, %v9301_v62  ;;  %v3374_v30 = vcombine.high %v3308_v19, %v3324_v6  ;;  %v3381_v35 = vrot.slane %v3373_v60, %v8332_v8  ;;  %v9339_v24 = vrot.slane %v3445_v14, %v8329_v42  ;;  %v12044_v47 = vld [vmem:[#allocation366_spill] sm:$0xff] }
 0x540   : > { %v3391_v15 = vcombine.low %v3340_v29, %v3372_v43  ;;  %v3390_v52 = vcombine.high %v3333_v55, %v9212_v17  ;;  %v9345_v39 = vsel %vm2996_vm6, %v8985_v34, %v12042_v51  ;;  %v9350_v46 = vsel %vm2996_vm6, %v8995_v13, %v12043_v54  ;;  %v12046_v34 = vld [vmem:[#allocation370_spill] sm:$0xff]  ;;  %v12049_v54 = vld [vmem:[#allocation388_spill] sm:$0xff] }
 0x541   : > { %v9355_v6 = vsel %vm2996_vm6, %v9008_v25, %v12044_v47  ;;  %v3342_v19 = vcombine.high %v3276_v57, %v3292_v45  ;;  %v3349_v60 = vrot.slane %v3341_v23, %v8332_v8  ;;  %v3421_v17 = vrot.slane %v3413_v59, %v8329_v42  ;;  %v12047_v25 = vld [vmem:[#allocation373_spill] sm:$0xff] }
 0x542   : > { %12045 = vst [vmem:[#allocation185_spill] sm:$0xff] %v9355_v6  ;;  %v3437_v55 = vrot.slane %v3429_v9, %v8329_v42  ;;  %5338 = vrot.lane.b32.xlu1 %v3391_v15, %s11212_s9  ;;  %5334 = vrot.lane.b32.xlu0 %v3390_v52, %s11210_s11  ;;  %v9365_v13 = vsel %vm2996_vm6, %v9037_v32, %v12046_v34  ;;  %v9378_v9 = vpop.permute.xlu0 %2700  ;;  %v12048_v15 = vld [vmem:[#allocation377_spill] sm:$0xff] }
 0x543   : > { %v9370_v51 = vsel %vm2996_vm6, %v9070_v56, %v12047_v25  ;;  %v3533_v45 = vcombine.low %v9329_v18, %v9334_v12  ;;  %v3405_v57 = vrot.slane %v3397_v37, %v8329_v42  ;;  %v3388_v14 = vrot.slane %v3374_v30, %v8332_v8  ;;  %v2689_v25 = vpop.permute.xlu1 %2688 }
 0x544   : > { %v3446_v23 = vcombine.high %v3079_v4, %v9279_v48  ;;  %v3493_v59 = vcombine.low %v3437_v55, %v9339_v24  ;;  %v3393_v32 = vcombine.low %v3349_v60, %v3381_v35  ;;  %v9383_v52 = vsel %vm2996_vm6, %v9075_v1, %v12048_v15  ;;  %v12050_v1 = vld [vmem:[#allocation381_spill] sm:$0xff] }
 0x545   : > { %v3398_v56 = vcombine.high %v2999_v2, %v9301_v62  ;;  %v9389_v37 = vsel %vm2996_vm6, %v9111_v21, %v12049_v54  ;;  %v3392_v30 = vcombine.high %v3340_v29, %v3372_v43  ;;  %v3356_v48 = vrot.slane %v3342_v19, %v8332_v8 }
 0x546   : > { %v3414_v4 = vcombine.high %v3015_v3, %v9290_v49  ;;  %v3461_v47 = vcombine.low %v3405_v57, %v3421_v17  ;;  %v3430_v34 = vcombine.high %v9318_v22, %v9296_v63  ;;  %5346 = vrot.lane.b32.xlu1 %v3393_v32, %s11208_s12  ;;  %v9399_v62 = vsel %vm2996_vm6, %v9084_v5, %v12050_v1  ;;  %v12052_v49 = vld [vmem:[#allocation400_spill] sm:$0xff] }
 0x547   : > { %12051 = vst [vmem:[#allocation79_spill] sm:$0xff] %v9399_v62  ;;  %v3534_v21 = vcombine.high %v9329_v18, %v9334_v12  ;;  %v9404_v43 = vrot.slane %v3533_v45, %v8329_v42  ;;  %v3048_v2 = vsel %vm2996_vm6, %v9133_v0, %v12052_v49  ;;  %5342 = vrot.lane.b32.xlu0 %v3392_v30, %s11206_s13  ;;  %v12055_v30 = vld [vmem:[#allocation416_spill] sm:$0xff] }
 0x548   : > { %v9411_v63 = vrot.slane %v3446_v23, %v8329_v42  ;;  %v3494_v3 = vcombine.high %v3437_v55, %v9339_v24  ;;  %v3501_v5 = vrot.slane %v3493_v59, %v8332_v8  ;;  %v3395_v22 = vcombine.low %v3356_v48, %v3388_v14  ;;  %v9429_v23 = vpop.permute.xlu0 %2708 }
 0x549   : > { %v9416_v29 = vrot.slane %v3398_v56, %v8329_v42  ;;  %v3669_v18 = vcombine.low %v9345_v39, %v9389_v37  ;;  %v9422_v0 = vsel %vm2996_vm6, %v9266_v36, %v2689_v25  ;;  %v3394_v12 = vcombine.high %v3349_v60, %v3381_v35  ;;  %v12053_v36 = vld [vmem:[#allocation432_spill] sm:$0xff]  ;;  %v12054_v60 = vld [vmem:[#allocation449_spill] sm:$0xff]  ;;  %v12056_v25 = vld [vmem:[#allocation403_spill] sm:$0xff] }
 0x54a   : > { %v9425_v19 = vrot.slane %v3414_v4, %v8329_v42  ;;  %v3462_v45 = vcombine.high %v3405_v57, %v3421_v17  ;;  %v3469_v24 = vrot.slane %v3461_v47, %v8332_v8  ;;  %v3444_v55 = vrot.slane %v3430_v34, %v8329_v42  ;;  %5354 = vrot.lane.b32.xlu1 %v3395_v22, %s11204_s14 }
 0x54b   : > { %v3549_v59 = vcombine.low %v9365_v13, %v3048_v2  ;;  %v3550_v32 = vcombine.high %v9365_v13, %v3048_v2  ;;  %v9437_v35 = vsel %vm2996_vm6, %v9197_v26, %v12053_v36  ;;  %v9442_v17 = vsel %vm2996_vm6, %v9228_v11, %v12054_v60  ;;  %5350 = vrot.lane.b32.xlu0 %v3394_v12, %s11202_s29 }
 0x54c   : > { %v3581_v57 = vcombine.low %v9437_v35, %v9422_v0  ;;  %v3508_v15 = vrot.slane %v3494_v3, %v8332_v8  ;;  %v3509_v13 = vcombine.low %v3444_v55, %v9411_v63  ;;  %v3525_v56 = vcombine.low %v3469_v24, %v3501_v5 }
 0x54d   : > { %v9450_v54 = vrot.slane %v3534_v21, %v8329_v42  ;;  %v9453_v26 = vrot.slane %v3669_v18, %v8329_v42  ;;  %v9458_v11 = vsel %vm2996_vm6, %v9167_v38, %v12055_v30  ;;  %v3396_v4 = vcombine.high %v3356_v48, %v3388_v14  ;;  %v12057_v48 = vld [vmem:[#allocation448_spill] sm:$0xff]  ;;  %v9493_v18 = vpop.permute.xlu0 %2716 }
 0x54e   : > { %v3476_v47 = vrot.slane %v3462_v45, %v8332_v8  ;;  %v3477_v34 = vcombine.low %v9416_v29, %v9425_v19  ;;  %v9466_v1 = vsel %vm2996_vm6, %v9146_v20, %v12056_v25  ;;  %v3565_v21 = vcombine.low %v9458_v11, %v9442_v17  ;;  %5362 = vrot.lane.b32.xlu1 %v3525_v56, %s11200_s15  ;;  %v12061_v56 = vld [vmem:[#allocation154_spill] sm:$0xff] }
 0x54f   : > { %v9472_v38 = vrot.slane %v3549_v59, %v8329_v42  ;;  %v9475_v14 = vrot.slane %v3550_v32, %v8329_v42  ;;  %v9480_v49 = vsel %vm2996_vm6, %v9237_v58, %v12057_v48  ;;  %v9485_v20 = vsel %vm2996_vm6, %v9271_v53, %v9324_v16  ;;  %5358 = vrot.lane.b32.xlu0 %v3396_v4, %s11198_s16  ;;  %v12058_v16 = vld [vmem:[#allocation435_spill] sm:$0xff]  ;;  %v12063_v4 = vld [vmem:[#allocation396_spill] sm:$0xff] }
 0x550   : > { %v9489_v2 = vrot.slane %v3581_v57, %v8329_v42  ;;  %v3510_v3 = vcombine.high %v3444_v55, %v9411_v63  ;;  %v3517_v22 = vrot.slane %v3509_v13, %v8332_v8  ;;  %v3527_v12 = vcombine.low %v3476_v47, %v3508_v15  ;;  %v12059_v63 = vld [vmem:[#allocation419_spill] sm:$0xff] }
 0x551   : > { %v3478_v58 = vcombine.high %v9416_v29, %v9425_v19  ;;  %v3685_v53 = vcombine.low %v9370_v51, %v9466_v1  ;;  %v9502_v45 = vsel %vm2996_vm6, %v9207_v27, %v12058_v16  ;;  %v3526_v59 = vcombine.high %v3469_v24, %v3501_v5  ;;  %v12060_v19 = vld [vmem:[#allocation392_spill] sm:$0xff] }
 0x552   : > { %v3485_v32 = vrot.slane %v3477_v34, %v8332_v8  ;;  %v9508_v55 = vsel %vm2996_vm6, %v9180_v10, %v12059_v63  ;;  %v3573_v36 = vrot.slane %v3565_v21, %v8329_v42  ;;  %v3717_v29 = vcombine.low %v9502_v45, %v9485_v20  ;;  %5370 = vrot.lane.b32.xlu1 %v3527_v12, %s11154_s17  ;;  %s11158_s17 = smov 76  }
 0x553   : > { %v9517_v27 = vsel %vm2996_vm6, %v9116_v61, %v12060_v19  ;;  %v3597_v5 = vcombine.low %v9404_v43, %v9472_v38  ;;  %v3701_v10 = vcombine.low %v9508_v55, %v9480_v49  ;;  %v3582_v24 = vcombine.high %v9437_v35, %v9422_v0  ;;  %5366 = vrot.lane.b32.xlu0 %v3526_v59, %s11196_s18  ;;  %v12062_v61 = vld [vmem:[#allocation148_spill] sm:$0xff]  ;;  %v12066_v59 = vld [vmem:[#allocation411_spill] sm:$0xff] }
 0x554   : > { %v3629_v60 = vcombine.low %v3573_v36, %v9489_v2  ;;  %v3524_v57 = vrot.slane %v3510_v3, %v8332_v8  ;;  %v3529_v13 = vcombine.low %v3485_v32, %v3517_v22  ;;  %v9533_v34 = vsel %vm2996_vm6, %v9128_v31, %v12063_v4  ;;  %v2725_v31 = vpop.permute.xlu0 %2724 }
 0x555   : > { %12064 = vst [vmem:[#allocation216_spill] sm:$0xff] %v9533_v34  ;;  %v3598_v25 = vcombine.high %v9404_v43, %v9472_v38  ;;  %v9538_v0 = vrot.slane %v3685_v53, %v8329_v42  ;;  %v3528_v35 = vcombine.high %v3476_v47, %v3508_v15  ;;  %v3613_v21 = vcombine.low %v9450_v54, %v9475_v14  ;;  %v12065_v38 = vld [vmem:[#allocation407_spill] sm:$0xff] }
 0x556   : > { %v3492_v48 = vrot.slane %v3478_v58, %v8332_v8  ;;  %v3566_v3 = vcombine.high %v9458_v11, %v9442_v17  ;;  %v9546_v12 = vrot.slane %v3717_v29, %v8329_v42  ;;  %5378 = vrot.lane.b32.xlu1 %v3529_v13, %s11156_s23  ;;  %v9550_v43 = vrot.slane %v3597_v5, %v8332_v8  ;;  %s11160_s23 = smov 88  }
 0x557   : > { %v9555_v15 = vsel %vm2996_vm6, %v9157_v7, %v12065_v38  ;;  %v9558_v47 = vrot.slane %v3701_v10, %v8329_v42  ;;  %v9561_v17 = vrot.slane %v3582_v24, %v8329_v42  ;;  %5374 = vrot.lane.b32.xlu0 %v3528_v35, %s11158_s17  ;;  %v3630_v11 = vcombine.high %v3573_v36, %v9489_v2  ;;  %v12069_v36 = vld [vmem:[#allocation439_spill] sm:$0xff]  ;;  %s11162_s17 = smov 84  }
 0x558   : > { %v3637_v58 = vrot.slane %v3629_v60, %v8332_v8  ;;  %v9569_v53 = vsel %vm2996_vm6, %v9276_v44, %v9429_v23  ;;  %v3531_v7 = vcombine.low %v3492_v48, %v3524_v57  ;;  %v3733_v16 = vcombine.low %v9453_v26, %v9538_v0  ;;  %v12070_v23 = vld [vmem:[#allocation456_spill] sm:$0xff]  ;;  %v12075_v24 = vld [vmem:[#allocation23_spill] sm:$0xff]  ;;  %v12076_v60 = vld [vmem:[#allocation354_spill] sm:$0xff] }
 0x559   : > { %v9576_v63 = vsel %vm2996_vm6, %v9162_v41, %v12066_v59  ;;  %v9580_v29 = vsel %vm2996_vm6, %v9308_v40, %v2725_v31  ;;  %v3530_v2 = vcombine.high %v3485_v32, %v3517_v22  ;;  %v9585_v19 = vsel %vm2996_vm6, %v9218_v28, %v12069_v36  ;;  %v12071_v40 = vld [vmem:[#allocation423_spill] sm:$0xff]  ;;  %v12073_v32 = vld [vmem:[#allocation48_spill] sm:$0xff] }
 0x55a   : > { %12067 = vst [vmem:[#allocation111_spill] sm:$0xff] %v9576_v63  ;;  %12068 = vst [vmem:[#allocation415_spill] sm:$0xff] %v9580_v29  ;;  %v3580_v44 = vrot.slane %v3566_v3, %v8329_v42  ;;  %v9591_v5 = vsel %vm2996_vm6, %v9247_v50, %v12070_v23  ;;  %v3765_v41 = vcombine.low %v9558_v47, %v9546_v12  ;;  %5386 = vrot.lane.b32.xlu1 %v3531_v7, %s11160_s23  ;;  %v12072_v28 = vld [vmem:[#allocation443_spill] sm:$0xff]  ;;  %s11164_s23 = smov 96  }
 0x55b   : > { %v9599_v22 = vsel %vm2996_vm6, %v9187_v33, %v12071_v40  ;;  %v9604_v10 = vsel %vm2996_vm6, %v12073_v32, %v12072_v28  ;;  %v9609_v50 = vsel %vm2996_vm6, %v12076_v60, %v12075_v24  ;;  %v4261_v13 = vcombine.low %v9585_v19, %v9569_v53  ;;  %5382 = vrot.lane.b32.xlu0 %v3530_v2, %s11162_s17  ;;  %v12078_v38 = vld [vmem:[#allocation427_spill] sm:$0xff]  ;;  %s11166_s17 = smov 92  }
 0x55c   : > { %12074 = vst [vmem:[#allocation156_spill] sm:$0xff] %v9604_v10  ;;  %12077 = vst [vmem:[#allocation49_spill] sm:$0xff] %v9609_v50  ;;  %v3644_v4 = vrot.slane %v3630_v11, %v8332_v8  ;;  %v3645_v33 = vcombine.low %v3580_v44, %v9561_v17  ;;  %v4805_v35 = vcombine.low %v9604_v10, %v9580_v29  ;;  %v12079_v7 = vld [vmem:[#allocation155_spill] sm:$0xff]  ;;  %v12163_v10 = vld [vmem:[#allocation116_spill] sm:$0xff] }
 0x55d   : > { %v3661_v3 = vcombine.low %v9550_v43, %v3637_v58  ;;  %v4229_v31 = vcombine.low %v9383_v52, %v9555_v15  ;;  %v9624_v59 = vsel %vm2996_vm6, %v12079_v7, %v12078_v38  ;;  %v4245_v2 = vcombine.low %v9599_v22, %v9591_v5  ;;  %v12170_v29 = vld [vmem:[#allocation281_spill] sm:$0xff] }
 0x55e   : > { %12080 = vst [vmem:[#allocation307_spill] sm:$0xff] %v9624_v59  ;;  %v3532_v36 = vcombine.high %v3492_v48, %v3524_v57  ;;  %v3612_v11 = vrot.slane %v3598_v25, %v8332_v8  ;;  %v4773_v23 = vcombine.low %v9399_v62, %v9576_v63  ;;  %v4789_v40 = vcombine.low %v9624_v59, %v9609_v50  ;;  %v12132_v50 = vld [vmem:[#allocation28_spill] sm:$0xff]  ;;  %v12134_v62 = vld [vmem:[#allocation141_spill] sm:$0xff] }
 0x55f   : > { %v9634_v28 = vrot.slane %v3765_v41, %v8332_v8  ;;  %5394 = vrot.lane.b32.xlu1 %v3661_v3, %s11164_s23  ;;  %v4213_v32 = vcombine.low %v9350_v46, %v9517_v27  ;;  %v4757_v57 = vcombine.low %v9355_v6, %v9533_v34  ;;  %v9642_v25 = vrot.slane %v3733_v16, %v8332_v8  ;;  %s11168_s23 = smov 104   ;;  %v12175_v34 = vld [vmem:[#allocation47_spill] sm:$0xff] }
 0x560   : > { %v9645_v48 = vrot.slane %v4261_v13, %v8329_v42  ;;  %5390 = vrot.lane.b32.xlu0 %v3532_v36, %s11166_s17  ;;  %v3646_v41 = vcombine.high %v3580_v44, %v9561_v17  ;;  %v3653_v24 = vrot.slane %v3645_v33, %v8332_v8  ;;  %v9651_v60 = vrot.slane %v4805_v35, %v8329_v42  ;;  %v12087_v33 = vld [vmem:[#allocation145_spill] sm:$0xff]  ;;  %s11170_s17 = smov 100  }
 0x561   : > { %12081 = vst [vmem:[#allocation338_spill] sm:$0xff] %v9634_v28  ;;  %12082 = vst [vmem:[#allocation157_spill] sm:$0xff] %v9642_v25  ;;  %v3663_v3 = vcombine.low %v3612_v11, %v3644_v4  ;;  %v3614_v38 = vcombine.high %v9450_v54, %v9475_v14  ;;  %v9656_v16 = vrot.slane %v4229_v31, %v8329_v42  ;;  %v12086_v14 = vld [vmem:[#allocation310_spill] sm:$0xff] }
 0x562   : > { %12083 = vst [vmem:[#allocation50_spill] sm:$0xff] %v9651_v60  ;;  %v9659_v13 = vrot.slane %v4245_v2, %v8329_v42  ;;  %v3662_v7 = vcombine.high %v9550_v43, %v3637_v58  ;;  %v3621_v36 = vrot.slane %v3613_v21, %v8332_v8  ;;  %v9664_v17 = vrot.slane %v4773_v23, %v8329_v42  ;;  %v2697_v2 = vpop.permute.xlu1 %2696 }
 0x563   : > { %v9667_v44 = vrot.slane %v4789_v40, %v8329_v42  ;;  %5402 = vrot.lane.b32.xlu1 %v3663_v3, %s11168_s23  ;;  %v2953_v35 = vsel %vm2867_vm5, %v12087_v33, %v12086_v14  ;;  %v9676_v43 = vrot.slane %v4213_v32, %v8329_v42  ;;  %v9679_v21 = vrot.slane %v4757_v57, %v8329_v42  ;;  %v12089_v33 = vld [vmem:[#allocation341_spill] sm:$0xff]  ;;  %s11172_s23 = smov 112  }
 0x564   : > { %12084 = vst [vmem:[#allocation431_spill] sm:$0xff] %v9664_v17  ;;  %v4309_v58 = vcombine.low %v9659_v13, %v9645_v48  ;;  %5398 = vrot.lane.b32.xlu0 %v3662_v7, %s11170_s17  ;;  %v3660_v31 = vrot.slane %v3646_v41, %v8332_v8  ;;  %v3718_v23 = vcombine.high %v9502_v45, %v9485_v20  ;;  %v12090_v41 = vld [vmem:[#allocation95_spill] sm:$0xff]  ;;  %s11174_s17 = smov 108  }
 0x565   : > { %12085 = vst [vmem:[#allocation158_spill] sm:$0xff] %v9667_v44  ;;  %12088 = vst [vmem:[#allocation51_spill] sm:$0xff] %v9679_v21  ;;  %v4853_v40 = vcombine.low %v9667_v44, %v9651_v60  ;;  %v3665_v32 = vcombine.low %v3621_v36, %v3653_v24  ;;  %v3670_v57 = vcombine.high %v9345_v39, %v9389_v37  ;;  %v12091_v39 = vld [vmem:[#allocation325_spill] sm:$0xff] }
 0x566   : > { %v3686_v3 = vcombine.high %v9370_v51, %v9466_v1  ;;  %v4277_v14 = vcombine.low %v9676_v43, %v9656_v16  ;;  %v3664_v7 = vcombine.high %v3612_v11, %v3644_v4  ;;  %v2985_v54 = vsel %vm2867_vm5, %v12090_v41, %v12089_v33  ;;  %v12092_v51 = vld [vmem:[#allocation149_spill] sm:$0xff]  ;;  %v12093_v1 = vld [vmem:[#allocation387_spill] sm:$0xff] }
 0x567   : > { %v3628_v20 = vrot.slane %v3614_v38, %v8332_v8  ;;  %v4821_v45 = vcombine.low %v9679_v21, %v9664_v17  ;;  %v3702_v30 = vcombine.high %v9508_v55, %v9480_v49  ;;  %5410 = vrot.lane.b32.xlu1 %v3665_v32, %s11172_s23  ;;  %v2969_v37 = vsel %vm2867_vm5, %v12092_v51, %v12091_v39  ;;  %v12094_v4 = vld [vmem:[#allocation63_spill] sm:$0xff]  ;;  %s11180_s23 = smov 120   ;;  %v12114_v21 = vld [vmem:[#allocation196_spill] sm:$0xff]  ;;  %v12115_v17 = vld [vmem:[#allocation90_spill] sm:$0xff] }
 0x568   : > { %v9710_v11 = vsel %vm2996_vm6, %v12094_v4, %v12093_v1  ;;  %v9713_v38 = vsel %vm2996_vm6, %v2985_v54, %v2697_v2  ;;  %v9716_v33 = vrot.slane %v4309_v58, %v8332_v8  ;;  %5406 = vrot.lane.b32.xlu0 %v3664_v7, %s11174_s17  ;;  %v3732_v49 = vrot.slane %v3718_v23, %v8329_v42  ;;  %s11218_s17 = smov 116   ;;  %v12102_v1 = vld [vmem:[#allocation152_spill] sm:$0xff]  ;;  %v12120_v44 = vld [vmem:[#allocation93_spill] sm:$0xff] }
 0x569   : > { %v3766_v55 = vcombine.high %v9558_v47, %v9546_v12  ;;  %v9723_v32 = vrot.slane %v4853_v40, %v8332_v8  ;;  %v3667_v41 = vcombine.low %v3628_v20, %v3660_v31  ;;  %v9726_v39 = vrot.slane %v3670_v57, %v8329_v42  ;;  %v12097_v12 = vld [vmem:[#allocation434_spill] sm:$0xff]  ;;  %v12124_v60 = vld [vmem:[#allocation117_spill] sm:$0xff] }
 0x56a   : > { %v9729_v54 = vrot.slane %v3686_v3, %v8329_v42  ;;  %v9732_v58 = vrot.slane %v4277_v14, %v8332_v8  ;;  %v3666_v2 = vcombine.high %v3621_v36, %v3653_v24  ;;  %v3734_v23 = vcombine.high %v9453_v26, %v9538_v0  ;;  %v12098_v57 = vld [vmem:[#allocation402_spill] sm:$0xff]  ;;  %v12099_v3 = vld [vmem:[#allocation153_spill] sm:$0xff]  ;;  %v12100_v24 = vld [vmem:[#allocation452_spill] sm:$0xff] }
 0x56b   : > { %12095 = vst [vmem:[#allocation159_spill] sm:$0xff] %v9723_v32  ;;  %v9737_v7 = vrot.slane %v4821_v45, %v8332_v8  ;;  %v9741_v47 = vsel %vm2996_vm6, %v2953_v35, %v12097_v12  ;;  %v3716_v40 = vrot.slane %v3702_v30, %v8329_v42  ;;  %5418 = vrot.lane.b32.xlu1 %v3667_v41, %s11180_s23  ;;  %v12103_v41 = vld [vmem:[#allocation372_spill] sm:$0xff]  ;;  %v12104_v12 = vld [vmem:[#allocation45_spill] sm:$0xff]  ;;  %s11220_s23 = smov 124  }
 0x56c   : > { %v9748_v14 = vsel %vm2996_vm6, %v12099_v3, %v12098_v57  ;;  %v9752_v26 = vsel %vm2996_vm6, %v2969_v37, %v12100_v24  ;;  %v3853_v0 = vcombine.low %v9741_v47, %v9713_v38  ;;  %5414 = vrot.lane.b32.xlu0 %v3666_v2, %s11218_s17  ;;  %v3780_v36 = vrot.slane %v3766_v55, %v8332_v8  ;;  %v12101_v37 = vld [vmem:[#allocation357_spill] sm:$0xff]  ;;  %v12105_v57 = vld [vmem:[#allocation418_spill] sm:$0xff] }
 0x56d   : > { %12096 = vst [vmem:[#allocation52_spill] sm:$0xff] %v9737_v7  ;;  %v3781_v35 = vcombine.low %v3716_v40, %v3732_v49  ;;  %v3798_v45 = vcombine.high %v9642_v25, %v9634_v28  ;;  %v3002_v4 = vsel %vm2996_vm6, %v12102_v1, %v12101_v37  ;;  %v3018_v2 = vsel %vm2996_vm6, %v12104_v12, %v12103_v41  ;;  %v12106_v3 = vld [vmem:[#allocation46_spill] sm:$0xff]  ;;  %v12107_v37 = vld [vmem:[#allocation192_spill] sm:$0xff] }
 0x56e   : > { %v3066_v24 = vsel %vm2996_vm6, %v12106_v3, %v12105_v57  ;;  %v3668_v55 = vcombine.high %v3628_v20, %v3660_v31  ;;  %v3821_v30 = vcombine.low %v3018_v2, %v9748_v14  ;;  %v3748_v28 = vrot.slane %v3734_v23, %v8332_v8  ;;  %v12108_v1 = vld [vmem:[#allocation86_spill] sm:$0xff]  ;;  %v12110_v7 = vld [vmem:[#allocation88_spill] sm:$0xff]  ;;  %v12112_v20 = vld [vmem:[#allocation195_spill] sm:$0xff] }
 0x56f   : > { %v3749_v51 = vcombine.low %v9726_v39, %v9729_v54  ;;  %v3837_v25 = vcombine.low %v3066_v24, %v9752_v26  ;;  %5426 = vrot.lane.b32.xlu1 %v3798_v45, %s11230_s26  ;;  %v9782_v41 = vsel %vm2738_vm4, %v12108_v1, %v12107_v37  ;;  %v12109_v12 = vld [vmem:[#allocation194_spill] sm:$0xff]  ;;  %v12113_v57 = vld [vmem:[#allocation89_spill] sm:$0xff]  ;;  %v3805_v3 = vcombine.low %v3002_v4, %v9710_v11 }
 0x570   : > { %v9787_v31 = vsel %vm2738_vm4, %v12110_v7, %v12109_v12  ;;  %v9792_v23 = vsel %vm2738_vm4, %v12113_v57, %v12112_v20  ;;  %5422 = vrot.lane.b32.xlu0 %v3668_v55, %s11220_s23  ;;  %v3861_v45 = vrot.slane %v3853_v0, %v8329_v42  ;;  %v3782_v32 = vcombine.high %v3716_v40, %v3732_v49  ;;  %v12116_v12 = vld [vmem:[#allocation198_spill] sm:$0xff]  ;;  %v12119_v57 = vld [vmem:[#allocation199_spill] sm:$0xff] }
 0x571   : > { %12111 = vst [vmem:[#allocation160_spill] sm:$0xff] %v9787_v31  ;;  %v3789_v37 = vrot.slane %v3781_v35, %v8332_v8  ;;  %v3800_v1 = vcombine.high %v3748_v28, %v3780_v36  ;;  %v9801_v7 = vsel %vm2738_vm4, %v12115_v17, %v12114_v21  ;;  %v12117_v31 = vld [vmem:[#allocation92_spill] sm:$0xff]  ;;  %v9811_v55 = vsel %vm2738_vm4, %v12120_v44, %v12119_v57  ;;  %v12121_v21 = vld [vmem:[#allocation206_spill] sm:$0xff] }
 0x572   : > { %v9806_v20 = vsel %vm2738_vm4, %v12117_v31, %v12116_v12  ;;  %v3799_v0 = vcombine.low %v3748_v28, %v3780_v36  ;;  %v3829_v49 = vrot.slane %v3821_v30, %v8329_v42  ;;  %v3750_v40 = vcombine.high %v9726_v39, %v9729_v54  ;;  %v12122_v31 = vld [vmem:[#allocation101_spill] sm:$0xff]  ;;  %v12127_v57 = vld [vmem:[#allocation252_spill] sm:$0xff] }
 0x573   : > { %12118 = vst [vmem:[#allocation53_spill] sm:$0xff] %v9806_v20  ;;  %v3757_v35 = vrot.slane %v3749_v51, %v8332_v8  ;;  %v3845_v17 = vrot.slane %v3837_v25, %v8329_v42  ;;  %5434 = vrot.lane.b32.xlu1 %v3800_v1, %s11228_s4  ;;  %v2841_v12 = vsel %vm2738_vm4, %v12122_v31, %v12121_v21  ;;  %v12123_v20 = vld [vmem:[#allocation222_spill] sm:$0xff]  ;;  %v12125_v28 = vld [vmem:[#allocation237_spill] sm:$0xff] }
 0x574   : > { %v2857_v44 = vsel %vm2738_vm4, %v12124_v60, %v12123_v20  ;;  %v12126_v36 = vld [vmem:[#allocation453_spill] sm:$0xff]  ;;  %v3813_v39 = vrot.slane %v3805_v3, %v8329_v42  ;;  %5430 = vrot.lane.b32.xlu0 %v3799_v0, %s11226_s25  ;;  %v3854_v25 = vcombine.high %v9741_v47, %v9713_v38  ;;  %v3796_v51 = vrot.slane %v3782_v32, %v8332_v8  ;;  %v12128_v21 = vld [vmem:[#allocation126_spill] sm:$0xff]  ;;  %v12129_v60 = vld [vmem:[#allocation267_spill] sm:$0xff] }
 0x575   : > { %v2874_v30 = vsel %vm2867_vm5, %v12126_v36, %v12125_v28  ;;  %v3901_v54 = vcombine.low %v3845_v17, %v3861_v45  ;;  %v3802_v1 = vcombine.high %v3757_v35, %v3789_v37  ;;  %v2890_v31 = vsel %vm2867_vm5, %v12128_v21, %v12127_v57  ;;  %v12130_v20 = vld [vmem:[#allocation22_spill] sm:$0xff]  ;;  %v12133_v21 = vld [vmem:[#allocation297_spill] sm:$0xff] }
 0x576   : > { %v2906_v59 = vsel %vm2867_vm5, %v12130_v20, %v12129_v60  ;;  %v3806_v28 = vcombine.high %v3002_v4, %v9710_v11  ;;  %v3801_v3 = vcombine.low %v3757_v35, %v3789_v37  ;;  %v3822_v0 = vcombine.high %v3018_v2, %v9748_v14  ;;  %v12131_v32 = vld [vmem:[#allocation282_spill] sm:$0xff]  ;;  %v12135_v20 = vld [vmem:[#allocation313_spill] sm:$0xff]  ;;  %v12137_v14 = vld [vmem:[#allocation344_spill] sm:$0xff] }
 0x577   : > { %v3869_v36 = vcombine.low %v3813_v39, %v3829_v49  ;;  %v3764_v38 = vrot.slane %v3750_v40, %v8332_v8  ;;  %v3838_v47 = vcombine.high %v3066_v24, %v9752_v26  ;;  %5442 = vrot.lane.b32.xlu1 %v3802_v1, %s11224_s7  ;;  %v2922_v57 = vsel %vm2867_vm5, %v12132_v50, %v12131_v32  ;;  %v12136_v11 = vld [vmem:[#allocation146_spill] sm:$0xff]  ;;  %v12138_v50 = vld [vmem:[#allocation328_spill] sm:$0xff] }
 0x578   : > { %v2938_v60 = vsel %vm2867_vm5, %v12134_v62, %v12133_v21  ;;  %v2954_v4 = vsel %vm2867_vm5, %v12136_v11, %v12135_v20  ;;  %v2986_v2 = vsel %vm2867_vm5, %v2857_v44, %v12137_v14  ;;  %5438 = vrot.lane.b32.xlu0 %v3801_v3, %s11223_s28  ;;  %v3868_v26 = vrot.slane %v3854_v25, %v8329_v42  ;;  %v12145_v11 = vld [vmem:[#allocation421_spill] sm:$0xff] }
 0x579   : > { %v3902_v24 = vcombine.high %v3845_v17, %v3861_v45  ;;  %v3909_v37 = vrot.slane %v3901_v54, %v8332_v8  ;;  %v3804_v40 = vcombine.high %v3764_v38, %v3796_v51  ;;  %v2970_v35 = vsel %vm2867_vm5, %v2841_v12, %v12138_v50  ;;  %v12139_v17 = vld [vmem:[#allocation390_spill] sm:$0xff]  ;;  %v12140_v12 = vld [vmem:[#allocation405_spill] sm:$0xff] }
 0x57a   : > { %v3820_v62 = vrot.slane %v3806_v28, %v8329_v42  ;;  %v9863_v1 = vsel %vm2996_vm6, %v2986_v2, %v9378_v9  ;;  %v3803_v32 = vcombine.low %v3764_v38, %v3796_v51  ;;  %v3836_v44 = vrot.slane %v3822_v0, %v8329_v42  ;;  %v12141_v9 = vld [vmem:[#allocation437_spill] sm:$0xff]  ;;  %v12142_v28 = vld [vmem:[#allocation450_spill] sm:$0xff]  ;;  %v12143_v38 = vld [vmem:[#allocation360_spill] sm:$0xff] }
 0x57b   : > { %v3870_v21 = vcombine.high %v3813_v39, %v3829_v49  ;;  %v3877_v3 = vrot.slane %v3869_v36, %v8332_v8  ;;  %v3852_v45 = vrot.slane %v3838_v47, %v8329_v42  ;;  %5450 = vrot.lane.b32.xlu1 %v3804_v40, %s11214_s10  ;;  %v9871_v25 = vsel %vm2996_vm6, %v2906_v59, %v12139_v17  ;;  %v12148_v17 = vld [vmem:[#allocation207_spill] sm:$0xff]  ;;  %s12270_s10 = smov 104  }
 0x57c   : > { %v9875_v54 = vsel %vm2996_vm6, %v2922_v57, %v12140_v12  ;;  %v3083_v51 = vsel %vm2996_vm6, %v2954_v4, %v12141_v9  ;;  %v9881_v49 = vsel %vm2996_vm6, %v2970_v35, %v12142_v28  ;;  %5446 = vrot.lane.b32.xlu0 %v3803_v32, %s11222_s6  ;;  %v3916_v39 = vrot.slane %v3902_v24, %v8332_v8  ;;  %v12144_v57 = vld [vmem:[#allocation375_spill] sm:$0xff]  ;;  %v12146_v35 = vld [vmem:[#allocation205_spill] sm:$0xff]  ;;  %v12147_v32 = vld [vmem:[#allocation100_spill] sm:$0xff] }
 0x57d   : > { %v3917_v0 = vcombine.low %v3852_v45, %v3868_v26  ;;  %v3989_v36 = vcombine.low %v3083_v51, %v9863_v1  ;;  %v3934_v59 = vcombine.high %v3877_v3, %v3909_v37  ;;  %v9888_v47 = vsel %vm2996_vm6, %v2874_v30, %v12143_v38  ;;  %v12149_v12 = vld [vmem:[#allocation102_spill] sm:$0xff] }
 0x57e   : > { %v3019_v20 = vsel %vm2996_vm6, %v2890_v31, %v12144_v57  ;;  %v3067_v4 = vsel %vm2996_vm6, %v2938_v60, %v12145_v11  ;;  %v3933_v14 = vcombine.low %v3877_v3, %v3909_v37  ;;  %v3884_v2 = vrot.slane %v3870_v21, %v8332_v8  ;;  %v12150_v60 = vld [vmem:[#allocation209_spill] sm:$0xff]  ;;  %v12151_v37 = vld [vmem:[#allocation104_spill] sm:$0xff]  ;;  %v12153_v11 = vld [vmem:[#allocation210_spill] sm:$0xff] }
 0x57f   : > { %v3885_v40 = vcombine.low %v3820_v62, %v3836_v44  ;;  %v3957_v24 = vcombine.low %v3019_v20, %v9875_v54  ;;  %v3973_v50 = vcombine.low %v3067_v4, %v9881_v49  ;;  %5458 = vrot.lane.b32.xlu1 %v3934_v59, %s11210_s11  ;;  %v2842_v30 = vsel %vm2738_vm4, %v12147_v32, %v12146_v35  ;;  %v2705_v59 = vpop.permute.xlu1 %2704  ;;  %v12154_v35 = vld [vmem:[#allocation105_spill] sm:$0xff]  ;;  %s12263_s11 = smov 96  }
 0x580   : > { %v9904_v31 = vsel %vm2738_vm4, %v12149_v12, %v12148_v17  ;;  %v9909_v21 = vsel %vm2738_vm4, %v12151_v37, %v12150_v60  ;;  %v3941_v3 = vcombine.low %v9888_v47, %v9871_v25  ;;  %5454 = vrot.lane.b32.xlu0 %v3933_v14, %s11216_s8  ;;  %v3918_v9 = vcombine.high %v3852_v45, %v3868_v26  ;;  %v12155_v17 = vld [vmem:[#allocation211_spill] sm:$0xff]  ;;  %v12156_v12 = vld [vmem:[#allocation106_spill] sm:$0xff]  ;;  %v12157_v37 = vld [vmem:[#allocation213_spill] sm:$0xff]  ;;  %s12274_s8 = smov 112  }
 0x581   : > { %12152 = vst [vmem:[#allocation161_spill] sm:$0xff] %v9909_v21  ;;  %v3925_v28 = vrot.slane %v3917_v0, %v8332_v8  ;;  %v3997_v38 = vrot.slane %v3989_v36, %v8329_v42  ;;  %v3936_v57 = vcombine.high %v3884_v2, %v3916_v39  ;;  %v9919_v32 = vsel %vm2738_vm4, %v12154_v35, %v12153_v11  ;;  %v12158_v21 = vld [vmem:[#allocation108_spill] sm:$0xff]  ;;  %v12160_v11 = vld [vmem:[#allocation214_spill] sm:$0xff]  ;;  %v12161_v35 = vld [vmem:[#allocation109_spill] sm:$0xff] }
 0x582   : > { %v9924_v60 = vsel %vm2738_vm4, %v12156_v12, %v12155_v17  ;;  %v9929_v26 = vsel %vm2738_vm4, %v12158_v21, %v12157_v37  ;;  %v3935_v45 = vcombine.low %v3884_v2, %v3916_v39  ;;  %v3886_v0 = vcombine.high %v3820_v62, %v3836_v44  ;;  %v12162_v12 = vld [vmem:[#allocation221_spill] sm:$0xff]  ;;  %v12164_v37 = vld [vmem:[#allocation236_spill] sm:$0xff]  ;;  %v12165_v39 = vld [vmem:[#allocation451_spill] sm:$0xff] }
 0x583   : > { %12159 = vst [vmem:[#allocation54_spill] sm:$0xff] %v9929_v26  ;;  %v3893_v36 = vrot.slane %v3885_v40, %v8332_v8  ;;  %v3965_v14 = vrot.slane %v3957_v24, %v8329_v42  ;;  %v3981_v63 = vrot.slane %v3973_v50, %v8329_v42  ;;  %5466 = vrot.lane.b32.xlu1 %v3936_v57, %s11206_s13  ;;  %v12166_v57 = vld [vmem:[#allocation251_spill] sm:$0xff]  ;;  %v12168_v26 = vld [vmem:[#allocation266_spill] sm:$0xff]  ;;  %v9962_v6 = vpop.permute.xlu1 %2712  ;;  %s12250_s13 = smov 88  }
 0x584   : > { %v9938_v17 = vsel %vm2738_vm4, %v12161_v35, %v12160_v11  ;;  %v2858_v21 = vsel %vm2738_vm4, %v12163_v10, %v12162_v12  ;;  %v2875_v62 = vsel %vm2867_vm5, %v12165_v39, %v12164_v37  ;;  %v3949_v44 = vrot.slane %v3941_v3, %v8329_v42  ;;  %5462 = vrot.lane.b32.xlu0 %v3935_v45, %s11212_s9  ;;  %v12167_v11 = vld [vmem:[#allocation16_spill] sm:$0xff]  ;;  %v12169_v10 = vld [vmem:[#allocation130_spill] sm:$0xff]  ;;  %s12267_s9 = smov 108  }
 0x585   : > { %v3932_v2 = vrot.slane %v3918_v9, %v8332_v8  ;;  %v3990_v40 = vcombine.high %v3083_v51, %v9863_v1  ;;  %v4037_v24 = vcombine.low %v3981_v63, %v3997_v38  ;;  %v3938_v50 = vcombine.high %v3893_v36, %v3925_v28  ;;  %v12171_v37 = vld [vmem:[#allocation136_spill] sm:$0xff] }
 0x586   : > { %v2891_v35 = vsel %vm2867_vm5, %v12167_v11, %v12166_v57  ;;  %v2907_v12 = vsel %vm2867_vm5, %v12169_v10, %v12168_v26  ;;  %v2923_v3 = vsel %vm2867_vm5, %v12171_v37, %v12170_v29  ;;  %v3937_v39 = vcombine.low %v3893_v36, %v3925_v28  ;;  %v12172_v57 = vld [vmem:[#allocation296_spill] sm:$0xff]  ;;  %v12176_v28 = vld [vmem:[#allocation343_spill] sm:$0xff] }
 0x587   : > { %v3900_v45 = vrot.slane %v3886_v0, %v8332_v8  ;;  %v3958_v9 = vcombine.high %v3019_v20, %v9875_v54  ;;  %v4005_v1 = vcombine.low %v3949_v44, %v3965_v14  ;;  %v3974_v51 = vcombine.high %v3067_v4, %v9881_v49  ;;  %5474 = vrot.lane.b32.xlu1 %v3938_v50, %s11202_s29  ;;  %v12173_v11 = vld [vmem:[#allocation32_spill] sm:$0xff]  ;;  %v12177_v50 = vld [vmem:[#allocation327_spill] sm:$0xff]  ;;  %s12228_s29 = smov 80  }
 0x588   : > { %v2939_v26 = vsel %vm2867_vm5, %v12173_v11, %v12172_v57  ;;  %v12174_v10 = vld [vmem:[#allocation312_spill] sm:$0xff]  ;;  %v2987_v0 = vsel %vm2867_vm5, %v2858_v21, %v12176_v28  ;;  %v3942_v54 = vcombine.high %v9888_v47, %v9871_v25  ;;  %5470 = vrot.lane.b32.xlu0 %v3937_v39, %s11208_s12  ;;  %v4004_v49 = vrot.slane %v3990_v40, %v8329_v42  ;;  %v12178_v57 = vld [vmem:[#allocation389_spill] sm:$0xff]  ;;  %s12259_s12 = smov 100  }
 0x589   : > { %v2955_v29 = vsel %vm2867_vm5, %v12175_v34, %v12174_v10  ;;  %v4038_v20 = vcombine.high %v3981_v63, %v3997_v38  ;;  %v4045_v4 = vrot.slane %v4037_v24, %v8332_v8  ;;  %v3940_v36 = vcombine.high %v3900_v45, %v3932_v2  ;;  %v12181_v39 = vld [vmem:[#allocation129_spill] sm:$0xff]  ;;  %v12184_v10 = vld [vmem:[#allocation374_spill] sm:$0xff]  ;;  %v12185_v28 = vld [vmem:[#allocation420_spill] sm:$0xff] }
 0x58a   : > { %v2971_v37 = vsel %vm2867_vm5, %v2842_v30, %v12177_v50  ;;  %v9982_v34 = vsel %vm2996_vm6, %v2907_v12, %v12178_v57  ;;  %v9985_v21 = vsel %vm2996_vm6, %v2987_v0, %v2705_v59  ;;  %v3939_v11 = vcombine.low %v3900_v45, %v3932_v2  ;;  %v12179_v30 = vld [vmem:[#allocation404_spill] sm:$0xff]  ;;  %v12187_v57 = vld [vmem:[#allocation118_spill] sm:$0xff] }
 0x58b   : > { %v3972_v25 = vrot.slane %v3958_v9, %v8329_v42  ;;  %v4006_v47 = vcombine.high %v3949_v44, %v3965_v14  ;;  %v4013_v40 = vrot.slane %v4005_v1, %v8332_v8  ;;  %v3988_v63 = vrot.slane %v3974_v51, %v8329_v42  ;;  %5482 = vrot.lane.b32.xlu1 %v3940_v36, %s11198_s16  ;;  %v12180_v12 = vld [vmem:[#allocation436_spill] sm:$0xff]  ;;  %v10005_v9 = vpop.permute.xlu1 %2720  ;;  %v12183_v51 = vld [vmem:[#allocation359_spill] sm:$0xff]  ;;  %s12210_s16 = smov 72  }
 0x58c   : > { %v3956_v38 = vrot.slane %v3942_v54, %v8329_v42  ;;  %v9994_v24 = vsel %vm2996_vm6, %v2923_v3, %v12179_v30  ;;  %v3084_v59 = vsel %vm2996_vm6, %v2955_v29, %v12180_v12  ;;  %v10000_v2 = vsel %vm2996_vm6, %v2971_v37, %v12181_v39  ;;  %5478 = vrot.lane.b32.xlu0 %v3939_v11, %s11204_s14  ;;  %v12189_v30 = vld [vmem:[#allocation120_spill] sm:$0xff]  ;;  %s12239_s14 = smov 92  }
 0x58d   : > { %v4125_v14 = vcombine.low %v3084_v59, %v9985_v21  ;;  %v4052_v44 = vrot.slane %v4038_v20, %v8332_v8  ;;  %v4053_v45 = vcombine.low %v3988_v63, %v4004_v49  ;;  %12182 = vst [vmem:[#allocation162_spill] sm:$0xff] %v10005_v9  ;;  %v4070_v1 = vcombine.high %v4013_v40, %v4045_v4  ;;  %v12199_v9 = vld [vmem:[#allocation125_spill] sm:$0xff] }
 0x58e   : > { %v10009_v3 = vsel %vm2996_vm6, %v2875_v62, %v12183_v51  ;;  %v3020_v29 = vsel %vm2996_vm6, %v2891_v35, %v12184_v10  ;;  %v10015_v0 = vsel %vm2996_vm6, %v2939_v26, %v12185_v28  ;;  %v4069_v54 = vcombine.low %v4013_v40, %v4045_v4  ;;  %v12186_v62 = vld [vmem:[#allocation223_spill] sm:$0xff]  ;;  %v12188_v35 = vld [vmem:[#allocation225_spill] sm:$0xff]  ;;  %v12191_v4 = vld [vmem:[#allocation226_spill] sm:$0xff] }
 0x58f   : > { %v4093_v36 = vcombine.low %v3020_v29, %v9994_v24  ;;  %v4020_v20 = vrot.slane %v4006_v47, %v8332_v8  ;;  %v4021_v50 = vcombine.low %v3956_v38, %v3972_v25  ;;  %v4109_v37 = vcombine.low %v10015_v0, %v10000_v2  ;;  %5490 = vrot.lane.b32.xlu1 %v4070_v1, %s11196_s18  ;;  %v12192_v40 = vld [vmem:[#allocation121_spill] sm:$0xff]  ;;  %v12193_v28 = vld [vmem:[#allocation227_spill] sm:$0xff]  ;;  %s12202_s18 = smov 76  }
 0x590   : > { %v10025_v11 = vsel %vm2738_vm4, %v12187_v57, %v12186_v62  ;;  %v10030_v26 = vsel %vm2738_vm4, %v12189_v30, %v12188_v35  ;;  %v10035_v47 = vsel %vm2738_vm4, %v12192_v40, %v12191_v4  ;;  %v4077_v12 = vcombine.low %v10009_v3, %v9982_v34  ;;  %5486 = vrot.lane.b32.xlu0 %v4069_v54, %s11200_s15  ;;  %v12194_v62 = vld [vmem:[#allocation122_spill] sm:$0xff]  ;;  %v12195_v35 = vld [vmem:[#allocation229_spill] sm:$0xff]  ;;  %v12196_v30 = vld [vmem:[#allocation124_spill] sm:$0xff]  ;;  %s12220_s15 = smov 84  }
 0x591   : > { %12190 = vst [vmem:[#allocation55_spill] sm:$0xff] %v10030_v26  ;;  %v4133_v39 = vrot.slane %v4125_v14, %v8329_v42  ;;  %v4054_v1 = vcombine.high %v3988_v63, %v4004_v49  ;;  %v4061_v51 = vrot.slane %v4053_v45, %v8332_v8  ;;  %v4072_v10 = vcombine.high %v4020_v20, %v4052_v44  ;;  %v12198_v40 = vld [vmem:[#allocation230_spill] sm:$0xff] }
 0x592   : > { %v10045_v57 = vsel %vm2738_vm4, %v12194_v62, %v12193_v28  ;;  %v10050_v4 = vsel %vm2738_vm4, %v12196_v30, %v12195_v35  ;;  %v10055_v54 = vsel %vm2738_vm4, %v12199_v9, %v12198_v40  ;;  %v4071_v14 = vcombine.low %v4020_v20, %v4052_v44  ;;  %v10060_v28 = vpop.permute.xlu1 %2728  ;;  %v12203_v62 = vld [vmem:[#allocation238_spill] sm:$0xff]  ;;  %v12206_v9 = vld [vmem:[#allocation455_spill] sm:$0xff] }
 0x593   : > { %12197 = vst [vmem:[#allocation163_spill] sm:$0xff] %v10050_v4  ;;  %12200 = vst [vmem:[#allocation56_spill] sm:$0xff] %v10055_v54  ;;  %v4101_v49 = vrot.slane %v4093_v36, %v8329_v42  ;;  %v4022_v63 = vcombine.high %v3956_v38, %v3972_v25  ;;  %v4029_v45 = vrot.slane %v4021_v50, %v8332_v8  ;;  %5498 = vrot.lane.b32.xlu1 %v4072_v10, %s12202_s18  ;;  %v12204_v35 = vld [vmem:[#allocation454_spill] sm:$0xff]  ;;  %v12205_v4 = vld [vmem:[#allocation240_spill] sm:$0xff]  ;;  %vm11229_vm4 = vcmask 457728  }
 0x594   : > { %v4117_v26 = vrot.slane %v4109_v37, %v8329_v42  ;;  %12201 = vst [vmem:[#allocation164_spill] sm:$0xff] %v10060_v28  ;;  %v10066_v30 = vsel %vm2867_vm5, %v12204_v35, %v12203_v62  ;;  %v10071_v44 = vsel %vm2867_vm5, %v12206_v9, %v12205_v4  ;;  %v12208_v36 = vld [vmem:[#allocation241_spill] sm:$0xff]  ;;  %v4085_v20 = vrot.slane %v4077_v12, %v8329_v42  ;;  %v12211_v62 = vld [vmem:[#allocation242_spill] sm:$0xff]  ;;  %v12214_v9 = vld [vmem:[#allocation244_spill] sm:$0xff] }
 0x595   : > { %12207 = vst [vmem:[#allocation57_spill] sm:$0xff] %v10071_v44  ;;  %v12209_v25 = vld [vmem:[#allocation457_spill] sm:$0xff]  ;;  %5494 = vrot.lane.b32.xlu0 %v4071_v14, %s12210_s16  ;;  %v4126_v50 = vcombine.high %v3084_v59, %v9985_v21  ;;  %v4068_v10 = vrot.slane %v4054_v1, %v8332_v8  ;;  %v4074_v40 = vcombine.high %v4029_v45, %v4061_v51  ;;  %v12212_v35 = vld [vmem:[#allocation458_spill] sm:$0xff]  ;;  %v12215_v44 = vld [vmem:[#allocation459_spill] sm:$0xff] }
 0x596   : > { %v10076_v38 = vsel %vm2867_vm5, %v12209_v25, %v12208_v36  ;;  %v4173_v37 = vcombine.low %v4117_v26, %v4133_v39  ;;  %v10085_v4 = vsel %vm2867_vm5, %v12212_v35, %v12211_v62  ;;  %v10090_v36 = vsel %vm2867_vm5, %v12215_v44, %v12214_v9  ;;  %v12217_v25 = vld [vmem:[#allocation245_spill] sm:$0xff]  ;;  %v12218_v12 = vld [vmem:[#allocation460_spill] sm:$0xff]  ;;  %v12223_v9 = vld [vmem:[#allocation255_spill] sm:$0xff] }
 0x597   : > { %12213 = vst [vmem:[#allocation165_spill] sm:$0xff] %v10085_v4  ;;  %12216 = vst [vmem:[#allocation58_spill] sm:$0xff] %v10090_v36  ;;  %v10095_v14 = vsel %vm2867_vm5, %v12218_v12, %v12217_v25  ;;  %v4073_v21 = vcombine.low %v4029_v45, %v4061_v51  ;;  %v4094_v59 = vcombine.high %v3020_v29, %v9994_v24  ;;  %5506 = vrot.lane.b32.xlu1 %v4074_v40, %s12220_s15  ;;  %v12221_v35 = vld [vmem:[#allocation253_spill] sm:$0xff]  ;;  %v12224_v36 = vld [vmem:[#allocation127_spill] sm:$0xff]  ;;  %v10120_v40 = vpop.permute.xlu1 %2736 }
 0x598   : > { %12219 = vst [vmem:[#allocation166_spill] sm:$0xff] %v10095_v14  ;;  %v4141_v1 = vcombine.low %v4085_v20, %v4101_v49  ;;  %v4036_v28 = vrot.slane %v4022_v63, %v8332_v8  ;;  %v4110_v62 = vcombine.high %v10015_v0, %v10000_v2  ;;  %v12222_v4 = vld [vmem:[#allocation17_spill] sm:$0xff]  ;;  %v10108_v25 = vsel %vm2867_vm5, %v12224_v36, %v12223_v9  ;;  %v12226_v51 = vld [vmem:[#allocation256_spill] sm:$0xff]  ;;  %v12257_v14 = vld [vmem:[#allocation314_spill] sm:$0xff] }
 0x599   : > { %v2893_v44 = vsel %vm2867_vm5, %v12222_v4, %v12221_v35  ;;  %12225 = vst [vmem:[#allocation59_spill] sm:$0xff] %v10108_v25  ;;  %v12227_v45 = vld [vmem:[#allocation128_spill] sm:$0xff]  ;;  %v4078_v29 = vcombine.high %v10009_v3, %v9982_v34  ;;  %5502 = vrot.lane.b32.xlu0 %v4073_v21, %s12228_s29  ;;  %v4140_v2 = vrot.slane %v4126_v50, %v8329_v42  ;;  %12229 = vst [vmem:[#allocation167_spill] sm:$0xff] %v10120_v40  ;;  %v10122_v4 = vpop.permute.xlu0 %2732  ;;  %v12231_v12 = vld [vmem:[#allocation257_spill] sm:$0xff] }
 0x59a   : > { %v10113_v24 = vsel %vm2867_vm5, %v12227_v45, %v12226_v51  ;;  %v4174_v0 = vcombine.high %v4117_v26, %v4133_v39  ;;  %v4181_v63 = vrot.slane %v4173_v37, %v8332_v8  ;;  %12230 = vst [vmem:[#allocation60_spill] sm:$0xff] %v10122_v4  ;;  %v4076_v36 = vcombine.high %v4036_v28, %v4068_v10  ;;  %v12232_v35 = vld [vmem:[#allocation19_spill] sm:$0xff]  ;;  %v12234_v51 = vld [vmem:[#allocation260_spill] sm:$0xff]  ;;  %v12235_v45 = vld [vmem:[#allocation21_spill] sm:$0xff] }
 0x59b   : > { %v10127_v9 = vsel %vm2867_vm5, %v12232_v35, %v12231_v12  ;;  %v10132_v34 = vsel %vm2867_vm5, %v12235_v45, %v12234_v51  ;;  %v12237_v3 = vld [vmem:[#allocation268_spill] sm:$0xff]  ;;  %v12238_v50 = vld [vmem:[#allocation131_spill] sm:$0xff]  ;;  %v4075_v39 = vcombine.low %v4036_v28, %v4068_v10  ;;  %v4108_v37 = vrot.slane %v4094_v59, %v8329_v42  ;;  %v12243_v45 = vld [vmem:[#allocation133_spill] sm:$0xff] }
 0x59c   : > { %12233 = vst [vmem:[#allocation168_spill] sm:$0xff] %v10127_v9  ;;  %12236 = vst [vmem:[#allocation61_spill] sm:$0xff] %v10132_v34  ;;  %v2909_v26 = vsel %vm2867_vm5, %v12238_v50, %v12237_v3  ;;  %v4142_v21 = vcombine.high %v4085_v20, %v4101_v49  ;;  %v4149_v40 = vrot.slane %v4141_v1, %v8332_v8  ;;  %5514 = vrot.lane.b32.xlu1 %v4076_v36, %s12239_s14  ;;  %v12240_v12 = vld [vmem:[#allocation271_spill] sm:$0xff]  ;;  %v12241_v35 = vld [vmem:[#allocation24_spill] sm:$0xff] }
 0x59d   : > { %v4124_v25 = vrot.slane %v4110_v62, %v8329_v42  ;;  %v10144_v4 = vsel %vm2867_vm5, %v12241_v35, %v12240_v12  ;;  %v12242_v51 = vld [vmem:[#allocation272_spill] sm:$0xff]  ;;  %v12245_v28 = vld [vmem:[#allocation275_spill] sm:$0xff]  ;;  %v12246_v10 = vld [vmem:[#allocation26_spill] sm:$0xff]  ;;  %5510 = vrot.lane.b32.xlu0 %v4075_v39, %s12250_s13  ;;  %v4092_v62 = vrot.slane %v4078_v29, %v8329_v42  ;;  %v4188_v36 = vrot.slane %v4174_v0, %v8332_v8  ;;  %v10162_v12 = vpop.permute.xlu1 %5306  ;;  %v5303_v35 = vpop.permute.xlu0 %5302 }
 0x59e   : > { %v10149_v34 = vsel %vm2867_vm5, %v12243_v45, %v12242_v51  ;;  %v10154_v49 = vsel %vm2867_vm5, %v12246_v10, %v12245_v28  ;;  %v12248_v20 = vld [vmem:[#allocation283_spill] sm:$0xff]  ;;  %v12249_v59 = vld [vmem:[#allocation137_spill] sm:$0xff]  ;;  %v4206_v50 = vcombine.high %v4149_v40, %v4181_v63  ;;  %v12251_v51 = vld [vmem:[#allocation286_spill] sm:$0xff]  ;;  %v4205_v0 = vcombine.low %v4149_v40, %v4181_v63 }
 0x59f   : > { %12244 = vst [vmem:[#allocation169_spill] sm:$0xff] %v10149_v34  ;;  %12247 = vst [vmem:[#allocation62_spill] sm:$0xff] %v10154_v49  ;;  %v2925_v1 = vsel %vm2867_vm5, %v12249_v59, %v12248_v20  ;;  %v4189_v3 = vcombine.low %v4124_v25, %v4140_v2  ;;  %v12252_v45 = vld [vmem:[#allocation138_spill] sm:$0xff]  ;;  %v12254_v49 = vld [vmem:[#allocation33_spill] sm:$0xff]  ;;  %v2957_v34 = vsel %vm2867_vm5, %v9782_v41, %v12257_v14 }
 0x5a0   : > { %v10167_v28 = vsel %vm2867_vm5, %v12252_v45, %v12251_v51  ;;  %v12253_v10 = vld [vmem:[#allocation298_spill] sm:$0xff]  ;;  %v12255_v59 = vld [vmem:[#allocation301_spill] sm:$0xff]  ;;  %v4156_v51 = vrot.slane %v4142_v21, %v8332_v8  ;;  %v4157_v45 = vcombine.low %v4092_v62, %v4108_v37  ;;  %5522 = vrot.lane.b32.xlu1 %v4206_v50, %s12259_s12  ;;  %v4190_v40 = vcombine.high %v4124_v25, %v4140_v2  ;;  %v12264_v50 = vld [vmem:[#allocation348_spill] sm:$0xff] }
 0x5a1   : > { %v2941_v20 = vsel %vm2867_vm5, %v12254_v49, %v12253_v10  ;;  %v12256_v39 = vld [vmem:[#allocation34_spill] sm:$0xff]  ;;  %v12258_v9 = vld [vmem:[#allocation317_spill] sm:$0xff]  ;;  %5518 = vrot.lane.b32.xlu0 %v4205_v0, %s12263_s11  ;;  %v12266_v25 = vld [vmem:[#allocation376_spill] sm:$0xff] }
 0x5a2   : > { %v10175_v29 = vsel %vm2867_vm5, %v12256_v39, %v12255_v59  ;;  %v10183_v54 = vsel %vm2867_vm5, %v9792_v23, %v12258_v9  ;;  %v12260_v49 = vld [vmem:[#allocation329_spill] sm:$0xff]  ;;  %v12261_v59 = vld [vmem:[#allocation332_spill] sm:$0xff]  ;;  %v4214_v23 = vcombine.high %v9350_v46, %v9517_v27  ;;  %v4197_v9 = vrot.slane %v4189_v3, %v8332_v8 }
 0x5a3   : > { %v2973_v10 = vsel %vm2867_vm5, %v9904_v31, %v12260_v49  ;;  %v10193_v63 = vsel %vm2867_vm5, %v9919_v32, %v12261_v59  ;;  %v12262_v41 = vld [vmem:[#allocation345_spill] sm:$0xff]  ;;  %v4262_v31 = vcombine.high %v9585_v19, %v9569_v53  ;;  %v4208_v21 = vcombine.high %v4156_v51, %v4188_v36 }
 0x5a4   : > { %v2989_v14 = vsel %vm2867_vm5, %v10025_v11, %v12262_v41  ;;  %v10207_v32 = vsel %vm2867_vm5, %v10035_v47, %v12264_v50  ;;  %v4158_v39 = vcombine.high %v4092_v62, %v4108_v37  ;;  %v4230_v11 = vcombine.high %v9383_v52, %v9555_v15  ;;  %v12265_v46 = vld [vmem:[#allocation361_spill] sm:$0xff]  ;;  %v5315_v47 = vpop.permute.xlu1 %5314  ;;  %v5311_v37 = vpop.permute.xlu0 %5310  ;;  %v12268_v52 = vld [vmem:[#allocation391_spill] sm:$0xff]  ;;  %v12269_v62 = vld [vmem:[#allocation406_spill] sm:$0xff] }
 0x5a5   : > { %v4207_v49 = vcombine.low %v4156_v51, %v4188_v36  ;;  %v10214_v27 = vsel %vm2996_vm6, %v10066_v30, %v12265_v46  ;;  %v10218_v2 = vsel %vm2996_vm6, %v2893_v44, %v12266_v25  ;;  %v4165_v53 = vrot.slane %v4157_v45, %v8332_v8  ;;  %5530 = vrot.lane.b32.xlu1 %v4208_v21, %s12267_s9  ;;  %v12276_v46 = vld [vmem:[#allocation364_spill] sm:$0xff] }
 0x5a6   : > { %v4246_v19 = vcombine.high %v9599_v22, %v9591_v5  ;;  %v10226_v15 = vsel %vm2996_vm6, %v2909_v26, %v12268_v52  ;;  %v10229_v30 = vrot.slane %v4214_v23, %v8329_v42  ;;  %v10233_v44 = vsel %vm2996_vm6, %v2925_v1, %v12269_v62  ;;  %v12272_v23 = vld [vmem:[#allocation438_spill] sm:$0xff] }
 0x5a7   : > { %5526 = vrot.lane.b32.xlu0 %v4207_v49, %s12270_s10  ;;  %v4204_v5 = vrot.slane %v4190_v40, %v8332_v8  ;;  %v4276_v22 = vrot.slane %v4262_v31, %v8329_v42  ;;  %v4310_v36 = vcombine.high %v9659_v13, %v9645_v48  ;;  %v4210_v3 = vcombine.high %v4165_v53, %v4197_v9 }
 0x5a8   : > { %v4172_v26 = vrot.slane %v4158_v39, %v8332_v8  ;;  %v4244_v0 = vrot.slane %v4230_v11, %v8329_v42  ;;  %v10244_v51 = vsel %vm2996_vm6, %v2989_v14, %v9962_v6  ;;  %v4209_v1 = vcombine.low %v4165_v53, %v4197_v9  ;;  %v12273_v14 = vld [vmem:[#allocation134_spill] sm:$0xff]  ;;  %v5323_v40 = vpop.permute.xlu1 %5322  ;;  %v5319_v9 = vpop.permute.xlu0 %5318 }
 0x5a9   : > { %v4278_v45 = vcombine.high %v9676_v43, %v9656_v16  ;;  %v4260_v59 = vrot.slane %v4246_v19, %v8329_v42  ;;  %v12271_v41 = vcombine.low %v12062_v61, %v12061_v56  ;;  %5538 = vrot.lane.b32.xlu1 %v4210_v3, %s11218_s17  ;;  %v4365_v13 = vcombine.low %v10218_v2, %v10233_v44  ;;  %s12277_s17 = smov 120  }
 0x5aa   : > { %v10258_v6 = vsel %vm2996_vm6, %v2957_v34, %v12272_v23  ;;  %v10262_v16 = vsel %vm2996_vm6, %v2973_v10, %v12273_v14  ;;  %v4324_v61 = vrot.slane %v4310_v36, %v8332_v8  ;;  %v4293_v31 = vcombine.low %v10229_v30, %v4244_v0  ;;  %v12275_v34 = vld [vmem:[#allocation422_spill] sm:$0xff] }
 0x5ab   : > { %v5798_v48 = vsel %vm5797_vm7, %v12271_v41, %v5303_v35  ;;  %5534 = vrot.lane.b32.xlu0 %v4209_v1, %s12274_s8  ;;  %v4397_v56 = vcombine.low %v10258_v6, %v10244_v51  ;;  %v4325_v43 = vcombine.low %v4260_v59, %v4276_v22  ;;  %v4212_v35 = vcombine.high %v4172_v26, %v4204_v5  ;;  %v12278_v1 = vld [vmem:[#allocation379_spill] sm:$0xff] }
 0x5ac   : > { %v10271_v21 = vsel %vm2996_vm6, %v2941_v20, %v12275_v34  ;;  %v5800_v10 = vsel %vm5799_vm8, %v5798_v48, %v10162_v12  ;;  %v4211_v50 = vcombine.low %v4172_v26, %v4204_v5  ;;  %v4292_v39 = vrot.slane %v4278_v45, %v8332_v8  ;;  %v5327_v26 = vpop.permute.xlu0 %5326 }
 0x5ad   : > { %v4381_v11 = vcombine.low %v10271_v21, %v10262_v16  ;;  %v5802_v49 = vsel %vm5801_vm9, %v5800_v10, %v5311_v37  ;;  %5546 = vrot.lane.b32.xlu1 %v4212_v35, %s11220_s23  ;;  %v10283_v25 = vsel %vm2996_vm6, %v10076_v38, %v12276_v46  ;;  %v4349_v20 = vcombine.low %v10214_v27, %v10226_v15  ;;  %v12280_v46 = vld [vmem:[#allocation409_spill] sm:$0xff]  ;;  %s12284_s23 = smov 32  }
 0x5ae   : > { %v4366_v12 = vcombine.high %v10218_v2, %v10233_v44  ;;  %v4405_v53 = vrot.slane %v4397_v56, %v8329_v42  ;;  %v4326_v19 = vcombine.high %v4260_v59, %v4276_v22  ;;  %v4333_v37 = vrot.slane %v4325_v43, %v8332_v8  ;;  %v5331_v22 = vpop.permute.xlu1 %5330 }
 0x5af   : > { %5542 = vrot.lane.b32.xlu0 %v4211_v50, %s12277_s17  ;;  %v4343_v52 = vcombine.low %v4292_v39, %v4324_v61  ;;  %v4373_v62 = vrot.slane %v4365_v13, %v8329_v42  ;;  %v4294_v38 = vcombine.high %v10229_v30, %v4244_v0  ;;  %v5804_v5 = vsel %vm5803_vm10, %v5802_v49, %v5315_v47 }
 0x5b0   : > { %v4342_v36 = vcombine.high %v9732_v58, %v9716_v33  ;;  %v4301_v2 = vrot.slane %v4293_v31, %v8332_v8  ;;  %v4389_v44 = vrot.slane %v4381_v11, %v8329_v42  ;;  %v5806_v3 = vsel %vm5805_vm11, %v5804_v5, %v5319_v9 }
 0x5b1   : > { %5554 = vrot.lane.b32.xlu1 %v4343_v52, %s11226_s25  ;;  %v10304_v30 = vsel %vm2996_vm6, %v10113_v24, %v12278_v1  ;;  %v4350_v47 = vcombine.high %v10214_v27, %v10226_v15  ;;  %v4357_v0 = vrot.slane %v4349_v20, %v8329_v42  ;;  %v4398_v45 = vcombine.high %v10258_v6, %v10244_v51  ;;  %v12279_v6 = vld [vmem:[#allocation394_spill] sm:$0xff]  ;;  %s12299_s25 = smov 48  }
 0x5b2   : > { %v4445_v59 = vcombine.low %v4389_v44, %v4405_v53  ;;  %v4340_v41 = vrot.slane %v4326_v19, %v8332_v8  ;;  %v4345_v48 = vcombine.low %v4301_v2, %v4333_v37  ;;  %v10314_v13 = vrot.slane %v4366_v12, %v8329_v42  ;;  %v12281_v12 = vld [vmem:[#allocation441_spill] sm:$0xff]  ;;  %v12286_v1 = vld [vmem:[#allocation30_spill] sm:$0xff] }
 0x5b3   : > { %5550 = vrot.lane.b32.xlu0 %v4342_v36, %s11230_s26  ;;  %v4413_v24 = vcombine.low %v4357_v0, %v4373_v62  ;;  %v5808_v23 = vsel %vm5807_vm12, %v5806_v3, %v5323_v40  ;;  %v4344_v14 = vcombine.high %v4292_v39, %v4324_v61  ;;  %v4308_v27 = vrot.slane %v4294_v38, %v8332_v8  ;;  %s12315_s26 = smov 56  }
 0x5b4   : > { %v4382_v15 = vcombine.high %v10271_v21, %v10262_v16  ;;  %v5810_v56 = vsel %vm5809_vm13, %v5808_v23, %v5327_v26  ;;  %v10323_v51 = vrot.slane %v4350_v47, %v8329_v42  ;;  %v10328_v43 = vsel %vm2996_vm6, %v10144_v4, %v12279_v6  ;;  %v5339_v9 = vpop.permute.xlu1 %5338  ;;  %v5335_v31 = vpop.permute.xlu0 %5334  ;;  %v12285_v26 = vld [vmem:[#allocation287_spill] sm:$0xff]  ;;  %v12287_v47 = vld [vmem:[#allocation290_spill] sm:$0xff] }
 0x5b5   : > { %5562 = vrot.lane.b32.xlu1 %v4345_v48, %s11223_s28  ;;  %v4414_v35 = vcombine.high %v4357_v0, %v4373_v62  ;;  %v4412_v61 = vrot.slane %v4398_v45, %v8329_v42  ;;  %v4446_v16 = vcombine.high %v4389_v44, %v4405_v53  ;;  %v4453_v40 = vrot.slane %v4445_v59, %v8332_v8  ;;  %v12288_v0 = vld [vmem:[#allocation31_spill] sm:$0xff]  ;;  %s12290_s28 = smov 40  }
 0x5b6   : > { %v4347_v34 = vcombine.low %v4308_v27, %v4340_v41  ;;  %v4429_v21 = vcombine.low %v10323_v51, %v10314_v13  ;;  %v10338_v4 = vsel %vm2996_vm6, %v10207_v32, %v9493_v18  ;;  %v5812_v10 = vsel %vm5811_vm14, %v5810_v56, %v5331_v22  ;;  %v12282_v32 = vld [vmem:[#allocation18_spill] sm:$0xff] }
 0x5b7   : > { %5558 = vrot.lane.b32.xlu0 %v4344_v14, %s11228_s4  ;;  %v4346_v50 = vcombine.high %v4301_v2, %v4333_v37  ;;  %v4421_v39 = vrot.slane %v4413_v24, %v8332_v8  ;;  %v4396_v11 = vrot.slane %v4382_v15, %v8329_v42  ;;  %v5814_v49 = vsel %vm5813_vm15, %v5812_v10, %v5335_v31  ;;  %v12291_v31 = vld [vmem:[#allocation302_spill] sm:$0xff]  ;;  %s12304_s4 = smov 44  }
 0x5b8   : > { %v10348_v20 = vsel %vm2996_vm6, %v10167_v28, %v12280_v46  ;;  %v10353_v18 = vsel %vm2996_vm6, %v10183_v54, %v12281_v12  ;;  %v10358_v53 = vsel %vm2996_vm6, %v10193_v63, %v12282_v32  ;;  %v4460_v19 = vrot.slane %v4446_v16, %v8332_v8  ;;  %v5347_v52 = vpop.permute.xlu1 %5346  ;;  %v12283_v54 = vld [vmem:[#allocation425_spill] sm:$0xff]  ;;  %v12295_v10 = vld [vmem:[#allocation318_spill] sm:$0xff] }
 0x5b9   : > { %5570 = vrot.lane.b32.xlu1 %v4347_v34, %s11222_s6  ;;  %v4461_v37 = vcombine.low %v4396_v11, %v4412_v61  ;;  %v4533_v28 = vcombine.low %v10353_v18, %v10338_v4  ;;  %v4477_v62 = vcombine.low %v4421_v39, %v4453_v40  ;;  %v4428_v38 = vrot.slane %v4414_v35, %v8332_v8  ;;  %v5343_v36 = vpop.permute.xlu0 %5342  ;;  %s12289_s6 = smov 28   ;;  %v12292_v34 = vld [vmem:[#allocation143_spill] sm:$0xff]  ;;  %v12297_v32 = vld [vmem:[#allocation321_spill] sm:$0xff] }
 0x5ba   : > { %v10368_v5 = vsel %vm2996_vm6, %v10175_v29, %v12283_v54  ;;  %v5816_v63 = vsel %vm11254_vm0, %v5814_v49, %v5339_v9  ;;  %v4348_v2 = vcombine.high %v4308_v27, %v4340_v41  ;;  %v4501_v44 = vcombine.low %v10304_v30, %v10348_v20 }
 0x5bb   : > { %5566 = vrot.lane.b32.xlu0 %v4346_v50, %s11224_s7  ;;  %v4517_v3 = vcombine.low %v10368_v5, %v10358_v53  ;;  %v5818_v22 = vsel %vm11250_vm1, %v5816_v63, %v5343_v36  ;;  %v10380_v29 = vsel %vm2867_vm5, %v12286_v1, %v12285_v26  ;;  %v10385_v45 = vsel %vm2867_vm5, %v12288_v0, %v12287_v47  ;;  %s12296_s7 = smov 36   ;;  %v12305_v26 = vld [vmem:[#allocation352_spill] sm:$0xff] }
 0x5bc   : > { %v4485_v59 = vcombine.low %v10283_v25, %v10328_v43  ;;  %v4462_v41 = vcombine.high %v4396_v11, %v4412_v61  ;;  %v4469_v48 = vrot.slane %v4461_v37, %v8332_v8  ;;  %v10392_v24 = vrot.slane %v4533_v28, %v8329_v42  ;;  %v5355_v23 = vpop.permute.xlu1 %5354  ;;  %v12298_v28 = vld [vmem:[#allocation333_spill] sm:$0xff]  ;;  %v12306_v1 = vld [vmem:[#allocation56_spill] sm:$0xff] }
 0x5bd   : > { %5578 = vrot.lane.b32.xlu1 %v4477_v62, %s12284_s23  ;;  %v4479_v14 = vcombine.low %v4428_v38, %v4460_v19  ;;  %v4430_v27 = vcombine.high %v10323_v51, %v10314_v13  ;;  %v4437_v15 = vrot.slane %v4429_v21, %v8332_v8  ;;  %v5820_v56 = vsel %vm11227_vm2, %v5818_v22, %v5347_v52  ;;  %v5351_v6 = vpop.permute.xlu0 %5350  ;;  %v12293_v51 = vld [vmem:[#allocation305_spill] sm:$0xff]  ;;  %v12294_v21 = vld [vmem:[#allocation36_spill] sm:$0xff] }
 0x5be   : > { %v4478_v35 = vcombine.high %v4421_v39, %v4453_v40  ;;  %v10399_v16 = vrot.slane %v4501_v44, %v8329_v42  ;;  %v10402_v61 = vrot.slane %v4517_v3, %v8329_v42  ;;  %v5822_v9 = vsel %vm11225_vm3, %v5820_v56, %v5351_v6  ;;  %v12311_v6 = vld [vmem:[#allocation111_spill] sm:$0xff] }
 0x5bf   : > { %5574 = vrot.lane.b32.xlu0 %v4348_v2, %s12289_s6  ;;  %v10409_v13 = vsel %vm2867_vm5, %v12292_v34, %v12291_v31  ;;  %v10414_v40 = vsel %vm2867_vm5, %v12294_v21, %v12293_v51  ;;  %v2961_v50 = vsel %vm2867_vm5, %v9801_v7, %v12295_v10  ;;  %vm11231_vm3 = vcmask 490496   ;;  %v12313_v10 = vld [vmem:[#allocation49_spill] sm:$0xff] }
 0x5c0   : > { %v10421_v39 = vrot.slane %v4485_v59, %v8329_v42  ;;  %v4476_v11 = vrot.slane %v4462_v41, %v8332_v8  ;;  %v4581_v49 = vcombine.low %v10402_v61, %v10392_v24  ;;  %v5363_v46 = vpop.permute.xlu1 %5362  ;;  %v4481_v12 = vcombine.low %v4437_v15, %v4469_v48  ;;  %v12307_v59 = vld [vmem:[#allocation415_spill] sm:$0xff] }
 0x5c1   : > { %5586 = vrot.lane.b32.xlu1 %v4479_v14, %s12290_s28  ;;  %v10429_v37 = vsel %vm2867_vm5, %v9811_v55, %v12297_v32  ;;  %v2977_v7 = vsel %vm2867_vm5, %v9924_v60, %v12298_v28  ;;  %v5824_v52 = vsel %vm11229_vm4, %v5822_v9, %v5355_v23  ;;  %v5359_v62 = vpop.permute.xlu0 %5358  ;;  %v4480_v54 = vcombine.high %v4428_v38, %v4460_v19  ;;  %v12300_v55 = vld [vmem:[#allocation336_spill] sm:$0xff]  ;;  %v12301_v60 = vld [vmem:[#allocation349_spill] sm:$0xff] }
 0x5c2   : > { %v4444_v63 = vrot.slane %v4430_v27, %v8332_v8  ;;  %v4549_v36 = vcombine.low %v10421_v39, %v10399_v16  ;;  %v5826_v2 = vsel %vm11231_vm3, %v5824_v52, %v5359_v62  ;;  %vm11232_vm2 = vcmask 523264   ;;  %v12302_v19 = vld [vmem:[#allocation216_spill] sm:$0xff]  ;;  %v12303_v38 = vld [vmem:[#allocation185_spill] sm:$0xff] }
 0x5c3   : > { %5582 = vrot.lane.b32.xlu0 %v4478_v35, %s12296_s7  ;;  %v10443_v44 = vsel %vm2867_vm5, %v9938_v17, %v12300_v55  ;;  %v2993_v3 = vsel %vm2867_vm5, %v10045_v57, %v12301_v60  ;;  %v4758_v22 = vcombine.high %v12303_v38, %v12302_v19  ;;  %vm11233_vm4 = vcmask 556032   ;;  %v12308_v17 = vld [vmem:[#allocation156_spill] sm:$0xff]  ;;  %v12309_v27 = vld [vmem:[#allocation365_spill] sm:$0xff]  ;;  %v12312_v35 = vld [vmem:[#allocation79_spill] sm:$0xff] }
 0x5c4   : > { %v10454_v47 = vsel %vm2867_vm5, %v12306_v1, %v12305_v26  ;;  %v4589_v0 = vrot.slane %v4581_v49, %v8332_v8  ;;  %v4806_v41 = vcombine.high %v12308_v17, %v12307_v59  ;;  %v5371_v23 = vpop.permute.xlu1 %5370  ;;  %v4483_v14 = vcombine.low %v4444_v63, %v4476_v11  ;;  %v12310_v57 = vld [vmem:[#allocation165_spill] sm:$0xff]  ;;  %v12314_v49 = vld [vmem:[#allocation307_spill] sm:$0xff]  ;;  %v12316_v28 = vld [vmem:[#allocation380_spill] sm:$0xff] }
 0x5c5   : > { %5594 = vrot.lane.b32.xlu1 %v4481_v12, %s12299_s25  ;;  %v10462_v56 = vsel %vm2996_vm6, %v12310_v57, %v12309_v27  ;;  %v4774_v9 = vcombine.high %v12312_v35, %v12311_v6  ;;  %v5828_v31 = vsel %vm11232_vm2, %v5826_v2, %v5363_v46  ;;  %v5367_v34 = vpop.permute.xlu0 %5366  ;;  %v4482_v51 = vcombine.high %v4437_v15, %v4469_v48  ;;  %v12317_v52 = vld [vmem:[#allocation168_spill] sm:$0xff]  ;;  %v12319_v55 = vld [vmem:[#allocation169_spill] sm:$0xff]  ;;  %v12321_v15 = vld [vmem:[#allocation410_spill] sm:$0xff] }
 0x5c6   : > { %v4557_v21 = vrot.slane %v4549_v36, %v8332_v8  ;;  %v4790_v12 = vcombine.high %v12314_v49, %v12313_v10  ;;  %v5830_v32 = vsel %vm11233_vm4, %v5828_v31, %v5367_v34  ;;  %vm11235_vm3 = vcmask 588800   ;;  %v12322_v60 = vld [vmem:[#allocation50_spill] sm:$0xff]  ;;  %v12326_v6 = vld [vmem:[#allocation51_spill] sm:$0xff] }
 0x5c7   : > { %5590 = vrot.lane.b32.xlu0 %v4480_v54, %s12304_s4  ;;  %v10475_v62 = vsel %vm2996_vm6, %v12317_v52, %v12316_v28  ;;  %v12318_v54 = vld [vmem:[#allocation395_spill] sm:$0xff]  ;;  %v10483_v48 = vrot.slane %v4758_v22, %v8329_v42  ;;  %vm11237_vm2 = vcmask 621568   ;;  %v10489_v36 = vsel %vm2996_vm6, %v10380_v29, %v12321_v15  ;;  %v12323_v19 = vld [vmem:[#allocation158_spill] sm:$0xff]  ;;  %v12324_v22 = vld [vmem:[#allocation164_spill] sm:$0xff] }
 0x5c8   : > { %v10480_v46 = vsel %vm2996_vm6, %v12319_v55, %v12318_v54  ;;  %v4820_v2 = vrot.slane %v4806_v41, %v8329_v42  ;;  %v4854_v38 = vcombine.high %v12323_v19, %v12322_v60  ;;  %v5379_v26 = vpop.permute.xlu1 %5378  ;;  %v4613_v1 = vcombine.low %v4557_v21, %v4589_v0  ;;  %v12325_v29 = vld [vmem:[#allocation431_spill] sm:$0xff]  ;;  %v12328_v34 = vld [vmem:[#allocation442_spill] sm:$0xff] }
 0x5c9   : > { %5602 = vrot.lane.b32.xlu1 %v4483_v14, %s12315_s26  ;;  %v10495_v59 = vrot.slane %v4774_v9, %v8329_v42  ;;  %v10499_v17 = vsel %vm2996_vm6, %v2993_v3, %v12324_v22  ;;  %v5832_v14 = vsel %vm11235_vm3, %v5830_v32, %v5371_v23  ;;  %v5375_v27 = vpop.permute.xlu0 %5374  ;;  %v4484_v57 = vcombine.high %v4444_v63, %v4476_v11  ;;  %v12329_v23 = vld [vmem:[#allocation140_spill] sm:$0xff]  ;;  %v12333_v52 = vld [vmem:[#allocation426_spill] sm:$0xff] }
 0x5ca   : > { %v4822_v35 = vcombine.high %v12326_v6, %v12325_v29  ;;  %v4804_v41 = vrot.slane %v4790_v12, %v8329_v42  ;;  %v5834_v31 = vsel %vm11237_vm2, %v5832_v14, %v5375_v27  ;;  %vm11240_vm4 = vcmask 654336   ;;  %v12331_v12 = vld [vmem:[#allocation159_spill] sm:$0xff]  ;;  %v12332_v32 = vld [vmem:[#allocation52_spill] sm:$0xff]  ;;  %v12336_v22 = vld [vmem:[#allocation166_spill] sm:$0xff] }
 0x5cb   : > { %5598 = vrot.lane.b32.xlu0 %v4482_v51, %s12320_s1  ;;  %v4909_v9 = vcombine.low %v10475_v62, %v10489_v36  ;;  %v10511_v3 = vsel %vm2996_vm6, %v2961_v50, %v12328_v34  ;;  %v10515_v11 = vsel %vm2996_vm6, %v2977_v7, %v12329_v23  ;;  %vm11241_vm3 = vcmask 687104  }
 0x5cc   : > { %v4941_v63 = vcombine.low %v10511_v3, %v10499_v17  ;;  %v4868_v51 = vrot.slane %v4854_v38, %v8332_v8  ;;  %v4869_v10 = vcombine.low %v4804_v41, %v4820_v2  ;;  %v5387_v49 = vpop.permute.xlu1 %5386  ;;  %v4886_v28 = vcombine.high %v12332_v32, %v12331_v12 }
 0x5cd   : > { %5610 = vrot.lane.b32.xlu1 %v4613_v1, %s12327_s27  ;;  %v4837_v50 = vcombine.low %v10483_v48, %v10495_v59  ;;  %v10528_v7 = vsel %vm2996_vm6, %v10409_v13, %v12333_v52  ;;  %v5836_v54 = vsel %vm11240_vm4, %v5834_v31, %v5379_v26  ;;  %v5383_v55 = vpop.permute.xlu0 %5382  ;;  %v4614_v15 = vcombine.high %v4557_v21, %v4589_v0  ;;  %v12335_v1 = vld [vmem:[#allocation368_spill] sm:$0xff] }
 0x5ce   : > { %v4836_v60 = vrot.slane %v4822_v35, %v8332_v8  ;;  %v4925_v19 = vcombine.low %v10528_v7, %v10515_v11  ;;  %v5838_v38 = vsel %vm11241_vm3, %v5836_v54, %v5383_v55  ;;  %vm11243_vm2 = vcmask 719872  }
 0x5cf   : > { %5606 = vrot.lane.b32.xlu0 %v4484_v57, %s12330_s21  ;;  %v10539_v14 = vsel %vm2996_vm6, %v12336_v22, %v12335_v1  ;;  %v4893_v13 = vcombine.low %v10462_v56, %v10480_v46  ;;  %v4910_v0 = vcombine.high %v10475_v62, %v10489_v36  ;;  %vm11244_vm4 = vcmask 752640  }
 0x5d0   : > { %v4949_v21 = vrot.slane %v4941_v63, %v8329_v42  ;;  %v4870_v26 = vcombine.high %v4804_v41, %v4820_v2  ;;  %v4877_v27 = vrot.slane %v4869_v10, %v8332_v8  ;;  %v4888_v29 = vcombine.high %v4836_v60, %v4868_v51  ;;  %v12339_v2 = vld [vmem:[#allocation383_spill] sm:$0xff]  ;;  %v12340_v41 = vld [vmem:[#allocation61_spill] sm:$0xff] }
 0x5d1   : > { %5674 = vrot.lane.b32.xlu1 %v4886_v28, %s12334_s20  ;;  %v5395_v57 = vpop.permute.xlu1 %5394  ;;  %v4917_v6 = vrot.slane %v4909_v9, %v8329_v42  ;;  %v4838_v35 = vcombine.high %v10483_v48, %v10495_v59  ;;  %v5840_v31 = vsel %vm11243_vm2, %v5838_v38, %v5387_v49  ;;  %v4887_v23 = vcombine.low %v4836_v60, %v4868_v51  ;;  %s12338_s20 = smov 12   ;;  %v12344_v38 = vld [vmem:[#allocation62_spill] sm:$0xff] }
 0x5d2   : > { %v5391_v34 = vpop.permute.xlu0 %5390  ;;  %v4845_v62 = vrot.slane %v4837_v50, %v8332_v8  ;;  %v4933_v36 = vrot.slane %v4925_v19, %v8329_v42  ;;  %vm11245_vm3 = vcmask 785408   ;;  %v10559_v9 = vsel %vm2996_vm6, %v12340_v41, %v12339_v2  ;;  %v12343_v19 = vld [vmem:[#allocation398_spill] sm:$0xff]  ;;  %v12349_v2 = vld [vmem:[#allocation135_spill] sm:$0xff] }
 0x5d3   : > { %5614 = vrot.lane.b32.xlu0 %v4614_v15, %s12337_s24  ;;  %v5842_v63 = vsel %vm11244_vm4, %v5840_v31, %v5391_v34  ;;  %v4894_v48 = vcombine.high %v10462_v56, %v10480_v46  ;;  %v4901_v59 = vrot.slane %v4893_v13, %v8329_v42  ;;  %vm11246_vm2 = vcmask 818176  }
 0x5d4   : > { %v4942_v51 = vcombine.high %v10511_v3, %v10499_v17  ;;  %v4989_v10 = vcombine.low %v4933_v36, %v4949_v21  ;;  %v4884_v49 = vrot.slane %v4870_v26, %v8332_v8  ;;  %v4890_v50 = vcombine.high %v4845_v62, %v4877_v27 }
 0x5d5   : > { %5682 = vrot.lane.b32.xlu1 %v4888_v29, %s12338_s20  ;;  %v5403_v28 = vpop.permute.xlu1 %5402  ;;  %v10569_v52 = vrot.slane %v4910_v0, %v8329_v42  ;;  %v4957_v54 = vcombine.low %v4901_v59, %v4917_v6  ;;  %v5844_v55 = vsel %vm11245_vm3, %v5842_v63, %v5395_v57  ;;  %v4889_v46 = vcombine.low %v4845_v62, %v4877_v27  ;;  %s12345_s20 = smov 16   ;;  %v12346_v57 = vld [vmem:[#allocation60_spill] sm:$0xff]  ;;  %v12347_v62 = vld [vmem:[#allocation413_spill] sm:$0xff] }
 0x5d6   : > { %v5399_v56 = vpop.permute.xlu0 %5398  ;;  %v4852_v15 = vrot.slane %v4838_v35, %v8332_v8  ;;  %v4926_v60 = vcombine.high %v10528_v7, %v10515_v11  ;;  %vm11248_vm4 = vcmask 850944   ;;  %v10578_v3 = vrot.slane %v4894_v48, %v8329_v42 }
 0x5d7   : > { %5678 = vrot.lane.b32.xlu0 %v4887_v23, %s12341_s22  ;;  %v5846_v17 = vsel %vm11246_vm2, %v5844_v55, %v5399_v56  ;;  %s12342_s22 = smov 20   ;;  %v10583_v1 = vsel %vm2996_vm6, %v12344_v38, %v12343_v19  ;;  %v4958_v22 = vcombine.high %v4901_v59, %v4917_v6  ;;  %vm11247_vm3 = vcmask 883712   ;;  %v12355_v19 = vld [vmem:[#allocation132_spill] sm:$0xff] }
 0x5d8   : > { %v10587_v13 = vrot.slane %v4942_v51, %v8329_v42  ;;  %v4990_v11 = vcombine.high %v4933_v36, %v4949_v21  ;;  %v4997_v7 = vrot.slane %v4989_v10, %v8332_v8  ;;  %v4892_v26 = vcombine.high %v4852_v15, %v4884_v49 }
 0x5d9   : > { %5690 = vrot.lane.b32.xlu1 %v4890_v50, %s12342_s22  ;;  %v5411_v0 = vpop.permute.xlu1 %5410  ;;  %v4973_v27 = vcombine.low %v10578_v3, %v10569_v52  ;;  %v10595_v29 = vsel %vm2996_vm6, %v10454_v47, %v12346_v57  ;;  %v5848_v6 = vsel %vm11248_vm4, %v5846_v17, %v5403_v28  ;;  %v4891_v31 = vcombine.low %v4852_v15, %v4884_v49  ;;  %v12348_v47 = vld [vmem:[#allocation444_spill] sm:$0xff]  ;;  %s12350_s22 = smov 24   ;;  %v12351_v49 = vld [vmem:[#allocation429_spill] sm:$0xff]  ;;  %v12352_v15 = vld [vmem:[#allocation259_spill] sm:$0xff] }
 0x5da   : > { %v5407_v35 = vpop.permute.xlu0 %5406  ;;  %v4965_v34 = vrot.slane %v4957_v54, %v8332_v8  ;;  %v4940_v21 = vrot.slane %v4926_v60, %v8329_v42  ;;  %vm11249_vm2 = vcmask 916480   ;;  %v10605_v36 = vsel %vm2996_vm6, %v10385_v45, %v12347_v62  ;;  %v12353_v60 = vld [vmem:[#allocation20_spill] sm:$0xff]  ;;  %v12354_v17 = vld [vmem:[#allocation270_spill] sm:$0xff] }
 0x5db   : > { %5686 = vrot.lane.b32.xlu0 %v4889_v46, %s12345_s20  ;;  %v5850_v23 = vsel %vm11247_vm3, %v5848_v6, %v5407_v35  ;;  %v10610_v63 = vsel %vm2996_vm6, %v10429_v37, %v12348_v47  ;;  %v10615_v41 = vsel %vm2996_vm6, %v10443_v44, %v12349_v2  ;;  %vm11253_vm3 = vcmask 949248   ;;  %v12356_v6 = vld [vmem:[#allocation274_spill] sm:$0xff]  ;;  %v12357_v35 = vld [vmem:[#allocation25_spill] sm:$0xff] }
 0x5dc   : > { %v5004_v48 = vrot.slane %v4990_v11, %v8332_v8  ;;  %v5005_v59 = vcombine.low %v4940_v21, %v10587_v13  ;;  %v5077_v45 = vcombine.low %v10610_v63, %v10595_v29  ;;  %v5022_v10 = vcombine.high %v4965_v34, %v4997_v7 }
 0x5dd   : > { %5698 = vrot.lane.b32.xlu1 %v4892_v26, %s12289_s6  ;;  %v5419_v51 = vpop.permute.xlu1 %5418  ;;  %v4972_v37 = vrot.slane %v4958_v22, %v8332_v8  ;;  %v10626_v28 = vsel %vm2996_vm6, %v10414_v40, %v12351_v49  ;;  %v5852_v44 = vsel %vm11249_vm2, %v5850_v23, %v5411_v0  ;;  %v5021_v54 = vcombine.low %v4965_v34, %v4997_v7  ;;  %s6048_s6 = sshll.u32 %s6484_s5, 5 }
 0x5de   : > { %v5415_v50 = vpop.permute.xlu0 %5414  ;;  %v5045_v55 = vcombine.low %v10559_v9, %v10605_v36  ;;  %v5061_v56 = vcombine.low %v10626_v28, %v10615_v41  ;;  %vm11252_vm4 = vcmask 982016   ;;  %v10639_v40 = vsel %vm2867_vm5, %v12353_v60, %v12352_v15 }
 0x5df   : > { %5694 = vrot.lane.b32.xlu0 %v4891_v31, %s12350_s22  ;;  %v5854_v46 = vsel %vm11253_vm3, %v5852_v44, %v5415_v50  ;;  %v10644_v38 = vsel %vm2867_vm5, %v12355_v19, %v12354_v17  ;;  %v5029_v22 = vcombine.low %v10539_v14, %v10583_v1  ;;  %vm11251_vm2 = vcmask 1014784   ;;  %v12364_v44 = vld [vmem:[#allocation304_spill] sm:$0xff]  ;;  %v12365_v50 = vld [vmem:[#allocation35_spill] sm:$0xff] }
 0x5e0   : > { %v5006_v11 = vcombine.high %v4940_v21, %v10587_v13  ;;  %v5013_v7 = vrot.slane %v5005_v59, %v8332_v8  ;;  %v10652_v0 = vrot.slane %v5077_v45, %v8329_v42  ;;  %v5024_v57 = vcombine.high %v4972_v37, %v5004_v48  ;;  %v12358_v45 = vld [vmem:[#allocation285_spill] sm:$0xff]  ;;  %v12366_v17 = vld [vmem:[#allocation316_spill] sm:$0xff] }
 0x5e1   : > { %5706 = vrot.lane.b32.xlu1 %v5022_v10, %s12296_s7  ;;  %v5427_v26 = vpop.permute.xlu1 %5426  ;;  %v10657_v31 = vsel %vm2867_vm5, %v12357_v35, %v12356_v6  ;;  %v4974_v34 = vcombine.high %v10578_v3, %v10569_v52  ;;  %v5856_v23 = vsel %vm11252_vm4, %v5854_v46, %v5419_v51  ;;  %v5023_v47 = vcombine.low %v4972_v37, %v5004_v48  ;;  %v12359_v10 = vld [vmem:[#allocation29_spill] sm:$0xff]  ;;  %v12361_v3 = vld [vmem:[#allocation139_spill] sm:$0xff]  ;;  %v12363_v51 = vld [vmem:[#allocation142_spill] sm:$0xff] }
 0x5e2   : > { %v5423_v62 = vpop.permute.xlu0 %5422  ;;  %v4981_v13 = vrot.slane %v4973_v27, %v8332_v8  ;;  %v10664_v21 = vrot.slane %v5045_v55, %v8329_v42  ;;  %v5069_v2 = vrot.slane %v5061_v56, %v8329_v42  ;;  %v10672_v49 = vsel %vm2867_vm5, %v12359_v10, %v12358_v45  ;;  %v12360_v52 = vld [vmem:[#allocation289_spill] sm:$0xff]  ;;  %v12362_v27 = vld [vmem:[#allocation300_spill] sm:$0xff]  ;;  %v12373_v10 = vld [vmem:[#allocation331_spill] sm:$0xff] }
 0x5e3   : > { %5702 = vrot.lane.b32.xlu0 %v5021_v54, %s12284_s23  ;;  %v5858_v59 = vsel %vm11251_vm2, %v5856_v23, %v5423_v62  ;;  %v10677_v48 = vsel %vm2867_vm5, %v12361_v3, %v12360_v52  ;;  %v10682_v37 = vsel %vm2867_vm5, %v12363_v51, %v12362_v27  ;;  %v10687_v54 = vsel %vm2867_vm5, %v12365_v50, %v12364_v44  ;;  %v12367_v19 = vld [vmem:[#allocation160_spill] sm:$0xff]  ;;  %v12369_v35 = vld [vmem:[#allocation53_spill] sm:$0xff]  ;;  %v12375_v50 = vld [vmem:[#allocation335_spill] sm:$0xff] }
 0x5e4   : > { %v5037_v55 = vrot.slane %v5029_v22, %v8329_v42  ;;  %v5020_v56 = vrot.slane %v5006_v11, %v8332_v8  ;;  %v5125_v46 = vcombine.low %v5069_v2, %v10652_v0  ;;  %v5026_v60 = vcombine.high %v4981_v13, %v5013_v7  ;;  %v12368_v6 = vld [vmem:[#allocation320_spill] sm:$0xff]  ;;  %v12370_v62 = vld [vmem:[#allocation157_spill] sm:$0xff] }
 0x5e5   : > { %5714 = vrot.lane.b32.xlu1 %v5024_v57, %s12304_s4  ;;  %s10689_s4 = scalar_lea.vmem [#allocation7], %s6048_s6  ;;  %v5435_v15 = vpop.permute.xlu1 %5434  ;;  %v10699_v57 = vsel %vm2867_vm5, %v12367_v19, %v12366_v17  ;;  %v10704_v23 = vsel %vm2867_vm5, %v12369_v35, %v12368_v6  ;;  %v5025_v45 = vcombine.low %v4981_v13, %v5013_v7  ;;  %v12374_v52 = vld [vmem:[#allocation161_spill] sm:$0xff]  ;;  %v4988_v27 = vrot.slane %v4974_v34, %v8332_v8  ;;  %v12376_v17 = vld [vmem:[#allocation54_spill] sm:$0xff] }
 0x5e6   : > { %5952 = vst [vmem:[%s10689_s4] sm:$0xff] %v5858_v59  ;;  %v5431_v11 = vpop.permute.xlu0 %5430  ;;  %v10713_v3 = vsel %vm2867_vm5, %v12374_v52, %v12373_v10  ;;  %v5093_v51 = vcombine.low %v5037_v55, %v10664_v21  ;;  %v10722_v19 = vsel %vm2867_vm5, %v12376_v17, %v12375_v50  ;;  %v4486_v7 = vcombine.high %v10283_v25, %v10328_v43 }
 0x5e7   : > { %5710 = vrot.lane.b32.xlu0 %v5023_v47, %s12290_s28  ;;  %v12371_v47 = vld [vmem:[#allocation338_spill] sm:$0xff]  ;;  %v5046_v34 = vcombine.high %v10559_v9, %v10605_v36  ;;  %v5078_v13 = vcombine.high %v10610_v63, %v10595_v29  ;;  %v5133_v6 = vrot.slane %v5125_v46, %v8332_v8  ;;  %v4534_v25 = vcombine.high %v10353_v18, %v10338_v4  ;;  %s5957_s28 = scalar_lea.sflag [#allocation6], %s6484_s5 }
 0x5e8   : > { %v12372_v59 = vcombine.low %v12370_v62, %v12371_v47  ;;  %v5028_v62 = vcombine.high %v4988_v27, %v5020_v56  ;;  %v5027_v9 = vcombine.low %v4988_v27, %v5020_v56  ;;  %v5094_v36 = vcombine.high %v5037_v55, %v10664_v21  ;;  %v12377_v47 = vld [vmem:[#allocation347_spill] sm:$0xff] }
 0x5e9   : > { %5722 = vrot.lane.b32.xlu1 %v5026_v60, %s12320_s1  ;;  %v5126_v60 = vcombine.high %v5069_v2, %v10652_v0  ;;  %v5443_v35 = vpop.permute.xlu1 %5442  ;;  %v5101_v29 = vrot.slane %v5093_v51, %v8332_v8  ;;  %v5062_v63 = vcombine.high %v10626_v28, %v10615_v41  ;;  %v10747_v4 = vrot.slane %v4486_v7, %v8329_v42  ;;  %s12417_s1 = smov 116  }
 0x5ea   : > { %v5859_v22 = vsel %vm5797_vm7, %v12372_v59, %v5427_v26  ;;  %v4502_v26 = vcombine.high %v10304_v30, %v10348_v20  ;;  %v4582_v30 = vcombine.high %v10402_v61, %v10392_v24  ;;  %v5439_v20 = vpop.permute.xlu0 %5438  ;;  %v5030_v18 = vcombine.high %v10539_v14, %v10583_v1  ;;  %v12378_v59 = vld [vmem:[#allocation55_spill] sm:$0xff] }
 0x5eb   : > { %v5860_v44 = vsel %vm5799_vm8, %v5859_v22, %v5431_v11  ;;  %5718 = vrot.lane.b32.xlu0 %v5025_v45, %s12299_s25  ;;  %v4550_v24 = vcombine.high %v10421_v39, %v10399_v16  ;;  %v4518_v61 = vcombine.high %v10368_v5, %v10358_v53  ;;  %v10760_v28 = vrot.slane %v5078_v13, %v8329_v42  ;;  %v12379_v11 = vld [vmem:[#allocation351_spill] sm:$0xff] }
 0x5ec   : > { %v5861_v43 = vsel %vm5801_vm9, %v5860_v44, %v5435_v15  ;;  %v10757_v41 = vrot.slane %v4502_v26, %v8329_v42  ;;  %v5140_v21 = vrot.slane %v5126_v60, %v8332_v8  ;;  %v5158_v55 = vcombine.high %v5101_v29, %v5133_v6  ;;  %v12380_v45 = vld [vmem:[#allocation163_spill] sm:$0xff] }
 0x5ed   : > { %v5862_v0 = vsel %vm5803_vm10, %v5861_v43, %v5439_v20  ;;  %5730 = vrot.lane.b32.xlu1 %v5028_v62, %s12330_s21  ;;  %v5451_v2 = vpop.permute.xlu1 %5450  ;;  %v10764_v14 = vrot.slane %v4534_v25, %v8329_v42  ;;  %v4596_v16 = vrot.slane %v4582_v30, %v8332_v8  ;;  %v5157_v5 = vcombine.low %v5101_v29, %v5133_v6  ;;  %v12381_v26 = vld [vmem:[#allocation363_spill] sm:$0xff]  ;;  %v12384_v30 = vld [vmem:[#allocation58_spill] sm:$0xff]  ;;  %s12419_s21 = smov 124  }
 0x5ee   : > { %v5863_v39 = vsel %vm5805_vm11, %v5862_v0, %v5443_v35  ;;  %v5447_v53 = vpop.permute.xlu0 %5446  ;;  %v10769_v1 = vrot.slane %v5046_v34, %v8329_v42  ;;  %v5108_v56 = vrot.slane %v5094_v36, %v8332_v8  ;;  %v10773_v46 = vrot.slane %v5062_v63, %v8329_v42  ;;  %v12382_v34 = vld [vmem:[#allocation57_spill] sm:$0xff]  ;;  %v12383_v25 = vld [vmem:[#allocation367_spill] sm:$0xff]  ;;  %v12385_v20 = vld [vmem:[#allocation378_spill] sm:$0xff] }
 0x5ef   : > { %5726 = vrot.lane.b32.xlu0 %v5027_v9, %s12315_s26  ;;  %v5864_v15 = vsel %vm5807_vm12, %v5863_v39, %v5447_v53  ;;  %v2991_v22 = vsel %vm2867_vm5, %v12378_v59, %v12377_v47  ;;  %v2995_v10 = vsel %vm2867_vm5, %v12380_v45, %v12379_v11  ;;  %v4564_v52 = vrot.slane %v4550_v24, %v8332_v8  ;;  %v12386_v9 = vld [vmem:[#allocation59_spill] sm:$0xff]  ;;  %v12387_v0 = vld [vmem:[#allocation382_spill] sm:$0xff]  ;;  %v12388_v24 = vld [vmem:[#allocation393_spill] sm:$0xff] }
 0x5f0   : > { %v10785_v27 = vrot.slane %v4518_v61, %v8329_v42  ;;  %v10789_v51 = vrot.slane %v5030_v18, %v8329_v42  ;;  %v4565_v44 = vcombine.low %v10747_v4, %v10757_v41  ;;  %v5141_v50 = vcombine.low %v10773_v46, %v10760_v28  ;;  %v12390_v39 = vld [vmem:[#allocation412_spill] sm:$0xff]  ;;  %v12392_v11 = vld [vmem:[#allocation167_spill] sm:$0xff] }
 0x5f1   : > { %5738 = vrot.lane.b32.xlu1 %v5158_v55, %s12337_s24  ;;  %v5459_v17 = vpop.permute.xlu1 %5458  ;;  %v5159_v7 = vcombine.low %v5108_v56, %v5140_v21  ;;  %v10798_v13 = vsel %vm2996_vm6, %v12382_v34, %v12381_v26  ;;  %v5865_v6 = vsel %vm5809_vm13, %v5864_v15, %v5451_v2  ;;  %v4615_v62 = vcombine.low %v4564_v52, %v4596_v16  ;;  %v12389_v2 = vld [vmem:[#allocation397_spill] sm:$0xff]  ;;  %s6081_s24 = sshll.u32 %s6400_s0, 9 }
 0x5f2   : > { %v4597_v60 = vcombine.low %v10785_v27, %v10764_v14  ;;  %v5455_v35 = vpop.permute.xlu0 %5454  ;;  %v10806_v43 = vsel %vm2996_vm6, %v12384_v30, %v12383_v25  ;;  %v10811_v36 = vsel %vm2996_vm6, %v12386_v9, %v12385_v20  ;;  %v5109_v29 = vcombine.low %v10789_v51, %v10769_v1  ;;  %s11099_s0 = scalar_lea.hbm %s11148_s2, %s6081_s24 }
 0x5f3   : > { %5734 = vrot.lane.b32.xlu0 %v5157_v5, %s12327_s27  ;;  %v5866_v63 = vsel %vm5811_vm14, %v5865_v6, %v5455_v35  ;;  %v10820_v18 = vsel %vm2996_vm6, %v10639_v40, %v12387_v0  ;;  %v10825_v61 = vsel %vm2996_vm6, %v10644_v38, %v12388_v24  ;;  %v10830_v55 = vsel %vm2996_vm6, %v10657_v31, %v12389_v2  ;;  %v12391_v5 = vld [vmem:[#allocation408_spill] sm:$0xff]  ;;  %v12398_v35 = vld [vmem:[#allocation27_spill] sm:$0xff]  ;;  %s5971_s27 = sshll.u32 %s10689_s4, 4  ;;  %s11101_s27 = int_to_ptr.vmem [resolvable:$true] %s5971_s27 }
 0x5f4   : > { %v10835_v53 = vsel %vm2996_vm6, %v10677_v48, %v12390_v39  ;;  %v10841_v40 = vsel %vm2996_vm6, %v10672_v49, %v12391_v5  ;;  %v4573_v38 = vrot.slane %v4565_v44, %v8332_v8  ;;  %v5149_v15 = vrot.slane %v5141_v50, %v8332_v8  ;;  %v12393_v44 = vld [vmem:[#allocation162_spill] sm:$0xff]  ;;  %s6240_s7 = scalar_lea.vmem %s11101_s27, 512 }
 0x5f5   : > { %5742 = vrot.lane.b32.xlu1 %v5159_v7, %s12210_s16  ;;  %v5467_v47 = vpop.permute.xlu1 %5466  ;;  %v5160_v59 = vcombine.high %v5108_v56, %v5140_v21  ;;  %v4605_v31 = vrot.slane %v4597_v60, %v8332_v8  ;;  %v10848_v45 = vsel %vm2996_vm6, %v2995_v10, %v12392_v11  ;;  %v5867_v48 = vsel %vm5813_vm15, %v5866_v63, %v5459_v17  ;;  %v12394_v56 = vld [vmem:[#allocation428_spill] sm:$0xff]  ;;  %p6241_p9 = scmp.ne.s32.totalorder %s11101_s27, %s6240_s7 }
 0x5f6   : > { %v5463_v7 = vpop.permute.xlu0 %5462  ;;  %v4616_v26 = vcombine.high %v4564_v52, %v4596_v16  ;;  %v5181_v49 = vcombine.low %v10820_v18, %v10835_v53  ;;  %v5117_v34 = vrot.slane %v5109_v29, %v8332_v8  ;;  %v10856_v50 = vsel %vm2996_vm6, %v2991_v22, %v12393_v44  ;;  %v12395_v17 = vld [vmem:[#allocation440_spill] sm:$0xff]  ;;  %v12396_v52 = vld [vmem:[#allocation445_spill] sm:$0xff] }
 0x5f7   : > { %5618 = vrot.lane.b32.xlu0 %v4615_v62, %s12210_s16  ;;  %v5868_v21 = vsel %vm11254_vm0, %v5867_v48, %v5463_v7  ;;  %v10863_v10 = vsel %vm2996_vm6, %v10687_v54, %v12394_v56  ;;  %v10868_v16 = vsel %vm2996_vm6, %v10699_v57, %v12395_v17  ;;  %v10873_v60 = vsel %vm2996_vm6, %v10704_v23, %v12396_v52  ;;  %v12397_v22 = vld [vmem:[#allocation144_spill] sm:$0xff]  ;;  %p6242_p1 = pnand %p6241_p9, %p12464_p0 }
 0x5f8   : > { %v10878_v6 = vsel %vm2996_vm6, %v10722_v19, %v12397_v22  ;;  %v10884_v54 = vsel %vm2996_vm6, %v10713_v3, %v12398_v35  ;;  %v5213_v57 = vcombine.low %v10873_v60, %v10848_v45  ;;  %v5142_v62 = vcombine.high %v10773_v46, %v10760_v28  ;;  %v12399_v63 = vld [vmem:[#allocation424_spill] sm:$0xff] }
 0x5f9   : > { %5746 = vrot.lane.b32.xlu1 %v5160_v59, %s12202_s18  ;;  %v5475_v23 = vpop.permute.xlu1 %5474  ;;  %v5161_v25 = vcombine.low %v5117_v34, %v5149_v15  ;;  %v4669_v30 = vcombine.low %v10868_v16, %v10856_v50  ;;  %v4598_v19 = vcombine.high %v10785_v27, %v10764_v14  ;;  %v5869_v20 = vsel %vm11250_vm1, %v5868_v21, %v5467_v47  ;;  %p6243_p2 = pneg %p6242_p1 }
 0x5fa   : > { %v5471_v9 = vpop.permute.xlu0 %5470  ;;  %v4617_v29 = vcombine.low %v4573_v38, %v4605_v31  ;;  %v5110_v3 = vcombine.high %v10789_v51, %v10769_v1  ;;  %v10900_v0 = vsel %vm2996_vm6, %v10682_v37, %v12399_v63  ;;  %v5197_v28 = vcombine.low %v10863_v10, %v10878_v6 }
 0x5fb   : > { %5622 = vrot.lane.b32.xlu0 %v4616_v26, %s12202_s18  ;;  %vm12400_vm5 = vcmask 392192   ;;  %v4621_v14 = vcombine.low %v10798_v13, %v10825_v61  ;;  %v4637_v27 = vcombine.low %v10811_v36, %v10841_v40  ;;  %v4566_v1 = vcombine.high %v10747_v4, %v10757_v41 }
 0x5fc   : > { %v5870_v46 = vsel %vm12400_vm5, %v5869_v20, %v5471_v9  ;;  %v4653_v37 = vcombine.low %v10900_v0, %v10884_v54  ;;  %v5165_v51 = vcombine.low %v10806_v43, %v10830_v55  ;;  %v10918_v24 = vrot.slane %v5213_v57, %v8329_v42 }
 0x5fd   : > { %5750 = vrot.lane.b32.xlu1 %v5161_v25, %s12228_s29  ;;  %v5156_v2 = vrot.slane %v5142_v62, %v8332_v8  ;;  %v5483_v39 = vpop.permute.xlu1 %5482  ;;  %v5162_v5 = vcombine.high %v5117_v34, %v5149_v15  ;;  %v10922_v47 = vrot.slane %v4669_v30, %v8329_v42  ;;  %v4612_v4 = vrot.slane %v4598_v19, %v8332_v8 }
 0x5fe   : > { %vm12401_vm6 = vcmask 424960   ;;  %v5479_v59 = vpop.permute.xlu0 %5478  ;;  %v4618_v11 = vcombine.high %v4573_v38, %v4605_v31  ;;  %v10927_v48 = vrot.slane %v5181_v49, %v8329_v42  ;;  %v5124_v7 = vrot.slane %v5110_v3, %v8332_v8 }
 0x5ff   : > { %5626 = vrot.lane.b32.xlu0 %v4617_v29, %s12228_s29  ;;  %v5871_v41 = vsel %vm12401_vm6, %v5870_v46, %v5475_v23  ;;  %v5205_v26 = vrot.slane %v5197_v28, %v8329_v42  ;;  %vm12402_vm5 = vcmask 457728   ;;  %v10934_v15 = vrot.slane %v4637_v27, %v8329_v42 }
 0x600   : > { %v5872_v44 = vsel %vm12402_vm5, %v5871_v41, %v5479_v59  ;;  %v4580_v34 = vrot.slane %v4566_v1, %v8332_v8  ;;  %v4661_v21 = vrot.slane %v4653_v37, %v8329_v42  ;;  %v5173_v38 = vrot.slane %v5165_v51, %v8329_v42 }
 0x601   : > { %5754 = vrot.lane.b32.xlu1 %v5162_v5, %s12220_s15  ;;  %v5261_v31 = vcombine.low %v5205_v26, %v10918_v24  ;;  %v5491_v49 = vpop.permute.xlu1 %5490  ;;  %v5163_v56 = vcombine.low %v5124_v7, %v5156_v2  ;;  %v4629_v17 = vrot.slane %v4621_v14, %v8329_v42  ;;  %vm12403_vm6 = vcmask 490496  }
 0x602   : > { %v4717_v52 = vcombine.low %v4661_v21, %v10922_v47  ;;  %v5873_v22 = vsel %vm12403_vm6, %v5872_v44, %v5483_v39  ;;  %v5487_v35 = vpop.permute.xlu0 %5486  ;;  %v4619_v57 = vcombine.low %v4580_v34, %v4612_v4  ;;  %v5229_v62 = vcombine.low %v5173_v38, %v10927_v48 }
 0x603   : > { %5630 = vrot.lane.b32.xlu0 %v4618_v11, %s12220_s15  ;;  %vm12404_vm5 = vcmask 523264   ;;  %v4685_v25 = vcombine.low %v4629_v17, %v10934_v15  ;;  %v5269_v30 = vrot.slane %v5261_v31, %v8332_v8  ;;  %v5164_v20 = vcombine.high %v5124_v7, %v5156_v2 }
 0x604   : > { %v5874_v23 = vsel %vm12404_vm5, %v5873_v22, %v5487_v35  ;;  %v4725_v9 = vrot.slane %v4717_v52, %v8332_v8  ;;  %vm12405_vm1 = vcmask 556032   ;;  %v4620_v63 = vcombine.high %v4580_v34, %v4612_v4 }
 0x605   : > { %5758 = vrot.lane.b32.xlu1 %v5163_v56, %s12250_s13  ;;  %v5499_v19 = vpop.permute.xlu1 %5498  ;;  %v5875_v29 = vsel %vm12405_vm1, %v5874_v23, %v5491_v49  ;;  %v5237_v28 = vrot.slane %v5229_v62, %v8332_v8  ;;  %vm12406_vm6 = vcmask 588800   ;;  %v4693_v14 = vrot.slane %v4685_v25, %v8332_v8 }
 0x606   : > { %v5214_v27 = vcombine.high %v10873_v60, %v10848_v45  ;;  %v5262_v1 = vcombine.high %v5205_v26, %v10918_v24  ;;  %v4670_v2 = vcombine.high %v10868_v16, %v10856_v50  ;;  %v4718_v39 = vcombine.high %v4661_v21, %v10922_v47 }
 0x607   : > { %5634 = vrot.lane.b32.xlu0 %v4619_v57, %s12250_s13  ;;  %v5495_v3 = vpop.permute.xlu0 %5494  ;;  %v5293_v51 = vcombine.low %v5237_v28, %v5269_v30  ;;  %vm12407_vm1 = vcmask 621568   ;;  %v4749_v41 = vcombine.low %v4693_v14, %v4725_v9  ;;  %v5182_v59 = vcombine.high %v10820_v18, %v10835_v53 }
 0x608   : > { %v5876_v46 = vsel %vm12406_vm6, %v5875_v29, %v5495_v3  ;;  %v5230_v11 = vcombine.high %v5173_v38, %v10927_v48  ;;  %v5198_v45 = vcombine.high %v10863_v10, %v10878_v6  ;;  %vm12408_vm5 = vcmask 654336  }
 0x609   : > { %5762 = vrot.lane.b32.xlu1 %v5164_v20, %s12239_s14  ;;  %v5507_v37 = vpop.permute.xlu1 %5506  ;;  %v5877_v5 = vsel %vm12407_vm1, %v5876_v46, %v5499_v19  ;;  %v4622_v50 = vcombine.high %v10798_v13, %v10825_v61  ;;  %v4638_v16 = vcombine.high %v10811_v36, %v10841_v40  ;;  %v4686_v24 = vcombine.high %v4629_v17, %v10934_v15 }
 0x60a   : > { %v4654_v18 = vcombine.high %v10900_v0, %v10884_v54  ;;  %v5166_v53 = vcombine.high %v10806_v43, %v10830_v55  ;;  %v5228_v10 = vrot.slane %v5214_v27, %v8329_v42  ;;  %v5276_v6 = vrot.slane %v5262_v1, %v8332_v8 }
 0x60b   : > { %5638 = vrot.lane.b32.xlu0 %v4620_v63, %s12239_s14  ;;  %v5503_v4 = vpop.permute.xlu0 %5502  ;;  %v5294_v48 = vcombine.high %v5237_v28, %v5269_v30  ;;  %v4684_v13 = vrot.slane %v4670_v2, %v8329_v42  ;;  %v4732_v36 = vrot.slane %v4718_v39, %v8332_v8  ;;  %vm12409_vm6 = vcmask 687104  }
 0x60c   : > { %v5878_v60 = vsel %vm12408_vm5, %v5877_v5, %v5503_v4  ;;  %v4750_v7 = vcombine.high %v4693_v14, %v4725_v9  ;;  %v5196_v54 = vrot.slane %v5182_v59, %v8329_v42  ;;  %v5244_v0 = vrot.slane %v5230_v11, %v8332_v8 }
 0x60d   : > { %5766 = vrot.lane.b32.xlu1 %v5293_v51, %s12263_s11  ;;  %v5879_v61 = vsel %vm12409_vm6, %v5878_v60, %v5507_v37  ;;  %v5212_v43 = vrot.slane %v5198_v45, %v8329_v42  ;;  %vm12410_vm1 = vcmask 719872   ;;  %v4652_v26 = vrot.slane %v4638_v16, %v8329_v42 }
 0x60e   : > { %v5515_v47 = vpop.permute.xlu1 %5514  ;;  %v4700_v44 = vrot.slane %v4686_v24, %v8332_v8  ;;  %v4668_v15 = vrot.slane %v4654_v18, %v8329_v42  ;;  %v5180_v34 = vrot.slane %v5166_v53, %v8329_v42  ;;  %v5295_v31 = vcombine.low %v5244_v0, %v5276_v6 }
 0x60f   : > { %5642 = vrot.lane.b32.xlu0 %v4749_v41, %s12263_s11  ;;  %v5511_v40 = vpop.permute.xlu0 %5510  ;;  %v5277_v21 = vcombine.low %v5212_v43, %v5228_v10  ;;  %v4636_v49 = vrot.slane %v4622_v50, %v8329_v42  ;;  %vm12411_vm5 = vcmask 752640   ;;  %vm12412_vm6 = vcmask 785408  }
 0x610   : > { %v5880_v55 = vsel %vm12410_vm1, %v5879_v61, %v5511_v40  ;;  %v4733_v56 = vcombine.low %v4668_v15, %v4684_v13  ;;  %v4751_v22 = vcombine.low %v4700_v44, %v4732_v36  ;;  %v5245_v35 = vcombine.low %v5180_v34, %v5196_v54 }
 0x611   : > { %5770 = vrot.lane.b32.xlu1 %v5294_v48, %s12259_s12  ;;  %v5881_v17 = vsel %vm12411_vm5, %v5880_v55, %v5515_v47  ;;  %v4701_v62 = vcombine.low %v4636_v49, %v4652_v26  ;;  %v5285_v23 = vrot.slane %v5277_v21, %v8332_v8  ;;  %v5296_v30 = vcombine.high %v5244_v0, %v5276_v6 }
 0x612   : > { %v5523_v38 = vpop.permute.xlu1 %5522  ;;  %v4741_v19 = vrot.slane %v4733_v56, %v8332_v8  ;;  %vm12413_vm1 = vcmask 818176   ;;  %v4752_v9 = vcombine.high %v4700_v44, %v4732_v36  ;;  %v5253_v29 = vrot.slane %v5245_v35, %v8332_v8 }
 0x613   : > { %5646 = vrot.lane.b32.xlu0 %v4750_v7, %s12259_s12  ;;  %v5519_v52 = vpop.permute.xlu0 %5518  ;;  %vm12414_vm5 = vcmask 850944   ;;  %v4709_v63 = vrot.slane %v4701_v62, %v8332_v8  ;;  %v5278_v28 = vcombine.high %v5212_v43, %v5228_v10  ;;  %v4734_v27 = vcombine.high %v4668_v15, %v4684_v13 }
 0x614   : > { %v5882_v57 = vsel %vm12412_vm6, %v5881_v17, %v5519_v52  ;;  %v5297_v14 = vcombine.low %v5253_v29, %v5285_v23  ;;  %vm12415_vm6 = vcmask 883712   ;;  %v5246_v2 = vcombine.high %v5180_v34, %v5196_v54 }
 0x615   : > { %5774 = vrot.lane.b32.xlu1 %v5295_v31, %s12270_s10  ;;  %v5883_v42 = vsel %vm12413_vm1, %v5882_v57, %v5523_v38  ;;  %v4753_v51 = vcombine.low %v4709_v63, %v4741_v19  ;;  %vm12416_vm1 = vcmask 916480   ;;  %v4702_v5 = vcombine.high %v4636_v49, %v4652_v26 }
 0x616   : > { %v5292_v4 = vrot.slane %v5278_v28, %v8332_v8  ;;  %v5298_v59 = vcombine.high %v5253_v29, %v5285_v23  ;;  %v4748_v11 = vrot.slane %v4734_v27, %v8332_v8  ;;  %v4754_v50 = vcombine.high %v4709_v63, %v4741_v19 }
 0x617   : > { %5650 = vrot.lane.b32.xlu0 %v4751_v22, %s12270_s10  ;;  %v5531_v25 = vpop.permute.xlu1 %5530  ;;  %v5260_v16 = vrot.slane %v5246_v2, %v8332_v8  ;;  %v4716_v18 = vrot.slane %v4702_v5, %v8332_v8  ;;  %v12418_v13 = vcombine.low %v9732_v58, %v9716_v33 }
 0x619   : > { %v5527_v20 = vpop.permute.xlu0 %5526  ;;  %5778 = vrot.lane.b32.xlu1 %v5296_v30, %s12267_s9  ;;  %v5299_v6 = vcombine.low %v5260_v16, %v5292_v4  ;;  %v4755_v48 = vcombine.low %v4716_v18, %v4748_v11  ;;  %v5300_v40 = vcombine.high %v5260_v16, %v5292_v4  ;;  %v4756_v54 = vcombine.high %v4716_v18, %v4748_v11 }
 0x61a   : > { %v5884_v3 = vsel %vm12414_vm5, %v5883_v42, %v5527_v20  ;;  %vm12420_vm5 = vcmask 359424   ;;  %v12427_v18 = vcombine.low %v12332_v32, %v12331_v12 }
 0x61b   : > { %5654 = vrot.lane.b32.xlu0 %v4752_v9, %s12267_s9  ;;  %v5539_v46 = vpop.permute.xlu1 %5538  ;;  %v5885_v1 = vsel %vm12415_vm6, %v5884_v3, %v5531_v25  ;;  %vm12421_vm6 = vcmask 392192  }
 0x61d   : > { %v5535_v37 = vpop.permute.xlu0 %5534  ;;  %5782 = vrot.lane.b32.xlu1 %v5297_v14, %s12274_s8 }
 0x61e   : > { %v5886_v39 = vsel %vm12416_vm1, %v5885_v1, %v5535_v37  ;;  %vm12422_vm1 = vcmask 424960  }
 0x61f   : > { %5658 = vrot.lane.b32.xlu0 %v4753_v51, %s12274_s8  ;;  %v5547_v41 = vpop.permute.xlu1 %5546  ;;  %v5887_v45 = vsel %vm11253_vm3, %v5886_v39, %v5539_v46  ;;  %vm12425_vm3 = vcmask 523264   ;;  %s6351_s8 = smov [#allocation7]  }
 0x620   : > { %s6244_s10 = sshll.u32 %s6351_s8, 4  ;;  %s6245_s10 = int_to_ptr.vmem [resolvable:$false] %s6244_s10 }
 0x621   : > { %v5543_v60 = vpop.permute.xlu0 %5542  ;;  %5786 = vrot.lane.b32.xlu1 %v5298_v59, %s12417_s1  ;;  %s6246_s9 = scalar_lea.vmem %s6245_s10, 1024  ;;  %p6247_p10 = scmp.lt.s32.totalorder %s11101_s27, %s6245_s10 }
 0x622   : > { %v5888_v24 = vsel %vm11252_vm4, %v5887_v45, %v5543_v60  ;;  %vm12424_vm4 = vcmask 490496   ;;  %p6248_p13 = scmp.lt.s32.totalorder %s6246_s9, %s6240_s7 }
 0x623   : > { %v5889_v53 = vsel %vm11251_vm2, %v5888_v24, %v5547_v41  ;;  %5662 = vrot.lane.b32.xlu0 %v4754_v50, %s12417_s1  ;;  %v5555_v10 = vpop.permute.xlu1 %5554  ;;  %vm12423_vm2 = vcmask 457728  }
 0x624   : > { %5953 = vst [vmem:[%s10689_s4 + $0x8] sm:$0xff] %v5889_v53  ;;  %p6249_p5 = por %p6248_p13, %p6247_p10 }
 0x625   : > { %v5551_v47 = vpop.permute.xlu0 %5550  ;;  %5790 = vrot.lane.b32.xlu1 %v5299_v6, %s12277_s17 }
 0x626   : > { %v5890_v36 = vsel %vm5797_vm7, %v12418_v13, %v5551_v47  ;;  %p6250_p7 = pnand %p6249_p5, %p6243_p2 }
 0x627   : > { %5666 = vrot.lane.b32.xlu0 %v4755_v48, %s12277_s17  ;;  %v5891_v8 = vsel %vm5799_vm8, %v5890_v36, %v5555_v10  ;;  %v5563_v61 = vpop.permute.xlu1 %5562 }
 0x629   : > { %v5559_v7 = vpop.permute.xlu0 %5558  ;;  %5794 = vrot.lane.b32.xlu1 %v5300_v40, %s12419_s21 }
 0x62a   : > { %v5892_v0 = vsel %vm5801_vm9, %v5891_v8, %v5559_v7 }
 0x62b   : > { %5670 = vrot.lane.b32.xlu0 %v4756_v54, %s12419_s21  ;;  %v5893_v33 = vsel %vm5803_vm10, %v5892_v0, %v5563_v61  ;;  %v5571_v58 = vpop.permute.xlu1 %5570 }
 0x62d   : > { %v5567_v43 = vpop.permute.xlu0 %5566 }
 0x62e   : > { %v5894_v55 = vsel %vm5805_vm11, %v5893_v33, %v5567_v43 }
 0x62f   : > { %v5895_v26 = vsel %vm5807_vm12, %v5894_v55, %v5571_v58  ;;  %v5579_v44 = vpop.permute.xlu1 %5578 }
 0x631   : > { %v5575_v15 = vpop.permute.xlu0 %5574 }
 0x632   : > { %v5896_v34 = vsel %vm5809_vm13, %v5895_v26, %v5575_v15 }
 0x633   : > { %v5897_v21 = vsel %vm5811_vm14, %v5896_v34, %v5579_v44  ;;  %v5587_v38 = vpop.permute.xlu1 %5586 }
 0x635   : > { %v5583_v31 = vpop.permute.xlu0 %5582 }
 0x636   : > { %v5898_v49 = vsel %vm5813_vm15, %v5897_v21, %v5583_v31 }
 0x637   : > { %v5899_v56 = vsel %vm11254_vm0, %v5898_v49, %v5587_v38  ;;  %v5595_v17 = vpop.permute.xlu1 %5594  ;;  %vm12426_vm0 = vcmask 556032  }
 0x639   : > { %v5591_v52 = vpop.permute.xlu0 %5590 }
 0x63a   : > { %v5900_v22 = vsel %vm12420_vm5, %v5899_v56, %v5591_v52 }
 0x63b   : > { %v5901_v35 = vsel %vm12421_vm6, %v5900_v22, %v5595_v17  ;;  %v5603_v57 = vpop.permute.xlu1 %5602 }
 0x63d   : > { %v5599_v62 = vpop.permute.xlu0 %5598 }
 0x63e   : > { %v5902_v23 = vsel %vm12422_vm1, %v5901_v35, %v5599_v62 }
 0x63f   : > { %v5903_v25 = vsel %vm12423_vm2, %v5902_v23, %v5603_v57  ;;  %v5611_v30 = vpop.permute.xlu1 %5610 }
 0x641   : > { %v5607_v19 = vpop.permute.xlu0 %5606 }
 0x642   : > { %v5904_v42 = vsel %vm12424_vm4, %v5903_v25, %v5607_v19 }
 0x643   : > { %v5905_v20 = vsel %vm12425_vm3, %v5904_v42, %v5611_v30  ;;  %v5675_v9 = vpop.permute.xlu1 %5674 }
 0x644   : > { %v5921_v53 = vsel %vm5797_vm7, %v12427_v18, %v5675_v9  ;;  %vm12428_vm7 = vcmask 326656  }
 0x645   : > { %v5615_v29 = vpop.permute.xlu0 %5614 }
 0x646   : > { %v5906_v3 = vsel %vm12426_vm0, %v5905_v20, %v5615_v29 }
 0x647   : > { %v5683_v63 = vpop.permute.xlu1 %5682 }
 0x649   : > { %v5679_v28 = vpop.permute.xlu0 %5678 }
 0x64a   : > { %v5922_v10 = vsel %vm5799_vm8, %v5921_v53, %v5679_v28  ;;  %vm12429_vm8 = vmmov %vm12420_vm5 }
 0x64b   : > { %v5691_v46 = vpop.permute.xlu1 %5690  ;;  %v5923_v48 = vsel %vm5801_vm9, %v5922_v10, %v5683_v63  ;;  %vm12430_vm9 = vmmov %vm12421_vm6  ;;  %vm12442_vm6 = vcmask 687104  }
 0x64d   : > { %v5687_v14 = vpop.permute.xlu0 %5686 }
 0x64e   : > { %v5924_v13 = vsel %vm5803_vm10, %v5923_v48, %v5687_v14  ;;  %vm12431_vm10 = vmmov %vm12422_vm1 }
 0x64f   : > { %v5699_v27 = vpop.permute.xlu1 %5698  ;;  %v5925_v61 = vsel %vm5805_vm11, %v5924_v13, %v5691_v46  ;;  %vm12432_vm11 = vmmov %vm12423_vm2  ;;  %vm12438_vm2 = vcmask 621568  }
 0x650   : > { %vm12443_vm1 = vmmov %vm12442_vm6 }
 0x651   : > { %v5695_v1 = vpop.permute.xlu0 %5694 }
 0x652   : > { %v5926_v40 = vsel %vm5807_vm12, %v5925_v61, %v5695_v1  ;;  %vm12433_vm12 = vmmov %vm12424_vm4  ;;  %vm12440_vm4 = vcmask 654336  }
 0x653   : > { %v5707_v37 = vpop.permute.xlu1 %5706  ;;  %v5927_v12 = vsel %vm5809_vm13, %v5926_v40, %v5699_v27  ;;  %vm12434_vm13 = vmmov %vm12425_vm3 }
 0x654   : > { %vm12439_vm3 = vmmov %vm12438_vm2 }
 0x655   : > { %v5703_v51 = vpop.permute.xlu0 %5702  ;;  %vm12441_vm5 = vmmov %vm12440_vm4 }
 0x656   : > { %v5928_v32 = vsel %vm5811_vm14, %v5927_v12, %v5703_v51  ;;  %vm12435_vm14 = vmmov %vm12426_vm0 }
 0x657   : > { %v5715_v2 = vpop.permute.xlu1 %5714  ;;  %v5929_v58 = vsel %vm5813_vm15, %v5928_v32, %v5707_v37  ;;  %vm12436_vm15 = vcmask 588800  }
 0x658   : > { %vm12437_vm0 = vmmov %vm12436_vm15 }
 0x659   : > { %v5711_v39 = vpop.permute.xlu0 %5710 }
 0x65a   : > { %v5930_v43 = vsel %vm12428_vm7, %v5929_v58, %v5711_v39  ;;  %vm12444_vm7 = vcmask 719872  }
 0x65b   : > { %v5723_v5 = vpop.permute.xlu1 %5722  ;;  %v5931_v44 = vsel %vm12429_vm8, %v5930_v43, %v5715_v2  ;;  %vm12445_vm8 = vmmov %vm12444_vm7 }
 0x65d   : > { %v5719_v4 = vpop.permute.xlu0 %5718 }
 0x65e   : > { %v5932_v15 = vsel %vm12430_vm9, %v5931_v44, %v5719_v4  ;;  %vm12446_vm9 = vcmask 752640  }
 0x65f   : > { %v5731_v41 = vpop.permute.xlu1 %5730  ;;  %v5933_v38 = vsel %vm12431_vm10, %v5932_v15, %v5723_v5  ;;  %vm12447_vm10 = vmmov %vm12446_vm9 }
 0x661   : > { %v5727_v59 = vpop.permute.xlu0 %5726 }
 0x662   : > { %v5934_v31 = vsel %vm12432_vm11, %v5933_v38, %v5727_v59  ;;  %vm12448_vm11 = vcmask 785408  }
 0x663   : > { %v5739_v11 = vpop.permute.xlu1 %5738  ;;  %v5935_v17 = vsel %vm12433_vm12, %v5934_v31, %v5731_v41  ;;  %vm12449_vm12 = vmmov %vm12448_vm11 }
 0x665   : > { %v5735_v45 = vpop.permute.xlu0 %5734 }
 0x666   : > { %v5936_v52 = vsel %vm12434_vm13, %v5935_v17, %v5735_v45  ;;  %vm12450_vm13 = vcmask 818176  }
 0x667   : > { %v5743_v60 = vpop.permute.xlu1 %5742  ;;  %v5937_v57 = vsel %vm12435_vm14, %v5936_v52, %v5739_v11  ;;  %vm12451_vm14 = vmmov %vm12450_vm13 }
 0x668   : > { %v5938_v62 = vsel %vm12436_vm15, %v5937_v57, %v5743_v60  ;;  %vm12452_vm15 = vcmask 850944  }
 0x669   : > { %v5619_v50 = vpop.permute.xlu0 %5618 }
 0x66a   : > { %v5907_v25 = vsel %vm12437_vm0, %v5906_v3, %v5619_v50  ;;  %vm12453_vm0 = vmmov %vm12452_vm15 }
 0x66b   : > { %v5747_v16 = vpop.permute.xlu1 %5746 }
 0x66c   : > { %v5939_v30 = vsel %vm12438_vm2, %v5938_v62, %v5747_v16  ;;  %vm12454_vm2 = vcmask 883712  }
 0x66d   : > { %v5623_v24 = vpop.permute.xlu0 %5622 }
 0x66e   : > { %v5908_v42 = vsel %vm12439_vm3, %v5907_v25, %v5623_v24  ;;  %vm12455_vm3 = vmmov %vm12454_vm2 }
 0x66f   : > { %v5751_v6 = vpop.permute.xlu1 %5750 }
 0x670   : > { %v5940_v20 = vsel %vm12440_vm4, %v5939_v30, %v5751_v6  ;;  %vm12456_vm4 = vcmask 916480  }
 0x671   : > { %v5627_v47 = vpop.permute.xlu0 %5626 }
 0x672   : > { %v5909_v9 = vsel %vm12441_vm5, %v5908_v42, %v5627_v47  ;;  %vm12457_vm5 = vmmov %vm12456_vm4 }
 0x673   : > { %v5755_v36 = vpop.permute.xlu1 %5754 }
 0x674   : > { %v5941_v29 = vsel %vm12442_vm6, %v5940_v20, %v5755_v36  ;;  %vm12458_vm6 = vcmask 949248  }
 0x675   : > { %v5631_v8 = vpop.permute.xlu0 %5630 }
 0x676   : > { %v5910_v63 = vsel %vm12443_vm1, %v5909_v9, %v5631_v8  ;;  %vm12459_vm1 = vmmov %vm12458_vm6 }
 0x677   : > { %v5759_v7 = vpop.permute.xlu1 %5758 }
 0x678   : > { %v5942_v28 = vsel %vm12444_vm7, %v5941_v29, %v5759_v7  ;;  %vm12460_vm7 = vcmask 982016  }
 0x679   : > { %v5635_v54 = vpop.permute.xlu0 %5634 }
 0x67a   : > { %v5911_v14 = vsel %vm12445_vm8, %v5910_v63, %v5635_v54  ;;  %vm12461_vm8 = vmmov %vm12460_vm7 }
 0x67b   : > { %v5763_v0 = vpop.permute.xlu1 %5762 }
 0x67c   : > { %v5943_v3 = vsel %vm12446_vm9, %v5942_v28, %v5763_v0  ;;  %vm12462_vm9 = vcmask 1014784  }
 0x67d   : > { %v5639_v33 = vpop.permute.xlu0 %5638 }
 0x67e   : > { %v5912_v1 = vsel %vm12447_vm10, %v5911_v14, %v5639_v33  ;;  %vm12463_vm10 = vmmov %vm12462_vm9 }
 0x67f   : > { %v5767_v55 = vpop.permute.xlu1 %5766 }
 0x680   : > { %v5944_v37 = vsel %vm12448_vm11, %v5943_v3, %v5767_v55 }
 0x681   : > { %v5643_v26 = vpop.permute.xlu0 %5642 }
 0x682   : > { %v5913_v51 = vsel %vm12449_vm12, %v5912_v1, %v5643_v26 }
 0x683   : > { %v5771_v34 = vpop.permute.xlu1 %5770 }
 0x684   : > { %v5945_v2 = vsel %vm12450_vm13, %v5944_v37, %v5771_v34 }
 0x685   : > { %v5647_v21 = vpop.permute.xlu0 %5646 }
 0x686   : > { %v5914_v39 = vsel %vm12451_vm14, %v5913_v51, %v5647_v21 }
 0x687   : > { %v5775_v49 = vpop.permute.xlu1 %5774 }
 0x688   : > { %v5946_v5 = vsel %vm12452_vm15, %v5945_v2, %v5775_v49 }
 0x689   : > { %v5651_v56 = vpop.permute.xlu0 %5650 }
 0x68a   : > { %v5915_v41 = vsel %vm12453_vm0, %v5914_v39, %v5651_v56 }
 0x68b   : > { %v5779_v22 = vpop.permute.xlu1 %5778 }
 0x68c   : > { %v5947_v59 = vsel %vm12454_vm2, %v5946_v5, %v5779_v22 }
 0x68d   : > { %v5655_v35 = vpop.permute.xlu0 %5654 }
 0x68e   : > { %v5916_v45 = vsel %vm12455_vm3, %v5915_v41, %v5655_v35 }
 0x68f   : > { %v5783_v23 = vpop.permute.xlu1 %5782 }
 0x690   : > { %v5948_v60 = vsel %vm12456_vm4, %v5947_v59, %v5783_v23 }
 0x691   : > { %v5659_v19 = vpop.permute.xlu0 %5658 }
 0x692   : > { %v5917_v50 = vsel %vm12457_vm5, %v5916_v45, %v5659_v19 }
 0x693   : > { %v5787_v46 = vpop.permute.xlu1 %5786 }
 0x694   : > { %v5949_v16 = vsel %vm12458_vm6, %v5948_v60, %v5787_v46 }
 0x695   : > { %v5663_v27 = vpop.permute.xlu0 %5662 }
 0x696   : > { %v5918_v24 = vsel %vm12459_vm1, %v5917_v50, %v5663_v27 }
 0x697   : > { %v5791_v4 = vpop.permute.xlu1 %5790 }
 0x698   : > { %v5950_v18 = vsel %vm12460_vm7, %v5949_v16, %v5791_v4 }
 0x699   : > { %v5667_v11 = vpop.permute.xlu0 %5666 }
 0x69a   : > { %v5919_v10 = vsel %vm12461_vm8, %v5918_v24, %v5667_v11 }
 0x69b   : > { %v5795_v53 = vpop.permute.xlu1 %5794 }
 0x69c   : > { %v5951_v6 = vsel %vm12462_vm9, %v5950_v18, %v5795_v53 }
 0x69d   : > { %v5671_v47 = vpop.permute.xlu0 %5670  ;;  %5955 = vst [vmem:[%s10689_s4 + $0x18] sm:$0xff] %v5951_v6 }
 0x69e   : > { %v5920_v48 = vsel %vm12463_vm10, %v5919_v10, %v5671_v47 }
 0x69f   : > { %5954 = vst [vmem:[%s10689_s4 + $0x10] sm:$0xff] %v5920_v48 }
 0x6a0   : > { %6253 = shalt.err (!%p6250_p7)
}
 0x6a1   : > { %s6254_s5 = scalar_lea.hbm %s11099_s0, 512  ;;  %s6258_s13 = scalar_lea.hbm %s11148_s2, 1024 }
 0x6a2   : > { %p6255_p8 = scmp.ne.s32.totalorder %s11099_s0, %s6254_s5  ;;  %p6259_p3 = scmp.lt.u32.totalorder %s11099_s0, %s11148_s2 }
 0x6a3   : > { %p6260_p4 = scmp.lt.u32.totalorder %s6258_s13, %s6254_s5  ;;  %p6262_p9 = scmp.lt.u32.totalorder %s6254_s5, %s11099_s0 }
 0x6a4   : > { %p6256_p11 = pnand %p6255_p8, %p12464_p0 }
 0x6a5   : > { %p6261_p6 = por %p6260_p4, %p6259_p3 }
 0x6a6   : > { %p6257_p12 = pneg %p6256_p11 }
 0x6a7   : > { %p6263_p1 = por %p6262_p9, %p6261_p6 }
 0x6a9   : > { %p6264_p2 = pnand %p6263_p1, %p6257_p12 }
 0x6ab   : > { %6267 = shalt.err (!%p6264_p2)
}
 0x6ac   : > { %6100 = dma.vmem_to_hbm [thread:$0]  (%p12464_p0), %s11101_s27, 512, %s11099_s0, %s5957_s28  }
 0x6ad PF: > { %s12465_s15 = sld [smem:[#allocation13_spill]]  ;;  %s5983_s16 = sand.u32 1, %s6296_s19  }
 0x6ae   : > { %p12466_p10 = scmp.ne.s32.totalorder %s11264_s3, 0  ;;  %s5984_s17 = scalar_lea.sflag [#allocation6], %s5983_s16 }
 0x6b3   : > { %p12467_p13 = scmp.ge.s32.totalorder %s12465_s15, 2 }
 0x6b5   : > { %p6107_p5 = pnand %p12467_p13, %p12466_p10 }
 0x6b7   : > { %6291 = dma.done.wait (!%p6107_p5), %s5984_s17, 512  }
 0x6b8   : > { %6293 = vsyncadd (!%p6107_p5), %s5984_s17, 4294966784  ;;  %s12468_s22 = sld [smem:[#allocation14_spill]]  ;;  %s12469_s19 = sld [smem:[#allocation11_spill]] }
 0x6b9   : > { %s12470_s20 = sld [smem:[#allocation12_spill]]  ;;  %s12471_s21 = sld [smem:[#allocation15_spill]] }
 0x6be   : > { %p19_p7 = scmp.ge.s32.totalorder %s12468_s22, 4  }
 0x6c0   :  { %21 = sbr.rel (!%p19_p7) target bundleno = 17 (0x11), region = 69 }
 0x6c7   :  { %5989 = vsyncpa [#allocation5], 1 }
 0x6c8   :  { %5991 = vsyncpa [#allocation5 + $0x1], 1 }
 0x6c9   :  { %5992 = vsyncpa [#allocation6], 1 }
 0x6ca   :  { %5994 = vsyncpa [#allocation6 + $0x1], 1 }

// kernel: tpu_custom_call.1
= control target key start
LH: loop header
LB: loop body
LE: loop exit
PB: predicated region body
PF: predicated region fallthrough
CT: control target
= control target key end

     0   :  { %s1478_s0 = inlined_call_operand.hbm [shape: f32[3,4], index: 0, kind: input, shape index: {}]   ;;  %s1479_s1 = inlined_call_operand.hbm [shape: f32[16,128], index: 1, kind: input, shape index: {}]   ;;  %s1480_s2 = inlined_call_operand.hbm [shape: f32[4,16,128], index: 2, kind: output, shape index: {}]  }
   0x1   :  { %s817_s11 = scalar_lea.hbm %s1478_s0, 64 }
   0x2   :  { %p818_p0 = scmp.ne.s32.totalorder %s1478_s0, %s817_s11  ;;  %p821_p1 = scmp.lt.u32.totalorder %s817_s11, %s1478_s0 }
   0x4   :  { %p823_p2 = pnand %p821_p1, %p818_p0 }
   0x6   :  { %826 = shalt.err (!%p823_p2)  }
   0x7   :  { %s927_s16 = smov [#allocation3]  }
   0x8   :  { %8 = dma.hbm_to_smem %s1478_s0, 64, %s927_s16, [#allocation2] }
   0x9   :  { %901 = dma.done.wait [#allocation2], 64 }
   0xa   :  { %902 = vsyncadd [#allocation2], 4294967232 }
   0xb   :  { %10 = sfence }
   0xc   :  { %11 = vsyncpa [#allocation5], 0 }
   0xd   :  { %13 = vsyncpa [#allocation5 + $0x1], 0 }
   0xe   :  { %14 = vsyncpa [#allocation6], 0 }
   0xf   :  { %16 = vsyncpa [#allocation6 + $0x1], 0  ;;  %s966_s19 = smov 0   ;;  %s968_s20 = smov 0  }
  0x10   :  { %s970_s21 = smov 0   ;;  %s972_s22 = smov 0  }
  0x11 LB: > { %s987_s0 = sadd.s32 4294967295, %s925_s22   ;;  %s687_s23 = sadd.s32 4294967294, %s925_s22   ;;  %s925_s22 = sphi %s972_s22, %s1499_s22   ;;  %s921_s21 = sphi %s970_s21, %s1498_s21   ;;  %s917_s20 = sphi %s968_s20, %s1497_s20   ;;  %s913_s19 = sphi %s966_s19, %s1496_s19  }
  0x12   : > { %s991_s24 = sadd.s32 1, %s925_s22   ;;  %s29_s25 = sadd.s32 1, %s921_s21 }
  0x13   : > { %s26_s26 = ssub.s32 %s925_s22, %s991_s24  ;;  %p36_p3 = scmp.ne.s32.totalorder %s921_s21, %s917_s20 }
  0x14   : > { %p27_p4 = scmp.eq.s32.totalorder %s26_s26, 0  ;;  %p37_p5 = scmp.eq.s32.totalorder %s925_s22, 0 }
  0x15   : > { %p42_p6 = scmp.ne.s32.totalorder %s917_s20, %s913_s19  ;;  %p43_p7 = scmp.eq.s32.totalorder %s987_s0, 0 }
  0x16   : > { %s1003_s27 = scalar_select %p27_p4, %s921_s21, %s29_s25  }
  0x17   : > { %p1005_p8 = por %p37_p5, %p36_p3  ;;  %p1009_p9 = por %p43_p7, %p42_p6 }
  0x18   : > { %p66_p10 = scmp.eq.s32.totalorder %s987_s0, 1  ;;  %p72_p11 = scmp.eq.s32.totalorder %s687_s23, 1 }
  0x19   : > { %p757_p13 = scmp.lt.s32.totalorder %s925_s22, 2  ;;  %s92_s4 = sand.u32 1, %s921_s21  }
  0x1a   : > { %p1016_p0 = por %p66_p10, %p36_p3  ;;  %p1020_p1 = por %p72_p11, %p42_p6 }
  0x1b   : > { %s691_s5 = sshll.u32 %s925_s22, 7  ;;  %s690_s6 = sshll.u32 %s92_s4, 3 }
  0x1c   : > { %s1484_s30 = scalar_select %p1016_p0, 1, 0 }
  0x1d   : > { %s1485_s3 = scalar_select %p1020_p1, 1, 0 }
  0x1e   : > { %s1029_s9 = scalar_lea.hbm %s1479_s1, %s691_s5  ;;  %s96_s10 = scalar_lea.vmem [#allocation4], %s690_s6 }
  0x1f   : > { %s103_s11 = sshll.u32 %s96_s10, 4  ;;  %p1033_p2 = pnand %p757_p13, %p1005_p8  ;;  %s1037_s11 = int_to_ptr.vmem [resolvable:$true] %s103_s11 }
  0x20   : > { %s93_s13 = scalar_lea.sflag [#allocation5], %s92_s4  ;;  %s827_s14 = scalar_lea.hbm %s1029_s9, 128 }
  0x21   : > { %p828_p5 = scmp.ne.s32.totalorder %s1029_s9, %s827_s14  ;;  %p829_p6 = pneg %p1033_p2 }
  0x22   : > { %s832_s17 = scalar_lea.hbm %s1479_s1, 256  ;;  %p833_p8 = scmp.lt.u32.totalorder %s1029_s9, %s1479_s1 }
  0x23   : > { %p830_p7 = pnand %p829_p6, %p828_p5  ;;  %p834_p11 = scmp.lt.u32.totalorder %s832_s17, %s827_s14 }
  0x24   : > { %p836_p12 = scmp.lt.u32.totalorder %s827_s14, %s1029_s9 }
  0x25   : > { %p831_p10 = pneg %p830_p7  ;;  %p835_p13 = por %p834_p11, %p833_p8 }
  0x27   : > { %p837_p3 = por %p836_p12, %p835_p13 }
  0x29   : > { %p838_p4 = pnand %p837_p3, %p831_p10 }
  0x2b   : > { %841 = shalt.err (!%p838_p4)
}
  0x2c   : > { %s842_s25 = scalar_lea.vmem %s1037_s11, 128  ;;  %s928_s26 = smov [#allocation4]  }
  0x2d   : > { %p843_p5 = scmp.ne.s32.totalorder %s1037_s11, %s842_s25  ;;  %s847_s28 = sshll.u32 %s928_s26, 4  ;;  %s848_s28 = int_to_ptr.vmem [resolvable:$false] %s847_s28 }
  0x2e   : > { %s849_s4 = scalar_lea.vmem %s848_s28, 256  ;;  %p850_p0 = scmp.lt.s32.totalorder %s1037_s11, %s848_s28 }
  0x2f   : > { %p845_p7 = pnand %p843_p5, %p829_p6  ;;  %p851_p8 = scmp.lt.s32.totalorder %s849_s4, %s842_s25 }
  0x31   : > { %p846_p1 = pneg %p845_p7  ;;  %p852_p11 = por %p851_p8, %p850_p0 }
  0x33   : > { %p853_p12 = pnand %p852_p11, %p846_p1 }
  0x35   : > { %856 = shalt.err (!%p853_p12)
}
  0x36   : > { %752 = dma.hbm_to_vmem [thread:$0]  (!%p1033_p2), %s1029_s9, 128, %s1037_s11, %s93_s13  }
  0x37   : > { %p1487_p3 = scmp.lt.s32.totalorder %s925_s22, 3  ;;  %p1488_p4 = scmp.ge.s32.totalorder %s925_s22, 1 }
  0x39   : > { %p109_p6 = pnand %p1488_p4, %p1487_p3 }
  0x3a   : > { %s1071_s5 = sand.u32 (!%p109_p6), 1, %s917_s20  }
  0x3b   : > { %112 = sbr.rel (%p109_p6) target bundleno = 237 (0xed), region = 24  ;;  %s693_s6 = sshll.u32 (!%p109_p6), %s1071_s5, 3 }
  0x3c   : > { %s115_s7 = scalar_lea.sflag (!%p109_p6), [#allocation5], %s1071_s5  ;;  %s118_s8 = scalar_lea.vmem (!%p109_p6), [#allocation4], %s693_s6 }
  0x42   : > { %904 = dma.done.wait (%p1009_p9), %s115_s7, 128  }
  0x43   : > { %906 = vsyncadd (%p1009_p9), %s115_s7, 4294967168  ;;  %s138_s10 = sld [smem:[#allocation3]]  ;;  %s695_s9 = sld [smem:[#allocation3 + $0x1]]  ;;  %v1079_v0 = vld [vmem:[%s118_s8] sm:$0xff]  ;;  %v929_v41 = vmov 683565275  }
  0x44   : > { %s696_s11 = sld [smem:[#allocation3 + $0x2]]  ;;  %s698_s12 = sld [smem:[#allocation3 + $0x80]]  ;;  %v930_v43 = vmov 2475754826   ;;  %v931_v45 = vmov 2131351028  }
  0x45   : > { %s699_s13 = sld [smem:[#allocation3 + $0x81]]  ;;  %s700_s14 = sld [smem:[#allocation3 + $0x82]]  ;;  %v932_v47 = vmov 2102212464   ;;  %v933_v49 = vmov 920167782  }
  0x46   : > { %s1090_s29 = sld [smem:[#allocation3 + $0x3]]  ;;  %v934_v57 = vmov 1326507024   ;;  %s1261_s16 = sld [smem:[#allocation3 + $0x100]] }
  0x47   : > { %s1155_s15 = sld [smem:[#allocation3 + $0x83]]  ;;  %s1345_s17 = sld [smem:[#allocation3 + $0x101]] }
  0x48   : > { %s694_s18 = sshll.u32 %s1071_s5, 5  ;;  %s704_s25 = sld [smem:[#allocation3 + $0x102]] }
  0x49   : > { %v150_v1 = vstv %s138_s10  ;;  %v261_v3 = vstv %s695_s9  ;;  %s1393_s23 = scalar_lea.vmem [#allocation7], %s694_s18  ;;  %s705_s26 = sld [smem:[#allocation3 + $0x103]] }
  0x4a   : > { %v151_v2 = vmul.f32 %v150_v1, %v1079_v0  ;;  %v372_v4 = vstv %s696_s11  ;;  %v152_v5 = vstv %s698_s12  ;;  %v262_v6 = vmul.f32 %v261_v3, %v1079_v0  ;;  %s726_s28 = sshll.u32 %s987_s0, 7  ;;  %s614_s4 = sshll.u32 %s1393_s23, 4  ;;  %s1433_s4 = int_to_ptr.vmem [resolvable:$true] %s614_s4 }
  0x4b   : > { %v373_v7 = vmul.f32 %v372_v4, %v1079_v0  ;;  %v263_v9 = vstv %s699_s13  ;;  %v374_v10 = vstv %s700_s14  ;;  %s1431_s8 = scalar_lea.hbm %s1480_s2, %s726_s28  ;;  %s602_s0 = scalar_lea.sflag [#allocation6], %s1071_s5 }
  0x4c   : > { %v1084_v8 = vadd.f32 %v152_v5, %v151_v2  ;;  %v1086_v11 = vadd.f32 %v263_v9, %v262_v6  ;;  %v483_v31 = vstv %s1090_s29  ;;  %s857_s10 = scalar_lea.vmem %s1433_s4, 512  ;;  %p1493_p0 = scmp.ne.s32.totalorder %s1484_s30, 0 }
  0x4d   : > { %v1094_v16 = vadd.f32 %v374_v10, %v373_v7  ;;  %p858_p9 = scmp.ne.s32.totalorder %s1433_s4, %s857_s10  ;;  %s935_s9 = smov [#allocation7]  }
  0x4e   : > { %v154_v12 = vand.u32 2147483647, %v1084_v8  ;;  %v157_v13 = vand.u32 2139095040, %v1084_v8  ;;  %v265_v14 = vand.u32 2147483647, %v1086_v11  ;;  %v268_v15 = vand.u32 2139095040, %v1086_v11 }
  0x4f   : > { %v379_v23 = vand.u32 2139095040, %v1094_v16  ;;  %v376_v35 = vand.u32 2147483647, %v1094_v16  ;;  %vm156_vm13 = vcmp.lt.s32.totalorder %v1084_v8, 0  ;;  %p859_p1 = pnand %p858_p9, %p1493_p0  ;;  %s861_s11 = sshll.u32 %s935_s9, 4  ;;  %s862_s11 = int_to_ptr.vmem [resolvable:$false] %s861_s11 }
  0x50   : > { %v158_v17 = vshrl.u32 %v157_v13, 23  ;;  %v161_v18 = vand.u32 8388607, %v154_v12  ;;  %v269_v19 = vshrl.u32 %v268_v15, 23  ;;  %v272_v20 = vand.u32 8388607, %v265_v14  ;;  %p864_p10 = scmp.lt.s32.totalorder %s1433_s4, %s862_s11 }
  0x51   : > { %v380_v28 = vshrl.u32 %v379_v23, 23  ;;  %vm1216_vm14 = vcmp.le.f32.partialorder %v154_v12, 0.7853982  ;;  %p860_p2 = pneg %p859_p1  ;;  %s863_s12 = scalar_lea.vmem %s862_s11, 1024 }
  0x52   : > { %v706_v21 = vadd.s32 4294967169, %v158_v17  ;;  %v710_v22 = vadd.s32 4294967169, %v269_v19  ;;  %v162_v25 = vor.u32 8388608, %v161_v18  ;;  %v273_v26 = vor.u32 8388608, %v272_v20  ;;  %p865_p13 = scmp.lt.s32.totalorder %s863_s12, %s857_s10 }
  0x53   : > { %v714_v30 = vadd.s32 4294967169, %v380_v28 }
  0x54   : > { %v164_v24 = vadd.s32 1, %v706_v21  ;;  %v275_v27 = vadd.s32 1, %v710_v22  ;;  %v1103_v36 = vshll.u32 %v162_v25, 8  ;;  %v1107_v39 = vshll.u32 %v273_v26, 8  ;;  %p866_p5 = por %p865_p13, %p864_p10 }
  0x55   : > { %v1114_v51 = vadd.s32 1, %v714_v30 }
  0x56   : > { %vm165_vm0 = vcmp.gt.s32.totalorder %v164_v24, 0  ;;  %vm276_vm1 = vcmp.gt.s32.totalorder %v275_v27, 0  ;;  %p867_p7 = pnand %p866_p5, %p860_p2 }
  0x57   : > { %v166_v29 = vsel %vm165_vm0, %v164_v24, 0  ;;  %v277_v34 = vsel %vm276_vm1, %v275_v27, 0  ;;  %vm387_vm11 = vcmp.gt.s32.totalorder %v1114_v51, 0 }
  0x58   : > { %v167_v32 = vshrl.u32 %v166_v29, 5  ;;  %v168_v33 = vand.u32 31, %v166_v29  ;;  %v1105_v37 = vshrl.u32 %v277_v34, 5  ;;  %v279_v38 = vand.u32 31, %v277_v34 }
  0x5a   : > { %v169_v40 = vsub.s32 32, %v168_v33  ;;  %v171_v42 = vshll.u32 %v929_v41, %v168_v33  ;;  %v174_v44 = vshll.u32 %v930_v43, %v168_v33  ;;  %v177_v46 = vshll.u32 %v931_v45, %v168_v33 }
  0x5b   : > { %v180_v48 = vshll.u32 %v932_v47, %v168_v33  ;;  %v183_v50 = vshll.u32 %v933_v49, %v168_v33  ;;  %vm186_vm2 = vcmp.lt.s32.totalorder %v167_v32, 1  ;;  %vm187_vm3 = vcmp.lt.s32.totalorder %v167_v32, 2 }
  0x5c   : > { %v170_v52 = vshrl.u32 %v929_v41, %v169_v40  ;;  %v172_v53 = vshrl.u32 %v930_v43, %v169_v40  ;;  %v175_v54 = vshrl.u32 %v931_v45, %v169_v40  ;;  %v178_v55 = vshrl.u32 %v932_v47, %v169_v40 }
  0x5d   : > { %v181_v56 = vshrl.u32 %v933_v49, %v169_v40  ;;  %v184_v58 = vshrl.u32 %v934_v57, %v169_v40  ;;  %vm189_vm4 = vcmp.lt.s32.totalorder %v167_v32, 4  ;;  %v280_v62 = vsub.s32 32, %v279_v38 }
  0x5e   : > { %v173_v59 = vor.u32 %v172_v53, %v171_v42  ;;  %v176_v60 = vor.u32 %v175_v54, %v174_v44  ;;  %v179_v61 = vor.u32 %v178_v55, %v177_v46  ;;  %vm188_vm5 = vcmp.lt.s32.totalorder %v167_v32, 3 }
  0x5f   : > { %v182_v63 = vor.u32 %v181_v56, %v180_v48  ;;  %v185_v1 = vor.u32 %v184_v58, %v183_v50  ;;  %v282_v2 = vshll.u32 %v929_v41, %v279_v38  ;;  %v285_v13 = vshll.u32 %v930_v43, %v279_v38 }
  0x60   : > { %v190_v3 = vsel %vm186_vm2, %v170_v52, %v173_v59  ;;  %v191_v4 = vsel %vm189_vm4, %v179_v61, 2102212464  ;;  %v194_v5 = vsel %vm186_vm2, %v173_v59, %v176_v60  ;;  %v198_v6 = vsel %vm186_vm2, %v176_v60, %v179_v61 }
  0x61   : > { %v192_v7 = vsel %vm188_vm5, %v176_v60, %v191_v4  ;;  %v195_v9 = vsel %vm189_vm4, %v182_v63, 920167782  ;;  %v199_v10 = vsel %vm189_vm4, %v185_v1, 1326507024  ;;  %v281_v18 = vshrl.u32 %v929_v41, %v280_v62 }
  0x62   : > { %v196_v15 = vsel %vm188_vm5, %v179_v61, %v195_v9  ;;  %v200_v17 = vsel %vm188_vm5, %v182_v63, %v199_v10  ;;  %v283_v19 = vshrl.u32 %v930_v43, %v280_v62  ;;  %v193_v20 = vsel %vm187_vm3, %v190_v3, %v192_v7 }
  0x63   : > { %v197_v21 = vsel %vm187_vm3, %v194_v5, %v196_v15  ;;  %v201_v22 = vsel %vm187_vm3, %v198_v6, %v200_v17  ;;  %v286_v23 = vshrl.u32 %v931_v45, %v280_v62  ;;  %v288_v30 = vshll.u32 %v931_v45, %v279_v38 }
  0x64   : > { %v1134_v24 = vmul.u32.u64.low %v1103_v36, %v201_v22  ;;  %v1135_v25 = vmul.u32.u64.high %v1103_v36, %v201_v22, %v1134_v24  ;;  %v1138_v26 = vmul.u32.u64.low %v1103_v36, %v197_v21  ;;  %v1139_v27 = vmul.u32.u64.high %v1103_v36, %v197_v21, %v1138_v26 }
  0x65   : > { %v284_v28 = vor.u32 %v283_v19, %v282_v2  ;;  %v287_v29 = vor.u32 %v286_v23, %v285_v13  ;;  %v289_v33 = vshrl.u32 %v932_v47, %v280_v62  ;;  %v291_v32 = vshll.u32 %v932_v47, %v279_v38 }
  0x66   : > { %v292_v34 = vshrl.u32 %v933_v49, %v280_v62  ;;  %v294_v40 = vshll.u32 %v933_v49, %v279_v38  ;;  %v295_v42 = vshrl.u32 %v934_v57, %v280_v62  ;;  %v209_v44 = vmul.u32 %v1103_v36, %v193_v20 }
  0x67   : > { %v290_v46 = vor.u32 %v289_v33, %v288_v30  ;;  %vm297_vm6 = vcmp.lt.s32.totalorder %v1105_v37, 1  ;;  %vm298_vm7 = vcmp.lt.s32.totalorder %v1105_v37, 2  ;;  %vm211_vm8 = vc.u32 %v1135_v25, %v1138_v26 }
  0x68   : > { %v212_v48 = vadd.s32 1, %v1139_v27  ;;  %v293_v50 = vor.u32 %v292_v34, %v291_v32  ;;  %vm299_vm9 = vcmp.lt.s32.totalorder %v1105_v37, 3  ;;  %v296_v38 = vor.u32 %v295_v42, %v294_v40 }
  0x69   : > { %vm300_vm10 = vcmp.lt.s32.totalorder %v1105_v37, 4  ;;  %v301_v52 = vsel %vm297_vm6, %v281_v18, %v284_v28  ;;  %v305_v36 = vsel %vm297_vm6, %v284_v28, %v287_v29  ;;  %v309_v56 = vsel %vm297_vm6, %v287_v29, %v290_v46 }
  0x6a   : > { %v213_v53 = vsel %vm211_vm8, %v212_v48, %v1139_v27  ;;  %v302_v54 = vsel %vm300_vm10, %v290_v46, 2102212464  ;;  %v306_v55 = vsel %vm300_vm10, %v293_v50, 920167782  ;;  %v310_v61 = vsel %vm300_vm10, %v296_v38, 1326507024 }
  0x6b   : > { %v214_v58 = vadd.s32 %v213_v53, %v209_v44  ;;  %v303_v59 = vsel %vm299_vm9, %v287_v29, %v302_v54  ;;  %v307_v60 = vsel %vm299_vm9, %v290_v46, %v306_v55  ;;  %v311_v1 = vsel %vm299_vm9, %v293_v50, %v310_v61 }
  0x6c   : > { %v304_v62 = vsel %vm298_vm7, %v301_v52, %v303_v59  ;;  %v308_v63 = vsel %vm298_vm7, %v305_v36, %v307_v60  ;;  %v312_v3 = vsel %vm298_vm7, %v309_v56, %v311_v1  ;;  %v388_v9 = vsel %vm387_vm11, %v1114_v51, 0 }
  0x6d   : > { %v215_v2 = vadd.s32 536870912, %v214_v58  ;;  %v1173_v4 = vmul.u32.u64.low %v1107_v39, %v308_v63  ;;  %v1174_v5 = vmul.u32.u64.high %v1107_v39, %v308_v63, %v1173_v4  ;;  %v390_v13 = vand.u32 31, %v388_v9 }
  0x6e   : > { %v1178_v6 = vmul.u32.u64.low %v1107_v39, %v312_v3  ;;  %v1179_v7 = vmul.u32.u64.high %v1107_v39, %v312_v3, %v1178_v6  ;;  %v320_v15 = vmul.u32 %v1107_v39, %v304_v62  ;;  %v383_v17 = vand.u32 8388607, %v376_v35 }
  0x6f   : > { %v216_v10 = vshrl.u32 %v215_v2, 30  ;;  %v484_v37 = vmul.f32 %v483_v31, %v1079_v0  ;;  %v323_v19 = vadd.s32 1, %v1174_v5  ;;  %v485_v20 = vstv %s1155_s15 }
  0x70   : > { %vm322_vm12 = vc.u32 %v1179_v7, %v1173_v4  ;;  %v391_v21 = vsub.s32 32, %v390_v13  ;;  %v384_v23 = vor.u32 8388608, %v383_v17  ;;  %v1199_v27 = vshrl.u32 %v388_v9, 5 }
  0x71   : > { %v217_v18 = vshll.u32 %v216_v10, 30  ;;  %v324_v51 = vsel %vm322_vm12, %v323_v19, %v1174_v5  ;;  %v1196_v24 = vadd.f32 %v485_v20, %v484_v37  ;;  %v393_v28 = vshll.u32 %v929_v41, %v390_v13 }
  0x72   : > { %v325_v39 = vadd.s32 %v324_v51, %v320_v15  ;;  %v396_v29 = vshll.u32 %v930_v43, %v390_v13  ;;  %v394_v33 = vshrl.u32 %v930_v43, %v391_v21  ;;  %v397_v32 = vshrl.u32 %v931_v45, %v391_v21 }
  0x73   : > { %v1192_v22 = vsub.s32 %v214_v58, %v217_v18  ;;  %v399_v34 = vshll.u32 %v931_v45, %v390_v13  ;;  %v400_v42 = vshrl.u32 %v932_v47, %v391_v21  ;;  %v402_v44 = vshll.u32 %v932_v47, %v390_v13 }
  0x74   : > { %v326_v30 = vadd.s32 536870912, %v325_v39  ;;  %v403_v46 = vshrl.u32 %v933_v49, %v391_v21  ;;  %v240_v48 = vsub.s32 4, %v216_v10  ;;  %v405_v38 = vshll.u32 %v933_v49, %v390_v13 }
  0x75   : > { %v220_v31 = vsub.s32 0, %v1192_v22  ;;  %v406_v52 = vshrl.u32 %v934_v57, %v391_v21  ;;  %v210_v53 = vadd.s32 %v1138_v26, %v1135_v25  ;;  %v1222_v55 = vshll.u32 %v384_v23, 8 }
  0x76   : > { %v1210_v50 = vshrl.u32 %v326_v30, 30  ;;  %v487_v56 = vand.u32 2147483647, %v1196_v24  ;;  %v392_v59 = vshrl.u32 %v929_v41, %v391_v21  ;;  %v395_v60 = vor.u32 %v394_v33, %v393_v28 }
  0x77   : > { %v707_v40 = vmin.u32 %v220_v31, %v1192_v22  ;;  %v398_v61 = vor.u32 %v397_v32, %v396_v29  ;;  %v401_v63 = vor.u32 %v400_v42, %v399_v34  ;;  %v404_v12 = vor.u32 %v403_v46, %v402_v44 }
  0x78   : > { %v328_v58 = vshll.u32 %v1210_v50, 30  ;;  %vm408_vm15 = vcmp.lt.s32.totalorder %v1199_v27, 1  ;;  %v241_v1 = vsel %vm156_vm13, %v240_v48, %v216_v10  ;;  %v407_v26 = vor.u32 %v406_v52, %v405_v38 }
  0x79   : > { %v222_v54 = vclz %v707_v40  ;;  %vm411_vm0 = vcmp.lt.s32.totalorder %v1199_v27, 4  ;;  %vm409_vm2 = vcmp.lt.s32.totalorder %v1199_v27, 2  ;;  %vm410_vm3 = vcmp.lt.s32.totalorder %v1199_v27, 3 }
  0x7a   : > { %v1230_v25 = vsub.s32 %v325_v39, %v328_v58  ;;  %v413_v2 = vsel %vm411_vm0, %v401_v63, 2102212464  ;;  %vm267_vm4 = vcmp.lt.s32.totalorder %v1086_v11, 0  ;;  %v412_v6 = vsel %vm408_vm15, %v392_v59, %v395_v60 }
  0x7b   : > { %v708_v62 = vadd.s32 4294967294, %v222_v54  ;;  %v416_v9 = vsel %vm408_vm15, %v395_v60, %v398_v61  ;;  %v417_v17 = vsel %vm411_vm0, %v404_v12, 920167782  ;;  %v414_v18 = vsel %vm410_vm3, %v398_v61, %v413_v2 }
  0x7c   : > { %v331_v5 = vsub.s32 0, %v1230_v25  ;;  %v418_v19 = vsel %vm410_vm3, %v401_v63, %v417_v17  ;;  %v420_v20 = vsel %vm408_vm15, %v398_v61, %v401_v63  ;;  %v421_v39 = vsel %vm411_vm0, %v407_v26, 1326507024 }
  0x7d   : > { %vm709_vm1 = vcmp.lt.s32.totalorder %v708_v62, 0  ;;  %v243_v23 = vsel %vm1216_vm14, 0, %v241_v1  ;;  %v351_v28 = vsub.s32 4, %v1210_v50  ;;  %v490_v29 = vand.u32 2139095040, %v1196_v24 }
  0x7e   : > { %v225_v3 = vsel %vm709_vm1, 0, %v708_v62  ;;  %v711_v37 = vmin.u32 %v331_v5, %v1230_v25  ;;  %v415_v32 = vsel %vm409_vm2, %v412_v6, %v414_v18  ;;  %v422_v34 = vsel %vm410_vm3, %v404_v12, %v421_v39 }
  0x7f   : > { %v226_v10 = vsub.s32 32, %v225_v3  ;;  %v227_v13 = vshll.u32 %v1192_v22, %v225_v3  ;;  %v230_v15 = vsub.s32 4294967266, %v225_v3  ;;  %v419_v22 = vsel %vm409_vm2, %v416_v9, %v418_v19 }
  0x80   : > { %v333_v31 = vclz %v711_v37  ;;  %v423_v42 = vsel %vm409_vm2, %v420_v20, %v422_v34  ;;  %v1270_v44 = vmul.u32.u64.low %v1222_v55, %v419_v22  ;;  %v1271_v46 = vmul.u32.u64.high %v1222_v55, %v419_v22, %v1270_v44 }
  0x81   : > { %v228_v21 = vshrl.u32 %v210_v53, %v226_v10  ;;  %v231_v51 = vadd.s32 127, %v230_v15  ;;  %v1275_v52 = vmul.u32.u64.low %v1222_v55, %v423_v42  ;;  %v1276_v53 = vmul.u32.u64.high %v1222_v55, %v423_v42, %v1275_v52 }
  0x82   : > { %v712_v40 = vadd.s32 4294967294, %v333_v31  ;;  %v247_v54 = vadd.s32 3, %v243_v23  ;;  %v321_v58 = vadd.s32 %v1173_v4, %v1179_v7  ;;  %v491_v59 = vshrl.u32 %v490_v29, 23 }
  0x83   : > { %v229_v30 = vor.u32 %v228_v21, %v227_v13  ;;  %v232_v33 = vshll.u32 %v231_v51, 23  ;;  %v352_v61 = vsel %vm267_vm4, %v351_v28, %v1210_v50  ;;  %v431_v62 = vmul.u32 %v1222_v55, %v415_v32 }
  0x84   : > { %vm713_vm5 = vcmp.lt.s32.totalorder %v712_v40, 0  ;;  %v434_v26 = vadd.s32 1, %v1271_v46  ;;  %vm1288_vm6 = vcmp.le.f32.partialorder %v265_v14, 0.7853982  ;;  %vm433_vm7 = vc.u32 %v1276_v53, %v1270_v44 }
  0x85   : > { %v233_v48 = vor.u32 4788187, %v232_v33  ;;  %v236_v38 = vcvt.s32.f32 %v229_v30  ;;  %v336_v27 = vsel %vm713_vm5, 0, %v712_v40  ;;  %v718_v7 = vadd.s32 4294967169, %v491_v59 }
  0x86   : > { %v337_v63 = vsub.s32 32, %v336_v27  ;;  %v338_v12 = vshll.u32 %v1230_v25, %v336_v27  ;;  %v341_v1 = vsub.s32 4294967266, %v336_v27  ;;  %v354_v55 = vsel %vm1288_vm6, 0, %v352_v61 }
  0x87   : > { %v234_v60 = vand.u32 2147483647, %v233_v48  ;;  %v435_v25 = vsel %vm433_vm7, %v434_v26, %v1271_v46  ;;  %v258_v6 = vstv %s1261_s16  ;;  %v497_v10 = vadd.s32 1, %v718_v7 }
  0x88   : > { %v339_v50 = vshrl.u32 %v321_v58, %v337_v63  ;;  %v342_v3 = vadd.s32 127, %v341_v1  ;;  %v436_v9 = vadd.s32 %v435_v25, %v431_v62  ;;  %v1298_v13 = vand.u32 3, %v247_v54 }
  0x89   : > { %v237_v2 = vmul.f32 %v236_v38, %v234_v60  ;;  %v494_v17 = vand.u32 8388607, %v487_v56  ;;  %v358_v18 = vadd.s32 3, %v354_v55  ;;  %vm498_vm8 = vcmp.gt.s32.totalorder %v497_v10, 0 }
  0x8a   : > { %v340_v14 = vor.u32 %v339_v50, %v338_v12  ;;  %v343_v15 = vshll.u32 %v342_v3, 23  ;;  %v437_v19 = vadd.s32 536870912, %v436_v9  ;;  %v499_v22 = vsel %vm498_vm8, %v497_v10, 0 }
  0x8b   : > { %v238_v5 = vxor.u32 2147483648, %v237_v2  ;;  %v501_v23 = vand.u32 31, %v499_v22  ;;  %v1310_v28 = vmul.f32 %v258_v6, %v1079_v0  ;;  %vm250_vm9 = vcmp.eq.s32.totalorder %v1298_v13, 0 }
  0x8c   : > { %v344_v21 = vor.u32 4788187, %v343_v15  ;;  %v347_v51 = vcvt.s32.f32 %v340_v14  ;;  %v1307_v39 = vshrl.u32 %v437_v19, 30  ;;  %vm253_vm10 = vcmp.eq.s32.totalorder %v1298_v13, 2 }
  0x8d   : > { %v239_v37 = vsel %vm156_vm13, %v238_v5, %v237_v2  ;;  %v502_v30 = vsub.s32 32, %v501_v23  ;;  %v1315_v33 = vand.u32 3, %v358_v18  ;;  %v495_v32 = vor.u32 8388608, %v494_v17 }
  0x8e   : > { %v242_v20 = vsel %vm1216_vm14, %v1084_v8, %v239_v37  ;;  %v345_v31 = vand.u32 2147483647, %v344_v21  ;;  %v439_v29 = vshll.u32 %v1307_v39, 30  ;;  %vm249_vm11 = vcmp.lt.s32.totalorder %v1298_v13, 2 }
  0x8f   : > { %801 = vcosq.f32 %v242_v20  ;;  %v1320_v40 = vshrl.u32 %v499_v22, 5  ;;  %v504_v42 = vshll.u32 %v929_v41, %v501_v23  ;;  %v505_v46 = vshrl.u32 %v930_v43, %v502_v30 }
  0x90   : > { %803 = vsinq.f32 %v242_v20  ;;  %v348_v36 = vmul.f32 %v347_v51, %v345_v31  ;;  %v1318_v34 = vsub.s32 %v436_v9, %v439_v29  ;;  %vm246_vm12 = vweird.f32 %v1084_v8 }
  0x91   : > { %v507_v38 = vshll.u32 %v930_v43, %v501_v23  ;;  %v508_v52 = vshrl.u32 %v931_v45, %v502_v30  ;;  %v513_v54 = vshll.u32 %v932_v47, %v501_v23  ;;  %v510_v59 = vshll.u32 %v931_v45, %v501_v23 }
  0x92   : > { %v349_v48 = vxor.u32 2147483648, %v348_v36  ;;  %v442_v58 = vsub.s32 0, %v1318_v34  ;;  %v511_v60 = vshrl.u32 %v932_v47, %v502_v30  ;;  %v514_v27 = vshrl.u32 %v933_v49, %v502_v30 }
  0x93   : > { %v432_v62 = vadd.s32 %v1270_v44, %v1276_v53  ;;  %v516_v43 = vshll.u32 %v933_v49, %v501_v23  ;;  %v1337_v63 = vshll.u32 %v495_v32, 8  ;;  %v503_v47 = vshrl.u32 %v929_v41, %v502_v30 }
  0x94   : > { %v350_v61 = vsel %vm267_vm4, %v349_v48, %v348_v36  ;;  %v715_v45 = vmin.u32 %v442_v58, %v1318_v34  ;;  %v506_v1 = vor.u32 %v505_v46, %v504_v42  ;;  %v509_v26 = vor.u32 %v508_v52, %v507_v38 }
  0x95   : > { %v353_v12 = vsel %vm1288_vm6, %v1086_v11, %v350_v61  ;;  %v515_v2 = vor.u32 %v514_v27, %v513_v54  ;;  %v517_v7 = vshrl.u32 %v934_v57, %v502_v30  ;;  %v512_v53 = vor.u32 %v511_v60, %v510_v59 }
  0x96   : > { %805 = vcosq.f32 %v353_v12  ;;  %v444_v49 = vclz %v715_v45  ;;  %vm519_vm13 = vcmp.lt.s32.totalorder %v1320_v40, 1  ;;  %vm520_vm14 = vcmp.lt.s32.totalorder %v1320_v40, 2 }
  0x97   : > { %807 = vsinq.f32 %v353_v12  ;;  %v518_v3 = vor.u32 %v517_v7, %v516_v43  ;;  %vm521_vm15 = vcmp.lt.s32.totalorder %v1320_v40, 3  ;;  %vm522_vm0 = vcmp.lt.s32.totalorder %v1320_v40, 4 }
  0x98   : > { %v716_v55 = vadd.s32 4294967294, %v444_v49  ;;  %v523_v57 = vsel %vm519_vm13, %v503_v47, %v506_v1  ;;  %v524_v5 = vsel %vm522_vm0, %v512_v53, 2102212464  ;;  %v527_v6 = vsel %vm519_vm13, %v506_v1, %v509_v26 }
  0x99   : > { %v802_v44 = vpop.eup %801  ;;  %v528_v9 = vsel %vm522_vm0, %v515_v2, 920167782  ;;  %v525_v14 = vsel %vm521_vm15, %v509_v26, %v524_v5  ;;  %vm357_vm2 = vweird.f32 %v1086_v11  ;;  %v531_v13 = vsel %vm519_vm13, %v509_v26, %v512_v53 }
  0x9a   : > { %v804_v4 = vpop.eup %803  ;;  %v254_v50 = vxor.u32 2147483648, %v802_v44  ;;  %vm717_vm1 = vcmp.lt.s32.totalorder %v716_v55, 0  ;;  %v529_v15 = vsel %vm521_vm15, %v512_v53, %v528_v9  ;;  %v526_v18 = vsel %vm520_vm14, %v523_v57, %v525_v14 }
  0x9b   : > { %v251_v41 = vxor.u32 2147483648, %v804_v4  ;;  %v447_v37 = vsel %vm717_vm1, 0, %v716_v55  ;;  %v530_v19 = vsel %vm520_vm14, %v527_v6, %v529_v15  ;;  %v532_v31 = vsel %vm522_vm0, %v518_v3, 1326507024 }
  0x9c   : > { %v255_v25 = vsel %vm253_vm10, %v254_v50, %v804_v4  ;;  %v448_v21 = vsub.s32 32, %v447_v37  ;;  %v449_v51 = vshll.u32 %v1318_v34, %v447_v37  ;;  %v452_v22 = vsub.s32 4294967266, %v447_v37 }
  0x9d   : > { %v252_v10 = vsel %vm250_vm9, %v802_v44, %v251_v41  ;;  %v369_v29 = vstv %s1345_s17  ;;  %v533_v8 = vsel %vm521_vm15, %v515_v2, %v532_v31  ;;  %vm364_vm3 = vcmp.eq.s32.totalorder %v1315_v33, 2 }
  0x9e   : > { %v256_v17 = vsel %vm249_vm11, %v252_v10, %v255_v25  ;;  %v450_v30 = vshrl.u32 %v432_v62, %v448_v21  ;;  %v453_v36 = vadd.s32 127, %v452_v22  ;;  %vm361_vm4 = vcmp.eq.s32.totalorder %v1315_v33, 0 }
  0x9f   : > { %v257_v20 = vsel %vm246_vm12, nan, %v256_v17  ;;  %v1390_v34 = vmul.u32.u64.low %v1337_v63, %v530_v19  ;;  %v1391_v42 = vmul.u32.u64.high %v1337_v63, %v530_v19, %v1390_v34  ;;  %vm360_vm5 = vcmp.lt.s32.totalorder %v1315_v33, 2 }
  0xa0   : > { %v260_v23 = vmul.f32 %v1310_v28, %v257_v20  ;;  %v806_v32 = vpop.eup %805  ;;  %v534_v28 = vsel %vm520_vm14, %v531_v13, %v533_v8  ;;  %v451_v38 = vor.u32 %v450_v30, %v449_v51  ;;  %v454_v52 = vshll.u32 %v453_v36, 23 }
  0xa1   : > { %v808_v46 = vpop.eup %807  ;;  %v365_v48 = vxor.u32 2147483648, %v806_v32  ;;  %v1399_v40 = vmul.u32.u64.low %v1337_v63, %v534_v28  ;;  %v1400_v58 = vmul.u32.u64.high %v1337_v63, %v534_v28, %v1399_v40  ;;  %v370_v60 = vmul.f32 %v369_v29, %v1079_v0 }
  0xa2   : > { %594 = vst [vmem:[%s1393_s23] sm:$0xff] %v260_v23  ;;  %v362_v54 = vxor.u32 2147483648, %v808_v46  ;;  %v455_v27 = vor.u32 4788187, %v454_v52  ;;  %v458_v61 = vcvt.s32.f32 %v451_v38  ;;  %v542_v43 = vmul.u32 %v1337_v63, %v526_v18 }
  0xa3   : > { %v366_v59 = vsel %vm364_vm3, %v365_v48, %v808_v46  ;;  %v545_v12 = vadd.s32 1, %v1391_v42  ;;  %v462_v33 = vsub.s32 4, %v1307_v39  ;;  %v543_v26 = vadd.s32 %v1390_v34, %v1400_v58 }
  0xa4   : > { %v363_v62 = vsel %vm361_vm4, %v806_v32, %v362_v54  ;;  %v456_v47 = vand.u32 2147483647, %v455_v27  ;;  %vm544_vm6 = vc.u32 %v1400_v58, %v1390_v34  ;;  %vm378_vm7 = vcmp.lt.s32.totalorder %v1094_v16, 0 }
  0xa5   : > { %v367_v45 = vsel %vm360_vm5, %v363_v62, %v366_v59  ;;  %v546_v44 = vsel %vm544_vm6, %v545_v12, %v1391_v42  ;;  %vm377_vm8 = vcmp.le.f32.partialorder %v376_v35, 0.7853982  ;;  %v463_v53 = vsel %vm378_vm7, %v462_v33, %v1307_v39 }
  0xa6   : > { %v368_v1 = vsel %vm357_vm2, nan, %v367_v45  ;;  %v459_v7 = vmul.f32 %v458_v61, %v456_v47  ;;  %v547_v63 = vadd.s32 %v546_v44, %v542_v43  ;;  %v465_v3 = vsel %vm377_vm8, 0, %v463_v53 }
  0xa7   : > { %v371_v2 = vmul.f32 %v370_v60, %v368_v1  ;;  %v469_v57 = vadd.s32 3, %v465_v3  ;;  %v480_v39 = vstv %s704_s25  ;;  %vm468_vm12 = vweird.f32 %v1094_v16 }
  0xa8   : > { %v460_v49 = vxor.u32 2147483648, %v459_v7  ;;  %v548_v11 = vadd.s32 536870912, %v547_v63  ;;  %v481_v19 = vmul.f32 %v480_v39, %v1079_v0  ;;  %vm489_vm14 = vcmp.lt.s32.totalorder %v1196_v24, 0 }
  0xa9   : > { %722 = vst [vmem:[%s1393_s23 + $0x8] sm:$0xff] %v371_v2  ;;  %v470_v6 = vand.u32 3, %v469_v57  ;;  %vm488_vm15 = vcmp.le.f32.partialorder %v487_v56, 0.7853982  ;;  %v591_v27 = vstv %s705_s26  ;;  %vm579_vm3 = vweird.f32 %v1196_v24 }
  0xaa   : > { %v461_v4 = vsel %vm378_vm7, %v460_v49, %v459_v7  ;;  %v549_v41 = vshrl.u32 %v548_v11, 30  ;;  %v592_v12 = vmul.f32 %v591_v27, %v1079_v0 }
  0xab   : > { %v464_v50 = vsel %vm377_vm8, %v1094_v16, %v461_v4  ;;  %vm475_vm9 = vcmp.eq.s32.totalorder %v470_v6, 2  ;;  %vm472_vm10 = vcmp.eq.s32.totalorder %v470_v6, 0  ;;  %vm471_vm11 = vcmp.lt.s32.totalorder %v470_v6, 2 }
  0xac   : > { %809 = vcosq.f32 %v464_v50  ;;  %v550_v55 = vshll.u32 %v549_v41, 30  ;;  %v573_v42 = vsub.s32 4, %v549_v41 }
  0xad   : > { %811 = vsinq.f32 %v464_v50 }
  0xae   : > { %v551_v25 = vsub.s32 %v547_v63, %v550_v55  ;;  %v574_v38 = vsel %vm489_vm14, %v573_v42, %v549_v41 }
  0xaf   : > { %v576_v40 = vsel %vm488_vm15, 0, %v574_v38 }
  0xb0   : > { %v553_v5 = vsub.s32 0, %v551_v25  ;;  %v580_v58 = vadd.s32 3, %v576_v40 }
  0xb2   : > { %v719_v9 = vmin.u32 %v553_v5, %v551_v25  ;;  %v581_v59 = vand.u32 3, %v580_v58 }
  0xb4   : > { %v555_v35 = vclz %v719_v9  ;;  %vm586_vm0 = vcmp.eq.s32.totalorder %v581_v59, 2  ;;  %vm583_vm1 = vcmp.eq.s32.totalorder %v581_v59, 0  ;;  %vm582_vm2 = vcmp.lt.s32.totalorder %v581_v59, 2 }
  0xb6   : > { %v810_v10 = vpop.eup %809  ;;  %v720_v17 = vadd.s32 4294967294, %v555_v35 }
  0xb7   : > { %v812_v14 = vpop.eup %811  ;;  %v476_v15 = vxor.u32 2147483648, %v810_v10 }
  0xb8   : > { %v473_v37 = vxor.u32 2147483648, %v812_v14  ;;  %vm721_vm13 = vcmp.lt.s32.totalorder %v720_v17, 0 }
  0xb9   : > { %v477_v18 = vsel %vm475_vm9, %v476_v15, %v812_v14  ;;  %v558_v21 = vsel %vm721_vm13, 0, %v720_v17 }
  0xba   : > { %v474_v20 = vsel %vm472_vm10, %v810_v10, %v473_v37  ;;  %v559_v22 = vsub.s32 32, %v558_v21  ;;  %v560_v23 = vshll.u32 %v551_v25, %v558_v21  ;;  %v563_v13 = vsub.s32 4294967266, %v558_v21 }
  0xbb   : > { %v478_v51 = vsel %vm471_vm11, %v474_v20, %v477_v18 }
  0xbc   : > { %v479_v31 = vsel %vm468_vm12, nan, %v478_v51  ;;  %v561_v30 = vshrl.u32 %v543_v26, %v559_v22  ;;  %v564_v36 = vadd.s32 127, %v563_v13 }
  0xbd   : > { %v482_v29 = vmul.f32 %v481_v19, %v479_v31 }
  0xbe   : > { %v562_v8 = vor.u32 %v561_v30, %v560_v23  ;;  %v565_v32 = vshll.u32 %v564_v36, 23 }
  0xbf   : > { %723 = vst [vmem:[%s1393_s23 + $0x10] sm:$0xff] %v482_v29 }
  0xc0   : > { %v566_v28 = vor.u32 4788187, %v565_v32  ;;  %v569_v16 = vcvt.s32.f32 %v562_v8 }
  0xc2   : > { %v567_v34 = vand.u32 2147483647, %v566_v28 }
  0xc4   : > { %v570_v46 = vmul.f32 %v569_v16, %v567_v34 }
  0xc6   : > { %v571_v48 = vxor.u32 2147483648, %v570_v46 }
  0xc8   : > { %v572_v52 = vsel %vm489_vm14, %v571_v48, %v570_v46 }
  0xc9   : > { %v575_v54 = vsel %vm488_vm15, %v1196_v24, %v572_v52 }
  0xca   : > { %813 = vcosq.f32 %v575_v54 }
  0xcb   : > { %815 = vsinq.f32 %v575_v54 }
  0xd4   : > { %v814_v60 = vpop.eup %813 }
  0xd5   : > { %v816_v61 = vpop.eup %815  ;;  %v587_v56 = vxor.u32 2147483648, %v814_v60 }
  0xd6   : > { %v584_v62 = vxor.u32 2147483648, %v816_v61 }
  0xd7   : > { %v588_v43 = vsel %vm586_vm0, %v587_v56, %v816_v61 }
  0xd8   : > { %v585_v45 = vsel %vm583_vm1, %v814_v60, %v584_v62 }
  0xd9   : > { %v589_v47 = vsel %vm582_vm2, %v585_v45, %v588_v43 }
  0xda   : > { %v590_v33 = vsel %vm579_vm3, nan, %v589_v47 }
  0xdb   : > { %v593_v1 = vmul.f32 %v592_v12, %v590_v33 }
  0xdd   : > { %724 = vst [vmem:[%s1393_s23 + $0x18] sm:$0xff] %v593_v1 }
  0xde   : > { %870 = shalt.err (!%p867_p7)
}
  0xdf   : > { %s871_s13 = scalar_lea.hbm %s1431_s8, 512  ;;  %s875_s15 = scalar_lea.hbm %s1480_s2, 1024 }
  0xe0   : > { %p872_p8 = scmp.ne.s32.totalorder %s1431_s8, %s871_s13  ;;  %p876_p3 = scmp.lt.u32.totalorder %s1431_s8, %s1480_s2 }
  0xe1   : > { %p877_p4 = scmp.lt.u32.totalorder %s875_s15, %s871_s13  ;;  %p879_p9 = scmp.lt.u32.totalorder %s871_s13, %s1431_s8 }
  0xe2   : > { %p873_p11 = pnand %p872_p8, %p1493_p0 }
  0xe3   : > { %p878_p6 = por %p877_p4, %p876_p3 }
  0xe4   : > { %p874_p12 = pneg %p873_p11 }
  0xe5   : > { %p880_p1 = por %p879_p9, %p878_p6 }
  0xe7   : > { %p881_p2 = pnand %p880_p1, %p874_p12 }
  0xe9   : > { %884 = shalt.err (!%p881_p2)
}
  0xea   : > { %s936_s18 = smov 128   ;;  %s937_s23 = smov 256  }
  0xeb   : > { %s938_s25 = smov 8  }
  0xec   : > { %747 = dma.vmem_to_hbm [thread:$0]  (%p1493_p0), %s1433_s4, 512, %s1431_s8, %s602_s0, %s936_s18, %s937_s23, %s938_s25  }
  0xed PF: > { %s629_s26 = sand.u32 1, %s913_s19   ;;  %p1494_p10 = scmp.ne.s32.totalorder %s1485_s3, 0 }
  0xee   : > { %p1495_p13 = scmp.ge.s32.totalorder %s925_s22, 2  ;;  %s630_s28 = scalar_lea.sflag [#allocation6], %s629_s26 }
  0xf0   : > { %p754_p5 = pnand %p1495_p13, %p1494_p10 }
  0xf2   : > { %908 = dma.done.wait (!%p754_p5), %s630_s28, 512  }
  0xf3   : > { %910 = vsyncadd (!%p754_p5), %s630_s28, 4294966784  ;;  %p19_p7 = scmp.ge.s32.totalorder %s991_s24, 4   ;;  %s1496_s19 = smov %s917_s20 }
  0xf4   : > { %s1497_s20 = smov %s921_s21  ;;  %s1498_s21 = smov %s1003_s27 }
  0xf5   : > { %s1499_s22 = smov %s991_s24  ;;  %21 = sbr.rel (!%p19_p7) target bundleno = 17 (0x11), region = 72 }
  0xfc   :  { %635 = vsyncpa [#allocation5], 1 }
  0xfd   :  { %637 = vsyncpa [#allocation5 + $0x1], 1 }
  0xfe   :  { %638 = vsyncpa [#allocation6], 1 }
  0xff   :  { %640 = vsyncpa [#allocation6 + $0x1], 1 }

</bundles_post_ra>
